<compile_context>
chip_gen: v7x
topology: tpu7x:2x2x1
jax: 0.10.0
libtpu: 0.0.40
codegen_flags: <defaults>
</compile_context>

<pallas_src>
import jax
import jax.numpy as jnp
from jax import lax
from jax.experimental import pallas as pl
from jax.experimental.pallas import tpu as pltpu


# ---------------------------------------------------------------------------
# Canvas geometry (all static Python ints)
# ---------------------------------------------------------------------------
def _round_up(n, m):
    return ((n + m - 1) // m) * m


def _geometry(S):
    """Canvas sizes / data origins for a square even input of size S."""
    O = (S - 3) // 2 + 1            # spatial size of every branch output
    Wg = _round_up(O, 8)            # stride-2 conv grid width (incl. rounding cols)
    g = dict(O=O, Wg=Wg, OX=3, O2=0, OA=3, OB=2, OC=1)
    # t2 canvas (Block2 1x1 output), data SxS at origin (0, 0)
    g["HC2"] = max(S, 2 * O + 2)
    g["WC2"] = _round_up(max(S, 2 * Wg + 1), 8)
    # t3c canvas ((7,1) output), data (S-2)x(S-2) at origin (1, 1)
    g["HCc"] = max(S - 1, 2 * O + 2)
    g["WCc"] = _round_up(max(S - 1, 2 * Wg + 1), 8)
    # t3b canvas ((1,7) output), data (S+2)x(S-4) at origin (2, 2)
    g["HCb"] = max(g["HCc"] + 6, S + 4)
    g["WCb"] = max(g["WCc"], _round_up(S - 2, 8))
    # t3a canvas (Block3 1x1 output), data SxS at origin (3, 3)
    g["HCa"] = max(g["HCb"], S + 3)
    g["WCa"] = _round_up(max(g["WCb"] + 6, S + 3), 8)
    # padded input canvas, data SxS at origin (3, 3)
    g["HXC"] = max(g["HC2"] + 3, g["HCa"], 2 * O + 5, S + 3)
    g["WXC"] = max(g["WC2"] + 3, g["WCa"], 2 * O + 4, S + 3)
    return g


# ---------------------------------------------------------------------------
# Fused Pallas kernel
# ---------------------------------------------------------------------------
def _build_kernel(g):
    O, Wg = g["O"], g["Wg"]
    OX, O2, OA, OB, OC = g["OX"], g["O2"], g["OA"], g["OB"], g["OC"]

    def conv_s1(in_ref, w_ref, b_ref, KH, KW, dh, dw, HCo, WCo, mask_ref=None):
        """Stride-1 conv computed on the full (HCo, WCo) output canvas grid.

        out[b,i,j,:] = sum_{kh,kw} in_ref[b, i+dh+kh, j+dw+kw, :] @ w[kh,kw] + bias,
        then (optionally) zeroed outside the valid-data block via `mask_ref`.
        """
        B, Ci = in_ref.shape[0], in_ref.shape[-1]
        Co = w_ref.shape[-1]
        M = B * HCo * WCo
        acc = jnp.zeros((M, Co), jnp.float32)
        for kh in range(KH):
            for kw in range(KW):
                patch = in_ref[:, dh + kh:dh + kh + HCo, dw + kw:dw + kw + WCo, :]
                acc = acc + jnp.dot(patch.reshape(M, Ci), w_ref[kh * KW + kw],
                                    preferred_element_type=jnp.float32)
        out = (acc + b_ref[...]).reshape(B, HCo, WCo, Co)
        if mask_ref is not None:
            out = out * mask_ref[...]           # zero ring -> built-in padding
        return out

    def conv3x3_s2(in_ref, w_ref, b_ref, r0, c0):
        """3x3 stride-2 conv: out[b,oh,ow,:] = sum in_ref[b, r0+2oh+kh, c0+2ow+kw, :] @ w."""
        B, Ci = in_ref.shape[0], in_ref.shape[-1]
        Co = w_ref.shape[-1]
        M = B * O * Wg
        acc = jnp.zeros((M, Co), jnp.float32)
        for kh in range(3):
            for kw in range(3):
                v = in_ref[:, r0 + kh:r0 + kh + 2 * O, pl.ds(c0 + kw, Wg, stride=2), :]
                v = v.reshape(B, O, 2, Wg, Ci)[:, :, 0, :, :]   # even row parity
                acc = acc + jnp.dot(v.reshape(M, Ci), w_ref[kh * 3 + kw],
                                    preferred_element_type=jnp.float32)
        return (acc + b_ref[...]).reshape(B, O, Wg, Co)

    def maxpool3x3_s2(in_ref, r0, c0):
        B, C = in_ref.shape[0], in_ref.shape[-1]
        out = None
        for kh in range(3):
            for kw in range(3):
                v = in_ref[:, r0 + kh:r0 + kh + 2 * O, pl.ds(c0 + kw, O, stride=2), :]
                v = v.reshape(B, O, 2, O, C)[:, :, 0, :, :]
                out = v if out is None else jnp.maximum(out, v)
        return out

    def kernel(x_ref,
               w2a, b2a, w2b, b2b,
               w3a, b3a, w3b, b3b, w3c, b3c, w3d, b3d,
               m3a, m3b, m3c,
               o1_ref, o2_ref, o3_ref,
               t2_ref, t3a_ref, t3b_ref, t3c_ref):
        # ---- Block 1: 3x3 stride-2 max-pool straight from the padded input ----
        o1_ref[...] = maxpool3x3_s2(x_ref, OX, OX).astype(o1_ref.dtype)

        # ---- Block 2: 1x1 conv -> 3x3 stride-2 (valid) conv ----
        t2_ref[...] = conv_s1(x_ref, w2a, b2a, 1, 1, OX - O2, OX - O2,
                              g["HC2"], g["WC2"])
        o2_ref[...] = conv3x3_s2(t2_ref, w2b, b2b, O2, O2).astype(o2_ref.dtype)

        # ---- Block 3: 1x1 -> (1,7) pad1 -> (7,1) pad1 -> 3x3 stride-2 pad1 ----
        t3a_ref[...] = conv_s1(x_ref, w3a, b3a, 1, 1, OX - OA, OX - OA,
                               g["HCa"], g["WCa"], m3a)
        t3b_ref[...] = conv_s1(t3a_ref, w3b, b3b, 1, 7, OA - OB - 1, OA - OB - 1,
                               g["HCb"], g["WCb"], m3b)
        t3c_ref[...] = conv_s1(t3b_ref, w3c, b3c, 7, 1, OB - OC - 1, OB - OC - 1,
                               g["HCc"], g["WCc"], m3c)
        o3_ref[...] = conv3x3_s2(t3c_ref, w3d, b3d, OC - 1, OC - 1).astype(o3_ref.dtype)

    return kernel


# ---------------------------------------------------------------------------
# Public wrapper (NCHW in / NCHW out, like the PyTorch module)
# ---------------------------------------------------------------------------
def reduction_block_7x7(x_nchw, params):
    x = jnp.transpose(x_nchw, (0, 2, 3, 1)).astype(jnp.float32)     # NCHW -> NHWC
    B, S, S2, Cin = x.shape
    assert S == S2 and S % 2 == 0 and S >= 12, "square even input expected"
    g = _geometry(S)
    O, Wg, OX = g["O"], g["Wg"], g["OX"]

    w2a, b2a = params["conv2a"]; w2b, b2b = params["conv2b"]
    w3a, b3a = params["conv3a"]; w3b, b3b = params["conv3b"]
    w3c, b3c = params["conv3c"]; w3d, b3d = params["conv3d"]
    c3in, c3out = w2a.shape[-1], w2b.shape[-1]
    c1x1, c7in, c7out = w3a.shape[-1], w3b.shape[-1], w3c.shape[-1]

    def prep_w(w):
        kh, kw, ci, co = w.shape
        return w.reshape(kh * kw, ci, co).astype(jnp.float32)

    def prep_b(b):
        return b.reshape(1, -1).astype(jnp.float32)

    def block_mask(hc, wc, oh, ow, hh, ww):
        r = jnp.arange(hc, dtype=jnp.int32)[:, None]
        c = jnp.arange(wc, dtype=jnp.int32)[None, :]
        m = (r >= oh) & (r < oh + hh) & (c >= ow) & (c < ow + ww)
        return m.astype(jnp.float32).reshape(1, hc, wc, 1)

    # pad the input ONCE; data sits at origin (OX, OX) inside a zero canvas
    xc = jnp.pad(x, ((0, 0), (OX, g["HXC"] - OX - S), (OX, g["WXC"] - OX - S), (0, 0)))

    m3a = block_mask(g["HCa"], g["WCa"], g["OA"], g["OA"], S, S)
    m3b = block_mask(g["HCb"], g["WCb"], g["OB"], g["OB"], S + 2, S - 4)
    m3c = block_mask(g["HCc"], g["WCc"], g["OC"], g["OC"], S - 2, S - 2)

    in_arrays = [xc,
                 prep_w(w2a), prep_b(b2a), prep_w(w2b), prep_b(b2b),
                 prep_w(w3a), prep_b(b3a), prep_w(w3b), prep_b(b3b),
                 prep_w(w3c), prep_b(b3c), prep_w(w3d), prep_b(b3d),
                 m3a, m3b, m3c]

    def batch_spec(shape):
        nd = len(shape)
        return pl.BlockSpec((1,) + tuple(shape[1:]),
                            lambda b: (b,) + (0,) * (nd - 1))

    def whole_spec(shape):
        nd = len(shape)
        return pl.BlockSpec(tuple(shape), lambda b: (0,) * nd)

    in_specs = [batch_spec(xc.shape)] + [whole_spec(a.shape) for a in in_arrays[1:]]

    out_shape = (jax.ShapeDtypeStruct((B, O, O, Cin), jnp.float32),
                 jax.ShapeDtypeStruct((B, O, Wg, c3out), jnp.float32),
                 jax.ShapeDtypeStruct((B, O, Wg, c3out), jnp.float32))
    out_specs = tuple(batch_spec(s.shape) for s in out_shape)

    scratch_shapes = [pltpu.VMEM((1, g["HC2"], g["WC2"], c3in), jnp.float32),
                      pltpu.VMEM((1, g["HCa"], g["WCa"], c1x1), jnp.float32),
                      pltpu.VMEM((1, g["HCb"], g["WCb"], c7in), jnp.float32),
                      pltpu.VMEM((1, g["HCc"], g["WCc"], c7out), jnp.float32)]

    o1, o2, o3 = pl.pallas_call(
        _build_kernel(g),
        grid=(B,),                                   # one batch element per step
        in_specs=in_specs,
        out_specs=out_specs,
        out_shape=out_shape,
        scratch_shapes=scratch_shapes,
        compiler_params=pltpu.CompilerParams(dimension_semantics=("parallel",)),
    )(*in_arrays)

    # drop the lane-rounding columns of the stride-2 branches and concat channels
    y = jnp.concatenate([o1, o2[:, :, :O, :], o3[:, :, :O, :]], axis=-1)
    return jnp.transpose(y, (0, 3, 1, 2))                           # NHWC -> NCHW


# ---------------------------------------------------------------------------
# Deterministic parameter init (PyTorch-Conv2d-like uniform bounds), HWIO layout
# ---------------------------------------------------------------------------
def init_params(key, in_ch, c1x1, c3in, c3out, c7in, c7out):
    def conv_init(k, kh, kw, ci, co):
        kw_, kb_ = jax.random.split(k)
        bound = 1.0 / float(ci * kh * kw) ** 0.5
        w = jax.random.uniform(kw_, (kh, kw, ci, co), jnp.float32, -bound, bound)
        b = jax.random.uniform(kb_, (co,), jnp.float32, -bound, bound)
        return w, b
    ks = jax.random.split(key, 6)
    return {
        "conv2a": conv_init(ks[0], 1, 1, in_ch, c3in),
        "conv2b": conv_init(ks[1], 3, 3, c3in, c3out),
        "conv3a": conv_init(ks[2], 1, 1, in_ch, c1x1),
        "conv3b": conv_init(ks[3], 1, 7, c1x1, c7in),
        "conv3c": conv_init(ks[4], 7, 1, c7in, c7out),
        "conv3d": conv_init(ks[5], 3, 3, c7out, c3out),
    }


# Pure-JAX reference (lax conv / reduce_window) for the self-check.
def reference_forward(x_nchw, params):
    x = jnp.transpose(x_nchw, (0, 2, 3, 1)).astype(jnp.float32)

    def conv(v, wb, stride, pad):
        w, b = wb
        y = lax.conv_general_dilated(
            v, w, (stride, stride), ((pad, pad), (pad, pad)),
            dimension_numbers=("NHWC", "HWIO", "NHWC"))
        return y + b

    x1 = lax.reduce_window(x, -jnp.inf, lax.max, (1, 3, 3, 1), (1, 2, 2, 1), "VALID")
    x2 = conv(conv(x, params["conv2a"], 1, 0), params["conv2b"], 2, 0)
    x3 = conv(conv(conv(conv(x, params["conv3a"], 1, 0),
                        params["conv3b"], 1, 1),
                   params["conv3c"], 1, 1),
              params["conv3d"], 2, 1)
    y = jnp.concatenate([x1, x2, x3], axis=-1)
    return jnp.transpose(y, (0, 3, 1, 2))


# ---------------------------------------------------------------------------
if __name__ == "__main__":
    key = jax.random.PRNGKey(0)
    kx, kp = jax.random.split(key)

    # Small, module-consistent config: x is (B, C_in, 16, 16).
    B, C_IN, H, W = 2, 8, 16, 16
    C1X1, C3_IN, C3_OUT, C7_IN, C7_OUT = 8, 8, 8, 8, 8

    x = jax.random.normal(kx, (B, C_IN, H, W), jnp.float32)
    params = init_params(kp, C_IN, C1X1, C3_IN, C3_OUT, C7_IN, C7_OUT)

    out = jax.block_until_ready(jax.jit(reduction_block_7x7)(x, params))

    O = (H - 3) // 2 + 1
    assert out.shape == (B, C_IN + 2 * C3_OUT, O, O), out.shape

    ref = jax.block_until_ready(jax.jit(reference_forward)(x, params))
    assert bool(jnp.allclose(out, ref, rtol=1e-3, atol=1e-3)), \
        float(jnp.max(jnp.abs(out - ref)))

    print("KERNEL_OK")
</pallas_src>

<mosaic_0001>
module attributes {stable_mosaic.version = 11 : i64} {
  func.func @kernel(%arg0: i32, %arg1: memref<1x22x32x8xf32, #tpu.memory_space<vmem>>, %arg2: memref<1x8x8xf32, #tpu.memory_space<vmem>>, %arg3: memref<1x8xf32, #tpu.memory_space<vmem>>, %arg4: memref<9x8x8xf32, #tpu.memory_space<vmem>>, %arg5: memref<1x8xf32, #tpu.memory_space<vmem>>, %arg6: memref<1x8x8xf32, #tpu.memory_space<vmem>>, %arg7: memref<1x8xf32, #tpu.memory_space<vmem>>, %arg8: memref<7x8x8xf32, #tpu.memory_space<vmem>>, %arg9: memref<1x8xf32, #tpu.memory_space<vmem>>, %arg10: memref<7x8x8xf32, #tpu.memory_space<vmem>>, %arg11: memref<1x8xf32, #tpu.memory_space<vmem>>, %arg12: memref<9x8x8xf32, #tpu.memory_space<vmem>>, %arg13: memref<1x8xf32, #tpu.memory_space<vmem>>, %arg14: memref<1x22x32x1xf32, #tpu.memory_space<vmem>>, %arg15: memref<1x22x24x1xf32, #tpu.memory_space<vmem>>, %arg16: memref<1x16x24x1xf32, #tpu.memory_space<vmem>>, %arg17: memref<1x7x7x8xf32, #tpu.memory_space<vmem>>, %arg18: memref<1x7x8x8xf32, #tpu.memory_space<vmem>>, %arg19: memref<1x7x8x8xf32, #tpu.memory_space<vmem>>, %arg20: memref<1x16x24x8xf32, #tpu.memory_space<vmem>>, %arg21: memref<1x22x32x8xf32, #tpu.memory_space<vmem>>, %arg22: memref<1x22x24x8xf32, #tpu.memory_space<vmem>>, %arg23: memref<1x16x24x8xf32, #tpu.memory_space<vmem>>) attributes {dimension_semantics = [#tpu.dimension_semantics<parallel>], iteration_bounds = array<i64: 2>, scalar_prefetch = 0 : i64, scratch_operands = 4 : i64, tpu.core_type = #tpu.core_type<tc>, window_params = [{transform_indices = @transform_0, window_bounds = array<i64: 1, 22, 32, 8>}, {pipeline_mode = #tpu.pipeline_mode<synchronous>, transform_indices = @transform_1, window_bounds = array<i64: 1, 8, 8>}, {pipeline_mode = #tpu.pipeline_mode<synchronous>, transform_indices = @transform_2, window_bounds = array<i64: 1, 8>}, {pipeline_mode = #tpu.pipeline_mode<synchronous>, transform_indices = @transform_3, window_bounds = array<i64: 9, 8, 8>}, {pipeline_mode = #tpu.pipeline_mode<synchronous>, transform_indices = @transform_4, window_bounds = array<i64: 1, 8>}, {pipeline_mode = #tpu.pipeline_mode<synchronous>, transform_indices = @transform_5, window_bounds = array<i64: 1, 8, 8>}, {pipeline_mode = #tpu.pipeline_mode<synchronous>, transform_indices = @transform_6, window_bounds = array<i64: 1, 8>}, {pipeline_mode = #tpu.pipeline_mode<synchronous>, transform_indices = @transform_7, window_bounds = array<i64: 7, 8, 8>}, {pipeline_mode = #tpu.pipeline_mode<synchronous>, transform_indices = @transform_8, window_bounds = array<i64: 1, 8>}, {pipeline_mode = #tpu.pipeline_mode<synchronous>, transform_indices = @transform_9, window_bounds = array<i64: 7, 8, 8>}, {pipeline_mode = #tpu.pipeline_mode<synchronous>, transform_indices = @transform_10, window_bounds = array<i64: 1, 8>}, {pipeline_mode = #tpu.pipeline_mode<synchronous>, transform_indices = @transform_11, window_bounds = array<i64: 9, 8, 8>}, {pipeline_mode = #tpu.pipeline_mode<synchronous>, transform_indices = @transform_12, window_bounds = array<i64: 1, 8>}, {pipeline_mode = #tpu.pipeline_mode<synchronous>, transform_indices = @transform_13, window_bounds = array<i64: 1, 22, 32, 1>}, {pipeline_mode = #tpu.pipeline_mode<synchronous>, transform_indices = @transform_14, window_bounds = array<i64: 1, 22, 24, 1>}, {pipeline_mode = #tpu.pipeline_mode<synchronous>, transform_indices = @transform_15, window_bounds = array<i64: 1, 16, 24, 1>}, {transform_indices = @transform_16, window_bounds = array<i64: 1, 7, 7, 8>}, {transform_indices = @transform_17, window_bounds = array<i64: 1, 7, 8, 8>}, {transform_indices = @transform_18, window_bounds = array<i64: 1, 7, 8, 8>}]} {
    %c0 = arith.constant 0 : index
    %c3 = arith.constant 3 : index
    %c3_0 = arith.constant 3 : index
    %c0_1 = arith.constant 0 : index
    %0 = tpu.strided_load %arg1[%c0, %c3, %c3_0, %c0_1] {strides = array<i32: 1, 1, 2, 1>} : memref<1x22x32x8xf32, #tpu.memory_space<vmem>>, vector<1x14x7x8xf32>
    %1 = vector.shape_cast %0 : vector<1x14x7x8xf32> to vector<1x7x2x7x8xf32>
    %2 = vector.extract_strided_slice %1 {offsets = [0, 0, 0, 0, 0], sizes = [1, 7, 1, 7, 8], strides = [1, 1, 1, 1, 1]} : vector<1x7x2x7x8xf32> to vector<1x7x1x7x8xf32>
    %3 = vector.shape_cast %2 : vector<1x7x1x7x8xf32> to vector<1x7x7x8xf32>
    %c0_2 = arith.constant 0 : index
    %c3_3 = arith.constant 3 : index
    %c4 = arith.constant 4 : index
    %c0_4 = arith.constant 0 : index
    %4 = tpu.strided_load %arg1[%c0_2, %c3_3, %c4, %c0_4] {strides = array<i32: 1, 1, 2, 1>} : memref<1x22x32x8xf32, #tpu.memory_space<vmem>>, vector<1x14x7x8xf32>
    %5 = vector.shape_cast %4 : vector<1x14x7x8xf32> to vector<1x7x2x7x8xf32>
    %6 = vector.extract_strided_slice %5 {offsets = [0, 0, 0, 0, 0], sizes = [1, 7, 1, 7, 8], strides = [1, 1, 1, 1, 1]} : vector<1x7x2x7x8xf32> to vector<1x7x1x7x8xf32>
    %7 = vector.shape_cast %6 : vector<1x7x1x7x8xf32> to vector<1x7x7x8xf32>
    %8 = arith.maximumf %3, %7 : vector<1x7x7x8xf32>
    %c0_5 = arith.constant 0 : index
    %c3_6 = arith.constant 3 : index
    %c5 = arith.constant 5 : index
    %c0_7 = arith.constant 0 : index
    %9 = tpu.strided_load %arg1[%c0_5, %c3_6, %c5, %c0_7] {strides = array<i32: 1, 1, 2, 1>} : memref<1x22x32x8xf32, #tpu.memory_space<vmem>>, vector<1x14x7x8xf32>
    %10 = vector.shape_cast %9 : vector<1x14x7x8xf32> to vector<1x7x2x7x8xf32>
    %11 = vector.extract_strided_slice %10 {offsets = [0, 0, 0, 0, 0], sizes = [1, 7, 1, 7, 8], strides = [1, 1, 1, 1, 1]} : vector<1x7x2x7x8xf32> to vector<1x7x1x7x8xf32>
    %12 = vector.shape_cast %11 : vector<1x7x1x7x8xf32> to vector<1x7x7x8xf32>
    %13 = arith.maximumf %8, %12 : vector<1x7x7x8xf32>
    %c0_8 = arith.constant 0 : index
    %c4_9 = arith.constant 4 : index
    %c3_10 = arith.constant 3 : index
    %c0_11 = arith.constant 0 : index
    %14 = tpu.strided_load %arg1[%c0_8, %c4_9, %c3_10, %c0_11] {strides = array<i32: 1, 1, 2, 1>} : memref<1x22x32x8xf32, #tpu.memory_space<vmem>>, vector<1x14x7x8xf32>
    %15 = vector.shape_cast %14 : vector<1x14x7x8xf32> to vector<1x7x2x7x8xf32>
    %16 = vector.extract_strided_slice %15 {offsets = [0, 0, 0, 0, 0], sizes = [1, 7, 1, 7, 8], strides = [1, 1, 1, 1, 1]} : vector<1x7x2x7x8xf32> to vector<1x7x1x7x8xf32>
    %17 = vector.shape_cast %16 : vector<1x7x1x7x8xf32> to vector<1x7x7x8xf32>
    %18 = arith.maximumf %13, %17 : vector<1x7x7x8xf32>
    %c0_12 = arith.constant 0 : index
    %c4_13 = arith.constant 4 : index
    %c4_14 = arith.constant 4 : index
    %c0_15 = arith.constant 0 : index
    %19 = tpu.strided_load %arg1[%c0_12, %c4_13, %c4_14, %c0_15] {strides = array<i32: 1, 1, 2, 1>} : memref<1x22x32x8xf32, #tpu.memory_space<vmem>>, vector<1x14x7x8xf32>
    %20 = vector.shape_cast %19 : vector<1x14x7x8xf32> to vector<1x7x2x7x8xf32>
    %21 = vector.extract_strided_slice %20 {offsets = [0, 0, 0, 0, 0], sizes = [1, 7, 1, 7, 8], strides = [1, 1, 1, 1, 1]} : vector<1x7x2x7x8xf32> to vector<1x7x1x7x8xf32>
    %22 = vector.shape_cast %21 : vector<1x7x1x7x8xf32> to vector<1x7x7x8xf32>
    %23 = arith.maximumf %18, %22 : vector<1x7x7x8xf32>
    %c0_16 = arith.constant 0 : index
    %c4_17 = arith.constant 4 : index
    %c5_18 = arith.constant 5 : index
    %c0_19 = arith.constant 0 : index
    %24 = tpu.strided_load %arg1[%c0_16, %c4_17, %c5_18, %c0_19] {strides = array<i32: 1, 1, 2, 1>} : memref<1x22x32x8xf32, #tpu.memory_space<vmem>>, vector<1x14x7x8xf32>
    %25 = vector.shape_cast %24 : vector<1x14x7x8xf32> to vector<1x7x2x7x8xf32>
    %26 = vector.extract_strided_slice %25 {offsets = [0, 0, 0, 0, 0], sizes = [1, 7, 1, 7, 8], strides = [1, 1, 1, 1, 1]} : vector<1x7x2x7x8xf32> to vector<1x7x1x7x8xf32>
    %27 = vector.shape_cast %26 : vector<1x7x1x7x8xf32> to vector<1x7x7x8xf32>
    %28 = arith.maximumf %23, %27 : vector<1x7x7x8xf32>
    %c0_20 = arith.constant 0 : index
    %c5_21 = arith.constant 5 : index
    %c3_22 = arith.constant 3 : index
    %c0_23 = arith.constant 0 : index
    %29 = tpu.strided_load %arg1[%c0_20, %c5_21, %c3_22, %c0_23] {strides = array<i32: 1, 1, 2, 1>} : memref<1x22x32x8xf32, #tpu.memory_space<vmem>>, vector<1x14x7x8xf32>
    %30 = vector.shape_cast %29 : vector<1x14x7x8xf32> to vector<1x7x2x7x8xf32>
    %31 = vector.extract_strided_slice %30 {offsets = [0, 0, 0, 0, 0], sizes = [1, 7, 1, 7, 8], strides = [1, 1, 1, 1, 1]} : vector<1x7x2x7x8xf32> to vector<1x7x1x7x8xf32>
    %32 = vector.shape_cast %31 : vector<1x7x1x7x8xf32> to vector<1x7x7x8xf32>
    %33 = arith.maximumf %28, %32 : vector<1x7x7x8xf32>
    %c0_24 = arith.constant 0 : index
    %c5_25 = arith.constant 5 : index
    %c4_26 = arith.constant 4 : index
    %c0_27 = arith.constant 0 : index
    %34 = tpu.strided_load %arg1[%c0_24, %c5_25, %c4_26, %c0_27] {strides = array<i32: 1, 1, 2, 1>} : memref<1x22x32x8xf32, #tpu.memory_space<vmem>>, vector<1x14x7x8xf32>
    %35 = vector.shape_cast %34 : vector<1x14x7x8xf32> to vector<1x7x2x7x8xf32>
    %36 = vector.extract_strided_slice %35 {offsets = [0, 0, 0, 0, 0], sizes = [1, 7, 1, 7, 8], strides = [1, 1, 1, 1, 1]} : vector<1x7x2x7x8xf32> to vector<1x7x1x7x8xf32>
    %37 = vector.shape_cast %36 : vector<1x7x1x7x8xf32> to vector<1x7x7x8xf32>
    %38 = arith.maximumf %33, %37 : vector<1x7x7x8xf32>
    %c0_28 = arith.constant 0 : index
    %c5_29 = arith.constant 5 : index
    %c5_30 = arith.constant 5 : index
    %c0_31 = arith.constant 0 : index
    %39 = tpu.strided_load %arg1[%c0_28, %c5_29, %c5_30, %c0_31] {strides = array<i32: 1, 1, 2, 1>} : memref<1x22x32x8xf32, #tpu.memory_space<vmem>>, vector<1x14x7x8xf32>
    %40 = vector.shape_cast %39 : vector<1x14x7x8xf32> to vector<1x7x2x7x8xf32>
    %41 = vector.extract_strided_slice %40 {offsets = [0, 0, 0, 0, 0], sizes = [1, 7, 1, 7, 8], strides = [1, 1, 1, 1, 1]} : vector<1x7x2x7x8xf32> to vector<1x7x1x7x8xf32>
    %42 = vector.shape_cast %41 : vector<1x7x1x7x8xf32> to vector<1x7x7x8xf32>
    %43 = arith.maximumf %38, %42 : vector<1x7x7x8xf32>
    %c0_32 = arith.constant 0 : index
    %c0_33 = arith.constant 0 : index
    %c0_34 = arith.constant 0 : index
    %c0_35 = arith.constant 0 : index
    %44 = vector.load %arg17[%c0_32, %c0_33, %c0_34, %c0_35] : memref<1x7x7x8xf32, #tpu.memory_space<vmem>>, vector<1x7x7x8xf32>
    tpu.vector_store %arg17[%c0_32, %c0_33, %c0_34, %c0_35], %43 {strides = array<i32>} : memref<1x7x7x8xf32, #tpu.memory_space<vmem>>, vector<1x7x7x8xf32>,
    %cst = arith.constant 0.000000e+00 : f32
    %45 = vector.broadcast %cst : f32 to vector<384x8xf32>
    %c0_36 = arith.constant 0 : index
    %c3_37 = arith.constant 3 : index
    %c3_38 = arith.constant 3 : index
    %c0_39 = arith.constant 0 : index
    %46 = vector.load %arg1[%c0_36, %c3_37, %c3_38, %c0_39] : memref<1x22x32x8xf32, #tpu.memory_space<vmem>>, vector<1x16x24x8xf32>
    %47 = vector.shape_cast %46 : vector<1x16x24x8xf32> to vector<384x8xf32>
    %c0_40 = arith.constant 0 : index
    %c0_41 = arith.constant 0 : index
    %c0_42 = arith.constant 0 : index
    %48 = vector.load %arg2[%c0_40, %c0_41, %c0_42] : memref<1x8x8xf32, #tpu.memory_space<vmem>>, vector<1x8x8xf32>
    %49 = vector.shape_cast %48 : vector<1x8x8xf32> to vector<8x8xf32>
    %cst_43 = arith.constant dense<0.000000e+00> : vector<384x8xf32>
    %50 = tpu.matmul %47, %49, %cst_43 {dimension_numbers = #tpu.dot_dimension_numbers<[1], [0], [0], [1], [0, 0, 1, 1], [], []>} : vector<384x8xf32>, vector<8x8xf32>, vector<384x8xf32> -> vector<384x8xf32>
    %51 = arith.addf %45, %50 : vector<384x8xf32>
    %c0_44 = arith.constant 0 : index
    %c0_45 = arith.constant 0 : index
    %52 = vector.load %arg3[%c0_44, %c0_45] : memref<1x8xf32, #tpu.memory_space<vmem>>, vector<1x8xf32>
    %53 = vector.broadcast %52 : vector<1x8xf32> to vector<384x8xf32>
    %54 = arith.addf %51, %53 : vector<384x8xf32>
    %55 = vector.shape_cast %54 : vector<384x8xf32> to vector<1x16x24x8xf32>
    %c0_46 = arith.constant 0 : index
    %c0_47 = arith.constant 0 : index
    %c0_48 = arith.constant 0 : index
    %c0_49 = arith.constant 0 : index
    %56 = vector.load %arg20[%c0_46, %c0_47, %c0_48, %c0_49] : memref<1x16x24x8xf32, #tpu.memory_space<vmem>>, vector<1x16x24x8xf32>
    tpu.vector_store %arg20[%c0_46, %c0_47, %c0_48, %c0_49], %55 {strides = array<i32>} : memref<1x16x24x8xf32, #tpu.memory_space<vmem>>, vector<1x16x24x8xf32>,
    %cst_50 = arith.constant 0.000000e+00 : f32
    %57 = vector.broadcast %cst_50 : f32 to vector<56x8xf32>
    %c0_51 = arith.constant 0 : index
    %c0_52 = arith.constant 0 : index
    %c0_53 = arith.constant 0 : index
    %c0_54 = arith.constant 0 : index
    %58 = tpu.strided_load %arg20[%c0_51, %c0_52, %c0_53, %c0_54] {strides = array<i32: 1, 1, 2, 1>} : memref<1x16x24x8xf32, #tpu.memory_space<vmem>>, vector<1x14x8x8xf32>
    %59 = vector.shape_cast %58 : vector<1x14x8x8xf32> to vector<1x7x2x8x8xf32>
    %60 = vector.extract_strided_slice %59 {offsets = [0, 0, 0, 0, 0], sizes = [1, 7, 1, 8, 8], strides = [1, 1, 1, 1, 1]} : vector<1x7x2x8x8xf32> to vector<1x7x1x8x8xf32>
    %61 = vector.shape_cast %60 : vector<1x7x1x8x8xf32> to vector<1x7x8x8xf32>
    %62 = vector.shape_cast %61 : vector<1x7x8x8xf32> to vector<56x8xf32>
    %c0_55 = arith.constant 0 : index
    %c0_56 = arith.constant 0 : index
    %c0_57 = arith.constant 0 : index
    %63 = vector.load %arg4[%c0_55, %c0_56, %c0_57] : memref<9x8x8xf32, #tpu.memory_space<vmem>>, vector<1x8x8xf32>
    %64 = vector.shape_cast %63 : vector<1x8x8xf32> to vector<8x8xf32>
    %cst_58 = arith.constant dense<0.000000e+00> : vector<56x8xf32>
    %65 = tpu.matmul %62, %64, %cst_58 {dimension_numbers = #tpu.dot_dimension_numbers<[1], [0], [0], [1], [0, 0, 1, 1], [], []>} : vector<56x8xf32>, vector<8x8xf32>, vector<56x8xf32> -> vector<56x8xf32>
    %66 = arith.addf %57, %65 : vector<56x8xf32>
    %c0_59 = arith.constant 0 : index
    %c0_60 = arith.constant 0 : index
    %c1 = arith.constant 1 : index
    %c0_61 = arith.constant 0 : index
    %67 = tpu.strided_load %arg20[%c0_59, %c0_60, %c1, %c0_61] {strides = array<i32: 1, 1, 2, 1>} : memref<1x16x24x8xf32, #tpu.memory_space<vmem>>, vector<1x14x8x8xf32>
    %68 = vector.shape_cast %67 : vector<1x14x8x8xf32> to vector<1x7x2x8x8xf32>
    %69 = vector.extract_strided_slice %68 {offsets = [0, 0, 0, 0, 0], sizes = [1, 7, 1, 8, 8], strides = [1, 1, 1, 1, 1]} : vector<1x7x2x8x8xf32> to vector<1x7x1x8x8xf32>
    %70 = vector.shape_cast %69 : vector<1x7x1x8x8xf32> to vector<1x7x8x8xf32>
    %71 = vector.shape_cast %70 : vector<1x7x8x8xf32> to vector<56x8xf32>
    %c1_62 = arith.constant 1 : index
    %c0_63 = arith.constant 0 : index
    %c0_64 = arith.constant 0 : index
    %72 = vector.load %arg4[%c1_62, %c0_63, %c0_64] : memref<9x8x8xf32, #tpu.memory_space<vmem>>, vector<1x8x8xf32>
    %73 = vector.shape_cast %72 : vector<1x8x8xf32> to vector<8x8xf32>
    %cst_65 = arith.constant dense<0.000000e+00> : vector<56x8xf32>
    %74 = tpu.matmul %71, %73, %cst_65 {dimension_numbers = #tpu.dot_dimension_numbers<[1], [0], [0], [1], [0, 0, 1, 1], [], []>} : vector<56x8xf32>, vector<8x8xf32>, vector<56x8xf32> -> vector<56x8xf32>
    %75 = arith.addf %66, %74 : vector<56x8xf32>
    %c0_66 = arith.constant 0 : index
    %c0_67 = arith.constant 0 : index
    %c2 = arith.constant 2 : index
    %c0_68 = arith.constant 0 : index
    %76 = tpu.strided_load %arg20[%c0_66, %c0_67, %c2, %c0_68] {strides = array<i32: 1, 1, 2, 1>} : memref<1x16x24x8xf32, #tpu.memory_space<vmem>>, vector<1x14x8x8xf32>
    %77 = vector.shape_cast %76 : vector<1x14x8x8xf32> to vector<1x7x2x8x8xf32>
    %78 = vector.extract_strided_slice %77 {offsets = [0, 0, 0, 0, 0], sizes = [1, 7, 1, 8, 8], strides = [1, 1, 1, 1, 1]} : vector<1x7x2x8x8xf32> to vector<1x7x1x8x8xf32>
    %79 = vector.shape_cast %78 : vector<1x7x1x8x8xf32> to vector<1x7x8x8xf32>
    %80 = vector.shape_cast %79 : vector<1x7x8x8xf32> to vector<56x8xf32>
    %c2_69 = arith.constant 2 : index
    %c0_70 = arith.constant 0 : index
    %c0_71 = arith.constant 0 : index
    %81 = vector.load %arg4[%c2_69, %c0_70, %c0_71] : memref<9x8x8xf32, #tpu.memory_space<vmem>>, vector<1x8x8xf32>
    %82 = vector.shape_cast %81 : vector<1x8x8xf32> to vector<8x8xf32>
    %cst_72 = arith.constant dense<0.000000e+00> : vector<56x8xf32>
    %83 = tpu.matmul %80, %82, %cst_72 {dimension_numbers = #tpu.dot_dimension_numbers<[1], [0], [0], [1], [0, 0, 1, 1], [], []>} : vector<56x8xf32>, vector<8x8xf32>, vector<56x8xf32> -> vector<56x8xf32>
    %84 = arith.addf %75, %83 : vector<56x8xf32>
    %c0_73 = arith.constant 0 : index
    %c1_74 = arith.constant 1 : index
    %c0_75 = arith.constant 0 : index
    %c0_76 = arith.constant 0 : index
    %85 = tpu.strided_load %arg20[%c0_73, %c1_74, %c0_75, %c0_76] {strides = array<i32: 1, 1, 2, 1>} : memref<1x16x24x8xf32, #tpu.memory_space<vmem>>, vector<1x14x8x8xf32>
    %86 = vector.shape_cast %85 : vector<1x14x8x8xf32> to vector<1x7x2x8x8xf32>
    %87 = vector.extract_strided_slice %86 {offsets = [0, 0, 0, 0, 0], sizes = [1, 7, 1, 8, 8], strides = [1, 1, 1, 1, 1]} : vector<1x7x2x8x8xf32> to vector<1x7x1x8x8xf32>
    %88 = vector.shape_cast %87 : vector<1x7x1x8x8xf32> to vector<1x7x8x8xf32>
    %89 = vector.shape_cast %88 : vector<1x7x8x8xf32> to vector<56x8xf32>
    %c3_77 = arith.constant 3 : index
    %c0_78 = arith.constant 0 : index
    %c0_79 = arith.constant 0 : index
    %90 = vector.load %arg4[%c3_77, %c0_78, %c0_79] : memref<9x8x8xf32, #tpu.memory_space<vmem>>, vector<1x8x8xf32>
    %91 = vector.shape_cast %90 : vector<1x8x8xf32> to vector<8x8xf32>
    %cst_80 = arith.constant dense<0.000000e+00> : vector<56x8xf32>
    %92 = tpu.matmul %89, %91, %cst_80 {dimension_numbers = #tpu.dot_dimension_numbers<[1], [0], [0], [1], [0, 0, 1, 1], [], []>} : vector<56x8xf32>, vector<8x8xf32>, vector<56x8xf32> -> vector<56x8xf32>
    %93 = arith.addf %84, %92 : vector<56x8xf32>
    %c0_81 = arith.constant 0 : index
    %c1_82 = arith.constant 1 : index
    %c1_83 = arith.constant 1 : index
    %c0_84 = arith.constant 0 : index
    %94 = tpu.strided_load %arg20[%c0_81, %c1_82, %c1_83, %c0_84] {strides = array<i32: 1, 1, 2, 1>} : memref<1x16x24x8xf32, #tpu.memory_space<vmem>>, vector<1x14x8x8xf32>
    %95 = vector.shape_cast %94 : vector<1x14x8x8xf32> to vector<1x7x2x8x8xf32>
    %96 = vector.extract_strided_slice %95 {offsets = [0, 0, 0, 0, 0], sizes = [1, 7, 1, 8, 8], strides = [1, 1, 1, 1, 1]} : vector<1x7x2x8x8xf32> to vector<1x7x1x8x8xf32>
    %97 = vector.shape_cast %96 : vector<1x7x1x8x8xf32> to vector<1x7x8x8xf32>
    %98 = vector.shape_cast %97 : vector<1x7x8x8xf32> to vector<56x8xf32>
    %c4_85 = arith.constant 4 : index
    %c0_86 = arith.constant 0 : index
    %c0_87 = arith.constant 0 : index
    %99 = vector.load %arg4[%c4_85, %c0_86, %c0_87] : memref<9x8x8xf32, #tpu.memory_space<vmem>>, vector<1x8x8xf32>
    %100 = vector.shape_cast %99 : vector<1x8x8xf32> to vector<8x8xf32>
    %cst_88 = arith.constant dense<0.000000e+00> : vector<56x8xf32>
    %101 = tpu.matmul %98, %100, %cst_88 {dimension_numbers = #tpu.dot_dimension_numbers<[1], [0], [0], [1], [0, 0, 1, 1], [], []>} : vector<56x8xf32>, vector<8x8xf32>, vector<56x8xf32> -> vector<56x8xf32>
    %102 = arith.addf %93, %101 : vector<56x8xf32>
    %c0_89 = arith.constant 0 : index
    %c1_90 = arith.constant 1 : index
    %c2_91 = arith.constant 2 : index
    %c0_92 = arith.constant 0 : index
    %103 = tpu.strided_load %arg20[%c0_89, %c1_90, %c2_91, %c0_92] {strides = array<i32: 1, 1, 2, 1>} : memref<1x16x24x8xf32, #tpu.memory_space<vmem>>, vector<1x14x8x8xf32>
    %104 = vector.shape_cast %103 : vector<1x14x8x8xf32> to vector<1x7x2x8x8xf32>
    %105 = vector.extract_strided_slice %104 {offsets = [0, 0, 0, 0, 0], sizes = [1, 7, 1, 8, 8], strides = [1, 1, 1, 1, 1]} : vector<1x7x2x8x8xf32> to vector<1x7x1x8x8xf32>
    %106 = vector.shape_cast %105 : vector<1x7x1x8x8xf32> to vector<1x7x8x8xf32>
    %107 = vector.shape_cast %106 : vector<1x7x8x8xf32> to vector<56x8xf32>
    %c5_93 = arith.constant 5 : index
    %c0_94 = arith.constant 0 : index
    %c0_95 = arith.constant 0 : index
    %108 = vector.load %arg4[%c5_93, %c0_94, %c0_95] : memref<9x8x8xf32, #tpu.memory_space<vmem>>, vector<1x8x8xf32>
    %109 = vector.shape_cast %108 : vector<1x8x8xf32> to vector<8x8xf32>
    %cst_96 = arith.constant dense<0.000000e+00> : vector<56x8xf32>
    %110 = tpu.matmul %107, %109, %cst_96 {dimension_numbers = #tpu.dot_dimension_numbers<[1], [0], [0], [1], [0, 0, 1, 1], [], []>} : vector<56x8xf32>, vector<8x8xf32>, vector<56x8xf32> -> vector<56x8xf32>
    %111 = arith.addf %102, %110 : vector<56x8xf32>
    %c0_97 = arith.constant 0 : index
    %c2_98 = arith.constant 2 : index
    %c0_99 = arith.constant 0 : index
    %c0_100 = arith.constant 0 : index
    %112 = tpu.strided_load %arg20[%c0_97, %c2_98, %c0_99, %c0_100] {strides = array<i32: 1, 1, 2, 1>} : memref<1x16x24x8xf32, #tpu.memory_space<vmem>>, vector<1x14x8x8xf32>
    %113 = vector.shape_cast %112 : vector<1x14x8x8xf32> to vector<1x7x2x8x8xf32>
    %114 = vector.extract_strided_slice %113 {offsets = [0, 0, 0, 0, 0], sizes = [1, 7, 1, 8, 8], strides = [1, 1, 1, 1, 1]} : vector<1x7x2x8x8xf32> to vector<1x7x1x8x8xf32>
    %115 = vector.shape_cast %114 : vector<1x7x1x8x8xf32> to vector<1x7x8x8xf32>
    %116 = vector.shape_cast %115 : vector<1x7x8x8xf32> to vector<56x8xf32>
    %c6 = arith.constant 6 : index
    %c0_101 = arith.constant 0 : index
    %c0_102 = arith.constant 0 : index
    %117 = vector.load %arg4[%c6, %c0_101, %c0_102] : memref<9x8x8xf32, #tpu.memory_space<vmem>>, vector<1x8x8xf32>
    %118 = vector.shape_cast %117 : vector<1x8x8xf32> to vector<8x8xf32>
    %cst_103 = arith.constant dense<0.000000e+00> : vector<56x8xf32>
    %119 = tpu.matmul %116, %118, %cst_103 {dimension_numbers = #tpu.dot_dimension_numbers<[1], [0], [0], [1], [0, 0, 1, 1], [], []>} : vector<56x8xf32>, vector<8x8xf32>, vector<56x8xf32> -> vector<56x8xf32>
    %120 = arith.addf %111, %119 : vector<56x8xf32>
    %c0_104 = arith.constant 0 : index
    %c2_105 = arith.constant 2 : index
    %c1_106 = arith.constant 1 : index
    %c0_107 = arith.constant 0 : index
    %121 = tpu.strided_load %arg20[%c0_104, %c2_105, %c1_106, %c0_107] {strides = array<i32: 1, 1, 2, 1>} : memref<1x16x24x8xf32, #tpu.memory_space<vmem>>, vector<1x14x8x8xf32>
    %122 = vector.shape_cast %121 : vector<1x14x8x8xf32> to vector<1x7x2x8x8xf32>
    %123 = vector.extract_strided_slice %122 {offsets = [0, 0, 0, 0, 0], sizes = [1, 7, 1, 8, 8], strides = [1, 1, 1, 1, 1]} : vector<1x7x2x8x8xf32> to vector<1x7x1x8x8xf32>
    %124 = vector.shape_cast %123 : vector<1x7x1x8x8xf32> to vector<1x7x8x8xf32>
    %125 = vector.shape_cast %124 : vector<1x7x8x8xf32> to vector<56x8xf32>
    %c7 = arith.constant 7 : index
    %c0_108 = arith.constant 0 : index
    %c0_109 = arith.constant 0 : index
    %126 = vector.load %arg4[%c7, %c0_108, %c0_109] : memref<9x8x8xf32, #tpu.memory_space<vmem>>, vector<1x8x8xf32>
    %127 = vector.shape_cast %126 : vector<1x8x8xf32> to vector<8x8xf32>
    %cst_110 = arith.constant dense<0.000000e+00> : vector<56x8xf32>
    %128 = tpu.matmul %125, %127, %cst_110 {dimension_numbers = #tpu.dot_dimension_numbers<[1], [0], [0], [1], [0, 0, 1, 1], [], []>} : vector<56x8xf32>, vector<8x8xf32>, vector<56x8xf32> -> vector<56x8xf32>
    %129 = arith.addf %120, %128 : vector<56x8xf32>
    %c0_111 = arith.constant 0 : index
    %c2_112 = arith.constant 2 : index
    %c2_113 = arith.constant 2 : index
    %c0_114 = arith.constant 0 : index
    %130 = tpu.strided_load %arg20[%c0_111, %c2_112, %c2_113, %c0_114] {strides = array<i32: 1, 1, 2, 1>} : memref<1x16x24x8xf32, #tpu.memory_space<vmem>>, vector<1x14x8x8xf32>
    %131 = vector.shape_cast %130 : vector<1x14x8x8xf32> to vector<1x7x2x8x8xf32>
    %132 = vector.extract_strided_slice %131 {offsets = [0, 0, 0, 0, 0], sizes = [1, 7, 1, 8, 8], strides = [1, 1, 1, 1, 1]} : vector<1x7x2x8x8xf32> to vector<1x7x1x8x8xf32>
    %133 = vector.shape_cast %132 : vector<1x7x1x8x8xf32> to vector<1x7x8x8xf32>
    %134 = vector.shape_cast %133 : vector<1x7x8x8xf32> to vector<56x8xf32>
    %c8 = arith.constant 8 : index
    %c0_115 = arith.constant 0 : index
    %c0_116 = arith.constant 0 : index
    %135 = vector.load %arg4[%c8, %c0_115, %c0_116] : memref<9x8x8xf32, #tpu.memory_space<vmem>>, vector<1x8x8xf32>
    %136 = vector.shape_cast %135 : vector<1x8x8xf32> to vector<8x8xf32>
    %cst_117 = arith.constant dense<0.000000e+00> : vector<56x8xf32>
    %137 = tpu.matmul %134, %136, %cst_117 {dimension_numbers = #tpu.dot_dimension_numbers<[1], [0], [0], [1], [0, 0, 1, 1], [], []>} : vector<56x8xf32>, vector<8x8xf32>, vector<56x8xf32> -> vector<56x8xf32>
    %138 = arith.addf %129, %137 : vector<56x8xf32>
    %c0_118 = arith.constant 0 : index
    %c0_119 = arith.constant 0 : index
    %139 = vector.load %arg5[%c0_118, %c0_119] : memref<1x8xf32, #tpu.memory_space<vmem>>, vector<1x8xf32>
    %140 = vector.broadcast %139 : vector<1x8xf32> to vector<56x8xf32>
    %141 = arith.addf %138, %140 : vector<56x8xf32>
    %142 = vector.shape_cast %141 : vector<56x8xf32> to vector<1x7x8x8xf32>
    %c0_120 = arith.constant 0 : index
    %c0_121 = arith.constant 0 : index
    %c0_122 = arith.constant 0 : index
    %c0_123 = arith.constant 0 : index
    %143 = vector.load %arg18[%c0_120, %c0_121, %c0_122, %c0_123] : memref<1x7x8x8xf32, #tpu.memory_space<vmem>>, vector<1x7x8x8xf32>
    tpu.vector_store %arg18[%c0_120, %c0_121, %c0_122, %c0_123], %142 {strides = array<i32>} : memref<1x7x8x8xf32, #tpu.memory_space<vmem>>, vector<1x7x8x8xf32>,
    %cst_124 = arith.constant 0.000000e+00 : f32
    %144 = vector.broadcast %cst_124 : f32 to vector<704x8xf32>
    %c0_125 = arith.constant 0 : index
    %c0_126 = arith.constant 0 : index
    %c0_127 = arith.constant 0 : index
    %c0_128 = arith.constant 0 : index
    %145 = vector.load %arg1[%c0_125, %c0_126, %c0_127, %c0_128] : memref<1x22x32x8xf32, #tpu.memory_space<vmem>>, vector<1x22x32x8xf32>
    %146 = vector.shape_cast %145 : vector<1x22x32x8xf32> to vector<704x8xf32>
    %c0_129 = arith.constant 0 : index
    %c0_130 = arith.constant 0 : index
    %c0_131 = arith.constant 0 : index
    %147 = vector.load %arg6[%c0_129, %c0_130, %c0_131] : memref<1x8x8xf32, #tpu.memory_space<vmem>>, vector<1x8x8xf32>
    %148 = vector.shape_cast %147 : vector<1x8x8xf32> to vector<8x8xf32>
    %cst_132 = arith.constant dense<0.000000e+00> : vector<704x8xf32>
    %149 = tpu.matmul %146, %148, %cst_132 {dimension_numbers = #tpu.dot_dimension_numbers<[1], [0], [0], [1], [0, 0, 1, 1], [], []>} : vector<704x8xf32>, vector<8x8xf32>, vector<704x8xf32> -> vector<704x8xf32>
    %150 = arith.addf %144, %149 : vector<704x8xf32>
    %c0_133 = arith.constant 0 : index
    %c0_134 = arith.constant 0 : index
    %151 = vector.load %arg7[%c0_133, %c0_134] : memref<1x8xf32, #tpu.memory_space<vmem>>, vector<1x8xf32>
    %152 = vector.broadcast %151 : vector<1x8xf32> to vector<704x8xf32>
    %153 = arith.addf %150, %152 : vector<704x8xf32>
    %154 = vector.shape_cast %153 : vector<704x8xf32> to vector<1x22x32x8xf32>
    %c0_135 = arith.constant 0 : index
    %c0_136 = arith.constant 0 : index
    %c0_137 = arith.constant 0 : index
    %c0_138 = arith.constant 0 : index
    %155 = vector.load %arg14[%c0_135, %c0_136, %c0_137, %c0_138] : memref<1x22x32x1xf32, #tpu.memory_space<vmem>>, vector<1x22x32x1xf32>
    %156 = vector.broadcast %155 : vector<1x22x32x1xf32> to vector<1x22x32x8xf32>
    %157 = arith.mulf %154, %156 : vector<1x22x32x8xf32>
    %c0_139 = arith.constant 0 : index
    %c0_140 = arith.constant 0 : index
    %c0_141 = arith.constant 0 : index
    %c0_142 = arith.constant 0 : index
    %158 = vector.load %arg21[%c0_139, %c0_140, %c0_141, %c0_142] : memref<1x22x32x8xf32, #tpu.memory_space<vmem>>, vector<1x22x32x8xf32>
    tpu.vector_store %arg21[%c0_139, %c0_140, %c0_141, %c0_142], %157 {strides = array<i32>} : memref<1x22x32x8xf32, #tpu.memory_space<vmem>>, vector<1x22x32x8xf32>,
    %cst_143 = arith.constant 0.000000e+00 : f32
    %159 = vector.broadcast %cst_143 : f32 to vector<528x8xf32>
    %c0_144 = arith.constant 0 : index
    %c0_145 = arith.constant 0 : index
    %c0_146 = arith.constant 0 : index
    %c0_147 = arith.constant 0 : index
    %160 = vector.load %arg21[%c0_144, %c0_145, %c0_146, %c0_147] : memref<1x22x32x8xf32, #tpu.memory_space<vmem>>, vector<1x22x24x8xf32>
    %161 = vector.shape_cast %160 : vector<1x22x24x8xf32> to vector<528x8xf32>
    %c0_148 = arith.constant 0 : index
    %c0_149 = arith.constant 0 : index
    %c0_150 = arith.constant 0 : index
    %162 = vector.load %arg8[%c0_148, %c0_149, %c0_150] : memref<7x8x8xf32, #tpu.memory_space<vmem>>, vector<1x8x8xf32>
    %163 = vector.shape_cast %162 : vector<1x8x8xf32> to vector<8x8xf32>
    %cst_151 = arith.constant dense<0.000000e+00> : vector<528x8xf32>
    %164 = tpu.matmul %161, %163, %cst_151 {dimension_numbers = #tpu.dot_dimension_numbers<[1], [0], [0], [1], [0, 0, 1, 1], [], []>} : vector<528x8xf32>, vector<8x8xf32>, vector<528x8xf32> -> vector<528x8xf32>
    %165 = arith.addf %159, %164 : vector<528x8xf32>
    %c0_152 = arith.constant 0 : index
    %c0_153 = arith.constant 0 : index
    %c1_154 = arith.constant 1 : index
    %c0_155 = arith.constant 0 : index
    %166 = vector.load %arg21[%c0_152, %c0_153, %c1_154, %c0_155] : memref<1x22x32x8xf32, #tpu.memory_space<vmem>>, vector<1x22x24x8xf32>
    %167 = vector.shape_cast %166 : vector<1x22x24x8xf32> to vector<528x8xf32>
    %c1_156 = arith.constant 1 : index
    %c0_157 = arith.constant 0 : index
    %c0_158 = arith.constant 0 : index
    %168 = vector.load %arg8[%c1_156, %c0_157, %c0_158] : memref<7x8x8xf32, #tpu.memory_space<vmem>>, vector<1x8x8xf32>
    %169 = vector.shape_cast %168 : vector<1x8x8xf32> to vector<8x8xf32>
    %cst_159 = arith.constant dense<0.000000e+00> : vector<528x8xf32>
    %170 = tpu.matmul %167, %169, %cst_159 {dimension_numbers = #tpu.dot_dimension_numbers<[1], [0], [0], [1], [0, 0, 1, 1], [], []>} : vector<528x8xf32>, vector<8x8xf32>, vector<528x8xf32> -> vector<528x8xf32>
    %171 = arith.addf %165, %170 : vector<528x8xf32>
    %c0_160 = arith.constant 0 : index
    %c0_161 = arith.constant 0 : index
    %c2_162 = arith.constant 2 : index
    %c0_163 = arith.constant 0 : index
    %172 = vector.load %arg21[%c0_160, %c0_161, %c2_162, %c0_163] : memref<1x22x32x8xf32, #tpu.memory_space<vmem>>, vector<1x22x24x8xf32>
    %173 = vector.shape_cast %172 : vector<1x22x24x8xf32> to vector<528x8xf32>
    %c2_164 = arith.constant 2 : index
    %c0_165 = arith.constant 0 : index
    %c0_166 = arith.constant 0 : index
    %174 = vector.load %arg8[%c2_164, %c0_165, %c0_166] : memref<7x8x8xf32, #tpu.memory_space<vmem>>, vector<1x8x8xf32>
    %175 = vector.shape_cast %174 : vector<1x8x8xf32> to vector<8x8xf32>
    %cst_167 = arith.constant dense<0.000000e+00> : vector<528x8xf32>
    %176 = tpu.matmul %173, %175, %cst_167 {dimension_numbers = #tpu.dot_dimension_numbers<[1], [0], [0], [1], [0, 0, 1, 1], [], []>} : vector<528x8xf32>, vector<8x8xf32>, vector<528x8xf32> -> vector<528x8xf32>
    %177 = arith.addf %171, %176 : vector<528x8xf32>
    %c0_168 = arith.constant 0 : index
    %c0_169 = arith.constant 0 : index
    %c3_170 = arith.constant 3 : index
    %c0_171 = arith.constant 0 : index
    %178 = vector.load %arg21[%c0_168, %c0_169, %c3_170, %c0_171] : memref<1x22x32x8xf32, #tpu.memory_space<vmem>>, vector<1x22x24x8xf32>
    %179 = vector.shape_cast %178 : vector<1x22x24x8xf32> to vector<528x8xf32>
    %c3_172 = arith.constant 3 : index
    %c0_173 = arith.constant 0 : index
    %c0_174 = arith.constant 0 : index
    %180 = vector.load %arg8[%c3_172, %c0_173, %c0_174] : memref<7x8x8xf32, #tpu.memory_space<vmem>>, vector<1x8x8xf32>
    %181 = vector.shape_cast %180 : vector<1x8x8xf32> to vector<8x8xf32>
    %cst_175 = arith.constant dense<0.000000e+00> : vector<528x8xf32>
    %182 = tpu.matmul %179, %181, %cst_175 {dimension_numbers = #tpu.dot_dimension_numbers<[1], [0], [0], [1], [0, 0, 1, 1], [], []>} : vector<528x8xf32>, vector<8x8xf32>, vector<528x8xf32> -> vector<528x8xf32>
    %183 = arith.addf %177, %182 : vector<528x8xf32>
    %c0_176 = arith.constant 0 : index
    %c0_177 = arith.constant 0 : index
    %c4_178 = arith.constant 4 : index
    %c0_179 = arith.constant 0 : index
    %184 = vector.load %arg21[%c0_176, %c0_177, %c4_178, %c0_179] : memref<1x22x32x8xf32, #tpu.memory_space<vmem>>, vector<1x22x24x8xf32>
    %185 = vector.shape_cast %184 : vector<1x22x24x8xf32> to vector<528x8xf32>
    %c4_180 = arith.constant 4 : index
    %c0_181 = arith.constant 0 : index
    %c0_182 = arith.constant 0 : index
    %186 = vector.load %arg8[%c4_180, %c0_181, %c0_182] : memref<7x8x8xf32, #tpu.memory_space<vmem>>, vector<1x8x8xf32>
    %187 = vector.shape_cast %186 : vector<1x8x8xf32> to vector<8x8xf32>
    %cst_183 = arith.constant dense<0.000000e+00> : vector<528x8xf32>
    %188 = tpu.matmul %185, %187, %cst_183 {dimension_numbers = #tpu.dot_dimension_numbers<[1], [0], [0], [1], [0, 0, 1, 1], [], []>} : vector<528x8xf32>, vector<8x8xf32>, vector<528x8xf32> -> vector<528x8xf32>
    %189 = arith.addf %183, %188 : vector<528x8xf32>
    %c0_184 = arith.constant 0 : index
    %c0_185 = arith.constant 0 : index
    %c5_186 = arith.constant 5 : index
    %c0_187 = arith.constant 0 : index
    %190 = vector.load %arg21[%c0_184, %c0_185, %c5_186, %c0_187] : memref<1x22x32x8xf32, #tpu.memory_space<vmem>>, vector<1x22x24x8xf32>
    %191 = vector.shape_cast %190 : vector<1x22x24x8xf32> to vector<528x8xf32>
    %c5_188 = arith.constant 5 : index
    %c0_189 = arith.constant 0 : index
    %c0_190 = arith.constant 0 : index
    %192 = vector.load %arg8[%c5_188, %c0_189, %c0_190] : memref<7x8x8xf32, #tpu.memory_space<vmem>>, vector<1x8x8xf32>
    %193 = vector.shape_cast %192 : vector<1x8x8xf32> to vector<8x8xf32>
    %cst_191 = arith.constant dense<0.000000e+00> : vector<528x8xf32>
    %194 = tpu.matmul %191, %193, %cst_191 {dimension_numbers = #tpu.dot_dimension_numbers<[1], [0], [0], [1], [0, 0, 1, 1], [], []>} : vector<528x8xf32>, vector<8x8xf32>, vector<528x8xf32> -> vector<528x8xf32>
    %195 = arith.addf %189, %194 : vector<528x8xf32>
    %c0_192 = arith.constant 0 : index
    %c0_193 = arith.constant 0 : index
    %c6_194 = arith.constant 6 : index
    %c0_195 = arith.constant 0 : index
    %196 = vector.load %arg21[%c0_192, %c0_193, %c6_194, %c0_195] : memref<1x22x32x8xf32, #tpu.memory_space<vmem>>, vector<1x22x24x8xf32>
    %197 = vector.shape_cast %196 : vector<1x22x24x8xf32> to vector<528x8xf32>
    %c6_196 = arith.constant 6 : index
    %c0_197 = arith.constant 0 : index
    %c0_198 = arith.constant 0 : index
    %198 = vector.load %arg8[%c6_196, %c0_197, %c0_198] : memref<7x8x8xf32, #tpu.memory_space<vmem>>, vector<1x8x8xf32>
    %199 = vector.shape_cast %198 : vector<1x8x8xf32> to vector<8x8xf32>
    %cst_199 = arith.constant dense<0.000000e+00> : vector<528x8xf32>
    %200 = tpu.matmul %197, %199, %cst_199 {dimension_numbers = #tpu.dot_dimension_numbers<[1], [0], [0], [1], [0, 0, 1, 1], [], []>} : vector<528x8xf32>, vector<8x8xf32>, vector<528x8xf32> -> vector<528x8xf32>
    %201 = arith.addf %195, %200 : vector<528x8xf32>
    %c0_200 = arith.constant 0 : index
    %c0_201 = arith.constant 0 : index
    %202 = vector.load %arg9[%c0_200, %c0_201] : memref<1x8xf32, #tpu.memory_space<vmem>>, vector<1x8xf32>
    %203 = vector.broadcast %202 : vector<1x8xf32> to vector<528x8xf32>
    %204 = arith.addf %201, %203 : vector<528x8xf32>
    %205 = vector.shape_cast %204 : vector<528x8xf32> to vector<1x22x24x8xf32>
    %c0_202 = arith.constant 0 : index
    %c0_203 = arith.constant 0 : index
    %c0_204 = arith.constant 0 : index
    %c0_205 = arith.constant 0 : index
    %206 = vector.load %arg15[%c0_202, %c0_203, %c0_204, %c0_205] : memref<1x22x24x1xf32, #tpu.memory_space<vmem>>, vector<1x22x24x1xf32>
    %207 = vector.broadcast %206 : vector<1x22x24x1xf32> to vector<1x22x24x8xf32>
    %208 = arith.mulf %205, %207 : vector<1x22x24x8xf32>
    %c0_206 = arith.constant 0 : index
    %c0_207 = arith.constant 0 : index
    %c0_208 = arith.constant 0 : index
    %c0_209 = arith.constant 0 : index
    %209 = vector.load %arg22[%c0_206, %c0_207, %c0_208, %c0_209] : memref<1x22x24x8xf32, #tpu.memory_space<vmem>>, vector<1x22x24x8xf32>
    tpu.vector_store %arg22[%c0_206, %c0_207, %c0_208, %c0_209], %208 {strides = array<i32>} : memref<1x22x24x8xf32, #tpu.memory_space<vmem>>, vector<1x22x24x8xf32>,
    %cst_210 = arith.constant 0.000000e+00 : f32
    %210 = vector.broadcast %cst_210 : f32 to vector<384x8xf32>
    %c0_211 = arith.constant 0 : index
    %c0_212 = arith.constant 0 : index
    %c0_213 = arith.constant 0 : index
    %c0_214 = arith.constant 0 : index
    %211 = vector.load %arg22[%c0_211, %c0_212, %c0_213, %c0_214] : memref<1x22x24x8xf32, #tpu.memory_space<vmem>>, vector<1x16x24x8xf32>
    %212 = vector.shape_cast %211 : vector<1x16x24x8xf32> to vector<384x8xf32>
    %c0_215 = arith.constant 0 : index
    %c0_216 = arith.constant 0 : index
    %c0_217 = arith.constant 0 : index
    %213 = vector.load %arg10[%c0_215, %c0_216, %c0_217] : memref<7x8x8xf32, #tpu.memory_space<vmem>>, vector<1x8x8xf32>
    %214 = vector.shape_cast %213 : vector<1x8x8xf32> to vector<8x8xf32>
    %cst_218 = arith.constant dense<0.000000e+00> : vector<384x8xf32>
    %215 = tpu.matmul %212, %214, %cst_218 {dimension_numbers = #tpu.dot_dimension_numbers<[1], [0], [0], [1], [0, 0, 1, 1], [], []>} : vector<384x8xf32>, vector<8x8xf32>, vector<384x8xf32> -> vector<384x8xf32>
    %216 = arith.addf %210, %215 : vector<384x8xf32>
    %c0_219 = arith.constant 0 : index
    %c1_220 = arith.constant 1 : index
    %c0_221 = arith.constant 0 : index
    %c0_222 = arith.constant 0 : index
    %217 = vector.load %arg22[%c0_219, %c1_220, %c0_221, %c0_222] : memref<1x22x24x8xf32, #tpu.memory_space<vmem>>, vector<1x16x24x8xf32>
    %218 = vector.shape_cast %217 : vector<1x16x24x8xf32> to vector<384x8xf32>
    %c1_223 = arith.constant 1 : index
    %c0_224 = arith.constant 0 : index
    %c0_225 = arith.constant 0 : index
    %219 = vector.load %arg10[%c1_223, %c0_224, %c0_225] : memref<7x8x8xf32, #tpu.memory_space<vmem>>, vector<1x8x8xf32>
    %220 = vector.shape_cast %219 : vector<1x8x8xf32> to vector<8x8xf32>
    %cst_226 = arith.constant dense<0.000000e+00> : vector<384x8xf32>
    %221 = tpu.matmul %218, %220, %cst_226 {dimension_numbers = #tpu.dot_dimension_numbers<[1], [0], [0], [1], [0, 0, 1, 1], [], []>} : vector<384x8xf32>, vector<8x8xf32>, vector<384x8xf32> -> vector<384x8xf32>
    %222 = arith.addf %216, %221 : vector<384x8xf32>
    %c0_227 = arith.constant 0 : index
    %c2_228 = arith.constant 2 : index
    %c0_229 = arith.constant 0 : index
    %c0_230 = arith.constant 0 : index
    %223 = vector.load %arg22[%c0_227, %c2_228, %c0_229, %c0_230] : memref<1x22x24x8xf32, #tpu.memory_space<vmem>>, vector<1x16x24x8xf32>
    %224 = vector.shape_cast %223 : vector<1x16x24x8xf32> to vector<384x8xf32>
    %c2_231 = arith.constant 2 : index
    %c0_232 = arith.constant 0 : index
    %c0_233 = arith.constant 0 : index
    %225 = vector.load %arg10[%c2_231, %c0_232, %c0_233] : memref<7x8x8xf32, #tpu.memory_space<vmem>>, vector<1x8x8xf32>
    %226 = vector.shape_cast %225 : vector<1x8x8xf32> to vector<8x8xf32>
    %cst_234 = arith.constant dense<0.000000e+00> : vector<384x8xf32>
    %227 = tpu.matmul %224, %226, %cst_234 {dimension_numbers = #tpu.dot_dimension_numbers<[1], [0], [0], [1], [0, 0, 1, 1], [], []>} : vector<384x8xf32>, vector<8x8xf32>, vector<384x8xf32> -> vector<384x8xf32>
    %228 = arith.addf %222, %227 : vector<384x8xf32>
    %c0_235 = arith.constant 0 : index
    %c3_236 = arith.constant 3 : index
    %c0_237 = arith.constant 0 : index
    %c0_238 = arith.constant 0 : index
    %229 = vector.load %arg22[%c0_235, %c3_236, %c0_237, %c0_238] : memref<1x22x24x8xf32, #tpu.memory_space<vmem>>, vector<1x16x24x8xf32>
    %230 = vector.shape_cast %229 : vector<1x16x24x8xf32> to vector<384x8xf32>
    %c3_239 = arith.constant 3 : index
    %c0_240 = arith.constant 0 : index
    %c0_241 = arith.constant 0 : index
    %231 = vector.load %arg10[%c3_239, %c0_240, %c0_241] : memref<7x8x8xf32, #tpu.memory_space<vmem>>, vector<1x8x8xf32>
    %232 = vector.shape_cast %231 : vector<1x8x8xf32> to vector<8x8xf32>
    %cst_242 = arith.constant dense<0.000000e+00> : vector<384x8xf32>
    %233 = tpu.matmul %230, %232, %cst_242 {dimension_numbers = #tpu.dot_dimension_numbers<[1], [0], [0], [1], [0, 0, 1, 1], [], []>} : vector<384x8xf32>, vector<8x8xf32>, vector<384x8xf32> -> vector<384x8xf32>
    %234 = arith.addf %228, %233 : vector<384x8xf32>
    %c0_243 = arith.constant 0 : index
    %c4_244 = arith.constant 4 : index
    %c0_245 = arith.constant 0 : index
    %c0_246 = arith.constant 0 : index
    %235 = vector.load %arg22[%c0_243, %c4_244, %c0_245, %c0_246] : memref<1x22x24x8xf32, #tpu.memory_space<vmem>>, vector<1x16x24x8xf32>
    %236 = vector.shape_cast %235 : vector<1x16x24x8xf32> to vector<384x8xf32>
    %c4_247 = arith.constant 4 : index
    %c0_248 = arith.constant 0 : index
    %c0_249 = arith.constant 0 : index
    %237 = vector.load %arg10[%c4_247, %c0_248, %c0_249] : memref<7x8x8xf32, #tpu.memory_space<vmem>>, vector<1x8x8xf32>
    %238 = vector.shape_cast %237 : vector<1x8x8xf32> to vector<8x8xf32>
    %cst_250 = arith.constant dense<0.000000e+00> : vector<384x8xf32>
    %239 = tpu.matmul %236, %238, %cst_250 {dimension_numbers = #tpu.dot_dimension_numbers<[1], [0], [0], [1], [0, 0, 1, 1], [], []>} : vector<384x8xf32>, vector<8x8xf32>, vector<384x8xf32> -> vector<384x8xf32>
    %240 = arith.addf %234, %239 : vector<384x8xf32>
    %c0_251 = arith.constant 0 : index
    %c5_252 = arith.constant 5 : index
    %c0_253 = arith.constant 0 : index
    %c0_254 = arith.constant 0 : index
    %241 = vector.load %arg22[%c0_251, %c5_252, %c0_253, %c0_254] : memref<1x22x24x8xf32, #tpu.memory_space<vmem>>, vector<1x16x24x8xf32>
    %242 = vector.shape_cast %241 : vector<1x16x24x8xf32> to vector<384x8xf32>
    %c5_255 = arith.constant 5 : index
    %c0_256 = arith.constant 0 : index
    %c0_257 = arith.constant 0 : index
    %243 = vector.load %arg10[%c5_255, %c0_256, %c0_257] : memref<7x8x8xf32, #tpu.memory_space<vmem>>, vector<1x8x8xf32>
    %244 = vector.shape_cast %243 : vector<1x8x8xf32> to vector<8x8xf32>
    %cst_258 = arith.constant dense<0.000000e+00> : vector<384x8xf32>
    %245 = tpu.matmul %242, %244, %cst_258 {dimension_numbers = #tpu.dot_dimension_numbers<[1], [0], [0], [1], [0, 0, 1, 1], [], []>} : vector<384x8xf32>, vector<8x8xf32>, vector<384x8xf32> -> vector<384x8xf32>
    %246 = arith.addf %240, %245 : vector<384x8xf32>
    %c0_259 = arith.constant 0 : index
    %c6_260 = arith.constant 6 : index
    %c0_261 = arith.constant 0 : index
    %c0_262 = arith.constant 0 : index
    %247 = vector.load %arg22[%c0_259, %c6_260, %c0_261, %c0_262] : memref<1x22x24x8xf32, #tpu.memory_space<vmem>>, vector<1x16x24x8xf32>
    %248 = vector.shape_cast %247 : vector<1x16x24x8xf32> to vector<384x8xf32>
    %c6_263 = arith.constant 6 : index
    %c0_264 = arith.constant 0 : index
    %c0_265 = arith.constant 0 : index
    %249 = vector.load %arg10[%c6_263, %c0_264, %c0_265] : memref<7x8x8xf32, #tpu.memory_space<vmem>>, vector<1x8x8xf32>
    %250 = vector.shape_cast %249 : vector<1x8x8xf32> to vector<8x8xf32>
    %cst_266 = arith.constant dense<0.000000e+00> : vector<384x8xf32>
    %251 = tpu.matmul %248, %250, %cst_266 {dimension_numbers = #tpu.dot_dimension_numbers<[1], [0], [0], [1], [0, 0, 1, 1], [], []>} : vector<384x8xf32>, vector<8x8xf32>, vector<384x8xf32> -> vector<384x8xf32>
    %252 = arith.addf %246, %251 : vector<384x8xf32>
    %c0_267 = arith.constant 0 : index
    %c0_268 = arith.constant 0 : index
    %253 = vector.load %arg11[%c0_267, %c0_268] : memref<1x8xf32, #tpu.memory_space<vmem>>, vector<1x8xf32>
    %254 = vector.broadcast %253 : vector<1x8xf32> to vector<384x8xf32>
    %255 = arith.addf %252, %254 : vector<384x8xf32>
    %256 = vector.shape_cast %255 : vector<384x8xf32> to vector<1x16x24x8xf32>
    %c0_269 = arith.constant 0 : index
    %c0_270 = arith.constant 0 : index
    %c0_271 = arith.constant 0 : index
    %c0_272 = arith.constant 0 : index
    %257 = vector.load %arg16[%c0_269, %c0_270, %c0_271, %c0_272] : memref<1x16x24x1xf32, #tpu.memory_space<vmem>>, vector<1x16x24x1xf32>
    %258 = vector.broadcast %257 : vector<1x16x24x1xf32> to vector<1x16x24x8xf32>
    %259 = arith.mulf %256, %258 : vector<1x16x24x8xf32>
    %c0_273 = arith.constant 0 : index
    %c0_274 = arith.constant 0 : index
    %c0_275 = arith.constant 0 : index
    %c0_276 = arith.constant 0 : index
    %260 = vector.load %arg23[%c0_273, %c0_274, %c0_275, %c0_276] : memref<1x16x24x8xf32, #tpu.memory_space<vmem>>, vector<1x16x24x8xf32>
    tpu.vector_store %arg23[%c0_273, %c0_274, %c0_275, %c0_276], %259 {strides = array<i32>} : memref<1x16x24x8xf32, #tpu.memory_space<vmem>>, vector<1x16x24x8xf32>,
    %cst_277 = arith.constant 0.000000e+00 : f32
    %261 = vector.broadcast %cst_277 : f32 to vector<56x8xf32>
    %c0_278 = arith.constant 0 : index
    %c0_279 = arith.constant 0 : index
    %c0_280 = arith.constant 0 : index
    %c0_281 = arith.constant 0 : index
    %262 = tpu.strided_load %arg23[%c0_278, %c0_279, %c0_280, %c0_281] {strides = array<i32: 1, 1, 2, 1>} : memref<1x16x24x8xf32, #tpu.memory_space<vmem>>, vector<1x14x8x8xf32>
    %263 = vector.shape_cast %262 : vector<1x14x8x8xf32> to vector<1x7x2x8x8xf32>
    %264 = vector.extract_strided_slice %263 {offsets = [0, 0, 0, 0, 0], sizes = [1, 7, 1, 8, 8], strides = [1, 1, 1, 1, 1]} : vector<1x7x2x8x8xf32> to vector<1x7x1x8x8xf32>
    %265 = vector.shape_cast %264 : vector<1x7x1x8x8xf32> to vector<1x7x8x8xf32>
    %266 = vector.shape_cast %265 : vector<1x7x8x8xf32> to vector<56x8xf32>
    %c0_282 = arith.constant 0 : index
    %c0_283 = arith.constant 0 : index
    %c0_284 = arith.constant 0 : index
    %267 = vector.load %arg12[%c0_282, %c0_283, %c0_284] : memref<9x8x8xf32, #tpu.memory_space<vmem>>, vector<1x8x8xf32>
    %268 = vector.shape_cast %267 : vector<1x8x8xf32> to vector<8x8xf32>
    %cst_285 = arith.constant dense<0.000000e+00> : vector<56x8xf32>
    %269 = tpu.matmul %266, %268, %cst_285 {dimension_numbers = #tpu.dot_dimension_numbers<[1], [0], [0], [1], [0, 0, 1, 1], [], []>} : vector<56x8xf32>, vector<8x8xf32>, vector<56x8xf32> -> vector<56x8xf32>
    %270 = arith.addf %261, %269 : vector<56x8xf32>
    %c0_286 = arith.constant 0 : index
    %c0_287 = arith.constant 0 : index
    %c1_288 = arith.constant 1 : index
    %c0_289 = arith.constant 0 : index
    %271 = tpu.strided_load %arg23[%c0_286, %c0_287, %c1_288, %c0_289] {strides = array<i32: 1, 1, 2, 1>} : memref<1x16x24x8xf32, #tpu.memory_space<vmem>>, vector<1x14x8x8xf32>
    %272 = vector.shape_cast %271 : vector<1x14x8x8xf32> to vector<1x7x2x8x8xf32>
    %273 = vector.extract_strided_slice %272 {offsets = [0, 0, 0, 0, 0], sizes = [1, 7, 1, 8, 8], strides = [1, 1, 1, 1, 1]} : vector<1x7x2x8x8xf32> to vector<1x7x1x8x8xf32>
    %274 = vector.shape_cast %273 : vector<1x7x1x8x8xf32> to vector<1x7x8x8xf32>
    %275 = vector.shape_cast %274 : vector<1x7x8x8xf32> to vector<56x8xf32>
    %c1_290 = arith.constant 1 : index
    %c0_291 = arith.constant 0 : index
    %c0_292 = arith.constant 0 : index
    %276 = vector.load %arg12[%c1_290, %c0_291, %c0_292] : memref<9x8x8xf32, #tpu.memory_space<vmem>>, vector<1x8x8xf32>
    %277 = vector.shape_cast %276 : vector<1x8x8xf32> to vector<8x8xf32>
    %cst_293 = arith.constant dense<0.000000e+00> : vector<56x8xf32>
    %278 = tpu.matmul %275, %277, %cst_293 {dimension_numbers = #tpu.dot_dimension_numbers<[1], [0], [0], [1], [0, 0, 1, 1], [], []>} : vector<56x8xf32>, vector<8x8xf32>, vector<56x8xf32> -> vector<56x8xf32>
    %279 = arith.addf %270, %278 : vector<56x8xf32>
    %c0_294 = arith.constant 0 : index
    %c0_295 = arith.constant 0 : index
    %c2_296 = arith.constant 2 : index
    %c0_297 = arith.constant 0 : index
    %280 = tpu.strided_load %arg23[%c0_294, %c0_295, %c2_296, %c0_297] {strides = array<i32: 1, 1, 2, 1>} : memref<1x16x24x8xf32, #tpu.memory_space<vmem>>, vector<1x14x8x8xf32>
    %281 = vector.shape_cast %280 : vector<1x14x8x8xf32> to vector<1x7x2x8x8xf32>
    %282 = vector.extract_strided_slice %281 {offsets = [0, 0, 0, 0, 0], sizes = [1, 7, 1, 8, 8], strides = [1, 1, 1, 1, 1]} : vector<1x7x2x8x8xf32> to vector<1x7x1x8x8xf32>
    %283 = vector.shape_cast %282 : vector<1x7x1x8x8xf32> to vector<1x7x8x8xf32>
    %284 = vector.shape_cast %283 : vector<1x7x8x8xf32> to vector<56x8xf32>
    %c2_298 = arith.constant 2 : index
    %c0_299 = arith.constant 0 : index
    %c0_300 = arith.constant 0 : index
    %285 = vector.load %arg12[%c2_298, %c0_299, %c0_300] : memref<9x8x8xf32, #tpu.memory_space<vmem>>, vector<1x8x8xf32>
    %286 = vector.shape_cast %285 : vector<1x8x8xf32> to vector<8x8xf32>
    %cst_301 = arith.constant dense<0.000000e+00> : vector<56x8xf32>
    %287 = tpu.matmul %284, %286, %cst_301 {dimension_numbers = #tpu.dot_dimension_numbers<[1], [0], [0], [1], [0, 0, 1, 1], [], []>} : vector<56x8xf32>, vector<8x8xf32>, vector<56x8xf32> -> vector<56x8xf32>
    %288 = arith.addf %279, %287 : vector<56x8xf32>
    %c0_302 = arith.constant 0 : index
    %c1_303 = arith.constant 1 : index
    %c0_304 = arith.constant 0 : index
    %c0_305 = arith.constant 0 : index
    %289 = tpu.strided_load %arg23[%c0_302, %c1_303, %c0_304, %c0_305] {strides = array<i32: 1, 1, 2, 1>} : memref<1x16x24x8xf32, #tpu.memory_space<vmem>>, vector<1x14x8x8xf32>
    %290 = vector.shape_cast %289 : vector<1x14x8x8xf32> to vector<1x7x2x8x8xf32>
    %291 = vector.extract_strided_slice %290 {offsets = [0, 0, 0, 0, 0], sizes = [1, 7, 1, 8, 8], strides = [1, 1, 1, 1, 1]} : vector<1x7x2x8x8xf32> to vector<1x7x1x8x8xf32>
    %292 = vector.shape_cast %291 : vector<1x7x1x8x8xf32> to vector<1x7x8x8xf32>
    %293 = vector.shape_cast %292 : vector<1x7x8x8xf32> to vector<56x8xf32>
    %c3_306 = arith.constant 3 : index
    %c0_307 = arith.constant 0 : index
    %c0_308 = arith.constant 0 : index
    %294 = vector.load %arg12[%c3_306, %c0_307, %c0_308] : memref<9x8x8xf32, #tpu.memory_space<vmem>>, vector<1x8x8xf32>
    %295 = vector.shape_cast %294 : vector<1x8x8xf32> to vector<8x8xf32>
    %cst_309 = arith.constant dense<0.000000e+00> : vector<56x8xf32>
    %296 = tpu.matmul %293, %295, %cst_309 {dimension_numbers = #tpu.dot_dimension_numbers<[1], [0], [0], [1], [0, 0, 1, 1], [], []>} : vector<56x8xf32>, vector<8x8xf32>, vector<56x8xf32> -> vector<56x8xf32>
    %297 = arith.addf %288, %296 : vector<56x8xf32>
    %c0_310 = arith.constant 0 : index
    %c1_311 = arith.constant 1 : index
    %c1_312 = arith.constant 1 : index
    %c0_313 = arith.constant 0 : index
    %298 = tpu.strided_load %arg23[%c0_310, %c1_311, %c1_312, %c0_313] {strides = array<i32: 1, 1, 2, 1>} : memref<1x16x24x8xf32, #tpu.memory_space<vmem>>, vector<1x14x8x8xf32>
    %299 = vector.shape_cast %298 : vector<1x14x8x8xf32> to vector<1x7x2x8x8xf32>
    %300 = vector.extract_strided_slice %299 {offsets = [0, 0, 0, 0, 0], sizes = [1, 7, 1, 8, 8], strides = [1, 1, 1, 1, 1]} : vector<1x7x2x8x8xf32> to vector<1x7x1x8x8xf32>
    %301 = vector.shape_cast %300 : vector<1x7x1x8x8xf32> to vector<1x7x8x8xf32>
    %302 = vector.shape_cast %301 : vector<1x7x8x8xf32> to vector<56x8xf32>
    %c4_314 = arith.constant 4 : index
    %c0_315 = arith.constant 0 : index
    %c0_316 = arith.constant 0 : index
    %303 = vector.load %arg12[%c4_314, %c0_315, %c0_316] : memref<9x8x8xf32, #tpu.memory_space<vmem>>, vector<1x8x8xf32>
    %304 = vector.shape_cast %303 : vector<1x8x8xf32> to vector<8x8xf32>
    %cst_317 = arith.constant dense<0.000000e+00> : vector<56x8xf32>
    %305 = tpu.matmul %302, %304, %cst_317 {dimension_numbers = #tpu.dot_dimension_numbers<[1], [0], [0], [1], [0, 0, 1, 1], [], []>} : vector<56x8xf32>, vector<8x8xf32>, vector<56x8xf32> -> vector<56x8xf32>
    %306 = arith.addf %297, %305 : vector<56x8xf32>
    %c0_318 = arith.constant 0 : index
    %c1_319 = arith.constant 1 : index
    %c2_320 = arith.constant 2 : index
    %c0_321 = arith.constant 0 : index
    %307 = tpu.strided_load %arg23[%c0_318, %c1_319, %c2_320, %c0_321] {strides = array<i32: 1, 1, 2, 1>} : memref<1x16x24x8xf32, #tpu.memory_space<vmem>>, vector<1x14x8x8xf32>
    %308 = vector.shape_cast %307 : vector<1x14x8x8xf32> to vector<1x7x2x8x8xf32>
    %309 = vector.extract_strided_slice %308 {offsets = [0, 0, 0, 0, 0], sizes = [1, 7, 1, 8, 8], strides = [1, 1, 1, 1, 1]} : vector<1x7x2x8x8xf32> to vector<1x7x1x8x8xf32>
    %310 = vector.shape_cast %309 : vector<1x7x1x8x8xf32> to vector<1x7x8x8xf32>
    %311 = vector.shape_cast %310 : vector<1x7x8x8xf32> to vector<56x8xf32>
    %c5_322 = arith.constant 5 : index
    %c0_323 = arith.constant 0 : index
    %c0_324 = arith.constant 0 : index
    %312 = vector.load %arg12[%c5_322, %c0_323, %c0_324] : memref<9x8x8xf32, #tpu.memory_space<vmem>>, vector<1x8x8xf32>
    %313 = vector.shape_cast %312 : vector<1x8x8xf32> to vector<8x8xf32>
    %cst_325 = arith.constant dense<0.000000e+00> : vector<56x8xf32>
    %314 = tpu.matmul %311, %313, %cst_325 {dimension_numbers = #tpu.dot_dimension_numbers<[1], [0], [0], [1], [0, 0, 1, 1], [], []>} : vector<56x8xf32>, vector<8x8xf32>, vector<56x8xf32> -> vector<56x8xf32>
    %315 = arith.addf %306, %314 : vector<56x8xf32>
    %c0_326 = arith.constant 0 : index
    %c2_327 = arith.constant 2 : index
    %c0_328 = arith.constant 0 : index
    %c0_329 = arith.constant 0 : index
    %316 = tpu.strided_load %arg23[%c0_326, %c2_327, %c0_328, %c0_329] {strides = array<i32: 1, 1, 2, 1>} : memref<1x16x24x8xf32, #tpu.memory_space<vmem>>, vector<1x14x8x8xf32>
    %317 = vector.shape_cast %316 : vector<1x14x8x8xf32> to vector<1x7x2x8x8xf32>
    %318 = vector.extract_strided_slice %317 {offsets = [0, 0, 0, 0, 0], sizes = [1, 7, 1, 8, 8], strides = [1, 1, 1, 1, 1]} : vector<1x7x2x8x8xf32> to vector<1x7x1x8x8xf32>
    %319 = vector.shape_cast %318 : vector<1x7x1x8x8xf32> to vector<1x7x8x8xf32>
    %320 = vector.shape_cast %319 : vector<1x7x8x8xf32> to vector<56x8xf32>
    %c6_330 = arith.constant 6 : index
    %c0_331 = arith.constant 0 : index
    %c0_332 = arith.constant 0 : index
    %321 = vector.load %arg12[%c6_330, %c0_331, %c0_332] : memref<9x8x8xf32, #tpu.memory_space<vmem>>, vector<1x8x8xf32>
    %322 = vector.shape_cast %321 : vector<1x8x8xf32> to vector<8x8xf32>
    %cst_333 = arith.constant dense<0.000000e+00> : vector<56x8xf32>
    %323 = tpu.matmul %320, %322, %cst_333 {dimension_numbers = #tpu.dot_dimension_numbers<[1], [0], [0], [1], [0, 0, 1, 1], [], []>} : vector<56x8xf32>, vector<8x8xf32>, vector<56x8xf32> -> vector<56x8xf32>
    %324 = arith.addf %315, %323 : vector<56x8xf32>
    %c0_334 = arith.constant 0 : index
    %c2_335 = arith.constant 2 : index
    %c1_336 = arith.constant 1 : index
    %c0_337 = arith.constant 0 : index
    %325 = tpu.strided_load %arg23[%c0_334, %c2_335, %c1_336, %c0_337] {strides = array<i32: 1, 1, 2, 1>} : memref<1x16x24x8xf32, #tpu.memory_space<vmem>>, vector<1x14x8x8xf32>
    %326 = vector.shape_cast %325 : vector<1x14x8x8xf32> to vector<1x7x2x8x8xf32>
    %327 = vector.extract_strided_slice %326 {offsets = [0, 0, 0, 0, 0], sizes = [1, 7, 1, 8, 8], strides = [1, 1, 1, 1, 1]} : vector<1x7x2x8x8xf32> to vector<1x7x1x8x8xf32>
    %328 = vector.shape_cast %327 : vector<1x7x1x8x8xf32> to vector<1x7x8x8xf32>
    %329 = vector.shape_cast %328 : vector<1x7x8x8xf32> to vector<56x8xf32>
    %c7_338 = arith.constant 7 : index
    %c0_339 = arith.constant 0 : index
    %c0_340 = arith.constant 0 : index
    %330 = vector.load %arg12[%c7_338, %c0_339, %c0_340] : memref<9x8x8xf32, #tpu.memory_space<vmem>>, vector<1x8x8xf32>
    %331 = vector.shape_cast %330 : vector<1x8x8xf32> to vector<8x8xf32>
    %cst_341 = arith.constant dense<0.000000e+00> : vector<56x8xf32>
    %332 = tpu.matmul %329, %331, %cst_341 {dimension_numbers = #tpu.dot_dimension_numbers<[1], [0], [0], [1], [0, 0, 1, 1], [], []>} : vector<56x8xf32>, vector<8x8xf32>, vector<56x8xf32> -> vector<56x8xf32>
    %333 = arith.addf %324, %332 : vector<56x8xf32>
    %c0_342 = arith.constant 0 : index
    %c2_343 = arith.constant 2 : index
    %c2_344 = arith.constant 2 : index
    %c0_345 = arith.constant 0 : index
    %334 = tpu.strided_load %arg23[%c0_342, %c2_343, %c2_344, %c0_345] {strides = array<i32: 1, 1, 2, 1>} : memref<1x16x24x8xf32, #tpu.memory_space<vmem>>, vector<1x14x8x8xf32>
    %335 = vector.shape_cast %334 : vector<1x14x8x8xf32> to vector<1x7x2x8x8xf32>
    %336 = vector.extract_strided_slice %335 {offsets = [0, 0, 0, 0, 0], sizes = [1, 7, 1, 8, 8], strides = [1, 1, 1, 1, 1]} : vector<1x7x2x8x8xf32> to vector<1x7x1x8x8xf32>
    %337 = vector.shape_cast %336 : vector<1x7x1x8x8xf32> to vector<1x7x8x8xf32>
    %338 = vector.shape_cast %337 : vector<1x7x8x8xf32> to vector<56x8xf32>
    %c8_346 = arith.constant 8 : index
    %c0_347 = arith.constant 0 : index
    %c0_348 = arith.constant 0 : index
    %339 = vector.load %arg12[%c8_346, %c0_347, %c0_348] : memref<9x8x8xf32, #tpu.memory_space<vmem>>, vector<1x8x8xf32>
    %340 = vector.shape_cast %339 : vector<1x8x8xf32> to vector<8x8xf32>
    %cst_349 = arith.constant dense<0.000000e+00> : vector<56x8xf32>
    %341 = tpu.matmul %338, %340, %cst_349 {dimension_numbers = #tpu.dot_dimension_numbers<[1], [0], [0], [1], [0, 0, 1, 1], [], []>} : vector<56x8xf32>, vector<8x8xf32>, vector<56x8xf32> -> vector<56x8xf32>
    %342 = arith.addf %333, %341 : vector<56x8xf32>
    %c0_350 = arith.constant 0 : index
    %c0_351 = arith.constant 0 : index
    %343 = vector.load %arg13[%c0_350, %c0_351] : memref<1x8xf32, #tpu.memory_space<vmem>>, vector<1x8xf32>
    %344 = vector.broadcast %343 : vector<1x8xf32> to vector<56x8xf32>
    %345 = arith.addf %342, %344 : vector<56x8xf32>
    %346 = vector.shape_cast %345 : vector<56x8xf32> to vector<1x7x8x8xf32>
    %c0_352 = arith.constant 0 : index
    %c0_353 = arith.constant 0 : index
    %c0_354 = arith.constant 0 : index
    %c0_355 = arith.constant 0 : index
    %347 = vector.load %arg19[%c0_352, %c0_353, %c0_354, %c0_355] : memref<1x7x8x8xf32, #tpu.memory_space<vmem>>, vector<1x7x8x8xf32>
    tpu.vector_store %arg19[%c0_352, %c0_353, %c0_354, %c0_355], %346 {strides = array<i32>} : memref<1x7x8x8xf32, #tpu.memory_space<vmem>>, vector<1x7x8x8xf32>,
    return
  }
  func.func @transform_0(%arg0: i32) -> (i32, i32, i32, i32) {
    %c0_i32 = arith.constant 0 : i32
    %c0_i32_0 = arith.constant 0 : i32
    %c0_i32_1 = arith.constant 0 : i32
    %c0_i32_2 = arith.constant 0 : i32
    return %arg0, %c0_i32, %c0_i32_0, %c0_i32_1 : i32, i32, i32, i32
  }
  func.func @transform_1(%arg0: i32) -> (i32, i32, i32) {
    %c0_i32 = arith.constant 0 : i32
    %c0_i32_0 = arith.constant 0 : i32
    %c0_i32_1 = arith.constant 0 : i32
    %c0_i32_2 = arith.constant 0 : i32
    return %c0_i32, %c0_i32_0, %c0_i32_1 : i32, i32, i32
  }
  func.func @transform_2(%arg0: i32) -> (i32, i32) {
    %c0_i32 = arith.constant 0 : i32
    %c0_i32_0 = arith.constant 0 : i32
    %c0_i32_1 = arith.constant 0 : i32
    return %c0_i32, %c0_i32_0 : i32, i32
  }
  func.func @transform_3(%arg0: i32) -> (i32, i32, i32) {
    %c0_i32 = arith.constant 0 : i32
    %c0_i32_0 = arith.constant 0 : i32
    %c0_i32_1 = arith.constant 0 : i32
    %c0_i32_2 = arith.constant 0 : i32
    return %c0_i32, %c0_i32_0, %c0_i32_1 : i32, i32, i32
  }
  func.func @transform_4(%arg0: i32) -> (i32, i32) {
    %c0_i32 = arith.constant 0 : i32
    %c0_i32_0 = arith.constant 0 : i32
    %c0_i32_1 = arith.constant 0 : i32
    return %c0_i32, %c0_i32_0 : i32, i32
  }
  func.func @transform_5(%arg0: i32) -> (i32, i32, i32) {
    %c0_i32 = arith.constant 0 : i32
    %c0_i32_0 = arith.constant 0 : i32
    %c0_i32_1 = arith.constant 0 : i32
    %c0_i32_2 = arith.constant 0 : i32
    return %c0_i32, %c0_i32_0, %c0_i32_1 : i32, i32, i32
  }
  func.func @transform_6(%arg0: i32) -> (i32, i32) {
    %c0_i32 = arith.constant 0 : i32
    %c0_i32_0 = arith.constant 0 : i32
    %c0_i32_1 = arith.constant 0 : i32
    return %c0_i32, %c0_i32_0 : i32, i32
  }
  func.func @transform_7(%arg0: i32) -> (i32, i32, i32) {
    %c0_i32 = arith.constant 0 : i32
    %c0_i32_0 = arith.constant 0 : i32
    %c0_i32_1 = arith.constant 0 : i32
    %c0_i32_2 = arith.constant 0 : i32
    return %c0_i32, %c0_i32_0, %c0_i32_1 : i32, i32, i32
  }
  func.func @transform_8(%arg0: i32) -> (i32, i32) {
    %c0_i32 = arith.constant 0 : i32
    %c0_i32_0 = arith.constant 0 : i32
    %c0_i32_1 = arith.constant 0 : i32
    return %c0_i32, %c0_i32_0 : i32, i32
  }
  func.func @transform_9(%arg0: i32) -> (i32, i32, i32) {
    %c0_i32 = arith.constant 0 : i32
    %c0_i32_0 = arith.constant 0 : i32
    %c0_i32_1 = arith.constant 0 : i32
    %c0_i32_2 = arith.constant 0 : i32
    return %c0_i32, %c0_i32_0, %c0_i32_1 : i32, i32, i32
  }
  func.func @transform_10(%arg0: i32) -> (i32, i32) {
    %c0_i32 = arith.constant 0 : i32
    %c0_i32_0 = arith.constant 0 : i32
    %c0_i32_1 = arith.constant 0 : i32
    return %c0_i32, %c0_i32_0 : i32, i32
  }
  func.func @transform_11(%arg0: i32) -> (i32, i32, i32) {
    %c0_i32 = arith.constant 0 : i32
    %c0_i32_0 = arith.constant 0 : i32
    %c0_i32_1 = arith.constant 0 : i32
    %c0_i32_2 = arith.constant 0 : i32
    return %c0_i32, %c0_i32_0, %c0_i32_1 : i32, i32, i32
  }
  func.func @transform_12(%arg0: i32) -> (i32, i32) {
    %c0_i32 = arith.constant 0 : i32
    %c0_i32_0 = arith.constant 0 : i32
    %c0_i32_1 = arith.constant 0 : i32
    return %c0_i32, %c0_i32_0 : i32, i32
  }
  func.func @transform_13(%arg0: i32) -> (i32, i32, i32, i32) {
    %c0_i32 = arith.constant 0 : i32
    %c0_i32_0 = arith.constant 0 : i32
    %c0_i32_1 = arith.constant 0 : i32
    %c0_i32_2 = arith.constant 0 : i32
    %c0_i32_3 = arith.constant 0 : i32
    return %c0_i32, %c0_i32_0, %c0_i32_1, %c0_i32_2 : i32, i32, i32, i32
  }
  func.func @transform_14(%arg0: i32) -> (i32, i32, i32, i32) {
    %c0_i32 = arith.constant 0 : i32
    %c0_i32_0 = arith.constant 0 : i32
    %c0_i32_1 = arith.constant 0 : i32
    %c0_i32_2 = arith.constant 0 : i32
    %c0_i32_3 = arith.constant 0 : i32
    return %c0_i32, %c0_i32_0, %c0_i32_1, %c0_i32_2 : i32, i32, i32, i32
  }
  func.func @transform_15(%arg0: i32) -> (i32, i32, i32, i32) {
    %c0_i32 = arith.constant 0 : i32
    %c0_i32_0 = arith.constant 0 : i32
    %c0_i32_1 = arith.constant 0 : i32
    %c0_i32_2 = arith.constant 0 : i32
    %c0_i32_3 = arith.constant 0 : i32
    return %c0_i32, %c0_i32_0, %c0_i32_1, %c0_i32_2 : i32, i32, i32, i32
  }
  func.func @transform_16(%arg0: i32) -> (i32, i32, i32, i32) {
    %c0_i32 = arith.constant 0 : i32
    %c0_i32_0 = arith.constant 0 : i32
    %c0_i32_1 = arith.constant 0 : i32
    %c0_i32_2 = arith.constant 0 : i32
    return %arg0, %c0_i32, %c0_i32_0, %c0_i32_1 : i32, i32, i32, i32
  }
  func.func @transform_17(%arg0: i32) -> (i32, i32, i32, i32) {
    %c0_i32 = arith.constant 0 : i32
    %c0_i32_0 = arith.constant 0 : i32
    %c0_i32_1 = arith.constant 0 : i32
    %c0_i32_2 = arith.constant 0 : i32
    return %arg0, %c0_i32, %c0_i32_0, %c0_i32_1 : i32, i32, i32, i32
  }
  func.func @transform_18(%arg0: i32) -> (i32, i32, i32, i32) {
    %c0_i32 = arith.constant 0 : i32
    %c0_i32_0 = arith.constant 0 : i32
    %c0_i32_1 = arith.constant 0 : i32
    %c0_i32_2 = arith.constant 0 : i32
    return %arg0, %c0_i32, %c0_i32_0, %c0_i32_1 : i32, i32, i32, i32
  }
}

</mosaic_0001>

<bundles_post_ra>
// kernel: reduction_block_7x7.1
= control target key start
LH: loop header
LB: loop body
LE: loop exit
PB: predicated region body
PF: predicated region fallthrough
CT: control target
= control target key end

     0   :  { %s20479_s27 = smov 0   ;;  %s24466_s0 = inlined_call_operand.vmem [shape: f32[2,22,32,8], index: 0, kind: input, shape index: {}]   ;;  %s24467_s1 = inlined_call_operand.vmem [shape: f32[1,8,8], index: 1, kind: input, shape index: {}]   ;;  %s24468_s2 = inlined_call_operand.vmem [shape: f32[1,8], index: 2, kind: input, shape index: {}]   ;;  %s24469_s3 = inlined_call_operand.vmem [shape: f32[9,8,8], index: 3, kind: input, shape index: {}]   ;;  %s24470_s4 = inlined_call_operand.vmem [shape: f32[1,8], index: 4, kind: input, shape index: {}]   ;;  %s24471_s5 = inlined_call_operand.vmem [shape: f32[1,8,8], index: 5, kind: input, shape index: {}]   ;;  %s24472_s6 = inlined_call_operand.vmem [shape: f32[1,8], index: 6, kind: input, shape index: {}]   ;;  %s24473_s7 = inlined_call_operand.vmem [shape: f32[7,8,8], index: 7, kind: input, shape index: {}]   ;;  %s24474_s8 = inlined_call_operand.vmem [shape: f32[1,8], index: 8, kind: input, shape index: {}]   ;;  %s24475_s9 = inlined_call_operand.vmem [shape: f32[7,8,8], index: 9, kind: input, shape index: {}]   ;;  %s24476_s10 = inlined_call_operand.vmem [shape: f32[1,8], index: 10, kind: input, shape index: {}]   ;;  %s24477_s11 = inlined_call_operand.vmem [shape: f32[9,8,8], index: 11, kind: input, shape index: {}]   ;;  %s24478_s12 = inlined_call_operand.vmem [shape: f32[1,8], index: 12, kind: input, shape index: {}]   ;;  %s24479_s13 = inlined_call_operand.vmem [shape: f32[1,22,32,1], index: 13, kind: input, shape index: {}]   ;;  %s24480_s14 = inlined_call_operand.vmem [shape: f32[1,22,24,1], index: 14, kind: input, shape index: {}]   ;;  %s24481_s15 = inlined_call_operand.vmem [shape: f32[1,16,24,1], index: 15, kind: input, shape index: {}]   ;;  %s24482_s16 = inlined_call_operand.vmem [shape: f32[2,7,7,8], index: 16, kind: output, shape index: {0}]   ;;  %s24483_s17 = inlined_call_operand.vmem [shape: f32[2,7,8,8], index: 17, kind: output, shape index: {1}]   ;;  %s24484_s18 = inlined_call_operand.vmem [shape: f32[2,7,8,8], index: 18, kind: output, shape index: {2}]  }
   0x1   :  { %24491 = sst [smem:[#allocation89_spill]] %s24466_s0 }
   0x2   :  { %24492 = sst [smem:[#allocation90_spill]] %s24467_s1 }
   0x3   :  { %24493 = sst [smem:[#allocation91_spill]] %s24468_s2 }
   0x4 LB: > { %s15517_s28 = sadd.s32 4294967295, %s20379_s27   ;;  %p15521_p0 = scmp.ge.s32.totalorder %s20379_s27, 1  ;;  %s20379_s27 = sphi %s20479_s27, %s29_s27  }
   0x5   : > { %p517_p1 = scmp.lt.s32.totalorder %s20379_s27, 3 }
   0x7   : > { %p518_p2 = pnand %p15521_p0, %p517_p1 }
   0x9   : > { %521 = sbr.rel (%p518_p2) target bundleno = 2992 (0xbb0), region = 84 }
  0x10   : > { %s24494_s0 = sld [smem:[#allocation90_spill]]  ;;  %p581_p3 = scmp.lt.s32.totalorder %s15517_s28, 1  ;;  %v3514_v1 = vld [vmem:[%s24479_s13] sm:$0xff]  ;;  %v3516_v2 = vld [vmem:[%s24479_s13 + $0x10] sm:$0xff]  ;;  %v20381_v3 = vmov 0   ;;  %v3515_v4 = vld [vmem:[%s24479_s13 + $0x8] sm:$0xff] }
  0x11   : > { %20371 = vset.pattern.permute.xlu0 %v20381_v3  ;;  %20372 = vset.pattern.permute.xlu1 %v20381_v3  ;;  %v3517_v5 = vld [vmem:[%s24479_s13 + $0x18] sm:$0xff]  ;;  %vm850_vm0 = vcmask 64512   ;;  %s24495_s30 = sld [smem:[#allocation89_spill]]  ;;  %v3518_v9 = vld [vmem:[%s24479_s13 + $0x20] sm:$0xff]  ;;  %v3519_v10 = vld [vmem:[%s24479_s13 + $0x28] sm:$0xff]  ;;  %vm20383_vm1 = vmmov 0  }
  0x12   : > { %s24669_s28 = smov (!%p581_p3, %s15517_s28), 1  ;;  %3604 = vperm.xlu0 %20371, %v3514_v1   ;;  %3614 = vperm.xlu1 %20372, %v3516_v2   ;;  %v3520_v13 = vld [vmem:[%s24479_s13 + $0x30] sm:$0xff]  ;;  %v3521_v14 = vld [vmem:[%s24479_s13 + $0x38] sm:$0xff]  ;;  %v3522_v17 = vld [vmem:[%s24479_s13 + $0x40] sm:$0xff]  ;;  %s24514_s29 = sld [smem:[#allocation91_spill]]  ;;  %vm786_vm2 = vcmask 63488  }
  0x13   : > { %s20358_s22 = smul.u32 704, %s24669_s28  ;;  %v3523_v18 = vld [vmem:[%s24479_s13 + $0x48] sm:$0xff]  ;;  %v3524_v21 = vld [vmem:[%s24479_s13 + $0x50] sm:$0xff]  ;;  %v3525_v22 = vld [vmem:[%s24479_s13 + $0x58] sm:$0xff] }
  0x14   : > { %v3526_v25 = vld [vmem:[%s24479_s13 + $0x60] sm:$0xff]  ;;  %v3527_v26 = vld [vmem:[%s24479_s13 + $0x68] sm:$0xff]  ;;  %v3528_v29 = vld [vmem:[%s24479_s13 + $0x70] sm:$0xff] }
  0x15   : > { %v3529_v30 = vld [vmem:[%s24479_s13 + $0x78] sm:$0xff]  ;;  %v3530_v33 = vld [vmem:[%s24479_s13 + $0x80] sm:$0xff]  ;;  %v3531_v34 = vld [vmem:[%s24479_s13 + $0x88] sm:$0xff] }
  0x16   : > { %v842_v0 = vld [vmem:[%s24494_s0] sm:$0xff]  ;;  %3609 = vperm.xlu0 %20371, %v3515_v4   ;;  %3619 = vperm.xlu1 %20372, %v3517_v5   ;;  %v3532_v37 = vld [vmem:[%s24479_s13 + $0x90] sm:$0xff]  ;;  %v3533_v38 = vld [vmem:[%s24479_s13 + $0x98] sm:$0xff] }
  0x17   : > { %17827 = vmatprep.subr.mxu0 %v842_v0  ;;  %s20508_s0 = scalar_lea.vmem %s24495_s30, %s20358_s22  ;;  %v3534_v41 = vld [vmem:[%s24479_s13 + $0xa0] sm:$0xff]  ;;  %v3535_v42 = vld [vmem:[%s24479_s13 + $0xa8] sm:$0xff]  ;;  %v3536_v45 = vld [vmem:[%s24479_s13 + $0xb0] sm:$0xff]  ;;  %s21917_s30 = smul.u32 56, %s24669_s28 }
  0x18   : > { %17828 = vmatpush3.msra.mxu0 %v842_v0  ;;  %v15589_v6 = vld [vmem:[%s20508_s0 + $0x63] sm:$0xff]  ;;  %v15590_v7 = vld [vmem:[%s20508_s0 + $0x6b] sm:$0xff]  ;;  %v15591_v8 = vld [vmem:[%s20508_s0 + $0x73] sm:$0xff] }
  0x19   : > { %17829 = vmatprep.mubr.msk.f32.mxu0 %vm850_vm0, %v15589_v6  ;;  %v15592_v11 = vld [vmem:[%s20508_s0 + $0x83] sm:$0xff]  ;;  %v15593_v12 = vld [vmem:[%s20508_s0 + $0x8b] sm:$0xff]  ;;  %v15594_v15 = vld [vmem:[%s20508_s0 + $0x93] sm:$0xff]  ;;  %s21938_s1 = scalar_lea.vmem %s24482_s16, %s21917_s30  ;;  %s22117_s26 = scalar_lea.vmem %s24483_s17, %s21917_s30 }
  0x1a   : > { %17830 = vmatmul.mubr.msk.f32.vlgmr.msra.gmra.mrb[0].mxu0 %vm850_vm0, %v15590_v7  ;;  %3624 = vperm.xlu0 %20371, %v3518_v9   ;;  %v15595_v16 = vld [vmem:[%s20508_s0 + $0xa3] sm:$0xff]  ;;  %v15596_v19 = vld [vmem:[%s20508_s0 + $0xab] sm:$0xff]  ;;  %v15597_v20 = vld [vmem:[%s20508_s0 + $0xb3] sm:$0xff] }
  0x1b   : > { %17832 = vmatprep.mubr.msk.f32.mxu0 %vm850_vm0, %v15591_v8  ;;  %3629 = vperm.xlu1 %20372, %v3519_v10   ;;  %v15598_v23 = vld [vmem:[%s20508_s0 + $0xc3] sm:$0xff]  ;;  %v15599_v24 = vld [vmem:[%s20508_s0 + $0xcb] sm:$0xff]  ;;  %v15600_v27 = vld [vmem:[%s20508_s0 + $0xd3] sm:$0xff] }
  0x1c   : > { %v15601_v28 = vld [vmem:[%s20508_s0 + $0xe3] sm:$0xff]  ;;  %v15602_v31 = vld [vmem:[%s20508_s0 + $0xeb] sm:$0xff]  ;;  %v15603_v32 = vld [vmem:[%s20508_s0 + $0xf3] sm:$0xff] }
  0x1d   : > { %v15604_v35 = vld [vmem:[%s20508_s0 + $0x103] sm:$0xff]  ;;  %v15605_v36 = vld [vmem:[%s20508_s0 + $0x10b] sm:$0xff]  ;;  %v15606_v39 = vld [vmem:[%s20508_s0 + $0x113] sm:$0xff] }
  0x1e   : > { %17833 = vmatmul.mubr.msk.f32.gmra.mrb[2].mxu0 %vm850_vm0, %v15592_v11  ;;  %3634 = vperm.xlu0 %20371, %v3520_v13   ;;  %v15607_v40 = vld [vmem:[%s20508_s0 + $0x123] sm:$0xff]  ;;  %v15608_v43 = vld [vmem:[%s20508_s0 + $0x12b] sm:$0xff]  ;;  %v15609_v44 = vld [vmem:[%s20508_s0 + $0x133] sm:$0xff] }
  0x1f   : > { %17835 = vmatprep.mubr.msk.f32.mxu0 %vm850_vm0, %v15593_v12  ;;  %3639 = vperm.xlu1 %20372, %v3521_v14   ;;  %v3537_v46 = vld [vmem:[%s24479_s13 + $0xb8] sm:$0xff]  ;;  %v15610_v47 = vld [vmem:[%s20508_s0 + $0x143] sm:$0xff]  ;;  %v15611_v48 = vld [vmem:[%s20508_s0 + $0x14b] sm:$0xff] }
  0x20   : > { %v3538_v49 = vld [vmem:[%s24479_s13 + $0xc0] sm:$0xff]  ;;  %v3539_v50 = vld [vmem:[%s24479_s13 + $0xc8] sm:$0xff]  ;;  %v15612_v51 = vld [vmem:[%s20508_s0 + $0x153] sm:$0xff] }
  0x21   : > { %v15613_v52 = vld [vmem:[%s20508_s0 + $0x163] sm:$0xff]  ;;  %v3540_v53 = vld [vmem:[%s24479_s13 + $0xd0] sm:$0xff]  ;;  %v3541_v54 = vld [vmem:[%s24479_s13 + $0xd8] sm:$0xff] }
  0x22   : > { %17836 = vmatmul.mubr.msk.f32.gmra.mrb[4].mxu0 %vm850_vm0, %v15594_v15  ;;  %3644 = vperm.xlu0 %20371, %v3522_v17   ;;  %v15614_v55 = vld [vmem:[%s20508_s0 + $0x16b] sm:$0xff]  ;;  %v15615_v56 = vld [vmem:[%s20508_s0 + $0x173] sm:$0xff]  ;;  %v3542_v57 = vld [vmem:[%s24479_s13 + $0xe0] sm:$0xff] }
  0x23   : > { %17838 = vmatprep.mubr.msk.f32.mxu0 %vm850_vm0, %v15595_v16  ;;  %3649 = vperm.xlu1 %20372, %v3523_v18   ;;  %v3543_v58 = vld [vmem:[%s24479_s13 + $0xe8] sm:$0xff]  ;;  %v3544_v61 = vld [vmem:[%s24479_s13 + $0xf0] sm:$0xff]  ;;  %v3545_v62 = vld [vmem:[%s24479_s13 + $0xf8] sm:$0xff] }
  0x24   : > { %v15616_v59 = vld [vmem:[%s20508_s0 + $0x183] sm:$0xff]  ;;  %v15617_v60 = vld [vmem:[%s20508_s0 + $0x18b] sm:$0xff]  ;;  %v15618_v63 = vld [vmem:[%s20508_s0 + $0x193] sm:$0xff] }
  0x25   : > { %v15619_v0 = vld [vmem:[%s20508_s0 + $0x1a3] sm:$0xff]  ;;  %v15620_v3 = vld [vmem:[%s20508_s0 + $0x1ab] sm:$0xff]  ;;  %v15621_v4 = vld [vmem:[%s20508_s0 + $0x1b3] sm:$0xff] }
  0x26   : > { %17839 = vmatmul.mubr.msk.f32.gmra.mrb[6].mxu0 %vm850_vm0, %v15596_v19  ;;  %3654 = vperm.xlu0 %20371, %v3524_v21   ;;  %v3546_v1 = vld [vmem:[%s24479_s13 + $0x100] sm:$0xff]  ;;  %v3547_v2 = vld [vmem:[%s24479_s13 + $0x108] sm:$0xff]  ;;  %v3548_v5 = vld [vmem:[%s24479_s13 + $0x110] sm:$0xff] }
  0x27   : > { %17841 = vmatprep.mubr.msk.f32.mxu0 %vm850_vm0, %v15597_v20  ;;  %3659 = vperm.xlu1 %20372, %v3525_v22   ;;  %v3549_v6 = vld [vmem:[%s24479_s13 + $0x118] sm:$0xff]  ;;  %v15622_v7 = vld [vmem:[%s20508_s0 + $0x1c3] sm:$0xff]  ;;  %v15623_v8 = vld [vmem:[%s20508_s0 + $0x1cb] sm:$0xff] }
  0x28   : > { %v3550_v9 = vld [vmem:[%s24479_s13 + $0x120] sm:$0xff]  ;;  %v3551_v10 = vld [vmem:[%s24479_s13 + $0x128] sm:$0xff]  ;;  %v15624_v11 = vld [vmem:[%s20508_s0 + $0x1d3] sm:$0xff] }
  0x29   : > { %v15625_v12 = vld [vmem:[%s20508_s0 + $0x1e3] sm:$0xff]  ;;  %v3552_v13 = vld [vmem:[%s24479_s13 + $0x130] sm:$0xff]  ;;  %v3553_v14 = vld [vmem:[%s24479_s13 + $0x138] sm:$0xff] }
  0x2a   : > { %17842 = vmatmul.mubr.msk.f32.gmra.mrb[8].mxu0 %vm850_vm0, %v15598_v23  ;;  %3664 = vperm.xlu0 %20371, %v3526_v25   ;;  %v15626_v15 = vld [vmem:[%s20508_s0 + $0x1eb] sm:$0xff]  ;;  %v15627_v16 = vld [vmem:[%s20508_s0 + $0x1f3] sm:$0xff]  ;;  %v3554_v17 = vld [vmem:[%s24479_s13 + $0x140] sm:$0xff] }
  0x2b   : > { %17844 = vmatprep.mubr.msk.f32.mxu0 %vm850_vm0, %v15599_v24  ;;  %3669 = vperm.xlu1 %20372, %v3527_v26   ;;  %v3555_v18 = vld [vmem:[%s24479_s13 + $0x148] sm:$0xff]  ;;  %v3556_v21 = vld [vmem:[%s24479_s13 + $0x150] sm:$0xff]  ;;  %v3557_v22 = vld [vmem:[%s24479_s13 + $0x158] sm:$0xff] }
  0x2c   : > { %v15628_v19 = vld [vmem:[%s20508_s0 + $0x203] sm:$0xff]  ;;  %v15629_v20 = vld [vmem:[%s20508_s0 + $0x20b] sm:$0xff]  ;;  %v15630_v23 = vld [vmem:[%s20508_s0 + $0x213] sm:$0xff] }
  0x2d   : > { %v15631_v24 = vld [vmem:[%s20508_s0 + $0x223] sm:$0xff]  ;;  %v15632_v25 = vld [vmem:[%s20508_s0 + $0x22b] sm:$0xff]  ;;  %v15633_v26 = vld [vmem:[%s20508_s0 + $0x233] sm:$0xff] }
  0x2e   : > { %17845 = vmatmul.mubr.msk.f32.gmra.mrb[10].mxu0 %vm850_vm0, %v15600_v27  ;;  %3674 = vperm.xlu0 %20371, %v3528_v29   ;;  %v15634_v27 = vld [vmem:[%s20508_s0 + $0x243] sm:$0xff] }
  0x2f   : > { %17847 = vmatprep.mubr.msk.f32.mxu0 %vm850_vm0, %v15601_v28  ;;  %3679 = vperm.xlu1 %20372, %v3529_v30   ;;  %v3558_v28 = vld [vmem:[%s24479_s13 + $0x160] sm:$0xff]  ;;  %v3559_v29 = vld [vmem:[%s24479_s13 + $0x168] sm:$0xff]  ;;  %v3560_v30 = vld [vmem:[%s24479_s13 + $0x170] sm:$0xff] }
  0x32   : > { %17848 = vmatmul.mubr.msk.f32.gmra.mrb[12].mxu0 %vm850_vm0, %v15602_v31  ;;  %3684 = vperm.xlu0 %20371, %v3530_v33   ;;  %v3561_v31 = vld [vmem:[%s24479_s13 + $0x178] sm:$0xff]  ;;  %v3562_v33 = vld [vmem:[%s24479_s13 + $0x180] sm:$0xff] }
  0x33   : > { %17850 = vmatprep.mubr.msk.f32.mxu0 %vm850_vm0, %v15603_v32  ;;  %3689 = vperm.xlu1 %20372, %v3531_v34   ;;  %v24485_v32 = vmov 0.0   ;;  %v15686_v34 = vld [vmem:[%s24469_s3 + $0x8] sm:$0xff] }
  0x34   : > { %17901 = vmatprep.subr.mxu1 %v24485_v32  ;;  %17993 = vmatprep.subr.mxu0 %v24485_v32 }
  0x35   : > { %17902 = vmatpush3.msra.mxu1 %v15686_v34  ;;  %17903 = vmatprep.mubr.msk.f32.mxu1 %vm20383_vm1, %v24485_v32  ;;  %v3600_v34 = vld [vmem:[%s24479_s13 + $0x2b0] sm:$0xff] }
  0x36   : > { %17851 = vmatmul.mubr.msk.f32.gmra.mrb[14].mxu0 %vm850_vm0, %v15604_v35  ;;  %3694 = vperm.xlu0 %20371, %v3532_v37   ;;  %v3563_v35 = vld [vmem:[%s24479_s13 + $0x188] sm:$0xff] }
  0x37   : > { %17853 = vmatprep.mubr.msk.f32.mxu0 %vm850_vm0, %v15605_v36  ;;  %3699 = vperm.xlu1 %20372, %v3533_v38   ;;  %v3564_v36 = vld [vmem:[%s24479_s13 + $0x190] sm:$0xff]  ;;  %v3565_v38 = vld [vmem:[%s24479_s13 + $0x198] sm:$0xff] }
  0x38   : > { %17924 = vmatprep.subr.mxu1 %v24485_v32  ;;  %v15635_v37 = vld [vmem:[%s20508_s0 + $0x24b] sm:$0xff] }
  0x3a   : > { %17854 = vmatmul.mubr.msk.f32.gmra.mrb[16].mxu0 %vm850_vm0, %v15606_v39  ;;  %3704 = vperm.xlu0 %20371, %v3534_v41   ;;  %v15636_v39 = vld [vmem:[%s20508_s0 + $0x253] sm:$0xff]  ;;  %v15717_v41 = vld [vmem:[%s24469_s3 + $0x20] sm:$0xff] }
  0x3b   : > { %17856 = vmatprep.mubr.msk.f32.mxu0 %vm850_vm0, %v15607_v40  ;;  %3709 = vperm.xlu1 %20372, %v3535_v42   ;;  %v3566_v40 = vld [vmem:[%s24479_s13 + $0x1a0] sm:$0xff]  ;;  %v3567_v42 = vld [vmem:[%s24479_s13 + $0x1a8] sm:$0xff] }
  0x3c   : > { %17994 = vmatpush3.msra.mxu0 %v15717_v41 }
  0x3d   : > { %18039 = vmatprep.subr.mxu0 %v24485_v32 }
  0x3e   : > { %17857 = vmatmul.mubr.msk.f32.gmra.mrb[18].mxu0 %vm850_vm0, %v15608_v43  ;;  %3714 = vperm.xlu0 %20371, %v3536_v45   ;;  %v3568_v43 = vld [vmem:[%s24479_s13 + $0x1b0] sm:$0xff]  ;;  %v3570_v45 = vld [vmem:[%s24479_s13 + $0x1c0] sm:$0xff] }
  0x3f   : > { %17859 = vmatprep.mubr.msk.f32.mxu0 %vm850_vm0, %v15609_v44  ;;  %3719 = vperm.xlu1 %20372, %v3537_v46   ;;  %v3569_v44 = vld [vmem:[%s24479_s13 + $0x1b8] sm:$0xff]  ;;  %v3571_v46 = vld [vmem:[%s24479_s13 + $0x1c8] sm:$0xff] }
  0x42   : > { %17860 = vmatmul.mubr.msk.f32.gmra.mrb[20].mxu0 %vm850_vm0, %v15610_v47  ;;  %3724 = vperm.xlu0 %20371, %v3538_v49   ;;  %v3572_v47 = vld [vmem:[%s24479_s13 + $0x1d0] sm:$0xff]  ;;  %v3574_v49 = vld [vmem:[%s24479_s13 + $0x1e0] sm:$0xff] }
  0x43   : > { %17862 = vmatprep.mubr.msk.f32.mxu0 %vm850_vm0, %v15611_v48  ;;  %3729 = vperm.xlu1 %20372, %v3539_v50   ;;  %v3573_v48 = vld [vmem:[%s24479_s13 + $0x1d8] sm:$0xff]  ;;  %v3575_v50 = vld [vmem:[%s24479_s13 + $0x1e8] sm:$0xff] }
  0x46   : > { %17863 = vmatmul.mubr.msk.f32.gmra.mrb[22].mxu0 %vm850_vm0, %v15612_v51  ;;  %3734 = vperm.xlu0 %20371, %v3540_v53   ;;  %v3576_v51 = vld [vmem:[%s24479_s13 + $0x1f0] sm:$0xff] }
  0x47   : > { %17865 = vmatprep.mubr.msk.f32.mxu0 %vm850_vm0, %v15613_v52  ;;  %3739 = vperm.xlu1 %20372, %v3541_v54   ;;  %v3577_v52 = vld [vmem:[%s24479_s13 + $0x1f8] sm:$0xff]  ;;  %v3578_v54 = vld [vmem:[%s24479_s13 + $0x200] sm:$0xff] }
  0x4a   : > { %17866 = vmatmul.mubr.msk.f32.gmra.mrb[24].mxu0 %vm850_vm0, %v15614_v55  ;;  %3744 = vperm.xlu0 %20371, %v3542_v57  }
  0x4b   : > { %17868 = vmatprep.mubr.msk.f32.mxu0 %vm850_vm0, %v15615_v56  ;;  %3749 = vperm.xlu1 %20372, %v3543_v58   ;;  %v3579_v56 = vld [vmem:[%s24479_s13 + $0x208] sm:$0xff]  ;;  %v3580_v58 = vld [vmem:[%s24479_s13 + $0x210] sm:$0xff] }
  0x4e   : > { %17869 = vmatmul.mubr.msk.f32.gmra.mrb[26].mxu0 %vm850_vm0, %v15616_v59  ;;  %3754 = vperm.xlu0 %20371, %v3544_v61  }
  0x4f   : > { %17871 = vmatprep.mubr.msk.f32.mxu0 %vm850_vm0, %v15617_v60  ;;  %3759 = vperm.xlu1 %20372, %v3545_v62   ;;  %v3581_v60 = vld [vmem:[%s24479_s13 + $0x218] sm:$0xff]  ;;  %v3582_v62 = vld [vmem:[%s24479_s13 + $0x220] sm:$0xff] }
  0x52   : > { %17872 = vmatmul.mubr.msk.f32.gmra.mrb[28].mxu0 %vm850_vm0, %v15618_v63  ;;  %3764 = vperm.xlu0 %20371, %v3546_v1  }
  0x53   : > { %17874 = vmatprep.mubr.msk.f32.mxu0 %vm850_vm0, %v15619_v0  ;;  %3769 = vperm.xlu1 %20372, %v3547_v2   ;;  %v3583_v0 = vld [vmem:[%s24479_s13 + $0x228] sm:$0xff]  ;;  %v3584_v2 = vld [vmem:[%s24479_s13 + $0x230] sm:$0xff] }
  0x56   : > { %17875 = vmatmul.mubr.msk.f32.gmra.mrb[30].mxu0 %vm850_vm0, %v15620_v3  ;;  %3774 = vperm.xlu0 %20371, %v3548_v5  }
  0x57   : > { %17877 = vmatprep.mubr.msk.f32.mxu0 %vm850_vm0, %v15621_v4  ;;  %3779 = vperm.xlu1 %20372, %v3549_v6   ;;  %v3585_v4 = vld [vmem:[%s24479_s13 + $0x238] sm:$0xff]  ;;  %v3586_v6 = vld [vmem:[%s24479_s13 + $0x240] sm:$0xff] }
  0x5a   : > { %17878 = vmatmul.mubr.msk.f32.gmra.mrb[32].mxu0 %vm850_vm0, %v15622_v7  ;;  %3784 = vperm.xlu0 %20371, %v3550_v9  }
  0x5b   : > { %17880 = vmatprep.mubr.msk.f32.mxu0 %vm850_vm0, %v15623_v8  ;;  %3789 = vperm.xlu1 %20372, %v3551_v10   ;;  %v3587_v8 = vld [vmem:[%s24479_s13 + $0x248] sm:$0xff]  ;;  %v3588_v10 = vld [vmem:[%s24479_s13 + $0x250] sm:$0xff] }
  0x5e   : > { %17881 = vmatmul.mubr.msk.f32.gmra.mrb[34].mxu0 %vm850_vm0, %v15624_v11  ;;  %3794 = vperm.xlu0 %20371, %v3552_v13  }
  0x5f   : > { %17883 = vmatprep.mubr.msk.f32.mxu0 %vm850_vm0, %v15625_v12  ;;  %3799 = vperm.xlu1 %20372, %v3553_v14   ;;  %v3589_v12 = vld [vmem:[%s24479_s13 + $0x258] sm:$0xff]  ;;  %v3590_v14 = vld [vmem:[%s24479_s13 + $0x260] sm:$0xff] }
  0x62   : > { %17884 = vmatmul.mubr.msk.f32.gmra.mrb[36].mxu0 %vm850_vm0, %v15626_v15  ;;  %3804 = vperm.xlu0 %20371, %v3554_v17  }
  0x63   : > { %17886 = vmatprep.mubr.msk.f32.mxu0 %vm850_vm0, %v15627_v16  ;;  %3809 = vperm.xlu1 %20372, %v3555_v18   ;;  %v3591_v16 = vld [vmem:[%s24479_s13 + $0x268] sm:$0xff]  ;;  %v3592_v18 = vld [vmem:[%s24479_s13 + $0x270] sm:$0xff] }
  0x66   : > { %17887 = vmatmul.mubr.msk.f32.gmra.mrb[38].mxu0 %vm850_vm0, %v15628_v19  ;;  %3814 = vperm.xlu0 %20371, %v3556_v21  }
  0x67   : > { %17889 = vmatprep.mubr.msk.f32.mxu0 %vm850_vm0, %v15629_v20  ;;  %3819 = vperm.xlu1 %20372, %v3557_v22   ;;  %v3593_v20 = vld [vmem:[%s24479_s13 + $0x278] sm:$0xff]  ;;  %v3594_v22 = vld [vmem:[%s24479_s13 + $0x280] sm:$0xff] }
  0x6a   : > { %17890 = vmatmul.mubr.msk.f32.gmra.mrb[40].mxu0 %vm850_vm0, %v15630_v23  ;;  %3824 = vperm.xlu0 %20371, %v3558_v28   ;;  %v3597_v28 = vld [vmem:[%s24479_s13 + $0x298] sm:$0xff] }
  0x6b   : > { %17892 = vmatprep.mubr.msk.f32.mxu0 %vm850_vm0, %v15631_v24  ;;  %3829 = vperm.xlu1 %20372, %v3559_v29   ;;  %v3595_v24 = vld [vmem:[%s24479_s13 + $0x288] sm:$0xff] }
  0x6e   : > { %17893 = vmatmul.mubr.msk.f32.gmra.mrb[42].mxu0 %vm850_vm0, %v15632_v25  ;;  %3834 = vperm.xlu0 %20371, %v3560_v30   ;;  %v3598_v30 = vld [vmem:[%s24479_s13 + $0x2a0] sm:$0xff] }
  0x6f   : > { %17895 = vmatprep.mubr.msk.f32.mxu0 %vm850_vm0, %v15633_v26  ;;  %3839 = vperm.xlu1 %20372, %v3561_v31   ;;  %v3596_v26 = vld [vmem:[%s24479_s13 + $0x290] sm:$0xff] }
  0x72   : > { %17896 = vmatmul.mubr.msk.f32.gmra.mrb[44].mxu0 %vm850_vm0, %v15634_v27  ;;  %3844 = vperm.xlu0 %20371, %v3562_v33   ;;  %v3599_v33 = vld [vmem:[%s24479_s13 + $0x2a8] sm:$0xff] }
  0x73   : > { %3849 = vperm.xlu1 %20372, %v3563_v35   ;;  %17898 = vmatprep.mubr.msk.f32.mxu0 %vm850_vm0, %v15635_v37  ;;  %v3601_v35 = vld [vmem:[%s24479_s13 + $0x2b8] sm:$0xff] }
  0x76   : > { %3854 = vperm.xlu0 %20371, %v3564_v36   ;;  %17899 = vmatmul.mubr.msk.f32.gmra.mrb[46].mxu0 %vm850_vm0, %v15636_v39  ;;  %v9251_v39 = vld [vmem:[%s24480_s14 + $0x20] sm:$0xff] }
  0x77   : > { %3859 = vperm.xlu1 %20372, %v3565_v38   ;;  %17995 = vmatprep.mubr.msk.f32.mxu0 %vm20383_vm1, %v24485_v32  ;;  %v9250_v38 = vld [vmem:[%s24480_s14 + $0x18] sm:$0xff] }
  0x7a   : > { %3864 = vperm.xlu0 %20371, %v3566_v40  }
  0x7b   : > { %3869 = vperm.xlu1 %20372, %v3567_v42   ;;  %v9252_v42 = vld [vmem:[%s24480_s14 + $0x28] sm:$0xff] }
  0x7e   : > { %3874 = vperm.xlu0 %20371, %v3568_v43   ;;  %v9253_v43 = vld [vmem:[%s24480_s14 + $0x30] sm:$0xff] }
  0x7f   : > { %3879 = vperm.xlu1 %20372, %v3569_v44  }
  0x82   : > { %3884 = vperm.xlu0 %20371, %v3570_v45  }
  0x83   : > { %3889 = vperm.xlu1 %20372, %v3571_v46   ;;  %v9254_v46 = vld [vmem:[%s24480_s14 + $0x38] sm:$0xff] }
  0x86   : > { %3894 = vperm.xlu0 %20371, %v3572_v47   ;;  %v9255_v47 = vld [vmem:[%s24480_s14 + $0x40] sm:$0xff] }
  0x87   : > { %3899 = vperm.xlu1 %20372, %v3573_v48  }
  0x8a   : > { %3904 = vperm.xlu0 %20371, %v3574_v49  }
  0x8b   : > { %3909 = vperm.xlu1 %20372, %v3575_v50   ;;  %v9256_v50 = vld [vmem:[%s24480_s14 + $0x48] sm:$0xff] }
  0x8e   : > { %3914 = vperm.xlu0 %20371, %v3576_v51   ;;  %v9257_v51 = vld [vmem:[%s24480_s14 + $0x50] sm:$0xff] }
  0x8f   : > { %3919 = vperm.xlu1 %20372, %v3577_v52  }
  0x91   : > { %v20800_v53 = vpop.permute.xlu0 %3604  ;;  %v20805_v55 = vpop.permute.xlu1 %3614 }
  0x92   : > { %3924 = vperm.xlu0 %20371, %v3578_v54  }
  0x93   : > { %3929 = vperm.xlu1 %20372, %v3579_v56   ;;  %v9258_v56 = vld [vmem:[%s24480_s14 + $0x58] sm:$0xff] }
  0x95   : > { %v20810_v57 = vpop.permute.xlu0 %3609  ;;  %v20815_v59 = vpop.permute.xlu1 %3619 }
  0x96   : > { %3934 = vperm.xlu0 %20371, %v3580_v58   ;;  %v9259_v58 = vld [vmem:[%s24480_s14 + $0x60] sm:$0xff] }
  0x97   : > { %3939 = vperm.xlu1 %20372, %v3581_v60  }
  0x99   : > { %v20820_v61 = vpop.permute.xlu0 %3624 }
  0x9a   : > { %v20825_v63 = vpop.permute.xlu1 %3629  ;;  %3944 = vperm.xlu0 %20371, %v3582_v62   ;;  %v9260_v62 = vld [vmem:[%s24480_s14 + $0x68] sm:$0xff] }
  0x9b   : > { %3949 = vperm.xlu1 %20372, %v3583_v0  }
  0x9d   : > { %v20830_v1 = vpop.permute.xlu0 %3634 }
  0x9e   : > { %v20835_v3 = vpop.permute.xlu1 %3639  ;;  %3954 = vperm.xlu0 %20371, %v3584_v2   ;;  %v9261_v2 = vld [vmem:[%s24480_s14 + $0x70] sm:$0xff] }
  0x9f   : > { %3959 = vperm.xlu1 %20372, %v3585_v4  }
  0xa1   : > { %v20840_v5 = vpop.permute.xlu0 %3644 }
  0xa2   : > { %v20845_v7 = vpop.permute.xlu1 %3649  ;;  %3964 = vperm.xlu0 %20371, %v3586_v6   ;;  %v9262_v6 = vld [vmem:[%s24480_s14 + $0x78] sm:$0xff] }
  0xa3   : > { %3969 = vperm.xlu1 %20372, %v3587_v8   ;;  %v9263_v8 = vld [vmem:[%s24480_s14 + $0x80] sm:$0xff] }
  0xa5   : > { %v20850_v9 = vpop.permute.xlu0 %3654 }
  0xa6   : > { %v20855_v11 = vpop.permute.xlu1 %3659  ;;  %3974 = vperm.xlu0 %20371, %v3588_v10  }
  0xa7   : > { %3979 = vperm.xlu1 %20372, %v3589_v12  }
  0xa9   : > { %v20860_v13 = vpop.permute.xlu0 %3664 }
  0xaa   : > { %v20865_v15 = vpop.permute.xlu1 %3669  ;;  %3984 = vperm.xlu0 %20371, %v3590_v14   ;;  %v9264_v14 = vld [vmem:[%s24480_s14 + $0x88] sm:$0xff] }
  0xab   : > { %3989 = vperm.xlu1 %20372, %v3591_v16   ;;  %v9265_v16 = vld [vmem:[%s24480_s14 + $0x90] sm:$0xff] }
  0xad   : > { %v20870_v17 = vpop.permute.xlu0 %3674 }
  0xae   : > { %v20875_v19 = vpop.permute.xlu1 %3679  ;;  %3994 = vperm.xlu0 %20371, %v3592_v18   ;;  %v9266_v18 = vld [vmem:[%s24480_s14 + $0x98] sm:$0xff] }
  0xaf   : > { %3999 = vperm.xlu1 %20372, %v3593_v20  }
  0xb1   : > { %v20880_v21 = vpop.permute.xlu0 %3684 }
  0xb2   : > { %v20885_v23 = vpop.permute.xlu1 %3689  ;;  %4004 = vperm.xlu0 %20371, %v3594_v22   ;;  %v9267_v22 = vld [vmem:[%s24480_s14 + $0xa0] sm:$0xff] }
  0xb3   : > { %4009 = vperm.xlu1 %20372, %v3595_v24  }
  0xb5   : > { %v20890_v25 = vpop.permute.xlu0 %3694 }
  0xb6   : > { %v20895_v27 = vpop.permute.xlu1 %3699  ;;  %4014 = vperm.xlu0 %20371, %v3596_v26   ;;  %v9268_v26 = vld [vmem:[%s24480_s14 + $0xa8] sm:$0xff] }
  0xb7   : > { %4019 = vperm.xlu1 %20372, %v3597_v28   ;;  %v9269_v28 = vld [vmem:[%s24480_s14 + $0xb0] sm:$0xff] }
  0xb9   : > { %v20900_v29 = vpop.permute.xlu0 %3704 }
  0xba   : > { %24496 = vst [vmem:[#allocation6_spill] sm:$0xff] %v20900_v29  ;;  %v20905_v31 = vpop.permute.xlu1 %3709  ;;  %4024 = vperm.xlu0 %20371, %v3598_v30   ;;  %v21013_v30 = vld [vmem:[%s24514_s29] ss:$0 sm:$0xff]  ;;  %s24441_s29 = scalar_lea.vmem %s24484_s18, %s21917_s30 }
  0xbb   : > { %4029 = vperm.xlu1 %20372, %v3599_v33  }
  0xbd   : > { %v20916_v36 = vpop.permute.xlu0 %3714 }
  0xbe   : > { %24497 = vst [vmem:[#allocation7_spill] sm:$0xff] %v20916_v36  ;;  %v20918_v37 = vpop.permute.xlu1 %3719  ;;  %4034 = vperm.xlu0 %20371, %v3600_v34  }
  0xbf   : > { %24498 = vst [vmem:[#allocation8_spill] sm:$0xff] %v20918_v37  ;;  %4039 = vperm.xlu1 %20372, %v3601_v35   ;;  %v9270_v35 = vld [vmem:[%s24480_s14 + $0xb8] sm:$0xff] }
  0xc1   : > { %v20926_v40 = vpop.permute.xlu0 %3724 }
  0xc2   : > { %24499 = vst [vmem:[#allocation9_spill] sm:$0xff] %v20926_v40  ;;  %v20928_v41 = vpop.permute.xlu1 %3729  ;;  %9330 = vperm.xlu0 %20371, %v9250_v38  }
  0xc3   : > { %24500 = vst [vmem:[#allocation10_spill] sm:$0xff] %v20928_v41  ;;  %9335 = vperm.xlu1 %20372, %v9251_v39   ;;  %v15545_v41 = vld [vmem:[%s20508_s0 + $0x1a5] ss:$2 sm:$0x7f] }
  0xc5   : > { %v20936_v44 = vpop.permute.xlu0 %3734 }
  0xc6   : > { %24501 = vst [vmem:[#allocation11_spill] sm:$0xff] %v20936_v44  ;;  %v20938_v45 = vpop.permute.xlu1 %3739  ;;  %9340 = vperm.xlu0 %20371, %v9252_v42   ;;  %v15544_v44 = vld [vmem:[%s20508_s0 + $0x165] ss:$2 sm:$0x7f] }
  0xc7   : > { %24502 = vst [vmem:[#allocation12_spill] sm:$0xff] %v20938_v45  ;;  %9345 = vperm.xlu1 %20372, %v9253_v43   ;;  %v9271_v43 = vld [vmem:[%s24480_s14 + $0xc0] sm:$0xff] }
  0xc9   : > { %v20946_v48 = vpop.permute.xlu0 %3744 }
  0xca   : > { %24503 = vst [vmem:[#allocation13_spill] sm:$0xff] %v20946_v48  ;;  %v20948_v49 = vpop.permute.xlu1 %3749  ;;  %9350 = vperm.xlu0 %20371, %v9254_v46  }
  0xcb   : > { %24504 = vst [vmem:[#allocation14_spill] sm:$0xff] %v20948_v49  ;;  %9355 = vperm.xlu1 %20372, %v9255_v47   ;;  %v15543_v49 = vld [vmem:[%s20508_s0 + $0x125] ss:$2 sm:$0x7f] }
  0xcd   : > { %v20956_v52 = vpop.permute.xlu0 %3754 }
  0xce   : > { %24505 = vst [vmem:[#allocation15_spill] sm:$0xff] %v20956_v52  ;;  %v20958_v54 = vpop.permute.xlu1 %3759  ;;  %9360 = vperm.xlu0 %20371, %v9256_v50   ;;  %v9272_v50 = vld [vmem:[%s24480_s14 + $0xc8] sm:$0xff] }
  0xcf   : > { %24506 = vst [vmem:[#allocation16_spill] sm:$0xff] %v20958_v54  ;;  %9365 = vperm.xlu1 %20372, %v9257_v51   ;;  %v15542_v52 = vld [vmem:[%s20508_s0 + $0xe5] ss:$2 sm:$0x7f] }
  0xd1   : > { %v20966_v60 = vpop.permute.xlu0 %3764 }
  0xd2   : > { %24507 = vst [vmem:[#allocation17_spill] sm:$0xff] %v20966_v60  ;;  %9370 = vperm.xlu0 %20371, %v9258_v56   ;;  %v20971_v0 = vpop.permute.xlu1 %3769 }
  0xd3   : > { %9375 = vperm.xlu1 %20372, %v9259_v58   ;;  %24508 = vst [vmem:[#allocation18_spill] sm:$0xff] %v20971_v0  ;;  %v15541_v0 = vld [vmem:[%s20508_s0 + $0xa5] ss:$2 sm:$0x7f] }
  0xd5   : > { %v20976_v4 = vpop.permute.xlu0 %3774 }
  0xd6   : > { %24509 = vst [vmem:[#allocation19_spill] sm:$0xff] %v20976_v4  ;;  %9380 = vperm.xlu0 %20371, %v9260_v62   ;;  %v20984_v10 = vpop.permute.xlu1 %3779  ;;  %v9273_v62 = vld [vmem:[%s24480_s14 + $0xd0] sm:$0xff] }
  0xd7   : > { %9385 = vperm.xlu1 %20372, %v9261_v2   ;;  %24510 = vst [vmem:[#allocation20_spill] sm:$0xff] %v20984_v10  ;;  %v15539_v4 = vld [vmem:[%s20508_s0 + $0x1e4] ss:$2 sm:$0x7f] }
  0xd8   : > { %v15540_v10 = vld [vmem:[%s20508_s0 + $0x65] ss:$2 sm:$0x7f] }
  0xd9   : > { %v20986_v12 = vpop.permute.xlu0 %3784 }
  0xda   : > { %9390 = vperm.xlu0 %20371, %v9262_v6   ;;  %24511 = vst [vmem:[#allocation21_spill] sm:$0xff] %v20986_v12  ;;  %v20997_v20 = vpop.permute.xlu1 %3789  ;;  %v15538_v12 = vld [vmem:[%s20508_s0 + $0x1a4] ss:$2 sm:$0x7f] }
  0xdb   : > { %9395 = vperm.xlu1 %20372, %v9263_v8   ;;  %24512 = vst [vmem:[#allocation22_spill] sm:$0xff] %v20997_v20  ;;  %v15532_v20 = vld [vmem:[%s20508_s0 + $0x1e3] ss:$2 sm:$0x7f] }
  0xdd   : > { %v21002_v24 = vpop.permute.xlu0 %3794 }
  0xde   : > { %9400 = vperm.xlu0 %20371, %v9264_v14   ;;  %24513 = vst [vmem:[#allocation23_spill] sm:$0xff] %v21002_v24  ;;  %v21015_v33 = vpop.permute.xlu1 %3799  ;;  %v9274_v14 = vld [vmem:[%s24480_s14 + $0xd8] sm:$0xff]  ;;  %v15531_v24 = vld [vmem:[%s20508_s0 + $0x1a3] ss:$2 sm:$0x7f] }
  0xdf   : > { %9405 = vperm.xlu1 %20372, %v9265_v16   ;;  %24515 = vst [vmem:[#allocation24_spill] sm:$0xff] %v21015_v33  ;;  %v15537_v33 = vld [vmem:[%s20508_s0 + $0x164] ss:$2 sm:$0x7f] }
  0xe1   : > { %v21021_v42 = vpop.permute.xlu0 %3804 }
  0xe2   : > { %9410 = vperm.xlu0 %20371, %v9266_v18   ;;  %24516 = vst [vmem:[#allocation25_spill] sm:$0xff] %v21021_v42  ;;  %v21033_v58 = vpop.permute.xlu1 %3809  ;;  %v15535_v42 = vld [vmem:[%s20508_s0 + $0xe4] ss:$2 sm:$0x7f] }
  0xe3   : > { %9415 = vperm.xlu1 %20372, %v9267_v22   ;;  %24517 = vst [vmem:[#allocation26_spill] sm:$0xff] %v21033_v58  ;;  %v9275_v22 = vld [vmem:[%s24480_s14 + $0xe0] sm:$0xff]  ;;  %v2682_v58 = vld [vmem:[%s20508_s0 + $0x108] sm:$0xff] }
  0xe5   : > { %v21040_v6 = vpop.permute.xlu0 %3814 }
  0xe6   : > { %9420 = vperm.xlu0 %20371, %v9268_v26   ;;  %24518 = vst [vmem:[#allocation27_spill] sm:$0xff] %v21040_v6  ;;  %v15534_v6 = vld [vmem:[%s20508_s0 + $0xa4] ss:$2 sm:$0x7f] }
  0xe7   : > { %9425 = vperm.xlu1 %20372, %v9269_v28   ;;  %v1361_v28 = vld [vmem:[%s24469_s3] sm:$0xff] }
  0xea   : > { %9430 = vperm.xlu0 %20371, %v9270_v35   ;;  %v21055_v35 = vpop.permute.xlu1 %3819 }
  0xeb   : > { %9435 = vperm.xlu1 %20372, %v9271_v43   ;;  %24519 = vst [vmem:[#allocation28_spill] sm:$0xff] %v21055_v35  ;;  %v15529_v35 = vld [vmem:[%s20508_s0 + $0x123] ss:$2 sm:$0x7f] }
  0xed   : > { %v17831_v34 = vpop.f32.mrb[0].mxu0 }
  0xee   : > { %v1067_v38 = vadd.f32 %v17831_v34, %v21013_v30  ;;  %v1061_v39 = vpop.f32.mrb[1].mxu0  ;;  %9440 = vperm.xlu0 %20371, %v9272_v50   ;;  %v9277_v50 = vld [vmem:[%s24480_s14 + $0xf0] sm:$0xff] }
  0xef   : > { %v1062_v46 = vadd.f32 %v21013_v30, %v1061_v39  ;;  %9445 = vperm.xlu1 %20372, %v9273_v62   ;;  %v9276_v39 = vld [vmem:[%s24480_s14 + $0xe8] sm:$0xff] }
  0xf0   : > { %1301 = vst.msk [vmem:[#allocation2 + $0x8] sm:$0xff] %vm850_vm0, %v1067_v38 }
  0xf1   : > { %1300 = vst.msk [vmem:[#allocation2] sm:$0xff] %vm850_vm0, %v1062_v46  ;;  %v17834_v47 = vpop.f32.mrb[2].mxu0 }
  0xf2   : > { %v1077_v51 = vadd.f32 %v17834_v47, %v21013_v30  ;;  %v1071_v56 = vpop.f32.mrb[3].mxu0  ;;  %9450 = vperm.xlu0 %20371, %v9274_v14   ;;  %v21065_v47 = vpop.permute.xlu0 %3824  ;;  %v9278_v14 = vld [vmem:[%s24480_s14 + $0xf8] sm:$0xff] }
  0xf3   : > { %v1072_v2 = vadd.f32 %v21013_v30, %v1071_v56  ;;  %9455 = vperm.xlu1 %20372, %v9275_v22   ;;  %24520 = vst [vmem:[#allocation29_spill] sm:$0xff] %v21065_v47  ;;  %v15733_v22 = vld [vmem:[%s24469_s3 + $0x30] sm:$0xff]  ;;  %v15528_v47 = vld [vmem:[%s20508_s0 + $0xe3] ss:$2 sm:$0x7f] }
  0xf4   : > { %1303 = vst.msk [vmem:[#allocation2 + $0x18] sm:$0xff] %vm850_vm0, %v1077_v51  ;;  %v632_v48 = vmax.f32 %v15528_v47, %v15535_v42  ;;  %v636_v42 = vmax.f32 %v15532_v20, %v15539_v4  ;;  %v2687_v4 = vld [vmem:[%s20508_s0 + $0x130] sm:$0xff] }
  0xf5   : > { %1302 = vst.msk [vmem:[#allocation2 + $0x10] sm:$0xff] %vm850_vm0, %v1072_v2  ;;  %v17837_v8 = vpop.f32.mrb[4].mxu0  ;;  %v15556_v20 = vld [vmem:[%s20508_s0 + $0x104] ss:$2 sm:$0x7f] }
  0xf6   : > { %v1087_v16 = vadd.f32 %v17837_v8, %v21013_v30  ;;  %v1081_v18 = vpop.f32.mrb[5].mxu0  ;;  %9460 = vperm.xlu0 %20371, %v9276_v39   ;;  %v21075_v8 = vpop.permute.xlu1 %3829 }
  0xf7   : > { %v1082_v26 = vadd.f32 %v21013_v30, %v1081_v18  ;;  %9465 = vperm.xlu1 %20372, %v9277_v50   ;;  %24521 = vst [vmem:[#allocation30_spill] sm:$0xff] %v21075_v8  ;;  %v15533_v8 = vld [vmem:[%s20508_s0 + $0x64] ss:$2 sm:$0x7f] }
  0xf8   : > { %1305 = vst.msk [vmem:[#allocation2 + $0x28] sm:$0xff] %vm850_vm0, %v1087_v16  ;;  %v1363_v34 = vld [vmem:[#allocation2 + $0x1] ss:$2 sm:$0xff] }
  0xf9   : > { %1304 = vst.msk [vmem:[#allocation2 + $0x20] sm:$0xff] %vm850_vm0, %v1082_v26  ;;  %v17840_v38 = vpop.f32.mrb[6].mxu0  ;;  %17904 = vmatmul.mubr.msk.f32.vlgmr.msra.gmra.mrb[0].mxu1 %vm850_vm0, %v1363_v34  ;;  %v9279_v16 = vld [vmem:[%s24480_s14 + $0x100] sm:$0xff] }
  0xfa   : > { %v1097_v43 = vadd.f32 %v17840_v38, %v21013_v30  ;;  %v1091_v46 = vpop.f32.mrb[7].mxu0  ;;  %17906 = vmatprep.mubr.msk.f32.mxu1 %vm20383_vm1, %v24485_v32  ;;  %17925 = vmatpush3.msra.mxu1 %v1361_v28  ;;  %v21088_v28 = vpop.permute.xlu0 %3834  ;;  %v9280_v38 = vld [vmem:[%s24480_s14 + $0x108] sm:$0xff] }
  0xfb   : > { %v1092_v51 = vadd.f32 %v21013_v30, %v1091_v46  ;;  %17947 = vmatprep.subr.mxu1 %v24485_v32  ;;  %24522 = vst [vmem:[#allocation31_spill] sm:$0xff] %v21088_v28  ;;  %9470 = vperm.xlu0 %20371, %v9278_v14   ;;  %v9281_v46 = vld [vmem:[%s24480_s14 + $0x110] sm:$0xff] }
  0xfc   : > { %1307 = vst.msk [vmem:[#allocation2 + $0x38] sm:$0xff] %vm850_vm0, %v1097_v43  ;;  %9475 = vperm.xlu1 %20372, %v9279_v16   ;;  %v2675_v28 = vld [vmem:[%s20508_s0 + $0xd0] sm:$0xff] }
  0xfd   : > { %1306 = vst.msk [vmem:[#allocation2 + $0x30] sm:$0xff] %vm850_vm0, %v1092_v51  ;;  %v17843_v56 = vpop.f32.mrb[8].mxu0 }
  0xfe   : > { %v1107_v62 = vadd.f32 %v17843_v56, %v21013_v30  ;;  %v1101_v2 = vpop.f32.mrb[9].mxu0  ;;  %v21104_v56 = vpop.permute.xlu1 %3839 }
  0xff   : > { %v1102_v18 = vadd.f32 %v21013_v30, %v1101_v2  ;;  %24523 = vst [vmem:[#allocation32_spill] sm:$0xff] %v21104_v56  ;;  %9480 = vperm.xlu0 %20371, %v9280_v38   ;;  %v9282_v2 = vld [vmem:[%s24480_s14 + $0x118] sm:$0xff]  ;;  %v9284_v38 = vld [vmem:[%s24480_s14 + $0x128] sm:$0xff]  ;;  %v2681_v56 = vld [vmem:[%s20508_s0 + $0x100] sm:$0xff] }
 0x100   : > { %1309 = vst.msk [vmem:[#allocation2 + $0x48] sm:$0xff] %vm850_vm0, %v1107_v62  ;;  %v1909_v26 = vld [vmem:[#allocation2 + $0x19] ss:$2 sm:$0xff]  ;;  %9485 = vperm.xlu1 %20372, %v9281_v46  }
 0x101   : > { %1308 = vst.msk [vmem:[#allocation2 + $0x40] sm:$0xff] %vm850_vm0, %v1102_v18  ;;  %v17846_v34 = vpop.f32.mrb[10].mxu0  ;;  %17996 = vmatmul.mubr.msk.f32.vlgmr.msra.gmra.mrb[48].mxu0 %vm850_vm0, %v1909_v26  ;;  %v21114_v18 = vpop.permute.xlu0 %3844 }
 0x102   : > { %v1117_v39 = vadd.f32 %v17846_v34, %v21013_v30  ;;  %v1111_v43 = vpop.f32.mrb[11].mxu0  ;;  %17998 = vmatprep.mubr.msk.f32.mxu0 %vm20383_vm1, %v24485_v32  ;;  %18040 = vmatpush3.msra.mxu0 %v15733_v22  ;;  %24524 = vst [vmem:[#allocation33_spill] sm:$0xff] %v21114_v18  ;;  %v9283_v22 = vld [vmem:[%s24480_s14 + $0x120] sm:$0xff]  ;;  %v21126_v46 = vpop.permute.xlu1 %3849 }
 0x103   : > { %v1112_v50 = vadd.f32 %v21013_v30, %v1111_v43  ;;  %18085 = vmatprep.subr.mxu0 %v24485_v32  ;;  %9490 = vperm.xlu0 %20371, %v9282_v2   ;;  %24525 = vst [vmem:[#allocation34_spill] sm:$0xff] %v21126_v46  ;;  %v2669_v18 = vld [vmem:[%s20508_s0 + $0xa0] sm:$0xff] }
 0x104   : > { %1311 = vst.msk [vmem:[#allocation2 + $0x58] sm:$0xff] %vm850_vm0, %v1117_v39  ;;  %v1365_v51 = vld [vmem:[#allocation2 + $0x31] ss:$2 sm:$0xff]  ;;  %9495 = vperm.xlu1 %20372, %v9283_v22  }
 0x105   : > { %1310 = vst.msk [vmem:[#allocation2 + $0x50] sm:$0xff] %vm850_vm0, %v1112_v50  ;;  %v17849_v62 = vpop.f32.mrb[12].mxu0  ;;  %17907 = vmatmul.mubr.msk.f32.gmra.mrb[2].mxu1 %vm850_vm0, %v1365_v51  ;;  %v9285_v50 = vld [vmem:[%s24480_s14 + $0x130] sm:$0xff]  ;;  %v21133_v2 = vpop.permute.xlu0 %3854 }
 0x106   : > { %v1127_v14 = vadd.f32 %v17849_v62, %v21013_v30  ;;  %v1121_v16 = vpop.f32.mrb[13].mxu0  ;;  %17909 = vmatprep.mubr.msk.f32.mxu1 %vm20383_vm1, %v24485_v32  ;;  %24526 = vst [vmem:[#allocation35_spill] sm:$0xff] %v21133_v2 }
 0x107   : > { %v1122_v26 = vadd.f32 %v21013_v30, %v1121_v16  ;;  %9500 = vperm.xlu0 %20371, %v9284_v38   ;;  %v9286_v16 = vld [vmem:[%s24480_s14 + $0x138] sm:$0xff] }
 0x108   : > { %1313 = vst.msk [vmem:[#allocation2 + $0x68] sm:$0xff] %vm850_vm0, %v1127_v14  ;;  %9505 = vperm.xlu1 %20372, %v9285_v50  }
 0x109   : > { %1312 = vst.msk [vmem:[#allocation2 + $0x60] sm:$0xff] %vm850_vm0, %v1122_v26  ;;  %v17852_v34 = vpop.f32.mrb[14].mxu0 }
 0x10a   : > { %v1137_v39 = vadd.f32 %v17852_v34, %v21013_v30  ;;  %v1131_v43 = vpop.f32.mrb[15].mxu0  ;;  %v9287_v34 = vld [vmem:[%s24480_s14 + $0x140] sm:$0xff] }
 0x10b   : > { %v1132_v51 = vadd.f32 %v21013_v30, %v1131_v43  ;;  %v21148_v43 = vpop.permute.xlu1 %3859  ;;  %9510 = vperm.xlu0 %20371, %v9286_v16   ;;  %v9289_v16 = vld [vmem:[%s24480_s14 + $0x150] sm:$0xff] }
 0x10c   : > { %1315 = vst.msk [vmem:[#allocation2 + $0x78] sm:$0xff] %vm850_vm0, %v1137_v39  ;;  %v1911_v62 = vld [vmem:[#allocation2 + $0x49] ss:$2 sm:$0xff]  ;;  %24527 = vst [vmem:[#allocation36_spill] sm:$0xff] %v21148_v43  ;;  %9515 = vperm.xlu1 %20372, %v9287_v34  }
 0x10d   : > { %1314 = vst.msk [vmem:[#allocation2 + $0x70] sm:$0xff] %vm850_vm0, %v1132_v51  ;;  %v17855_v14 = vpop.f32.mrb[16].mxu0  ;;  %17999 = vmatmul.mubr.msk.f32.gmra.mrb[50].mxu0 %vm850_vm0, %v1911_v62  ;;  %v9288_v51 = vld [vmem:[%s24480_s14 + $0x148] sm:$0xff] }
 0x10e   : > { %v1147_v22 = vadd.f32 %v17855_v14, %v21013_v30  ;;  %v1141_v26 = vpop.f32.mrb[17].mxu0  ;;  %18001 = vmatprep.mubr.msk.f32.mxu0 %vm20383_vm1, %v24485_v32 }
 0x10f   : > { %v1142_v38 = vadd.f32 %v21013_v30, %v1141_v26  ;;  %9520 = vperm.xlu0 %20371, %v9288_v51  }
 0x110   : > { %1317 = vst.msk [vmem:[#allocation2 + $0x88] sm:$0xff] %vm850_vm0, %v1147_v22  ;;  %v1367_v39 = vld [vmem:[#allocation2 + $0x61] ss:$2 sm:$0xff]  ;;  %v21158_v22 = vpop.permute.xlu0 %3864  ;;  %9525 = vperm.xlu1 %20372, %v9289_v16  }
 0x111   : > { %1316 = vst.msk [vmem:[#allocation2 + $0x80] sm:$0xff] %vm850_vm0, %v1142_v38  ;;  %v17858_v50 = vpop.f32.mrb[18].mxu0  ;;  %17910 = vmatmul.mubr.msk.f32.gmra.mrb[4].mxu1 %vm850_vm0, %v1367_v39  ;;  %24528 = vst [vmem:[#allocation37_spill] sm:$0xff] %v21158_v22  ;;  %v9290_v38 = vld [vmem:[%s24480_s14 + $0x158] sm:$0xff] }
 0x112   : > { %v1157_v62 = vadd.f32 %v17858_v50, %v21013_v30  ;;  %v1151_v14 = vpop.f32.mrb[19].mxu0  ;;  %17912 = vmatprep.mubr.msk.f32.mxu1 %vm20383_vm1, %v24485_v32  ;;  %v21170_v32 = vpop.permute.xlu1 %3869 }
 0x113   : > { %v1152_v26 = vadd.f32 %v21013_v30, %v1151_v14  ;;  %24529 = vst [vmem:[#allocation38_spill] sm:$0xff] %v21170_v32  ;;  %v9291_v14 = vld [vmem:[%s24480_s14 + $0x160] sm:$0xff]  ;;  %9530 = vperm.xlu0 %20371, %v9290_v38   ;;  %v24531_v32 = vmov 0.0   ;;  %v9293_v38 = vld [vmem:[%s24480_s14 + $0x170] sm:$0xff] }
 0x114   : > { %1319 = vst.msk [vmem:[#allocation2 + $0x98] sm:$0xff] %vm850_vm0, %v1157_v62  ;;  %9535 = vperm.xlu1 %20372, %v9291_v14  }
 0x115   : > { %1318 = vst.msk [vmem:[#allocation2 + $0x90] sm:$0xff] %vm850_vm0, %v1152_v26  ;;  %v17861_v34 = vpop.f32.mrb[20].mxu0  ;;  %v21177_v26 = vpop.permute.xlu0 %3874 }
 0x116   : > { %v1167_v39 = vadd.f32 %v17861_v34, %v21013_v30  ;;  %v1161_v50 = vpop.f32.mrb[21].mxu0  ;;  %24530 = vst [vmem:[#allocation39_spill] sm:$0xff] %v21177_v26  ;;  %v21192_v14 = vpop.permute.xlu1 %3879 }
 0x117   : > { %v1162_v62 = vadd.f32 %v21013_v30, %v1161_v50  ;;  %24532 = vst [vmem:[#allocation40_spill] sm:$0xff] %v21192_v14 }
 0x118   : > { %1321 = vst.msk [vmem:[#allocation2 + $0xa8] sm:$0xff] %vm850_vm0, %v1167_v39  ;;  %v1913_v51 = vld [vmem:[#allocation2 + $0x79] ss:$2 sm:$0xff]  ;;  %v9292_v39 = vld [vmem:[%s24480_s14 + $0x168] sm:$0xff]  ;;  %9545 = vperm.xlu1 %20372, %v9293_v38  }
 0x119   : > { %1320 = vst.msk [vmem:[#allocation2 + $0xa0] sm:$0xff] %vm850_vm0, %v1162_v62  ;;  %v17864_v16 = vpop.f32.mrb[22].mxu0  ;;  %18002 = vmatmul.mubr.msk.f32.gmra.mrb[52].mxu0 %vm850_vm0, %v1913_v51  ;;  %9540 = vperm.xlu0 %20371, %v9292_v39  }
 0x11a   : > { %v1177_v34 = vadd.f32 %v17864_v16, %v21013_v30  ;;  %v1171_v22 = vpop.f32.mrb[23].mxu0  ;;  %18004 = vmatprep.mubr.msk.f32.mxu0 %vm20383_vm1, %v24531_v32  ;;  %v9294_v16 = vld [vmem:[%s24480_s14 + $0x178] sm:$0xff] }
 0x11b   : > { %v1172_v50 = vadd.f32 %v21013_v30, %v1171_v22  ;;  %v21202_v22 = vpop.permute.xlu0 %3884 }
 0x11c   : > { %1323 = vst.msk [vmem:[#allocation2 + $0xb8] sm:$0xff] %vm850_vm0, %v1177_v34  ;;  %v1369_v62 = vld [vmem:[#allocation2 + $0x91] ss:$2 sm:$0xff]  ;;  %24533 = vst [vmem:[#allocation41_spill] sm:$0xff] %v21202_v22  ;;  %v9295_v34 = vld [vmem:[%s24480_s14 + $0x180] sm:$0xff]  ;;  %v21214_v22 = vpop.permute.xlu1 %3889 }
 0x11d   : > { %1322 = vst.msk [vmem:[#allocation2 + $0xb0] sm:$0xff] %vm850_vm0, %v1172_v50  ;;  %v17867_v51 = vpop.f32.mrb[24].mxu0  ;;  %17913 = vmatmul.mubr.msk.f32.gmra.mrb[6].mxu1 %vm850_vm0, %v1369_v62  ;;  %9550 = vperm.xlu0 %20371, %v9294_v16   ;;  %v9296_v50 = vld [vmem:[%s24480_s14 + $0x188] sm:$0xff]  ;;  %24534 = vst [vmem:[#allocation42_spill] sm:$0xff] %v21214_v22 }
 0x11e   : > { %v1187_v26 = vadd.f32 %v17867_v51, %v21013_v30  ;;  %v1181_v2 = vpop.f32.mrb[25].mxu0  ;;  %17915 = vmatprep.mubr.msk.f32.mxu1 %vm20383_vm1, %v24531_v32  ;;  %9555 = vperm.xlu1 %20372, %v9295_v34  }
 0x11f   : > { %v1182_v39 = vadd.f32 %v21013_v30, %v1181_v2  ;;  %v9297_v2 = vld [vmem:[%s24480_s14 + $0x190] sm:$0xff] }
 0x120   : > { %1325 = vst.msk [vmem:[#allocation2 + $0xc8] sm:$0xff] %vm850_vm0, %v1187_v26 }
 0x121   : > { %1324 = vst.msk [vmem:[#allocation2 + $0xc0] sm:$0xff] %vm850_vm0, %v1182_v39  ;;  %v17870_v38 = vpop.f32.mrb[26].mxu0  ;;  %v21221_v39 = vpop.permute.xlu0 %3894  ;;  %9560 = vperm.xlu0 %20371, %v9296_v50   ;;  %v9248_v50 = vld [vmem:[%s24480_s14 + $0x8] sm:$0xff] }
 0x122   : > { %v1197_v62 = vadd.f32 %v17870_v38, %v21013_v30  ;;  %v1191_v51 = vpop.f32.mrb[27].mxu0  ;;  %24535 = vst [vmem:[#allocation43_spill] sm:$0xff] %v21221_v39  ;;  %9565 = vperm.xlu1 %20372, %v9297_v2   ;;  %v9247_v38 = vld [vmem:[%s24480_s14] sm:$0xff]  ;;  %v21236_v2 = vpop.permute.xlu1 %3899 }
 0x123   : > { %v1192_v26 = vadd.f32 %v21013_v30, %v1191_v51  ;;  %24536 = vst [vmem:[#allocation44_spill] sm:$0xff] %v21236_v2 }
 0x124   : > { %1327 = vst.msk [vmem:[#allocation2 + $0xd8] sm:$0xff] %vm850_vm0, %v1197_v62  ;;  %v1915_v16 = vld [vmem:[#allocation2 + $0xa9] ss:$2 sm:$0xff] }
 0x125   : > { %1326 = vst.msk [vmem:[#allocation2 + $0xd0] sm:$0xff] %vm850_vm0, %v1192_v26  ;;  %v17873_v34 = vpop.f32.mrb[28].mxu0  ;;  %18005 = vmatmul.mubr.msk.f32.gmra.mrb[54].mxu0 %vm850_vm0, %v1915_v16  ;;  %9315 = vperm.xlu0 %20371, %v9247_v38   ;;  %v9249_v16 = vld [vmem:[%s24480_s14 + $0x10] sm:$0xff] }
 0x126   : > { %v1207_v22 = vadd.f32 %v17873_v34, %v21013_v30  ;;  %v1201_v14 = vpop.f32.mrb[29].mxu0  ;;  %18007 = vmatprep.mubr.msk.f32.mxu0 %vm20383_vm1, %v24531_v32  ;;  %9320 = vperm.xlu1 %20372, %v9248_v50  }
 0x127   : > { %v1202_v62 = vadd.f32 %v21013_v30, %v1201_v14  ;;  %v21246_v14 = vpop.permute.xlu0 %3904 }
 0x128   : > { %1329 = vst.msk [vmem:[#allocation2 + $0xe8] sm:$0xff] %vm850_vm0, %v1207_v22  ;;  %v1371_v51 = vld [vmem:[#allocation2 + $0xc1] ss:$2 sm:$0xff]  ;;  %24537 = vst [vmem:[#allocation45_spill] sm:$0xff] %v21246_v14  ;;  %v9298_v22 = vld [vmem:[%s24480_s14 + $0x198] sm:$0xff]  ;;  %v21258_v14 = vpop.permute.xlu1 %3909 }
 0x129   : > { %1328 = vst.msk [vmem:[#allocation2 + $0xe0] sm:$0xff] %vm850_vm0, %v1202_v62  ;;  %v17876_v26 = vpop.f32.mrb[30].mxu0  ;;  %17916 = vmatmul.mubr.msk.f32.gmra.mrb[8].mxu1 %vm850_vm0, %v1371_v51  ;;  %9325 = vperm.xlu0 %20371, %v9249_v16   ;;  %v9299_v62 = vld [vmem:[%s24480_s14 + $0x1a0] sm:$0xff]  ;;  %24538 = vst [vmem:[#allocation46_spill] sm:$0xff] %v21258_v14 }
 0x12a   : > { %v1217_v34 = vadd.f32 %v17876_v26, %v21013_v30  ;;  %v1211_v39 = vpop.f32.mrb[31].mxu0  ;;  %17918 = vmatprep.mubr.msk.f32.mxu1 %vm20383_vm1, %v24531_v32  ;;  %9570 = vperm.xlu1 %20372, %v9298_v22  }
 0x12b   : > { %v1212_v38 = vadd.f32 %v21013_v30, %v1211_v39  ;;  %v9300_v39 = vld [vmem:[%s24480_s14 + $0x1a8] sm:$0xff] }
 0x12c   : > { %1331 = vst.msk [vmem:[#allocation2 + $0xf8] sm:$0xff] %vm850_vm0, %v1217_v34 }
 0x12d   : > { %1330 = vst.msk [vmem:[#allocation2 + $0xf0] sm:$0xff] %vm850_vm0, %v1212_v38  ;;  %v17879_v50 = vpop.f32.mrb[32].mxu0  ;;  %v21265_v38 = vpop.permute.xlu0 %3914  ;;  %9575 = vperm.xlu0 %20371, %v9299_v62   ;;  %v9302_v62 = vld [vmem:[%s24480_s14 + $0x1b8] sm:$0xff] }
 0x12e   : > { %v1227_v51 = vadd.f32 %v17879_v50, %v21013_v30  ;;  %v1221_v26 = vpop.f32.mrb[33].mxu0  ;;  %24539 = vst [vmem:[#allocation47_spill] sm:$0xff] %v21265_v38  ;;  %9580 = vperm.xlu1 %20372, %v9300_v39   ;;  %v9301_v50 = vld [vmem:[%s24480_s14 + $0x1b0] sm:$0xff]  ;;  %v21280_v39 = vpop.permute.xlu1 %3919 }
 0x12f   : > { %v1222_v34 = vadd.f32 %v21013_v30, %v1221_v26  ;;  %24540 = vst [vmem:[#allocation48_spill] sm:$0xff] %v21280_v39 }
 0x130   : > { %1333 = vst.msk [vmem:[#allocation2 + $0x108] sm:$0xff] %vm850_vm0, %v1227_v51  ;;  %v1917_v16 = vld [vmem:[#allocation2 + $0xd9] ss:$2 sm:$0xff] }
 0x131   : > { %1332 = vst.msk [vmem:[#allocation2 + $0x100] sm:$0xff] %vm850_vm0, %v1222_v34  ;;  %v17882_v22 = vpop.f32.mrb[34].mxu0  ;;  %18008 = vmatmul.mubr.msk.f32.gmra.mrb[56].mxu0 %vm850_vm0, %v1917_v16  ;;  %9585 = vperm.xlu0 %20371, %v9301_v50   ;;  %v21287_v38 = vpop.permute.xlu0 %3924 }
 0x132   : > { %v1237_v14 = vadd.f32 %v17882_v22, %v21013_v30  ;;  %v1231_v2 = vpop.f32.mrb[35].mxu0  ;;  %18010 = vmatprep.mubr.msk.f32.mxu0 %vm20383_vm1, %v24531_v32  ;;  %9590 = vperm.xlu1 %20372, %v9302_v62   ;;  %24541 = vst [vmem:[#allocation49_spill] sm:$0xff] %v21287_v38  ;;  %v21302_v38 = vpop.permute.xlu1 %3929 }
 0x133   : > { %v1232_v51 = vadd.f32 %v21013_v30, %v1231_v2  ;;  %v9303_v2 = vld [vmem:[%s24480_s14 + $0x1c0] sm:$0xff]  ;;  %24542 = vst [vmem:[#allocation50_spill] sm:$0xff] %v21302_v38 }
 0x134   : > { %1335 = vst.msk [vmem:[#allocation2 + $0x118] sm:$0xff] %vm850_vm0, %v1237_v14  ;;  %v1373_v26 = vld [vmem:[#allocation2 + $0xf1] ss:$2 sm:$0xff]  ;;  %v9304_v14 = vld [vmem:[%s24480_s14 + $0x1c8] sm:$0xff] }
 0x135   : > { %1334 = vst.msk [vmem:[#allocation2 + $0x110] sm:$0xff] %vm850_vm0, %v1232_v51  ;;  %v17885_v34 = vpop.f32.mrb[36].mxu0  ;;  %17919 = vmatmul.mubr.msk.f32.gmra.mrb[10].mxu1 %vm850_vm0, %v1373_v26  ;;  %9595 = vperm.xlu0 %20371, %v9303_v2   ;;  %v9305_v51 = vld [vmem:[%s24480_s14 + $0x1d0] sm:$0xff] }
 0x136   : > { %v1247_v16 = vadd.f32 %v17885_v34, %v21013_v30  ;;  %v1241_v22 = vpop.f32.mrb[37].mxu0  ;;  %17921 = vmatprep.mubr.msk.f32.mxu1 %vm20383_vm1, %v24531_v32  ;;  %9600 = vperm.xlu1 %20372, %v9304_v14  }
 0x137   : > { %v1242_v50 = vadd.f32 %v21013_v30, %v1241_v22  ;;  %v9306_v22 = vld [vmem:[%s24480_s14 + $0x1d8] sm:$0xff] }
 0x138   : > { %1337 = vst.msk [vmem:[#allocation2 + $0x128] sm:$0xff] %vm850_vm0, %v1247_v16 }
 0x139   : > { %1336 = vst.msk [vmem:[#allocation2 + $0x120] sm:$0xff] %vm850_vm0, %v1242_v50  ;;  %v17888_v62 = vpop.f32.mrb[38].mxu0  ;;  %v21309_v50 = vpop.permute.xlu0 %3934  ;;  %9605 = vperm.xlu0 %20371, %v9305_v51   ;;  %v9308_v51 = vld [vmem:[%s24480_s14 + $0x1e8] sm:$0xff] }
 0x13a   : > { %v1257_v26 = vadd.f32 %v17888_v62, %v21013_v30  ;;  %v1251_v34 = vpop.f32.mrb[39].mxu0  ;;  %24543 = vst [vmem:[#allocation51_spill] sm:$0xff] %v21309_v50  ;;  %9610 = vperm.xlu1 %20372, %v9306_v22   ;;  %v9307_v62 = vld [vmem:[%s24480_s14 + $0x1e0] sm:$0xff]  ;;  %v21324_v22 = vpop.permute.xlu1 %3939 }
 0x13b   : > { %v1252_v16 = vadd.f32 %v21013_v30, %v1251_v34  ;;  %24544 = vst [vmem:[#allocation52_spill] sm:$0xff] %v21324_v22  ;;  %v2663_v22 = vld [vmem:[%s20508_s0 + $0x70] sm:$0xff] }
 0x13c   : > { %1339 = vst.msk [vmem:[#allocation2 + $0x138] sm:$0xff] %vm850_vm0, %v1257_v26  ;;  %v1919_v2 = vld [vmem:[#allocation2 + $0x109] ss:$2 sm:$0xff] }
 0x13d   : > { %1338 = vst.msk [vmem:[#allocation2 + $0x130] sm:$0xff] %vm850_vm0, %v1252_v16  ;;  %v17891_v14 = vpop.f32.mrb[40].mxu0  ;;  %18011 = vmatmul.mubr.msk.f32.gmra.mrb[58].mxu0 %vm850_vm0, %v1919_v2  ;;  %9615 = vperm.xlu0 %20371, %v9307_v62   ;;  %v9309_v2 = vld [vmem:[%s24480_s14 + $0x1f0] sm:$0xff]  ;;  %v9310_v62 = vld [vmem:[%s24480_s14 + $0x1f8] sm:$0xff] }
 0x13e   : > { %v1267_v38 = vadd.f32 %v17891_v14, %v21013_v30  ;;  %v1261_v39 = vpop.f32.mrb[41].mxu0  ;;  %18013 = vmatprep.mubr.msk.f32.mxu0 %vm20383_vm1, %v24531_v32  ;;  %9620 = vperm.xlu1 %20372, %v9308_v51   ;;  %v21334_v14 = vpop.permute.xlu0 %3944  ;;  %v15701_v51 = vld [vmem:[%s24469_s3 + $0x10] sm:$0xff] }
 0x13f   : > { %v1262_v26 = vadd.f32 %v21013_v30, %v1261_v39  ;;  %24545 = vst [vmem:[#allocation53_spill] sm:$0xff] %v21334_v14  ;;  %v9311_v14 = vld [vmem:[%s24480_s14 + $0x200] sm:$0xff]  ;;  %v21351_v50 = vpop.permute.xlu1 %3949 }
 0x140   : > { %1341 = vst.msk [vmem:[#allocation2 + $0x148] sm:$0xff] %vm850_vm0, %v1267_v38  ;;  %v1375_v34 = vld [vmem:[#allocation2 + $0x121] ss:$2 sm:$0xff]  ;;  %24546 = vst [vmem:[#allocation54_spill] sm:$0xff] %v21351_v50 }
 0x141   : > { %1340 = vst.msk [vmem:[#allocation2 + $0x140] sm:$0xff] %vm850_vm0, %v1262_v26  ;;  %17922 = vmatmul.mubr.msk.f32.gmra.mrb[12].mxu1 %vm850_vm0, %v1375_v34  ;;  %v17894_v16 = vpop.f32.mrb[42].mxu0  ;;  %v1348_v34 = vld [vmem:[#allocation2] ss:$2 sm:$0xff]  ;;  %9625 = vperm.xlu0 %20371, %v9309_v2  }
 0x142   : > { %17926 = vmatprep.mubr.msk.f32.mxu1 %vm20383_vm1, %v24531_v32  ;;  %v1277_v39 = vadd.f32 %v17894_v16, %v21013_v30  ;;  %v1271_v38 = vpop.f32.mrb[43].mxu0  ;;  %9630 = vperm.xlu1 %20372, %v9310_v62   ;;  %v9312_v62 = vld [vmem:[%s24480_s14 + $0x208] sm:$0xff] }
 0x143   : > { %v1272_v26 = vadd.f32 %v21013_v30, %v1271_v38 }
 0x144   : > { %1343 = vst.msk [vmem:[#allocation2 + $0x158] sm:$0xff] %vm850_vm0, %v1277_v39  ;;  %v1350_v39 = vld [vmem:[#allocation2 + $0x30] ss:$2 sm:$0xff] }
 0x145   : > { %17927 = vmatmul.mubr.msk.f32.vlgmr.msra.gmra.mrb[14].mxu1 %vm850_vm0, %v1348_v34  ;;  %1342 = vst.msk [vmem:[#allocation2 + $0x150] sm:$0xff] %vm850_vm0, %v1272_v26  ;;  %v17897_v16 = vpop.f32.mrb[44].mxu0  ;;  %v21355_v26 = vpop.permute.xlu0 %3954  ;;  %9635 = vperm.xlu0 %20371, %v9311_v14   ;;  %v1352_v14 = vld [vmem:[#allocation2 + $0x60] ss:$2 sm:$0xff] }
 0x146   : > { %17948 = vmatpush3.msra.mxu1 %v15701_v51  ;;  %17929 = vmatprep.mubr.msk.f32.mxu1 %vm20383_vm1, %v24531_v32  ;;  %v1281_v38 = vpop.f32.mrb[45].mxu0  ;;  %24547 = vst [vmem:[#allocation55_spill] sm:$0xff] %v21355_v26  ;;  %v13568_v51 = vld [vmem:[%s24481_s15] sm:$0xff]  ;;  %v2197_v16 = vld [vmem:[#allocation2 + $0x30] ss:$2 sm:$0xff] }
 0x147   : > { %17970 = vmatprep.subr.mxu1 %v24531_v32  ;;  %v1282_v2 = vadd.f32 %v21013_v30, %v1281_v38  ;;  %v15749_v30 = vld [vmem:[%s24469_s3 + $0x40] sm:$0xff]  ;;  %9640 = vperm.xlu1 %20372, %v9312_v62   ;;  %v21373_v38 = vpop.permute.xlu1 %3959  ;;  %v1354_v62 = vld [vmem:[#allocation2 + $0x90] ss:$2 sm:$0xff] }
 0x148   : > { %v1921_v34 = vld [vmem:[#allocation2 + $0x139] ss:$2 sm:$0xff]  ;;  %24548 = vst [vmem:[#allocation56_spill] sm:$0xff] %v21373_v38 }
 0x149   : > { %17930 = vmatmul.mubr.msk.f32.gmra.mrb[16].mxu1 %vm850_vm0, %v1350_v39  ;;  %18014 = vmatmul.mubr.msk.f32.gmra.mrb[60].mxu0 %vm850_vm0, %v1921_v34  ;;  %1344 = vst.msk [vmem:[#allocation2 + $0x160] sm:$0xff] %vm850_vm0, %v1282_v2  ;;  %v13569_v2 = vld [vmem:[%s24481_s15 + $0x8] sm:$0xff]  ;;  %v13574_v39 = vld [vmem:[%s24481_s15 + $0x30] sm:$0xff]  ;;  %v21387_v34 = vpop.permute.xlu0 %3964  ;;  %v13580_v26 = vld [vmem:[%s24481_s15 + $0x60] sm:$0xff] }
 0x14a   : > { %17932 = vmatprep.mubr.msk.f32.mxu1 %vm20383_vm1, %v24531_v32  ;;  %18041 = vmatprep.mubr.msk.f32.mxu0 %vm20383_vm1, %v24531_v32  ;;  %24549 = vst [vmem:[#allocation57_spill] sm:$0xff] %v21387_v34  ;;  %v2201_v34 = vld [vmem:[#allocation2 + $0x90] ss:$2 sm:$0xff]  ;;  %v2657_v38 = vld [vmem:[%s20508_s0 + $0x40] sm:$0xff] }
 0x14b   : > { %13618 = vperm.xlu0 %20371, %v13568_v51   ;;  %13623 = vperm.xlu1 %20372, %v13569_v2   ;;  %v2199_v51 = vld [vmem:[#allocation2 + $0x60] ss:$2 sm:$0xff] }
 0x14d   : > { %17933 = vmatmul.mubr.msk.f32.gmra.mrb[18].mxu1 %vm850_vm0, %v1352_v14  ;;  %18042 = vmatmul.mubr.msk.f32.vlgmr.msra.gmra.mrb[62].mxu0 %vm850_vm0, %v2197_v16  ;;  %v13575_v14 = vld [vmem:[%s24481_s15 + $0x38] sm:$0xff]  ;;  %v17900_v16 = vpop.f32.mrb[46].mxu0 }
 0x14e   : > { %17935 = vmatprep.mubr.msk.f32.mxu1 %vm20383_vm1, %v24531_v32  ;;  %18044 = vmatprep.mubr.msk.f32.mxu0 %vm20383_vm1, %v24531_v32  ;;  %v1291_v2 = vpop.f32.mrb[47].mxu0  ;;  %v13586_v16 = vld [vmem:[%s24481_s15 + $0x90] sm:$0xff] }
 0x14f   : > { %18086 = vmatpush3.msra.mxu0 %v15749_v30  ;;  %13648 = vperm.xlu0 %20371, %v13574_v39   ;;  %v21401_v30 = vpop.permute.xlu1 %3969  ;;  %v1356_v39 = vld [vmem:[#allocation2 + $0xc0] ss:$2 sm:$0xff] }
 0x150   : > { %24550 = vst [vmem:[#allocation58_spill] sm:$0xff] %v21401_v30  ;;  %13653 = vperm.xlu1 %20372, %v13575_v14   ;;  %v2203_v14 = vld [vmem:[#allocation2 + $0xc0] ss:$2 sm:$0xff] }
 0x151   : > { %17936 = vmatmul.mubr.msk.f32.gmra.mrb[20].mxu1 %vm850_vm0, %v1354_v62  ;;  %18045 = vmatmul.mubr.msk.f32.gmra.mrb[64].mxu0 %vm850_vm0, %v2199_v51  ;;  %v21403_v62 = vpop.permute.xlu0 %3974  ;;  %v13581_v51 = vld [vmem:[%s24481_s15 + $0x68] sm:$0xff] }
 0x152   : > { %17938 = vmatprep.mubr.msk.f32.mxu1 %vm20383_vm1, %v24531_v32  ;;  %18047 = vmatprep.mubr.msk.f32.mxu0 %vm20383_vm1, %v24531_v32  ;;  %24551 = vst [vmem:[#allocation59_spill] sm:$0xff] %v21403_v62  ;;  %v2205_v62 = vld [vmem:[#allocation2 + $0xf0] ss:$2 sm:$0xff] }
 0x153   : > { %13678 = vperm.xlu0 %20371, %v13580_v26   ;;  %v1358_v26 = vld [vmem:[#allocation2 + $0xf0] ss:$2 sm:$0xff]  ;;  %v21417_v2 = vpop.permute.xlu1 %3979 }
 0x154   : > { %13683 = vperm.xlu1 %20372, %v13581_v51   ;;  %24552 = vst [vmem:[#allocation60_spill] sm:$0xff] %v21417_v2  ;;  %v13599_v2 = vld [vmem:[%s24481_s15 + $0xf8] sm:$0xff] }
 0x155   : > { %17939 = vmatmul.mubr.msk.f32.gmra.mrb[22].mxu1 %vm850_vm0, %v1356_v39  ;;  %18048 = vmatmul.mubr.msk.f32.gmra.mrb[66].mxu0 %vm850_vm0, %v2201_v34  ;;  %v13587_v34 = vld [vmem:[%s24481_s15 + $0x98] sm:$0xff]  ;;  %v13592_v39 = vld [vmem:[%s24481_s15 + $0xc0] sm:$0xff]  ;;  %v21431_v51 = vpop.permute.xlu0 %3984 }
 0x156   : > { %17941 = vmatprep.mubr.msk.f32.mxu1 %vm20383_vm1, %v24531_v32  ;;  %18050 = vmatprep.mubr.msk.f32.mxu0 %vm20383_vm1, %v24531_v32  ;;  %24553 = vst [vmem:[#allocation61_spill] sm:$0xff] %v21431_v51  ;;  %v2207_v51 = vld [vmem:[#allocation2 + $0x120] ss:$2 sm:$0xff] }
 0x157   : > { %13708 = vperm.xlu0 %20371, %v13586_v16   ;;  %v1360_v16 = vld [vmem:[#allocation2 + $0x120] ss:$2 sm:$0xff] }
 0x158   : > { %13713 = vperm.xlu1 %20372, %v13587_v34   ;;  %v21445_v34 = vpop.permute.xlu1 %3989 }
 0x159   : > { %17942 = vmatmul.mubr.msk.f32.gmra.mrb[24].mxu1 %vm850_vm0, %v1358_v26  ;;  %18051 = vmatmul.mubr.msk.f32.gmra.mrb[68].mxu0 %vm850_vm0, %v2203_v14  ;;  %v13593_v26 = vld [vmem:[%s24481_s15 + $0xc8] sm:$0xff]  ;;  %v13598_v14 = vld [vmem:[%s24481_s15 + $0xf0] sm:$0xff]  ;;  %24554 = vst [vmem:[#allocation62_spill] sm:$0xff] %v21445_v34  ;;  %v13604_v34 = vld [vmem:[%s24481_s15 + $0x120] sm:$0xff] }
 0x15a   : > { %17944 = vmatprep.mubr.msk.f32.mxu1 %vm20383_vm1, %v24531_v32  ;;  %18053 = vmatprep.mubr.msk.f32.mxu0 %vm20383_vm1, %v24531_v32 }
 0x15b   : > { %13738 = vperm.xlu0 %20371, %v13592_v39   ;;  %v15709_v39 = vld [vmem:[%s24469_s3 + $0x18] sm:$0xff] }
 0x15c   : > { %13743 = vperm.xlu1 %20372, %v13593_v26   ;;  %v2209_v26 = vld [vmem:[#allocation2 + $0x150] ss:$2 sm:$0xff] }
 0x15d   : > { %17945 = vmatmul.mubr.msk.f32.gmra.mrb[26].mxu1 %vm850_vm0, %v1360_v16  ;;  %18054 = vmatmul.mubr.msk.f32.gmra.mrb[70].mxu0 %vm850_vm0, %v2205_v62  ;;  %v1621_v16 = vld [vmem:[#allocation2 + $0x2] ss:$2 sm:$0xff]  ;;  %v21450_v62 = vpop.permute.xlu0 %3994 }
 0x15e   : > { %17949 = vmatprep.mubr.msk.f32.mxu1 %vm20383_vm1, %v24531_v32  ;;  %18056 = vmatprep.mubr.msk.f32.mxu0 %vm20383_vm1, %v24531_v32  ;;  %24555 = vst [vmem:[#allocation63_spill] sm:$0xff] %v21450_v62  ;;  %v13582_v62 = vld [vmem:[%s24481_s15 + $0x70] sm:$0xff] }
 0x15f   : > { %13768 = vperm.xlu0 %20371, %v13598_v14   ;;  %v1623_v14 = vld [vmem:[#allocation2 + $0x32] ss:$2 sm:$0xff] }
 0x160   : > { %13773 = vperm.xlu1 %20372, %v13599_v2  }
 0x161   : > { %17950 = vmatmul.mubr.msk.f32.vlgmr.msra.gmra.mrb[28].mxu1 %vm850_vm0, %v1621_v16  ;;  %18057 = vmatmul.mubr.msk.f32.gmra.mrb[72].mxu0 %vm850_vm0, %v2207_v51  ;;  %v21465_v51 = vpop.permute.xlu1 %3999  ;;  %v13570_v16 = vld [vmem:[%s24481_s15 + $0x10] sm:$0xff]  ;;  %v21479_v2 = vpop.permute.xlu0 %4004 }
 0x162   : > { %17971 = vmatpush3.msra.mxu1 %v15709_v39  ;;  %17952 = vmatprep.mubr.msk.f32.mxu1 %vm20383_vm1, %v24531_v32  ;;  %24556 = vst [vmem:[#allocation64_spill] sm:$0xff] %v21465_v51  ;;  %v13605_v39 = vld [vmem:[%s24481_s15 + $0x128] sm:$0xff]  ;;  %24557 = vst [vmem:[#allocation65_spill] sm:$0xff] %v21479_v2  ;;  %v13594_v51 = vld [vmem:[%s24481_s15 + $0xd0] sm:$0xff] }
 0x163   : > { %18059 = vmatprep.mubr.msk.f32.mxu0 %vm20383_vm1, %v24531_v32  ;;  %18016 = vmatprep.subr.mxu1 %v24531_v32 }
 0x164   : > { %13798 = vperm.xlu0 %20371, %v13604_v34   ;;  %v1625_v34 = vld [vmem:[#allocation2 + $0x62] ss:$2 sm:$0xff]  ;;  %13803 = vperm.xlu1 %20372, %v13605_v39  }
 0x165   : > { %17953 = vmatmul.mubr.msk.f32.gmra.mrb[30].mxu1 %vm850_vm0, %v1623_v14  ;;  %18060 = vmatmul.mubr.msk.f32.gmra.mrb[74].mxu0 %vm850_vm0, %v2209_v26  ;;  %v2485_v14 = vld [vmem:[#allocation2 + $0x32] ss:$2 sm:$0xff]  ;;  %v21493_v39 = vpop.permute.xlu1 %4009  ;;  %v21495_v2 = vpop.permute.xlu0 %4014 }
 0x166   : > { %17955 = vmatprep.mubr.msk.f32.mxu1 %vm20383_vm1, %v24531_v32  ;;  %18087 = vmatprep.mubr.msk.f32.mxu0 %vm20383_vm1, %v24531_v32  ;;  %v13576_v26 = vld [vmem:[%s24481_s15 + $0x40] sm:$0xff]  ;;  %24558 = vst [vmem:[#allocation66_spill] sm:$0xff] %v21493_v39  ;;  %24559 = vst [vmem:[#allocation67_spill] sm:$0xff] %v21495_v2  ;;  %v13578_v39 = vld [vmem:[%s24481_s15 + $0x50] sm:$0xff] }
 0x168   : > { %13628 = vperm.xlu0 %20371, %v13570_v16   ;;  %v1627_v16 = vld [vmem:[#allocation2 + $0x92] ss:$2 sm:$0xff]  ;;  %13658 = vperm.xlu1 %20372, %v13576_v26   ;;  %v1629_v26 = vld [vmem:[#allocation2 + $0xc2] ss:$2 sm:$0xff] }
 0x169   : > { %17956 = vmatmul.mubr.msk.f32.gmra.mrb[32].mxu1 %vm850_vm0, %v1625_v34  ;;  %18088 = vmatmul.mubr.msk.f32.vlgmr.msra.gmra.mrb[76].mxu0 %vm850_vm0, %v2485_v14  ;;  %v2487_v34 = vld [vmem:[#allocation2 + $0x62] ss:$2 sm:$0xff]  ;;  %v21509_v2 = vpop.permute.xlu1 %4019 }
 0x16a   : > { %17958 = vmatprep.mubr.msk.f32.mxu1 %vm20383_vm1, %v24531_v32  ;;  %18090 = vmatprep.mubr.msk.f32.mxu0 %vm20383_vm1, %v24531_v32  ;;  %v13588_v14 = vld [vmem:[%s24481_s15 + $0xa0] sm:$0xff]  ;;  %24560 = vst [vmem:[#allocation68_spill] sm:$0xff] %v21509_v2 }
 0x16b   : > { %v13572_v2 = vld [vmem:[%s24481_s15 + $0x20] sm:$0xff] }
 0x16c   : > { %13688 = vperm.xlu0 %20371, %v13582_v62   ;;  %v2489_v62 = vld [vmem:[#allocation2 + $0x92] ss:$2 sm:$0xff]  ;;  %13718 = vperm.xlu1 %20372, %v13588_v14   ;;  %v21523_v14 = vpop.permute.xlu0 %4024 }
 0x16d   : > { %17959 = vmatmul.mubr.msk.f32.gmra.mrb[34].mxu1 %vm850_vm0, %v1627_v16  ;;  %18091 = vmatmul.mubr.msk.f32.gmra.mrb[78].mxu0 %vm850_vm0, %v2487_v34  ;;  %v13600_v16 = vld [vmem:[%s24481_s15 + $0x100] sm:$0xff]  ;;  %v13606_v34 = vld [vmem:[%s24481_s15 + $0x130] sm:$0xff]  ;;  %24561 = vst [vmem:[#allocation69_spill] sm:$0xff] %v21523_v14 }
 0x16e   : > { %17961 = vmatprep.mubr.msk.f32.mxu1 %vm20383_vm1, %v24531_v32  ;;  %18093 = vmatprep.mubr.msk.f32.mxu0 %vm20383_vm1, %v24531_v32 }
 0x170   : > { %13748 = vperm.xlu0 %20371, %v13594_v51   ;;  %v1631_v51 = vld [vmem:[#allocation2 + $0xf2] ss:$2 sm:$0xff]  ;;  %13778 = vperm.xlu1 %20372, %v13600_v16   ;;  %v21537_v16 = vpop.permute.xlu1 %4029  ;;  %v21539_v14 = vpop.permute.xlu0 %4034 }
 0x171   : > { %17962 = vmatmul.mubr.msk.f32.gmra.mrb[36].mxu1 %vm850_vm0, %v1629_v26  ;;  %18094 = vmatmul.mubr.msk.f32.gmra.mrb[80].mxu0 %vm850_vm0, %v2489_v62  ;;  %v2491_v26 = vld [vmem:[#allocation2 + $0xc2] ss:$2 sm:$0xff]  ;;  %v13571_v62 = vld [vmem:[%s24481_s15 + $0x18] sm:$0xff]  ;;  %24562 = vst [vmem:[#allocation70_spill] sm:$0xff] %v21537_v16  ;;  %24563 = vst [vmem:[#allocation71_spill] sm:$0xff] %v21539_v14 }
 0x172   : > { %17964 = vmatprep.mubr.msk.f32.mxu1 %vm20383_vm1, %v24531_v32  ;;  %18096 = vmatprep.mubr.msk.f32.mxu0 %vm20383_vm1, %v24531_v32  ;;  %v13583_v14 = vld [vmem:[%s24481_s15 + $0x78] sm:$0xff]  ;;  %v13584_v16 = vld [vmem:[%s24481_s15 + $0x80] sm:$0xff] }
 0x174   : > { %13808 = vperm.xlu0 %20371, %v13606_v34   ;;  %v1633_v34 = vld [vmem:[#allocation2 + $0x122] ss:$2 sm:$0xff]  ;;  %13633 = vperm.xlu1 %20372, %v13571_v62   ;;  %v21568_v30 = vpop.permute.xlu0 %9330 }
 0x175   : > { %17965 = vmatmul.mubr.msk.f32.gmra.mrb[38].mxu1 %vm850_vm0, %v1631_v51  ;;  %18097 = vmatmul.mubr.msk.f32.gmra.mrb[82].mxu0 %vm850_vm0, %v2491_v26  ;;  %v2493_v51 = vld [vmem:[#allocation2 + $0xf2] ss:$2 sm:$0xff]  ;;  %v13577_v26 = vld [vmem:[%s24481_s15 + $0x48] sm:$0xff]  ;;  %24565 = vst [vmem:[#allocation73_spill] sm:$0xff] %v21568_v30 }
 0x176   : > { %17967 = vmatprep.mubr.msk.f32.mxu1 %vm20383_vm1, %v24531_v32  ;;  %18099 = vmatprep.mubr.msk.f32.mxu0 %vm20383_vm1, %v24531_v32  ;;  %v1765_v62 = vld [vmem:[#allocation2 + $0x18] ss:$2 sm:$0xff] }
 0x177   : > { %v1769_v30 = vld [vmem:[#allocation2 + $0x78] ss:$2 sm:$0xff] }
 0x178   : > { %13638 = vperm.xlu0 %20371, %v13572_v2   ;;  %v15725_v2 = vld [vmem:[%s24469_s3 + $0x28] sm:$0xff]  ;;  %13663 = vperm.xlu1 %20372, %v13577_v26   ;;  %v2497_v26 = vld [vmem:[#allocation2 + $0x152] ss:$2 sm:$0xff] }
 0x179   : > { %17968 = vmatmul.mubr.msk.f32.gmra.mrb[40].mxu1 %vm850_vm0, %v1633_v34  ;;  %18100 = vmatmul.mubr.msk.f32.gmra.mrb[84].mxu0 %vm850_vm0, %v2493_v51  ;;  %v2495_v34 = vld [vmem:[#allocation2 + $0x122] ss:$2 sm:$0xff]  ;;  %v21556_v51 = vpop.permute.xlu1 %4039 }
 0x17a   : > { %17972 = vmatprep.mubr.msk.f32.mxu1 %vm20383_vm1, %v24531_v32  ;;  %18102 = vmatprep.mubr.msk.f32.mxu0 %vm20383_vm1, %v24531_v32  ;;  %24564 = vst [vmem:[#allocation72_spill] sm:$0xff] %v21556_v51  ;;  %v2055_v51 = vld [vmem:[#allocation2 + $0x4a] ss:$2 sm:$0xff] }
 0x17c   : > { %13668 = vperm.xlu0 %20371, %v13578_v39   ;;  %v1767_v39 = vld [vmem:[#allocation2 + $0x48] ss:$2 sm:$0xff]  ;;  %13693 = vperm.xlu1 %20372, %v13583_v14   ;;  %v21585_v14 = vpop.permute.xlu0 %9340 }
 0x17d   : > { %17973 = vmatmul.mubr.msk.f32.vlgmr.msra.gmra.mrb[42].mxu1 %vm850_vm0, %v1765_v62  ;;  %18103 = vmatmul.mubr.msk.f32.gmra.mrb[86].mxu0 %vm850_vm0, %v2495_v34  ;;  %v13590_v62 = vld [vmem:[%s24481_s15 + $0xb0] sm:$0xff]  ;;  %v21583_v34 = vpop.permute.xlu1 %9335  ;;  %24567 = vst [vmem:[#allocation75_spill] sm:$0xff] %v21585_v14  ;;  %v1773_v14 = vld [vmem:[#allocation2 + $0xd8] ss:$2 sm:$0xff] }
 0x17e   : > { %18017 = vmatpush3.msra.mxu1 %v15725_v2  ;;  %17975 = vmatprep.mubr.msk.f32.mxu1 %vm20383_vm1, %v24531_v32  ;;  %v13589_v2 = vld [vmem:[%s24481_s15 + $0xa8] sm:$0xff]  ;;  %24566 = vst [vmem:[#allocation74_spill] sm:$0xff] %v21583_v34 }
 0x17f   : > { %18062 = vmatprep.subr.mxu1 %v24531_v32  ;;  %18105 = vmatprep.mubr.msk.f32.mxu0 %vm20383_vm1, %v24531_v32 }
 0x180   : > { %13698 = vperm.xlu0 %20371, %v13584_v16   ;;  %13723 = vperm.xlu1 %20372, %v13589_v2   ;;  %v13595_v16 = vld [vmem:[%s24481_s15 + $0xd8] sm:$0xff]  ;;  %v13602_v2 = vld [vmem:[%s24481_s15 + $0x110] sm:$0xff] }
 0x181   : > { %17976 = vmatmul.mubr.msk.f32.gmra.mrb[44].mxu1 %vm850_vm0, %v1767_v39  ;;  %18106 = vmatmul.mubr.msk.f32.gmra.mrb[88].mxu0 %vm850_vm0, %v2497_v26  ;;  %v13596_v26 = vld [vmem:[%s24481_s15 + $0xe0] sm:$0xff]  ;;  %v1771_v39 = vld [vmem:[#allocation2 + $0xa8] ss:$2 sm:$0xff]  ;;  %v21596_v34 = vpop.permute.xlu1 %9345 }
 0x182   : > { %17978 = vmatprep.mubr.msk.f32.mxu1 %vm20383_vm1, %v24531_v32  ;;  %24568 = vst [vmem:[#allocation76_spill] sm:$0xff] %v21596_v34  ;;  %v1775_v34 = vld [vmem:[#allocation2 + $0x108] ss:$2 sm:$0xff] }
 0x184   : > { %13728 = vperm.xlu0 %20371, %v13590_v62   ;;  %13753 = vperm.xlu1 %20372, %v13595_v16   ;;  %v21607_v62 = vpop.permute.xlu0 %9350  ;;  %v13607_v16 = vld [vmem:[%s24481_s15 + $0x138] sm:$0xff] }
 0x185   : > { %17979 = vmatmul.mubr.msk.f32.gmra.mrb[46].mxu1 %vm850_vm0, %v1769_v30  ;;  %v13601_v30 = vld [vmem:[%s24481_s15 + $0x108] sm:$0xff]  ;;  %24569 = vst [vmem:[#allocation77_spill] sm:$0xff] %v21607_v62 }
 0x186   : > { %17981 = vmatprep.mubr.msk.f32.mxu1 %vm20383_vm1, %v24531_v32 }
 0x188   : > { %13758 = vperm.xlu0 %20371, %v13596_v26   ;;  %13783 = vperm.xlu1 %20372, %v13601_v30   ;;  %v13608_v26 = vld [vmem:[%s24481_s15 + $0x140] sm:$0xff]  ;;  %v21620_v62 = vpop.permute.xlu0 %9360  ;;  %v13579_v30 = vld [vmem:[%s24481_s15 + $0x58] sm:$0xff] }
 0x189   : > { %17982 = vmatmul.mubr.msk.f32.gmra.mrb[48].mxu1 %vm850_vm0, %v1771_v39  ;;  %v21618_v39 = vpop.permute.xlu1 %9355  ;;  %24571 = vst [vmem:[#allocation79_spill] sm:$0xff] %v21620_v62 }
 0x18a   : > { %17984 = vmatprep.mubr.msk.f32.mxu1 %vm20383_vm1, %v24531_v32  ;;  %24570 = vst [vmem:[#allocation78_spill] sm:$0xff] %v21618_v39 }
 0x18c   : > { %13788 = vperm.xlu0 %20371, %v13602_v2   ;;  %13813 = vperm.xlu1 %20372, %v13607_v16   ;;  %v1777_v2 = vld [vmem:[#allocation2 + $0x138] ss:$2 sm:$0xff] }
 0x18d   : > { %17985 = vmatmul.mubr.msk.f32.gmra.mrb[50].mxu1 %vm850_vm0, %v1773_v14  ;;  %v13573_v14 = vld [vmem:[%s24481_s15 + $0x28] sm:$0xff]  ;;  %v21631_v39 = vpop.permute.xlu1 %9365  ;;  %v13591_v16 = vld [vmem:[%s24481_s15 + $0xb8] sm:$0xff] }
 0x18e   : > { %17987 = vmatprep.mubr.msk.f32.mxu1 %vm20383_vm1, %v24531_v32  ;;  %24572 = vst [vmem:[#allocation80_spill] sm:$0xff] %v21631_v39  ;;  %v13597_v39 = vld [vmem:[%s24481_s15 + $0xe8] sm:$0xff] }
 0x190   : > { %13818 = vperm.xlu0 %20371, %v13608_v26   ;;  %13643 = vperm.xlu1 %20372, %v13573_v14   ;;  %v21642_v26 = vpop.permute.xlu0 %9370  ;;  %v15741_v14 = vld [vmem:[%s24469_s3 + $0x38] sm:$0xff] }
 0x191   : > { %17988 = vmatmul.mubr.msk.f32.gmra.mrb[52].mxu1 %vm850_vm0, %v1775_v34  ;;  %v13585_v34 = vld [vmem:[%s24481_s15 + $0x88] sm:$0xff]  ;;  %24573 = vst [vmem:[#allocation81_spill] sm:$0xff] %v21642_v26  ;;  %v13603_v26 = vld [vmem:[%s24481_s15 + $0x118] sm:$0xff]  ;;  %v21659_v62 = vpop.permute.xlu1 %9375 }
 0x192   : > { %17990 = vmatprep.mubr.msk.f32.mxu1 %vm20383_vm1, %v24531_v32  ;;  %24574 = vst [vmem:[#allocation82_spill] sm:$0xff] %v21659_v62 }
 0x194   : > { %13673 = vperm.xlu0 %20371, %v13579_v30   ;;  %v2053_v30 = vld [vmem:[#allocation2 + $0x1a] ss:$2 sm:$0xff]  ;;  %13703 = vperm.xlu1 %20372, %v13585_v34   ;;  %v21661_v34 = vpop.permute.xlu0 %9380 }
 0x195   : > { %17991 = vmatmul.mubr.msk.f32.gmra.mrb[54].mxu1 %vm850_vm0, %v1777_v2  ;;  %v2737_v2 = vld [vmem:[%s24471_s5] sm:$0xff]  ;;  %24575 = vst [vmem:[#allocation83_spill] sm:$0xff] %v21661_v34  ;;  %v21672_v62 = vpop.permute.xlu1 %9385  ;;  %v2059_v34 = vld [vmem:[#allocation2 + $0xaa] ss:$2 sm:$0xff] }
 0x196   : > { %18018 = vmatprep.mubr.msk.f32.mxu1 %vm20383_vm1, %v24531_v32  ;;  %24576 = vst [vmem:[#allocation84_spill] sm:$0xff] %v21672_v62  ;;  %v2061_v62 = vld [vmem:[#allocation2 + $0xda] ss:$2 sm:$0xff] }
 0x198   : > { %13733 = vperm.xlu0 %20371, %v13591_v16   ;;  %13763 = vperm.xlu1 %20372, %v13597_v39   ;;  %v13609_v16 = vld [vmem:[%s24481_s15 + $0x148] sm:$0xff]  ;;  %v13612_v39 = vld [vmem:[%s24481_s15 + $0x160] sm:$0xff] }
 0x199   : > { %18019 = vmatmul.mubr.msk.f32.vlgmr.msra.gmra.mrb[56].mxu1 %vm850_vm0, %v2053_v30  ;;  %v2057_v30 = vld [vmem:[#allocation2 + $0x7a] ss:$2 sm:$0xff] }
 0x19a   : > { %18063 = vmatpush3.msra.mxu1 %v15741_v14  ;;  %18021 = vmatprep.mubr.msk.f32.mxu1 %vm20383_vm1, %v24531_v32  ;;  %v13610_v14 = vld [vmem:[%s24481_s15 + $0x150] sm:$0xff] }
 0x19b   : > { %18108 = vmatprep.subr.mxu1 %v2737_v2 }
 0x19c   : > { %13793 = vperm.xlu0 %20371, %v13603_v26   ;;  %13823 = vperm.xlu1 %20372, %v13609_v16   ;;  %v21683_v26 = vpop.permute.xlu0 %9390  ;;  %v13613_v16 = vld [vmem:[%s24481_s15 + $0x168] sm:$0xff] }
 0x19d   : > { %18022 = vmatmul.mubr.msk.f32.gmra.mrb[58].mxu1 %vm850_vm0, %v2055_v51  ;;  %v13611_v51 = vld [vmem:[%s24481_s15 + $0x158] sm:$0xff]  ;;  %24577 = vst [vmem:[#allocation85_spill] sm:$0xff] %v21683_v26 }
 0x19e   : > { %18024 = vmatprep.mubr.msk.f32.mxu1 %vm20383_vm1, %v24531_v32 }
 0x1a0   : > { %13828 = vperm.xlu0 %20371, %v13610_v14   ;;  %13833 = vperm.xlu1 %20372, %v13611_v51   ;;  %v13614_v14 = vld [vmem:[%s24481_s15 + $0x170] sm:$0xff]  ;;  %v21696_v26 = vpop.permute.xlu0 %9400 }
 0x1a1   : > { %18025 = vmatmul.mubr.msk.f32.gmra.mrb[60].mxu1 %vm850_vm0, %v2057_v30  ;;  %v21694_v30 = vpop.permute.xlu1 %9395  ;;  %24579 = vst [vmem:[#allocation87_spill] sm:$0xff] %v21696_v26  ;;  %v2063_v51 = vld [vmem:[#allocation2 + $0x10a] ss:$2 sm:$0xff] }
 0x1a2   : > { %18027 = vmatprep.mubr.msk.f32.mxu1 %vm20383_vm1, %v24531_v32  ;;  %24578 = vst [vmem:[#allocation86_spill] sm:$0xff] %v21694_v30  ;;  %v2653_v30 = vld [vmem:[%s20508_s0 + $0x20] sm:$0xff] }
 0x1a4   : > { %13838 = vperm.xlu0 %20371, %v13612_v39   ;;  %13843 = vperm.xlu1 %20372, %v13613_v16   ;;  %v2065_v16 = vld [vmem:[#allocation2 + $0x13a] ss:$2 sm:$0xff] }
 0x1a5   : > { %18028 = vmatmul.mubr.msk.f32.gmra.mrb[62].mxu1 %vm850_vm0, %v2059_v34  ;;  %v13615_v34 = vld [vmem:[%s24481_s15 + $0x178] sm:$0xff]  ;;  %v21704_v39 = vpop.permute.xlu1 %9405 }
 0x1a6   : > { %18030 = vmatprep.mubr.msk.f32.mxu1 %vm20383_vm1, %v24531_v32  ;;  %24580 = vst [vmem:[#allocation88_spill] sm:$0xff] %v21704_v39  ;;  %v2651_v39 = vld [vmem:[%s20508_s0 + $0x10] sm:$0xff] }
 0x1a8   : > { %13848 = vperm.xlu0 %20371, %v13614_v14   ;;  %13853 = vperm.xlu1 %20372, %v13615_v34   ;;  %v2343_v14 = vld [vmem:[#allocation2 + $0x61] ss:$2 sm:$0xff]  ;;  %v2345_v34 = vld [vmem:[#allocation2 + $0x91] ss:$2 sm:$0xff] }
 0x1a9   : > { %18031 = vmatmul.mubr.msk.f32.gmra.mrb[64].mxu1 %vm850_vm0, %v2061_v62  ;;  %v2341_v62 = vld [vmem:[#allocation2 + $0x31] ss:$2 sm:$0xff] }
 0x1aa   : > { %18033 = vmatprep.mubr.msk.f32.mxu1 %vm20383_vm1, %v24531_v32 }
 0x1ad   : > { %18034 = vmatmul.mubr.msk.f32.gmra.mrb[66].mxu1 %vm850_vm0, %v2063_v51  ;;  %v2347_v51 = vld [vmem:[#allocation2 + $0xc1] ss:$2 sm:$0xff] }
 0x1ae   : > { %18036 = vmatprep.mubr.msk.f32.mxu1 %vm20383_vm1, %v24531_v32 }
 0x1b1   : > { %18037 = vmatmul.mubr.msk.f32.gmra.mrb[68].mxu1 %vm850_vm0, %v2065_v16  ;;  %v2351_v16 = vld [vmem:[#allocation2 + $0x121] ss:$2 sm:$0xff] }
 0x1b2   : > { %18064 = vmatprep.mubr.msk.f32.mxu1 %vm20383_vm1, %v24531_v32 }
 0x1b5   : > { %18065 = vmatmul.mubr.msk.f32.vlgmr.msra.gmra.mrb[70].mxu1 %vm850_vm0, %v2341_v62  ;;  %v2353_v62 = vld [vmem:[#allocation2 + $0x151] ss:$2 sm:$0xff] }
 0x1b6   : > { %18109 = vmatpush3.msra.mxu1 %v2737_v2  ;;  %18067 = vmatprep.mubr.msk.f32.mxu1 %vm20383_vm1, %v24531_v32  ;;  %v2349_v2 = vld [vmem:[#allocation2 + $0xf1] ss:$2 sm:$0xff] }
 0x1b9   : > { %18068 = vmatmul.mubr.msk.f32.gmra.mrb[72].mxu1 %vm850_vm0, %v2343_v14  ;;  %v2649_v14 = vld [vmem:[%s20508_s0] sm:$0xff] }
 0x1ba   : > { %18070 = vmatprep.mubr.msk.f32.mxu1 %vm20383_vm1, %v24531_v32 }
 0x1bd   : > { %18071 = vmatmul.mubr.msk.f32.gmra.mrb[74].mxu1 %vm850_vm0, %v2345_v34 }
 0x1be   : > { %18073 = vmatprep.mubr.msk.f32.mxu1 %vm20383_vm1, %v24531_v32 }
 0x1c1   : > { %18074 = vmatmul.mubr.msk.f32.gmra.mrb[76].mxu1 %vm850_vm0, %v2347_v51 }
 0x1c2   : > { %18076 = vmatprep.mubr.msk.f32.mxu1 %vm20383_vm1, %v24531_v32 }
 0x1c5   : > { %18077 = vmatmul.mubr.msk.f32.gmra.mrb[78].mxu1 %vm850_vm0, %v2349_v2  ;;  %v2650_v2 = vld [vmem:[%s20508_s0 + $0x8] sm:$0xff] }
 0x1c6   : > { %18079 = vmatprep.mubr.msk.f32.mxu1 %vm20383_vm1, %v24531_v32 }
 0x1c9   : > { %18080 = vmatmul.mubr.msk.f32.gmra.mrb[80].mxu1 %vm850_vm0, %v2351_v16  ;;  %v2652_v16 = vld [vmem:[%s20508_s0 + $0x18] sm:$0xff] }
 0x1ca   : > { %18082 = vmatprep.mubr.msk.f32.mxu1 %vm20383_vm1, %v24531_v32 }
 0x1cc   : > { %v21731_v34 = vpop.f32.mrb[0].mxu1 }
 0x1cd   : > { %v17905_v51 = vpop.f32.mrb[1].mxu1  ;;  %18083 = vmatmul.mubr.msk.f32.gmra.mrb[82].mxu1 %vm850_vm0, %v2353_v62  ;;  %v2654_v62 = vld [vmem:[%s20508_s0 + $0x28] sm:$0xff] }
 0x1ce   : > { %18110 = vmatprep.mubr.msk.f32.mxu1 %vm850_vm0, %v2649_v14  ;;  %v2655_v14 = vld [vmem:[%s20508_s0 + $0x30] sm:$0xff] }
 0x1d1   : > { %18111 = vmatmul.mubr.msk.f32.vlgmr.msra.gmra.mrb[84].mxu1 %vm850_vm0, %v2650_v2 }
 0x1d2   : > { %18113 = vmatprep.mubr.msk.f32.mxu1 %vm850_vm0, %v2651_v39  ;;  %v2656_v39 = vld [vmem:[%s20508_s0 + $0x38] sm:$0xff] }
 0x1d4   : > { %v21741_v26 = vpop.f32.mrb[48].mxu0 }
 0x1d5   : > { %v17997_v32 = vpop.f32.mrb[49].mxu0  ;;  %18114 = vmatmul.mubr.msk.f32.gmra.mrb[86].mxu1 %vm850_vm0, %v2652_v16 }
 0x1d6   : > { %18116 = vmatprep.mubr.msk.f32.mxu1 %vm850_vm0, %v2653_v30  ;;  %v2658_v32 = vld [vmem:[%s20508_s0 + $0x48] sm:$0xff]  ;;  %v2659_v30 = vld [vmem:[%s20508_s0 + $0x50] sm:$0xff] }
 0x1d8   : > { %v21747_v51 = vpop.f32.mrb[2].mxu1 }
 0x1d9   : > { %v17908_v2 = vpop.f32.mrb[3].mxu1  ;;  %18117 = vmatmul.mubr.msk.f32.gmra.mrb[88].mxu1 %vm850_vm0, %v2654_v62  ;;  %v2660_v62 = vld [vmem:[%s20508_s0 + $0x58] sm:$0xff] }
 0x1da   : > { %18119 = vmatprep.mubr.msk.f32.mxu1 %vm850_vm0, %v2655_v14  ;;  %v2661_v14 = vld [vmem:[%s20508_s0 + $0x60] sm:$0xff] }
 0x1dd   : > { %18120 = vmatmul.mubr.msk.f32.gmra.mrb[90].mxu1 %vm850_vm0, %v2656_v39 }
 0x1de   : > { %18122 = vmatprep.mubr.msk.f32.mxu1 %vm850_vm0, %v2657_v38  ;;  %v2662_v38 = vld [vmem:[%s20508_s0 + $0x68] sm:$0xff] }
 0x1e0   : > { %v21757_v16 = vpop.f32.mrb[50].mxu0 }
 0x1e1   : > { %v18000_v50 = vpop.f32.mrb[51].mxu0  ;;  %18123 = vmatmul.mubr.msk.f32.gmra.mrb[92].mxu1 %vm850_vm0, %v2658_v32  ;;  %v2665_v32 = vld [vmem:[%s20508_s0 + $0x80] sm:$0xff] }
 0x1e2   : > { %18125 = vmatprep.mubr.msk.f32.mxu1 %vm850_vm0, %v2659_v30  ;;  %v2664_v50 = vld [vmem:[%s20508_s0 + $0x78] sm:$0xff] }
 0x1e4   : > { %v21763_v2 = vpop.f32.mrb[4].mxu1 }
 0x1e5   : > { %v17911_v39 = vpop.f32.mrb[5].mxu1  ;;  %18126 = vmatmul.mubr.msk.f32.gmra.mrb[94].mxu1 %vm850_vm0, %v2660_v62  ;;  %v2666_v62 = vld [vmem:[%s20508_s0 + $0x88] sm:$0xff] }
 0x1e6   : > { %18128 = vmatprep.mubr.msk.f32.mxu1 %vm850_vm0, %v2661_v14  ;;  %v2667_v14 = vld [vmem:[%s20508_s0 + $0x90] sm:$0xff] }
 0x1e9   : > { %18129 = vmatmul.mubr.msk.f32.gmra.mrb[96].mxu1 %vm850_vm0, %v2662_v38 }
 0x1ea   : > { %18131 = vmatprep.mubr.msk.f32.mxu1 %vm850_vm0, %v2663_v22  ;;  %v2668_v22 = vld [vmem:[%s20508_s0 + $0x98] sm:$0xff] }
 0x1ec   : > { %v21773_v30 = vpop.f32.mrb[52].mxu0 }
 0x1ed   : > { %v18003_v43 = vpop.f32.mrb[53].mxu0  ;;  %18132 = vmatmul.mubr.msk.f32.gmra.mrb[98].mxu1 %vm850_vm0, %v2664_v50  ;;  %v2671_v50 = vld [vmem:[%s20508_s0 + $0xb0] sm:$0xff] }
 0x1ee   : > { %18134 = vmatprep.mubr.msk.f32.mxu1 %vm850_vm0, %v2665_v32  ;;  %v2670_v43 = vld [vmem:[%s20508_s0 + $0xa8] sm:$0xff] }
 0x1f0   : > { %v21779_v39 = vpop.f32.mrb[6].mxu1 }
 0x1f1   : > { %v17914_v38 = vpop.f32.mrb[7].mxu1  ;;  %18135 = vmatmul.mubr.msk.f32.gmra.mrb[100].mxu1 %vm850_vm0, %v2666_v62  ;;  %v2672_v62 = vld [vmem:[%s20508_s0 + $0xb8] sm:$0xff] }
 0x1f2   : > { %18137 = vmatprep.mubr.msk.f32.mxu1 %vm850_vm0, %v2667_v14  ;;  %v2673_v14 = vld [vmem:[%s20508_s0 + $0xc0] sm:$0xff] }
 0x1f5   : > { %18138 = vmatmul.mubr.msk.f32.gmra.mrb[102].mxu1 %vm850_vm0, %v2668_v22 }
 0x1f6   : > { %18140 = vmatprep.mubr.msk.f32.mxu1 %vm850_vm0, %v2669_v18  ;;  %v2674_v18 = vld [vmem:[%s20508_s0 + $0xc8] sm:$0xff] }
 0x1f8   : > { %v21789_v32 = vpop.f32.mrb[54].mxu0 }
 0x1f9   : > { %v18006_v46 = vpop.f32.mrb[55].mxu0  ;;  %18141 = vmatmul.mubr.msk.f32.gmra.mrb[104].mxu1 %vm850_vm0, %v2670_v43  ;;  %v2677_v43 = vld [vmem:[%s20508_s0 + $0xe0] sm:$0xff] }
 0x1fa   : > { %18143 = vmatprep.mubr.msk.f32.mxu1 %vm850_vm0, %v2671_v50  ;;  %v2676_v46 = vld [vmem:[%s20508_s0 + $0xd8] sm:$0xff] }
 0x1fc   : > { %v21795_v38 = vpop.f32.mrb[8].mxu1 }
 0x1fd   : > { %v17917_v22 = vpop.f32.mrb[9].mxu1  ;;  %18144 = vmatmul.mubr.msk.f32.gmra.mrb[106].mxu1 %vm850_vm0, %v2672_v62 }
 0x1fe   : > { %18146 = vmatprep.mubr.msk.f32.mxu1 %vm850_vm0, %v2673_v14  ;;  %v2678_v14 = vld [vmem:[%s20508_s0 + $0xe8] sm:$0xff]  ;;  %v2679_v22 = vld [vmem:[%s20508_s0 + $0xf0] sm:$0xff] }
 0x201   : > { %18147 = vmatmul.mubr.msk.f32.gmra.mrb[108].mxu1 %vm850_vm0, %v2674_v18 }
 0x202   : > { %18149 = vmatprep.mubr.msk.f32.mxu1 %vm850_vm0, %v2675_v28 }
 0x204   : > { %v21805_v50 = vpop.f32.mrb[56].mxu0 }
 0x205   : > { %v18009_v62 = vpop.f32.mrb[57].mxu0  ;;  %18150 = vmatmul.mubr.msk.f32.gmra.mrb[110].mxu1 %vm850_vm0, %v2676_v46  ;;  %v15526_v46 = vld [vmem:[%s20508_s0 + $0x63] ss:$2 sm:$0x7f] }
 0x206   : > { %18152 = vmatprep.mubr.msk.f32.mxu1 %vm850_vm0, %v2677_v43  ;;  %v2680_v62 = vld [vmem:[%s20508_s0 + $0xf8] sm:$0xff]  ;;  %v15527_v43 = vld [vmem:[%s20508_s0 + $0xa3] ss:$2 sm:$0x7f]  ;;  %v630_v60 = vmax.f32 %v15526_v46, %v15533_v8  ;;  %v635_v46 = vmax.f32 %v15531_v24, %v15538_v12 }
 0x207   : > { %v631_v54 = vmax.f32 %v15527_v43, %v15534_v6  ;;  %v2684_v8 = vld [vmem:[%s20508_s0 + $0x118] sm:$0xff]  ;;  %v15546_v6 = vld [vmem:[%s20508_s0 + $0x1e5] ss:$2 sm:$0x7f] }
 0x208   : > { %v21811_v28 = vpop.f32.mrb[10].mxu1  ;;  %v651_v47 = vmax.f32 %v630_v60, %v15540_v10  ;;  %v15548_v43 = vld [vmem:[%s20508_s0 + $0xc3] ss:$2 sm:$0x7f]  ;;  %v656_v10 = vmax.f32 %v635_v46, %v15545_v41 }
 0x209   : > { %v17920_v18 = vpop.f32.mrb[11].mxu1  ;;  %18153 = vmatmul.mubr.msk.f32.gmra.mrb[112].mxu1 %vm850_vm0, %v2678_v14  ;;  %v15536_v14 = vld [vmem:[%s20508_s0 + $0x124] ss:$2 sm:$0x7f] }
 0x20a   : > { %18155 = vmatprep.mubr.msk.f32.mxu1 %vm850_vm0, %v2679_v22  ;;  %v15530_v18 = vld [vmem:[%s20508_s0 + $0x163] ss:$2 sm:$0x7f]  ;;  %v2683_v22 = vld [vmem:[%s20508_s0 + $0x110] sm:$0xff]  ;;  %v633_v45 = vmax.f32 %v15529_v35, %v15536_v14 }
 0x20b   : > { %v634_v40 = vmax.f32 %v15530_v18, %v15537_v33  ;;  %v15547_v35 = vld [vmem:[%s20508_s0 + $0x83] ss:$2 sm:$0x7f]  ;;  %v652_v33 = vmax.f32 %v631_v54, %v15541_v0  ;;  %v653_v18 = vmax.f32 %v632_v48, %v15542_v52  ;;  %v657_v48 = vmax.f32 %v636_v42, %v15546_v6  ;;  %v15557_v41 = vld [vmem:[%s20508_s0 + $0x144] ss:$2 sm:$0x7f] }
 0x20c   : > { %v654_v37 = vmax.f32 %v633_v45, %v15543_v49  ;;  %v15551_v24 = vld [vmem:[%s20508_s0 + $0x183] ss:$2 sm:$0x7f]  ;;  %v673_v0 = vmax.f32 %v651_v47, %v15547_v35  ;;  %v15554_v45 = vld [vmem:[%s20508_s0 + $0x84] ss:$2 sm:$0x7f] }
 0x20d   : > { %18156 = vmatmul.mubr.msk.f32.gmra.mrb[114].mxu1 %vm850_vm0, %v2680_v62  ;;  %v655_v12 = vmax.f32 %v634_v40, %v15544_v44  ;;  %v2686_v60 = vld [vmem:[%s20508_s0 + $0x128] sm:$0xff]  ;;  %v674_v40 = vmax.f32 %v652_v33, %v15548_v43  ;;  %v2688_v6 = vld [vmem:[%s20508_s0 + $0x138] sm:$0xff]  ;;  %v2689_v42 = vld [vmem:[%s20508_s0 + $0x140] sm:$0xff] }
 0x20e   : > { %18158 = vmatprep.mubr.msk.f32.mxu1 %vm850_vm0, %v2681_v56  ;;  %v2685_v56 = vld [vmem:[%s20508_s0 + $0x120] sm:$0xff] }
 0x20f   : > { %v15552_v54 = vld [vmem:[%s20508_s0 + $0x1c3] ss:$2 sm:$0x7f]  ;;  %v15555_v49 = vld [vmem:[%s20508_s0 + $0xc4] ss:$2 sm:$0x7f]  ;;  %v677_v29 = vmax.f32 %v655_v12, %v15551_v24 }
 0x210   : > { %v21840_v62 = vpop.f32.mrb[58].mxu0  ;;  %v15553_v52 = vld [vmem:[%s20508_s0 + $0x203] ss:$2 sm:$0x7f]  ;;  %v678_v47 = vmax.f32 %v656_v10, %v15552_v54 }
 0x211   : > { %v18012_v36 = vpop.f32.mrb[59].mxu0  ;;  %18159 = vmatmul.mubr.msk.f32.gmra.mrb[116].mxu1 %vm850_vm0, %v2682_v58  ;;  %v15550_v58 = vld [vmem:[%s20508_s0 + $0x143] ss:$2 sm:$0x7f]  ;;  %v679_v43 = vmax.f32 %v657_v48, %v15553_v52 }
 0x212   : > { %18161 = vmatprep.mubr.msk.f32.mxu1 %vm850_vm0, %v2683_v22  ;;  %v15549_v36 = vld [vmem:[%s20508_s0 + $0x103] ss:$2 sm:$0x7f]  ;;  %v15558_v35 = vld [vmem:[%s20508_s0 + $0x184] ss:$2 sm:$0x7f] }
 0x213   : > { %v675_v44 = vmax.f32 %v653_v18, %v15549_v36  ;;  %v15560_v33 = vld [vmem:[%s20508_s0 + $0x204] ss:$2 sm:$0x7f]  ;;  %v694_v18 = vmax.f32 %v673_v0, %v15554_v45  ;;  %v695_v36 = vmax.f32 %v674_v40, %v15555_v49  ;;  %v15562_v12 = vld [vmem:[%s20508_s0 + $0xc5] ss:$2 sm:$0x7f] }
 0x214   : > { %v21852_v14 = vpop.f32.mrb[12].mxu1  ;;  %v2690_v10 = vld [vmem:[%s20508_s0 + $0x148] sm:$0xff]  ;;  %v2691_v45 = vld [vmem:[%s20508_s0 + $0x150] sm:$0xff]  ;;  %v700_v49 = vmax.f32 %v679_v43, %v15560_v33 }
 0x215   : > { %v17923_v22 = vpop.f32.mrb[13].mxu1  ;;  %18162 = vmatmul.mubr.msk.f32.gmra.mrb[118].mxu1 %vm850_vm0, %v2684_v8  ;;  %v15569_v43 = vld [vmem:[%s20508_s0 + $0xe3] ss:$2 sm:$0x7f] }
 0x216   : > { %18164 = vmatprep.mubr.msk.f32.mxu1 %vm850_vm0, %v2685_v56  ;;  %v676_v22 = vmax.f32 %v654_v37, %v15550_v58  ;;  %v15559_v37 = vld [vmem:[%s20508_s0 + $0x1c4] ss:$2 sm:$0x7f]  ;;  %v15561_v58 = vld [vmem:[%s20508_s0 + $0x85] ss:$2 sm:$0x7f] }
 0x217   : > { %v699_v40 = vmax.f32 %v678_v47, %v15559_v37  ;;  %v2692_v47 = vld [vmem:[%s20508_s0 + $0x158] sm:$0xff] }
 0x218   : > { %v1586_v8 = vpop.f32.mrb[14].mxu1  ;;  %v697_v54 = vmax.f32 %v676_v22, %v15557_v41  ;;  %v15566_v22 = vld [vmem:[%s20508_s0 + $0x1c5] ss:$2 sm:$0x7f] }
 0x219   : > { %v21866_v56 = vadd.f32 %v1586_v8, %v21731_v34  ;;  %v17928_v46 = vpop.f32.mrb[15].mxu1  ;;  %18165 = vmatmul.mubr.msk.f32.gmra.mrb[120].mxu1 %vm850_vm0, %v2686_v60  ;;  %v696_v34 = vmax.f32 %v675_v44, %v15556_v20  ;;  %v698_v8 = vmax.f32 %v677_v29, %v15558_v35  ;;  %v15564_v44 = vld [vmem:[%s20508_s0 + $0x145] ss:$2 sm:$0x7f]  ;;  %v715_v29 = vmax.f32 %v694_v18, %v15561_v58 }
 0x21a   : > { %18167 = vmatprep.mubr.msk.f32.mxu1 %vm850_vm0, %v2687_v4  ;;  %v15563_v4 = vld [vmem:[%s20508_s0 + $0x105] ss:$2 sm:$0x7f]  ;;  %v718_v37 = vmax.f32 %v697_v54, %v15564_v44 }
 0x21b   : > { %v15565_v20 = vld [vmem:[%s20508_s0 + $0x185] ss:$2 sm:$0x7f]  ;;  %v717_v46 = vmax.f32 %v696_v34, %v15563_v4  ;;  %v720_v34 = vmax.f32 %v699_v40, %v15566_v22 }
 0x21c   : > { %v1591_v24 = vpop.f32.mrb[16].mxu1  ;;  %v21877_v60 = vpop.f32.mrb[60].mxu0  ;;  %v15567_v41 = vld [vmem:[%s20508_s0 + $0x205] ss:$2 sm:$0x7f] }
 0x21d   : > { %v21882_v48 = vadd.f32 %v1591_v24, %v21747_v51  ;;  %v17931_v52 = vpop.f32.mrb[17].mxu1  ;;  %18168 = vmatmul.mubr.msk.f32.gmra.mrb[122].mxu1 %vm850_vm0, %v2688_v6  ;;  %v18015_v0 = vpop.f32.mrb[61].mxu0  ;;  %v716_v51 = vmax.f32 %v695_v36, %v15562_v12  ;;  %v15568_v35 = vld [vmem:[%s20508_s0 + $0xa3] ss:$2 sm:$0x7f]  ;;  %v721_v4 = vmax.f32 %v700_v49, %v15567_v41 }
 0x21e   : > { %18170 = vmatprep.mubr.msk.f32.mxu1 %vm850_vm0, %v2689_v42  ;;  %v719_v42 = vmax.f32 %v698_v8, %v15565_v20  ;;  %v2693_v36 = vld [vmem:[%s20508_s0 + $0x160] sm:$0xff]  ;;  %v737_v8 = vmax.f32 %v715_v29, %v15568_v35  ;;  %v2694_v40 = vld [vmem:[%s20508_s0 + $0x168] sm:$0xff] }
 0x21f   : > { %v15570_v12 = vld [vmem:[%s20508_s0 + $0x123] ss:$2 sm:$0x7f]  ;;  %v738_v44 = vmax.f32 %v716_v51, %v15569_v43  ;;  %v15575_v49 = vld [vmem:[%s20508_s0 + $0xa4] ss:$2 sm:$0x7f] }
 0x220   : > { %v1596_v6 = vpop.f32.mrb[18].mxu1  ;;  %v21892_v24 = vpop.f32.mrb[62].mxu0  ;;  %v15571_v52 = vld [vmem:[%s20508_s0 + $0x163] ss:$2 sm:$0x7f]  ;;  %v739_v20 = vmax.f32 %v717_v46, %v15570_v12  ;;  %v2695_v51 = vld [vmem:[%s20508_s0 + $0x170] sm:$0xff] }
 0x221   : > { %v21897_v33 = vadd.f32 %v1596_v6, %v21763_v2  ;;  %v17934_v18 = vpop.f32.mrb[19].mxu1  ;;  %v18043_v58 = vpop.f32.mrb[63].mxu0  ;;  %18171 = vmatmul.mubr.msk.f32.gmra.mrb[124].mxu1 %vm850_vm0, %v2690_v10  ;;  %v15572_v54 = vld [vmem:[%s20508_s0 + $0x1a3] ss:$2 sm:$0x7f]  ;;  %v740_v22 = vmax.f32 %v718_v37, %v15571_v52 }
 0x222   : > { %18173 = vmatprep.mubr.msk.f32.mxu1 %vm850_vm0, %v2691_v45  ;;  %v15573_v0 = vld [vmem:[%s20508_s0 + $0x1e3] ss:$2 sm:$0x7f]  ;;  %v741_v45 = vmax.f32 %v719_v42, %v15572_v54  ;;  %v15576_v43 = vld [vmem:[%s20508_s0 + $0xe4] ss:$2 sm:$0x7f]  ;;  %v758_v58 = vmax.f32 %v737_v8, %v15575_v49 }
 0x223   : > { %v15574_v2 = vld [vmem:[%s20508_s0 + $0x223] ss:$2 sm:$0x7f]  ;;  %v742_v46 = vmax.f32 %v720_v34, %v15573_v0  ;;  %v15577_v42 = vld [vmem:[%s20508_s0 + $0x124] ss:$2 sm:$0x7f]  ;;  %v759_v52 = vmax.f32 %v738_v44, %v15576_v43 }
 0x224   : > { %v1601_v6 = vpop.f32.mrb[20].mxu1  ;;  %v21907_v10 = vpop.f32.mrb[64].mxu0  ;;  %v743_v37 = vmax.f32 %v721_v4, %v15574_v2  ;;  %v15578_v18 = vld [vmem:[%s20508_s0 + $0x164] ss:$2 sm:$0x7f] }
 0x225   : > { %v21912_v41 = vadd.f32 %v1601_v6, %v21779_v39  ;;  %v17937_v29 = vpop.f32.mrb[21].mxu1  ;;  %v18046_v35 = vpop.f32.mrb[65].mxu0  ;;  %18174 = vmatmul.mubr.msk.f32.gmra.mrb[126].mxu1 %vm850_vm0, %v2692_v47  ;;  %v15579_v39 = vld [vmem:[%s20508_s0 + $0x1a4] ss:$2 sm:$0x7f]  ;;  %v760_v47 = vmax.f32 %v739_v20, %v15577_v42  ;;  %v761_v0 = vmax.f32 %v740_v22, %v15578_v18 }
 0x226   : > { %18176 = vmatprep.mubr.msk.f32.mxu1 %vm850_vm0, %v2693_v36  ;;  %v15580_v12 = vld [vmem:[%s20508_s0 + $0x1e4] ss:$2 sm:$0x7f]  ;;  %v2696_v29 = vld [vmem:[%s20508_s0 + $0x178] sm:$0xff]  ;;  %v762_v36 = vmax.f32 %v741_v45, %v15579_v39 }
 0x227   : > { %v15581_v34 = vld [vmem:[%s20508_s0 + $0x224] ss:$2 sm:$0x7f]  ;;  %v763_v20 = vmax.f32 %v742_v46, %v15580_v12  ;;  %v15582_v49 = vld [vmem:[%s20508_s0 + $0xa5] ss:$2 sm:$0x7f] }
 0x228   : > { %v1606_v54 = vpop.f32.mrb[22].mxu1  ;;  %v21925_v6 = vpop.f32.mrb[66].mxu0  ;;  %v2697_v44 = vld [vmem:[%s20508_s0 + $0x180] sm:$0xff]  ;;  %v764_v22 = vmax.f32 %v743_v37, %v15581_v34  ;;  %v779_v35 = vmax.f32 %v758_v58, %v15582_v49  ;;  %v2700_v49 = vld [vmem:[%s20508_s0 + $0x198] sm:$0xff] }
 0x229   : > { %v21930_v4 = vadd.f32 %v1606_v54, %v21795_v38  ;;  %v17940_v8 = vpop.f32.mrb[23].mxu1  ;;  %v18049_v2 = vpop.f32.mrb[67].mxu0  ;;  %18177 = vmatmul.mubr.msk.f32.gmra.mrb[128].mxu1 %vm850_vm0, %v2694_v40  ;;  %v15583_v38 = vld [vmem:[%s20508_s0 + $0xe5] ss:$2 sm:$0x7f] }
 0x22a   : > { %18179 = vmatprep.mubr.msk.f32.mxu1 %vm850_vm0, %v2695_v51  ;;  %v15584_v45 = vld [vmem:[%s20508_s0 + $0x125] ss:$2 sm:$0x7f]  ;;  %v780_v42 = vmax.f32 %v759_v52, %v15583_v38  ;;  %787 = vst.msk [vmem:[%s21938_s1] sm:$0x7f] %vm786_vm2, %v779_v35 }
 0x22b   : > { %v15585_v43 = vld [vmem:[%s20508_s0 + $0x165] ss:$2 sm:$0x7f]  ;;  %v781_v18 = vmax.f32 %v760_v47, %v15584_v45 }
 0x22c   : > { %v15586_v40 = vld [vmem:[%s20508_s0 + $0x1a5] ss:$2 sm:$0x7f]  ;;  %v1611_v39 = vpop.f32.mrb[24].mxu1  ;;  %v21946_v54 = vpop.f32.mrb[68].mxu0  ;;  %v782_v12 = vmax.f32 %v761_v0, %v15585_v43 }
 0x22d   : > { %v15587_v46 = vld [vmem:[%s20508_s0 + $0x1e5] ss:$2 sm:$0x7f]  ;;  %v783_v51 = vmax.f32 %v762_v36, %v15586_v40  ;;  %v21952_v37 = vadd.f32 %v1611_v39, %v21811_v28  ;;  %v17943_v58 = vpop.f32.mrb[25].mxu1  ;;  %v18052_v52 = vpop.f32.mrb[69].mxu0  ;;  %18180 = vmatmul.mubr.msk.f32.gmra.mrb[130].mxu1 %vm850_vm0, %v2696_v29 }
 0x22e   : > { %v15588_v47 = vld [vmem:[%s20508_s0 + $0x225] ss:$2 sm:$0x7f]  ;;  %v784_v34 = vmax.f32 %v763_v20, %v15587_v46  ;;  %788 = vst.msk [vmem:[%s21938_s1 + $0x8] sm:$0x7f] %vm786_vm2, %v780_v42  ;;  %18182 = vmatprep.mubr.msk.f32.mxu1 %vm850_vm0, %v2697_v44  ;;  %v2704_v58 = vld [vmem:[%s20508_s0 + $0x1b8] sm:$0xff] }
 0x22f   : > { %789 = vst.msk [vmem:[%s21938_s1 + $0x10] sm:$0x7f] %vm786_vm2, %v781_v18  ;;  %v2698_v0 = vld [vmem:[%s20508_s0 + $0x188] sm:$0xff]  ;;  %v785_v36 = vmax.f32 %v764_v22, %v15588_v47  ;;  %790 = vst.msk [vmem:[%s21938_s1 + $0x18] sm:$0x7f] %vm786_vm2, %v782_v12  ;;  %v2699_v28 = vld [vmem:[%s20508_s0 + $0x190] sm:$0xff] }
 0x230   : > { %791 = vst.msk [vmem:[%s21938_s1 + $0x20] sm:$0x7f] %vm786_vm2, %v783_v51  ;;  %792 = vst.msk [vmem:[%s21938_s1 + $0x28] sm:$0x7f] %vm786_vm2, %v784_v34  ;;  %v1616_v29 = vpop.f32.mrb[26].mxu1  ;;  %v21969_v8 = vpop.f32.mrb[70].mxu0 }
 0x231   : > { %793 = vst.msk [vmem:[%s21938_s1 + $0x30] sm:$0x7f] %vm786_vm2, %v785_v36  ;;  %v21974_v2 = vadd.f32 %v1616_v29, %v21852_v14  ;;  %v17946_v44 = vpop.f32.mrb[27].mxu1  ;;  %v18055_v20 = vpop.f32.mrb[71].mxu0  ;;  %18183 = vmatmul.mubr.msk.f32.gmra.mrb[132].mxu1 %vm850_vm0, %v2698_v0  ;;  %v2701_v22 = vld [vmem:[%s20508_s0 + $0x1a0] sm:$0xff]  ;;  %v15847_v35 = vld [vmem:[%s24473_s7 + $0x8] sm:$0xff] }
 0x232   : > { %18185 = vmatprep.mubr.msk.f32.mxu1 %vm850_vm0, %v2699_v28  ;;  %18242 = vmatprep.subr.mxu0 %v15847_v35  ;;  %v2702_v42 = vld [vmem:[%s20508_s0 + $0x1a8] sm:$0xff]  ;;  %v2703_v18 = vld [vmem:[%s20508_s0 + $0x1b0] sm:$0xff]  ;;  %v2705_v52 = vld [vmem:[%s20508_s0 + $0x1c0] sm:$0xff] }
 0x233   : > { %18243 = vmatpush3.msra.mxu0 %v15847_v35  ;;  %v2707_v29 = vld [vmem:[%s20508_s0 + $0x1d0] sm:$0xff]  ;;  %v2709_v35 = vld [vmem:[%s20508_s0 + $0x1e0] sm:$0xff] }
 0x234   : > { %v1723_v38 = vpop.f32.mrb[28].mxu1  ;;  %v21980_v45 = vpop.f32.mrb[72].mxu0 }
 0x235   : > { %v21986_v14 = vadd.f32 %v1723_v38, %v21866_v56  ;;  %v17951_v43 = vpop.f32.mrb[29].mxu1  ;;  %v18058_v40 = vpop.f32.mrb[73].mxu0  ;;  %18186 = vmatmul.mubr.msk.f32.gmra.mrb[134].mxu1 %vm850_vm0, %v2700_v49  ;;  %v2708_v38 = vld [vmem:[%s20508_s0 + $0x1d8] sm:$0xff] }
 0x236   : > { %18188 = vmatprep.mubr.msk.f32.mxu1 %vm850_vm0, %v2701_v22 }
 0x238   : > { %v1728_v39 = vpop.f32.mrb[30].mxu1  ;;  %v21992_v46 = vpop.f32.mrb[74].mxu0 }
 0x239   : > { %v21995_v56 = vadd.f32 %v1728_v39, %v21882_v48  ;;  %v17954_v12 = vpop.f32.mrb[31].mxu1  ;;  %18189 = vmatmul.mubr.msk.f32.gmra.mrb[136].mxu1 %vm850_vm0, %v2702_v42  ;;  %v18061_v51 = vpop.f32.mrb[75].mxu0  ;;  %v2706_v48 = vld [vmem:[%s20508_s0 + $0x1c8] sm:$0xff] }
 0x23a   : > { %18191 = vmatprep.mubr.msk.f32.mxu1 %vm850_vm0, %v2703_v18  ;;  %v2710_v12 = vld [vmem:[%s20508_s0 + $0x1e8] sm:$0xff]  ;;  %v2711_v51 = vld [vmem:[%s20508_s0 + $0x1f0] sm:$0xff] }
 0x23c   : > { %v1733_v47 = vpop.f32.mrb[32].mxu1  ;;  %v22001_v34 = vpop.f32.mrb[76].mxu0 }
 0x23d   : > { %v22004_v0 = vadd.f32 %v1733_v47, %v21897_v33  ;;  %v17957_v36 = vpop.f32.mrb[33].mxu1  ;;  %v18089_v28 = vpop.f32.mrb[77].mxu0  ;;  %18192 = vmatmul.mubr.msk.f32.gmra.mrb[138].mxu1 %vm850_vm0, %v2704_v58 }
 0x23e   : > { %18194 = vmatprep.mubr.msk.f32.mxu1 %vm850_vm0, %v2705_v52  ;;  %v2712_v28 = vld [vmem:[%s20508_s0 + $0x1f8] sm:$0xff] }
 0x240   : > { %v1738_v44 = vpop.f32.mrb[34].mxu1  ;;  %v22010_v20 = vpop.f32.mrb[78].mxu0 }
 0x241   : > { %v17960_v49 = vpop.f32.mrb[35].mxu1  ;;  %v18092_v22 = vpop.f32.mrb[79].mxu0  ;;  %18195 = vmatmul.mubr.msk.f32.gmra.mrb[140].mxu1 %vm850_vm0, %v2706_v48  ;;  %v1760_v33 = vadd.f32 %v1738_v44, %v21912_v41  ;;  %v2713_v48 = vld [vmem:[%s20508_s0 + $0x200] sm:$0xff] }
 0x242   : > { %18197 = vmatprep.mubr.msk.f32.mxu1 %vm850_vm0, %v2707_v29 }
 0x244   : > { %v1743_v43 = vpop.f32.mrb[36].mxu1  ;;  %v22017_v40 = vpop.f32.mrb[80].mxu0 }
 0x245   : > { %v17963_v42 = vpop.f32.mrb[37].mxu1  ;;  %v18095_v18 = vpop.f32.mrb[81].mxu0  ;;  %18198 = vmatmul.mubr.msk.f32.gmra.mrb[142].mxu1 %vm850_vm0, %v2708_v38  ;;  %v1761_v39 = vadd.f32 %v1743_v43, %v21930_v4  ;;  %v2714_v38 = vld [vmem:[%s20508_s0 + $0x208] sm:$0xff] }
 0x246   : > { %18200 = vmatprep.mubr.msk.f32.mxu1 %vm850_vm0, %v2709_v35  ;;  %v2715_v35 = vld [vmem:[%s20508_s0 + $0x210] sm:$0xff] }
 0x248   : > { %v1748_v41 = vpop.f32.mrb[38].mxu1  ;;  %v22024_v58 = vpop.f32.mrb[82].mxu0 }
 0x249   : > { %v17966_v52 = vpop.f32.mrb[39].mxu1  ;;  %v18098_v47 = vpop.f32.mrb[83].mxu0  ;;  %18201 = vmatmul.mubr.msk.f32.gmra.mrb[144].mxu1 %vm850_vm0, %v2710_v12  ;;  %v1762_v36 = vadd.f32 %v1748_v41, %v21952_v37  ;;  %v2717_v41 = vld [vmem:[%s20508_s0 + $0x220] sm:$0xff] }
 0x24a   : > { %18203 = vmatprep.mubr.msk.f32.mxu1 %vm850_vm0, %v2711_v51  ;;  %v2716_v51 = vld [vmem:[%s20508_s0 + $0x218] sm:$0xff] }
 0x24c   : > { %v1753_v4 = vpop.f32.mrb[40].mxu1  ;;  %v22031_v29 = vpop.f32.mrb[84].mxu0 }
 0x24d   : > { %v17969_v44 = vpop.f32.mrb[41].mxu1  ;;  %v18101_v49 = vpop.f32.mrb[85].mxu0  ;;  %18204 = vmatmul.mubr.msk.f32.gmra.mrb[146].mxu1 %vm850_vm0, %v2712_v28  ;;  %v1763_v22 = vadd.f32 %v1753_v4, %v21974_v2  ;;  %v2718_v4 = vld [vmem:[%s20508_s0 + $0x228] sm:$0xff] }
 0x24e   : > { %18206 = vmatprep.mubr.msk.f32.mxu1 %vm850_vm0, %v2713_v48  ;;  %v2719_v44 = vld [vmem:[%s20508_s0 + $0x230] sm:$0xff] }
 0x250   : > { %v1867_v37 = vpop.f32.mrb[42].mxu1  ;;  %v22038_v43 = vpop.f32.mrb[86].mxu0 }
 0x251   : > { %v1901_v42 = vadd.f32 %v1867_v37, %v21986_v14  ;;  %v17974_v18 = vpop.f32.mrb[43].mxu1  ;;  %v18104_v12 = vpop.f32.mrb[87].mxu0  ;;  %18207 = vmatmul.mubr.msk.f32.gmra.mrb[148].mxu1 %vm850_vm0, %v2714_v38  ;;  %v2721_v37 = vld [vmem:[%s20508_s0 + $0x240] sm:$0xff] }
 0x252   : > { %18209 = vmatprep.mubr.msk.f32.mxu1 %vm850_vm0, %v2715_v35 }
 0x253   : > { %v2045_v2 = vadd.f32 %v21741_v26, %v1901_v42 }
 0x254   : > { %v1872_v52 = vpop.f32.mrb[44].mxu1  ;;  %v22046_v47 = vpop.f32.mrb[88].mxu0 }
 0x255   : > { %v1902_v28 = vadd.f32 %v1872_v52, %v21995_v56  ;;  %v17977_v48 = vpop.f32.mrb[45].mxu1  ;;  %18210 = vmatmul.mubr.msk.f32.gmra.mrb[150].mxu1 %vm850_vm0, %v2716_v51  ;;  %v18107_v14 = vpop.f32.mrb[89].mxu0  ;;  %v2720_v56 = vld [vmem:[%s20508_s0 + $0x238] sm:$0xff] }
 0x256   : > { %18212 = vmatprep.mubr.msk.f32.mxu1 %vm850_vm0, %v2717_v41  ;;  %v2725_v14 = vld [vmem:[%s20508_s0 + $0x260] sm:$0xff] }
 0x257   : > { %v2046_v49 = vadd.f32 %v21757_v16, %v1902_v28  ;;  %v2722_v16 = vld [vmem:[%s20508_s0 + $0x248] sm:$0xff] }
 0x258   : > { %v1877_v26 = vpop.f32.mrb[46].mxu1 }
 0x259   : > { %v1903_v38 = vadd.f32 %v1877_v26, %v22004_v0  ;;  %v17980_v35 = vpop.f32.mrb[47].mxu1  ;;  %18213 = vmatmul.mubr.msk.f32.gmra.mrb[152].mxu1 %vm850_vm0, %v2718_v4  ;;  %v2723_v0 = vld [vmem:[%s20508_s0 + $0x250] sm:$0xff]  ;;  %v2726_v26 = vld [vmem:[%s20508_s0 + $0x268] sm:$0xff] }
 0x25a   : > { %18215 = vmatprep.mubr.msk.f32.mxu1 %vm850_vm0, %v2719_v44 }
 0x25b   : > { %v2047_v42 = vadd.f32 %v21773_v30, %v1903_v38  ;;  %v2724_v30 = vld [vmem:[%s20508_s0 + $0x258] sm:$0xff]  ;;  %v2727_v38 = vld [vmem:[%s20508_s0 + $0x270] sm:$0xff] }
 0x25c   : > { %v1882_v18 = vpop.f32.mrb[48].mxu1 }
 0x25d   : > { %v1904_v12 = vadd.f32 %v1882_v18, %v1760_v33  ;;  %v17983_v51 = vpop.f32.mrb[49].mxu1  ;;  %18216 = vmatmul.mubr.msk.f32.gmra.mrb[154].mxu1 %vm850_vm0, %v2720_v56  ;;  %v22071_v33 = vld [vmem:[%s24473_s7] sm:$0xff] }
 0x25e   : > { %18218 = vmatprep.mubr.msk.f32.mxu1 %vm850_vm0, %v2721_v37  ;;  %18343 = vmatprep.subr.mxu0 %v22071_v33 }
 0x25f   : > { %v2048_v41 = vadd.f32 %v21789_v32, %v1904_v12 }
 0x260   : > { %v1887_v52 = vpop.f32.mrb[50].mxu1 }
 0x261   : > { %v1905_v28 = vadd.f32 %v1887_v52, %v1761_v39  ;;  %v17986_v48 = vpop.f32.mrb[51].mxu1  ;;  %18219 = vmatmul.mubr.msk.f32.gmra.mrb[156].mxu1 %vm850_vm0, %v2722_v16 }
 0x262   : > { %18221 = vmatprep.mubr.msk.f32.mxu1 %vm850_vm0, %v2723_v0 }
 0x263   : > { %v2049_v4 = vadd.f32 %v21805_v50, %v1905_v28  ;;  %v2728_v50 = vld [vmem:[%s20508_s0 + $0x278] sm:$0xff] }
 0x264   : > { %v1892_v32 = vpop.f32.mrb[52].mxu1 }
 0x265   : > { %v1906_v39 = vadd.f32 %v1892_v32, %v1762_v36  ;;  %v17989_v44 = vpop.f32.mrb[53].mxu1  ;;  %18222 = vmatmul.mubr.msk.f32.gmra.mrb[158].mxu1 %vm850_vm0, %v2724_v30  ;;  %v2729_v36 = vld [vmem:[%s20508_s0 + $0x280] sm:$0xff] }
 0x266   : > { %18224 = vmatprep.mubr.msk.f32.mxu1 %vm850_vm0, %v2725_v14 }
 0x267   : > { %v2050_v35 = vadd.f32 %v21840_v62, %v1906_v39  ;;  %v2730_v62 = vld [vmem:[%s20508_s0 + $0x288] sm:$0xff] }
 0x268   : > { %v1897_v56 = vpop.f32.mrb[54].mxu1 }
 0x269   : > { %v1907_v37 = vadd.f32 %v1897_v56, %v1763_v22  ;;  %v17992_v18 = vpop.f32.mrb[55].mxu1  ;;  %18225 = vmatmul.mubr.msk.f32.gmra.mrb[160].mxu1 %vm850_vm0, %v2726_v26  ;;  %v2731_v22 = vld [vmem:[%s20508_s0 + $0x290] sm:$0xff] }
 0x26a   : > { %18227 = vmatprep.mubr.msk.f32.mxu1 %vm850_vm0, %v2727_v38  ;;  %v2735_v26 = vld [vmem:[%s20508_s0 + $0x2b0] sm:$0xff]  ;;  %v2736_v18 = vld [vmem:[%s20508_s0 + $0x2b8] sm:$0xff] }
 0x26b   : > { %v2051_v12 = vadd.f32 %v21877_v60, %v1907_v37  ;;  %v2732_v60 = vld [vmem:[%s20508_s0 + $0x298] sm:$0xff] }
 0x26c   : > { %v2155_v51 = vpop.f32.mrb[56].mxu1 }
 0x26d   : > { %v2189_v16 = vadd.f32 %v2155_v51, %v2045_v2  ;;  %v18020_v0 = vpop.f32.mrb[57].mxu1  ;;  %18228 = vmatmul.mubr.msk.f32.gmra.mrb[162].mxu1 %vm850_vm0, %v2728_v50  ;;  %v2733_v2 = vld [vmem:[%s20508_s0 + $0x2a0] sm:$0xff] }
 0x26e   : > { %18230 = vmatprep.mubr.msk.f32.mxu1 %vm850_vm0, %v2729_v36 }
 0x26f   : > { %v2333_v52 = vadd.f32 %v21892_v24, %v2189_v16  ;;  %v2734_v24 = vld [vmem:[%s20508_s0 + $0x2a8] sm:$0xff] }
 0x270   : > { %v2160_v28 = vpop.f32.mrb[58].mxu1 }
 0x271   : > { %v2190_v48 = vadd.f32 %v2160_v28, %v2046_v49  ;;  %v18023_v30 = vpop.f32.mrb[59].mxu1  ;;  %18231 = vmatmul.mubr.msk.f32.gmra.mrb[164].mxu1 %vm850_vm0, %v2730_v62 }
 0x272   : > { %18233 = vmatprep.mubr.msk.f32.mxu1 %vm850_vm0, %v2731_v22 }
 0x273   : > { %v2334_v14 = vadd.f32 %v21907_v10, %v2190_v48 }
 0x274   : > { %v2165_v32 = vpop.f32.mrb[60].mxu1 }
 0x275   : > { %v2191_v39 = vadd.f32 %v2165_v32, %v2047_v42  ;;  %v18026_v44 = vpop.f32.mrb[61].mxu1  ;;  %18234 = vmatmul.mubr.msk.f32.gmra.mrb[166].mxu1 %vm850_vm0, %v2732_v60 }
 0x276   : > { %18236 = vmatprep.mubr.msk.f32.mxu1 %vm850_vm0, %v2733_v2 }
 0x277   : > { %v2335_v49 = vadd.f32 %v21925_v6, %v2191_v39 }
 0x278   : > { %v2170_v38 = vpop.f32.mrb[62].mxu1 }
 0x279   : > { %v2192_v56 = vadd.f32 %v2170_v38, %v2048_v41  ;;  %v18029_v37 = vpop.f32.mrb[63].mxu1  ;;  %18237 = vmatmul.mubr.msk.f32.gmra.mrb[168].mxu1 %vm850_vm0, %v2734_v24 }
 0x27a   : > { %18239 = vmatprep.mubr.msk.f32.mxu1 %vm850_vm0, %v2735_v26 }
 0x27b   : > { %v2336_v10 = vadd.f32 %v21946_v54, %v2192_v56 }
 0x27c   : > { %v2175_v42 = vpop.f32.mrb[64].mxu1 }
 0x27d   : > { %v2193_v50 = vadd.f32 %v2175_v42, %v2049_v4  ;;  %v18032_v36 = vpop.f32.mrb[65].mxu1  ;;  %18240 = vmatmul.mubr.msk.f32.gmra.mrb[170].mxu1 %vm850_vm0, %v2736_v18  ;;  %v15757_v4 = vld [vmem:[%s24470_s4] ss:$0 sm:$0xff] }
 0x27f   : > { %v2337_v51 = vadd.f32 %v21969_v8, %v2193_v50 }
 0x280   : > { %v2180_v16 = vpop.f32.mrb[66].mxu1 }
 0x281   : > { %v2194_v6 = vadd.f32 %v2180_v16, %v2050_v35  ;;  %v18035_v0 = vpop.f32.mrb[67].mxu1 }
 0x283   : > { %v2338_v41 = vadd.f32 %v21980_v45, %v2194_v6 }
 0x284   : > { %v2185_v62 = vpop.f32.mrb[68].mxu1 }
 0x285   : > { %v2195_v22 = vadd.f32 %v2185_v62, %v2051_v12  ;;  %v18038_v28 = vpop.f32.mrb[69].mxu1 }
 0x287   : > { %v2339_v48 = vadd.f32 %v21992_v46, %v2195_v22 }
 0x288   : > { %v2443_v30 = vpop.f32.mrb[70].mxu1 }
 0x289   : > { %v2477_v54 = vadd.f32 %v2443_v30, %v2333_v52  ;;  %v18066_v60 = vpop.f32.mrb[71].mxu1 }
 0x28b   : > { %v2621_v2 = vadd.f32 %v22001_v34, %v2477_v54 }
 0x28c   : > { %v2448_v8 = vpop.f32.mrb[72].mxu1 }
 0x28d   : > { %v2635_v45 = vadd.f32 %v15757_v4, %v2621_v2  ;;  %v2478_v46 = vadd.f32 %v2448_v8, %v2334_v14  ;;  %v18069_v35 = vpop.f32.mrb[73].mxu1 }
 0x28f   : > { %2642 = vst.msk [vmem:[%s22117_s26] sm:$0xff] %vm850_vm0, %v2635_v45  ;;  %v2622_v12 = vadd.f32 %v22010_v20, %v2478_v46 }
 0x290   : > { %v2453_v52 = vpop.f32.mrb[74].mxu1 }
 0x291   : > { %v2636_v32 = vadd.f32 %v15757_v4, %v2622_v12  ;;  %v2479_v34 = vadd.f32 %v2453_v52, %v2335_v49  ;;  %v18072_v39 = vpop.f32.mrb[75].mxu1 }
 0x293   : > { %2643 = vst.msk [vmem:[%s22117_s26 + $0x8] sm:$0xff] %vm850_vm0, %v2636_v32  ;;  %v2623_v44 = vadd.f32 %v22017_v40, %v2479_v34 }
 0x294   : > { %v2458_v24 = vpop.f32.mrb[76].mxu1 }
 0x295   : > { %v2637_v26 = vadd.f32 %v15757_v4, %v2623_v44  ;;  %v2480_v38 = vadd.f32 %v2458_v24, %v2336_v10  ;;  %v18075_v56 = vpop.f32.mrb[77].mxu1 }
 0x297   : > { %2644 = vst.msk [vmem:[%s22117_s26 + $0x10] sm:$0xff] %vm850_vm0, %v2637_v26  ;;  %v2624_v14 = vadd.f32 %v22024_v58, %v2480_v38 }
 0x298   : > { %v2463_v37 = vpop.f32.mrb[78].mxu1 }
 0x299   : > { %v2638_v20 = vadd.f32 %v15757_v4, %v2624_v14  ;;  %v2481_v18 = vadd.f32 %v2463_v37, %v2337_v51  ;;  %v18078_v42 = vpop.f32.mrb[79].mxu1  ;;  %v22137_v51 = vld [vmem:[%s24472_s6] ss:$0 sm:$0xff] }
 0x29b   : > { %2645 = vst.msk [vmem:[%s22117_s26 + $0x18] sm:$0xff] %vm850_vm0, %v2638_v20  ;;  %v2625_v49 = vadd.f32 %v22031_v29, %v2481_v18 }
 0x29c   : > { %v2468_v50 = vpop.f32.mrb[80].mxu1 }
 0x29d   : > { %v2639_v40 = vadd.f32 %v15757_v4, %v2625_v49  ;;  %v2482_v36 = vadd.f32 %v2468_v50, %v2338_v41  ;;  %v18081_v16 = vpop.f32.mrb[81].mxu1 }
 0x29f   : > { %2646 = vst.msk [vmem:[%s22117_s26 + $0x20] sm:$0xff] %vm850_vm0, %v2639_v40  ;;  %v2626_v10 = vadd.f32 %v22038_v43, %v2482_v36 }
 0x2a0   : > { %v2473_v6 = vpop.f32.mrb[82].mxu1 }
 0x2a1   : > { %v2640_v58 = vadd.f32 %v15757_v4, %v2626_v10  ;;  %v2483_v0 = vadd.f32 %v2473_v6, %v2339_v48  ;;  %v18084_v62 = vpop.f32.mrb[83].mxu1 }
 0x2a3   : > { %2647 = vst.msk [vmem:[%s22117_s26 + $0x28] sm:$0xff] %vm850_vm0, %v2640_v58  ;;  %v2627_v29 = vadd.f32 %v22046_v47, %v2483_v0 }
 0x2a4   : > { %v18112_v41 = vpop.f32.mrb[84].mxu1 }
 0x2a5   : > { %v2641_v22 = vadd.f32 %v15757_v4, %v2627_v29  ;;  %v3081_v28 = vadd.f32 %v18112_v41, %v22137_v51  ;;  %v3075_v30 = vpop.f32.mrb[85].mxu1 }
 0x2a6   : > { %v3076_v43 = vadd.f32 %v22137_v51, %v3075_v30 }
 0x2a7   : > { %2648 = vst.msk [vmem:[%s22117_s26 + $0x30] sm:$0xff] %vm850_vm0, %v2641_v22  ;;  %v4043_v48 = vmul.f32 %v20810_v57, %v3081_v28 }
 0x2a8   : > { %v4042_v54 = vmul.f32 %v20800_v53, %v3076_v43  ;;  %v18115_v60 = vpop.f32.mrb[86].mxu1 }
 0x2a9   : > { %4131 = vst.msk [vmem:[#allocation3 + $0x8] sm:$0xff] %vm850_vm0, %v4043_v48  ;;  %v3091_v2 = vadd.f32 %v18115_v60, %v22137_v51  ;;  %v3085_v8 = vpop.f32.mrb[87].mxu1 }
 0x2aa   : > { %4130 = vst.msk [vmem:[#allocation3] sm:$0xff] %vm850_vm0, %v4042_v54  ;;  %v3086_v47 = vadd.f32 %v22137_v51, %v3085_v8 }
 0x2ab   : > { %v4045_v4 = vmul.f32 %v20815_v59, %v3091_v2 }
 0x2ac   : > { %v4044_v45 = vmul.f32 %v20805_v55, %v3086_v47  ;;  %v18118_v46 = vpop.f32.mrb[88].mxu1 }
 0x2ad   : > { %4133 = vst.msk [vmem:[#allocation3 + $0x18] sm:$0xff] %vm850_vm0, %v4045_v4  ;;  %v3101_v57 = vadd.f32 %v18118_v46, %v22137_v51  ;;  %v3095_v53 = vpop.f32.mrb[89].mxu1 }
 0x2ae   : > { %4132 = vst.msk [vmem:[#allocation3 + $0x10] sm:$0xff] %vm850_vm0, %v4044_v45  ;;  %v3096_v35 = vadd.f32 %v22137_v51, %v3095_v53 }
 0x2af   : > { %v4047_v12 = vmul.f32 %v20825_v63, %v3101_v57 }
 0x2b0   : > { %v4046_v52 = vmul.f32 %v20820_v61, %v3096_v35  ;;  %v18121_v32 = vpop.f32.mrb[90].mxu1 }
 0x2b1   : > { %4135 = vst.msk [vmem:[#allocation3 + $0x28] sm:$0xff] %vm850_vm0, %v4047_v12  ;;  %v3111_v59 = vadd.f32 %v18121_v32, %v22137_v51  ;;  %v3105_v55 = vpop.f32.mrb[91].mxu1  ;;  %v4285_v34 = vld [vmem:[#allocation3 + $0x1] sm:$0xff] }
 0x2b2   : > { %4134 = vst.msk [vmem:[#allocation3 + $0x20] sm:$0xff] %vm850_vm0, %v4046_v52  ;;  %v3106_v39 = vadd.f32 %v22137_v51, %v3105_v55  ;;  %18244 = vmatprep.mubr.msk.f32.mxu0 %vm850_vm0, %v4285_v34 }
 0x2b3   : > { %v4049_v44 = vmul.f32 %v20835_v3, %v3111_v59 }
 0x2b4   : > { %v4048_v24 = vmul.f32 %v20830_v1, %v3106_v39  ;;  %v18124_v63 = vpop.f32.mrb[92].mxu1  ;;  %v24582_v39 = vld [vmem:[#allocation8_spill] sm:$0xff] }
 0x2b5   : > { %4137 = vst.msk [vmem:[#allocation3 + $0x38] sm:$0xff] %vm850_vm0, %v4049_v44  ;;  %v3121_v61 = vadd.f32 %v18124_v63, %v22137_v51  ;;  %v3115_v26 = vpop.f32.mrb[93].mxu1  ;;  %v4286_v38 = vld [vmem:[#allocation3 + $0x9] sm:$0xff]  ;;  %v4287_v56 = vld [vmem:[#allocation3 + $0x11] sm:$0xff] }
 0x2b6   : > { %4136 = vst.msk [vmem:[#allocation3 + $0x30] sm:$0xff] %vm850_vm0, %v4048_v24  ;;  %v3116_v14 = vadd.f32 %v22137_v51, %v3115_v26  ;;  %18245 = vmatmul.mubr.msk.f32.vlgmr.msra.gmra.mrb[90].mxu0 %vm850_vm0, %v4286_v38 }
 0x2b7   : > { %v4051_v37 = vmul.f32 %v20845_v7, %v3121_v61  ;;  %18247 = vmatprep.mubr.msk.f32.mxu0 %vm850_vm0, %v4287_v56  ;;  %18344 = vmatpush3.msra.mxu0 %v22071_v33 }
 0x2b8   : > { %v4050_v1 = vmul.f32 %v20840_v5, %v3116_v14  ;;  %v18127_v3 = vpop.f32.mrb[94].mxu1 }
 0x2b9   : > { %4139 = vst.msk [vmem:[#allocation3 + $0x48] sm:$0xff] %vm850_vm0, %v4051_v37  ;;  %v3131_v20 = vadd.f32 %v18127_v3, %v22137_v51  ;;  %v3125_v18 = vpop.f32.mrb[95].mxu1  ;;  %v4288_v42 = vld [vmem:[#allocation3 + $0x21] sm:$0xff]  ;;  %v24584_v37 = vld [vmem:[#allocation10_spill] sm:$0xff] }
 0x2ba   : > { %4138 = vst.msk [vmem:[#allocation3 + $0x40] sm:$0xff] %vm850_vm0, %v4050_v1  ;;  %v3126_v49 = vadd.f32 %v22137_v51, %v3125_v18  ;;  %18248 = vmatmul.mubr.msk.f32.gmra.mrb[92].mxu0 %vm850_vm0, %v4288_v42  ;;  %v24585_v3 = vld [vmem:[#allocation9_spill] sm:$0xff] }
 0x2bb   : > { %v4053_v7 = vmul.f32 %v20855_v11, %v3131_v20 }
 0x2bc   : > { %v4052_v50 = vmul.f32 %v20850_v9, %v3126_v49  ;;  %v18130_v33 = vpop.f32.mrb[96].mxu1 }
 0x2bd   : > { %4141 = vst.msk [vmem:[#allocation3 + $0x58] sm:$0xff] %vm850_vm0, %v4053_v7  ;;  %v3141_v5 = vadd.f32 %v18130_v33, %v22137_v51  ;;  %v3135_v40 = vpop.f32.mrb[97].mxu1  ;;  %v4289_v36 = vld [vmem:[#allocation3 + $0x29] sm:$0xff]  ;;  %v4290_v16 = vld [vmem:[#allocation3 + $0x31] sm:$0xff]  ;;  %v24586_v33 = vld [vmem:[#allocation12_spill] sm:$0xff] }
 0x2be   : > { %4140 = vst.msk [vmem:[#allocation3 + $0x50] sm:$0xff] %vm850_vm0, %v4052_v50  ;;  %v3136_v10 = vadd.f32 %v22137_v51, %v3135_v40  ;;  %18250 = vmatprep.mubr.msk.f32.mxu0 %vm850_vm0, %v4289_v36  ;;  %v24587_v40 = vld [vmem:[#allocation11_spill] sm:$0xff] }
 0x2bf   : > { %v4055_v6 = vmul.f32 %v20865_v15, %v3141_v5  ;;  %18251 = vmatmul.mubr.msk.f32.gmra.mrb[94].mxu0 %vm850_vm0, %v4290_v16 }
 0x2c0   : > { %v4054_v9 = vmul.f32 %v20860_v13, %v3136_v10  ;;  %v18133_v11 = vpop.f32.mrb[98].mxu1 }
 0x2c1   : > { %4143 = vst.msk [vmem:[#allocation3 + $0x68] sm:$0xff] %vm850_vm0, %v4055_v6  ;;  %v3151_v58 = vadd.f32 %v18133_v11, %v22137_v51  ;;  %v3145_v0 = vpop.f32.mrb[99].mxu1  ;;  %v4291_v62 = vld [vmem:[#allocation3 + $0x41] sm:$0xff] }
 0x2c2   : > { %4142 = vst.msk [vmem:[#allocation3 + $0x60] sm:$0xff] %vm850_vm0, %v4054_v9  ;;  %v3146_v29 = vadd.f32 %v22137_v51, %v3145_v0  ;;  %18253 = vmatprep.mubr.msk.f32.mxu0 %vm850_vm0, %v4291_v62  ;;  %v24588_v0 = vld [vmem:[#allocation14_spill] sm:$0xff] }
 0x2c3   : > { %v4057_v41 = vmul.f32 %v20875_v19, %v3151_v58 }
 0x2c4   : > { %v4056_v15 = vmul.f32 %v20870_v17, %v3146_v29  ;;  %v18136_v22 = vpop.f32.mrb[100].mxu1  ;;  %v24589_v29 = vld [vmem:[#allocation13_spill] sm:$0xff] }
 0x2c5   : > { %4145 = vst.msk [vmem:[#allocation3 + $0x78] sm:$0xff] %vm850_vm0, %v4057_v41  ;;  %v3161_v13 = vadd.f32 %v18136_v22, %v22137_v51  ;;  %v3155_v28 = vpop.f32.mrb[101].mxu1  ;;  %v4292_v30 = vld [vmem:[#allocation3 + $0x49] sm:$0xff]  ;;  %v4293_v43 = vld [vmem:[#allocation3 + $0x51] sm:$0xff] }
 0x2c6   : > { %4144 = vst.msk [vmem:[#allocation3 + $0x70] sm:$0xff] %vm850_vm0, %v4056_v15  ;;  %v3156_v48 = vadd.f32 %v22137_v51, %v3155_v28  ;;  %18254 = vmatmul.mubr.msk.f32.gmra.mrb[96].mxu0 %vm850_vm0, %v4292_v30  ;;  %v22254_v22 = vld [vmem:[%s24473_s7 + $0x10] sm:$0xff] }
 0x2c7   : > { %v4059_v54 = vmul.f32 %v20885_v23, %v3161_v13  ;;  %18256 = vmatprep.mubr.msk.f32.mxu0 %vm850_vm0, %v4293_v43  ;;  %18444 = vmatprep.subr.mxu0 %v22254_v22 }
 0x2c8   : > { %v4058_v17 = vmul.f32 %v20880_v21, %v3156_v48  ;;  %v18139_v19 = vpop.f32.mrb[102].mxu1  ;;  %v24590_v48 = vld [vmem:[#allocation16_spill] sm:$0xff] }
 0x2c9   : > { %4147 = vst.msk [vmem:[#allocation3 + $0x88] sm:$0xff] %vm850_vm0, %v4059_v54  ;;  %v3171_v60 = vadd.f32 %v18139_v19, %v22137_v51  ;;  %v3165_v2 = vpop.f32.mrb[103].mxu1  ;;  %v4294_v8 = vld [vmem:[#allocation3 + $0x61] sm:$0xff] }
 0x2ca   : > { %4146 = vst.msk [vmem:[#allocation3 + $0x80] sm:$0xff] %vm850_vm0, %v4058_v17  ;;  %v3166_v47 = vadd.f32 %v22137_v51, %v3165_v2  ;;  %18257 = vmatmul.mubr.msk.f32.gmra.mrb[98].mxu0 %vm850_vm0, %v4294_v8  ;;  %v24591_v17 = vld [vmem:[#allocation15_spill] sm:$0xff] }
 0x2cb   : > { %v4061_v4 = vmul.f32 %v20895_v27, %v3171_v60  ;;  %v24581_v27 = vld [vmem:[#allocation6_spill] sm:$0xff] }
 0x2cc   : > { %v4060_v23 = vmul.f32 %v20890_v25, %v3166_v47  ;;  %v18142_v45 = vpop.f32.mrb[104].mxu1 }
 0x2cd   : > { %4149 = vst.msk [vmem:[#allocation3 + $0x98] sm:$0xff] %vm850_vm0, %v4061_v4  ;;  %v3181_v21 = vadd.f32 %v18142_v45, %v22137_v51  ;;  %v3175_v46 = vpop.f32.mrb[105].mxu1  ;;  %v4295_v57 = vld [vmem:[#allocation3 + $0x69] sm:$0xff]  ;;  %v4296_v53 = vld [vmem:[#allocation3 + $0x71] sm:$0xff] }
 0x2ce   : > { %4148 = vst.msk [vmem:[#allocation3 + $0x90] sm:$0xff] %vm850_vm0, %v4060_v23  ;;  %v3176_v35 = vadd.f32 %v22137_v51, %v3175_v46  ;;  %18259 = vmatprep.mubr.msk.f32.mxu0 %vm850_vm0, %v4295_v57  ;;  %v24592_v45 = vld [vmem:[#allocation18_spill] sm:$0xff]  ;;  %v24593_v46 = vld [vmem:[#allocation17_spill] sm:$0xff] }
 0x2cf   : > { %v4063_v12 = vmul.f32 %v20905_v31, %v3181_v21  ;;  %18260 = vmatmul.mubr.msk.f32.gmra.mrb[100].mxu0 %vm850_vm0, %v4296_v53  ;;  %v24583_v31 = vld [vmem:[#allocation7_spill] sm:$0xff] }
 0x2d0   : > { %v4062_v25 = vmul.f32 %v24581_v27, %v3176_v35  ;;  %v18145_v52 = vpop.f32.mrb[106].mxu1 }
 0x2d1   : > { %4151 = vst.msk [vmem:[#allocation3 + $0xa8] sm:$0xff] %vm850_vm0, %v4063_v12  ;;  %v3191_v32 = vadd.f32 %v18145_v52, %v22137_v51  ;;  %v3185_v59 = vpop.f32.mrb[107].mxu1  ;;  %v4297_v55 = vld [vmem:[#allocation3 + $0x81] sm:$0xff] }
 0x2d2   : > { %4150 = vst.msk [vmem:[#allocation3 + $0xa0] sm:$0xff] %vm850_vm0, %v4062_v25  ;;  %v3186_v34 = vadd.f32 %v22137_v51, %v3185_v59  ;;  %18262 = vmatprep.mubr.msk.f32.mxu0 %vm850_vm0, %v4297_v55  ;;  %v24594_v52 = vld [vmem:[#allocation20_spill] sm:$0xff]  ;;  %v24595_v59 = vld [vmem:[#allocation19_spill] sm:$0xff] }
 0x2d3   : > { %v4065_v44 = vmul.f32 %v24582_v39, %v3191_v32 }
 0x2d4   : > { %v4064_v24 = vmul.f32 %v24583_v31, %v3186_v34  ;;  %v18148_v63 = vpop.f32.mrb[108].mxu1 }
 0x2d5   : > { %4153 = vst.msk [vmem:[#allocation3 + $0xb8] sm:$0xff] %vm850_vm0, %v4065_v44  ;;  %v3201_v61 = vadd.f32 %v18148_v63, %v22137_v51  ;;  %v3195_v26 = vpop.f32.mrb[109].mxu1  ;;  %v4298_v38 = vld [vmem:[#allocation3 + $0x89] sm:$0xff]  ;;  %v4299_v56 = vld [vmem:[#allocation3 + $0x91] sm:$0xff] }
 0x2d6   : > { %4152 = vst.msk [vmem:[#allocation3 + $0xb0] sm:$0xff] %vm850_vm0, %v4064_v24  ;;  %v3196_v14 = vadd.f32 %v22137_v51, %v3195_v26  ;;  %18263 = vmatmul.mubr.msk.f32.gmra.mrb[102].mxu0 %vm850_vm0, %v4298_v38  ;;  %v24597_v38 = vld [vmem:[#allocation21_spill] sm:$0xff] }
 0x2d7   : > { %v4067_v1 = vmul.f32 %v24584_v37, %v3201_v61  ;;  %18265 = vmatprep.mubr.msk.f32.mxu0 %vm850_vm0, %v4299_v56  ;;  %v24596_v61 = vld [vmem:[#allocation22_spill] sm:$0xff] }
 0x2d8   : > { %v4066_v20 = vmul.f32 %v24585_v3, %v3196_v14  ;;  %v18151_v18 = vpop.f32.mrb[110].mxu1 }
 0x2d9   : > { %4155 = vst.msk [vmem:[#allocation3 + $0xc8] sm:$0xff] %vm850_vm0, %v4067_v1  ;;  %v3211_v42 = vadd.f32 %v18151_v18, %v22137_v51  ;;  %v3205_v49 = vpop.f32.mrb[111].mxu1  ;;  %v4300_v7 = vld [vmem:[#allocation3 + $0xa1] sm:$0xff] }
 0x2da   : > { %4154 = vst.msk [vmem:[#allocation3 + $0xc0] sm:$0xff] %vm850_vm0, %v4066_v20  ;;  %v3206_v50 = vadd.f32 %v22137_v51, %v3205_v49  ;;  %18266 = vmatmul.mubr.msk.f32.gmra.mrb[104].mxu0 %vm850_vm0, %v4300_v7  ;;  %v24598_v18 = vld [vmem:[#allocation24_spill] sm:$0xff]  ;;  %v24599_v49 = vld [vmem:[#allocation23_spill] sm:$0xff] }
 0x2db   : > { %v4069_v5 = vmul.f32 %v24586_v33, %v3211_v42 }
 0x2dc   : > { %v4068_v36 = vmul.f32 %v24587_v40, %v3206_v50  ;;  %v18154_v16 = vpop.f32.mrb[112].mxu1 }
 0x2dd   : > { %4157 = vst.msk [vmem:[#allocation3 + $0xd8] sm:$0xff] %vm850_vm0, %v4069_v5  ;;  %v3221_v10 = vadd.f32 %v18154_v16, %v22137_v51  ;;  %v3215_v6 = vpop.f32.mrb[113].mxu1  ;;  %v4301_v9 = vld [vmem:[#allocation3 + $0xa9] sm:$0xff]  ;;  %v4302_v11 = vld [vmem:[#allocation3 + $0xb1] sm:$0xff] }
 0x2de   : > { %4156 = vst.msk [vmem:[#allocation3 + $0xd0] sm:$0xff] %vm850_vm0, %v4068_v36  ;;  %v3216_v58 = vadd.f32 %v22137_v51, %v3215_v6  ;;  %18268 = vmatprep.mubr.msk.f32.mxu0 %vm850_vm0, %v4301_v9  ;;  %v24601_v9 = vld [vmem:[#allocation25_spill] sm:$0xff] }
 0x2df   : > { %v4071_v62 = vmul.f32 %v24588_v0, %v3221_v10  ;;  %18269 = vmatmul.mubr.msk.f32.gmra.mrb[106].mxu0 %vm850_vm0, %v4302_v11  ;;  %v24600_v10 = vld [vmem:[#allocation26_spill] sm:$0xff] }
 0x2e0   : > { %v4070_v41 = vmul.f32 %v24589_v29, %v3216_v58  ;;  %v18157_v15 = vpop.f32.mrb[114].mxu1 }
 0x2e1   : > { %4159 = vst.msk [vmem:[#allocation3 + $0xe8] sm:$0xff] %vm850_vm0, %v4071_v62  ;;  %v3231_v13 = vadd.f32 %v18157_v15, %v22137_v51  ;;  %v3225_v28 = vpop.f32.mrb[115].mxu1  ;;  %v4303_v30 = vld [vmem:[#allocation3 + $0xc1] sm:$0xff] }
 0x2e2   : > { %4158 = vst.msk [vmem:[#allocation3 + $0xe0] sm:$0xff] %vm850_vm0, %v4070_v41  ;;  %v3226_v43 = vadd.f32 %v22137_v51, %v3225_v28  ;;  %18271 = vmatprep.mubr.msk.f32.mxu0 %vm850_vm0, %v4303_v30  ;;  %v24602_v15 = vld [vmem:[#allocation28_spill] sm:$0xff]  ;;  %v24603_v28 = vld [vmem:[#allocation27_spill] sm:$0xff] }
 0x2e3   : > { %v4073_v54 = vmul.f32 %v24590_v48, %v3231_v13 }
 0x2e4   : > { %v4072_v19 = vmul.f32 %v24591_v17, %v3226_v43  ;;  %v18160_v60 = vpop.f32.mrb[116].mxu1 }
 0x2e5   : > { %4161 = vst.msk [vmem:[#allocation3 + $0xf8] sm:$0xff] %vm850_vm0, %v4073_v54  ;;  %v3241_v2 = vadd.f32 %v18160_v60, %v22137_v51  ;;  %v3235_v8 = vpop.f32.mrb[117].mxu1  ;;  %v4304_v47 = vld [vmem:[#allocation3 + $0xc9] sm:$0xff]  ;;  %v4305_v4 = vld [vmem:[#allocation3 + $0xd1] sm:$0xff] }
 0x2e6   : > { %4160 = vst.msk [vmem:[#allocation3 + $0xf0] sm:$0xff] %vm850_vm0, %v4072_v19  ;;  %v3236_v23 = vadd.f32 %v22137_v51, %v3235_v8  ;;  %18272 = vmatmul.mubr.msk.f32.gmra.mrb[108].mxu0 %vm850_vm0, %v4304_v47  ;;  %v24605_v47 = vld [vmem:[#allocation29_spill] sm:$0xff] }
 0x2e7   : > { %v4075_v21 = vmul.f32 %v24592_v45, %v3241_v2  ;;  %18274 = vmatprep.mubr.msk.f32.mxu0 %vm850_vm0, %v4305_v4  ;;  %v24604_v2 = vld [vmem:[#allocation30_spill] sm:$0xff] }
 0x2e8   : > { %v4074_v57 = vmul.f32 %v24593_v46, %v3236_v23  ;;  %v18163_v53 = vpop.f32.mrb[118].mxu1 }
 0x2e9   : > { %4163 = vst.msk [vmem:[#allocation3 + $0x108] sm:$0xff] %vm850_vm0, %v4075_v21  ;;  %v3251_v35 = vadd.f32 %v18163_v53, %v22137_v51  ;;  %v3245_v12 = vpop.f32.mrb[119].mxu1  ;;  %v4306_v27 = vld [vmem:[#allocation3 + $0xe1] sm:$0xff] }
 0x2ea   : > { %4162 = vst.msk [vmem:[#allocation3 + $0x100] sm:$0xff] %vm850_vm0, %v4074_v57  ;;  %v3246_v25 = vadd.f32 %v22137_v51, %v3245_v12  ;;  %18275 = vmatmul.mubr.msk.f32.gmra.mrb[110].mxu0 %vm850_vm0, %v4306_v27  ;;  %v24606_v53 = vld [vmem:[#allocation32_spill] sm:$0xff]  ;;  %v24607_v12 = vld [vmem:[#allocation31_spill] sm:$0xff] }
 0x2eb   : > { %v4077_v32 = vmul.f32 %v24594_v52, %v3251_v35 }
 0x2ec   : > { %v4076_v55 = vmul.f32 %v24595_v59, %v3246_v25  ;;  %v18166_v34 = vpop.f32.mrb[120].mxu1 }
 0x2ed   : > { %4165 = vst.msk [vmem:[#allocation3 + $0x118] sm:$0xff] %vm850_vm0, %v4077_v32  ;;  %v3261_v39 = vadd.f32 %v18166_v34, %v22137_v51  ;;  %v3255_v44 = vpop.f32.mrb[121].mxu1  ;;  %v4307_v31 = vld [vmem:[#allocation3 + $0xe9] sm:$0xff]  ;;  %v4308_v24 = vld [vmem:[#allocation3 + $0xf1] sm:$0xff] }
 0x2ee   : > { %4164 = vst.msk [vmem:[#allocation3 + $0x110] sm:$0xff] %vm850_vm0, %v4076_v55  ;;  %v3256_v63 = vadd.f32 %v22137_v51, %v3255_v44  ;;  %18277 = vmatprep.mubr.msk.f32.mxu0 %vm850_vm0, %v4307_v31  ;;  %v24609_v31 = vld [vmem:[#allocation33_spill] sm:$0xff] }
 0x2ef   : > { %v4079_v26 = vmul.f32 %v24596_v61, %v3261_v39  ;;  %18278 = vmatmul.mubr.msk.f32.gmra.mrb[112].mxu0 %vm850_vm0, %v4308_v24  ;;  %v24608_v39 = vld [vmem:[#allocation34_spill] sm:$0xff] }
 0x2f0   : > { %v4078_v56 = vmul.f32 %v24597_v38, %v3256_v63  ;;  %v18169_v14 = vpop.f32.mrb[122].mxu1 }
 0x2f1   : > { %4167 = vst.msk [vmem:[#allocation3 + $0x128] sm:$0xff] %vm850_vm0, %v4079_v26  ;;  %v3271_v37 = vadd.f32 %v18169_v14, %v22137_v51  ;;  %v3265_v1 = vpop.f32.mrb[123].mxu1  ;;  %v4309_v3 = vld [vmem:[#allocation3 + $0x101] sm:$0xff] }
 0x2f2   : > { %4166 = vst.msk [vmem:[#allocation3 + $0x120] sm:$0xff] %vm850_vm0, %v4078_v56  ;;  %v3266_v20 = vadd.f32 %v22137_v51, %v3265_v1  ;;  %18280 = vmatprep.mubr.msk.f32.mxu0 %vm850_vm0, %v4309_v3  ;;  %v24610_v14 = vld [vmem:[#allocation36_spill] sm:$0xff]  ;;  %v24611_v1 = vld [vmem:[#allocation35_spill] sm:$0xff] }
 0x2f3   : > { %v4081_v42 = vmul.f32 %v24598_v18, %v3271_v37 }
 0x2f4   : > { %v4080_v7 = vmul.f32 %v24599_v49, %v3266_v20  ;;  %v18172_v50 = vpop.f32.mrb[124].mxu1 }
 0x2f5   : > { %4169 = vst.msk [vmem:[#allocation3 + $0x138] sm:$0xff] %vm850_vm0, %v4081_v42  ;;  %v3281_v33 = vadd.f32 %v18172_v50, %v22137_v51  ;;  %v3275_v5 = vpop.f32.mrb[125].mxu1  ;;  %v4310_v40 = vld [vmem:[#allocation3 + $0x109] sm:$0xff]  ;;  %v4311_v36 = vld [vmem:[#allocation3 + $0x111] sm:$0xff] }
 0x2f6   : > { %4168 = vst.msk [vmem:[#allocation3 + $0x130] sm:$0xff] %vm850_vm0, %v4080_v7  ;;  %v3276_v16 = vadd.f32 %v22137_v51, %v3275_v5  ;;  %18281 = vmatmul.mubr.msk.f32.gmra.mrb[114].mxu0 %vm850_vm0, %v4310_v40  ;;  %v24613_v40 = vld [vmem:[#allocation37_spill] sm:$0xff] }
 0x2f7   : > { %v4083_v6 = vmul.f32 %v24600_v10, %v3281_v33  ;;  %18283 = vmatprep.mubr.msk.f32.mxu0 %vm850_vm0, %v4311_v36  ;;  %v24612_v33 = vld [vmem:[#allocation38_spill] sm:$0xff] }
 0x2f8   : > { %v4082_v11 = vmul.f32 %v24601_v9, %v3276_v16  ;;  %v18175_v58 = vpop.f32.mrb[126].mxu1 }
 0x2f9   : > { %4171 = vst.msk [vmem:[#allocation3 + $0x148] sm:$0xff] %vm850_vm0, %v4083_v6  ;;  %v3291_v0 = vadd.f32 %v18175_v58, %v22137_v51  ;;  %v3285_v62 = vpop.f32.mrb[127].mxu1  ;;  %v4312_v29 = vld [vmem:[#allocation3 + $0x121] sm:$0xff] }
 0x2fa   : > { %4170 = vst.msk [vmem:[#allocation3 + $0x140] sm:$0xff] %vm850_vm0, %v4082_v11  ;;  %v3286_v41 = vadd.f32 %v22137_v51, %v3285_v62  ;;  %18284 = vmatmul.mubr.msk.f32.gmra.mrb[116].mxu0 %vm850_vm0, %v4312_v29  ;;  %v24614_v58 = vld [vmem:[#allocation40_spill] sm:$0xff]  ;;  %v24615_v62 = vld [vmem:[#allocation39_spill] sm:$0xff] }
 0x2fb   : > { %v4085_v13 = vmul.f32 %v24602_v15, %v3291_v0 }
 0x2fc   : > { %v4084_v30 = vmul.f32 %v24603_v28, %v3286_v41  ;;  %v18178_v43 = vpop.f32.mrb[128].mxu1 }
 0x2fd   : > { %4173 = vst.msk [vmem:[#allocation3 + $0x158] sm:$0xff] %vm850_vm0, %v4085_v13  ;;  %v3301_v48 = vadd.f32 %v18178_v43, %v22137_v51  ;;  %v3295_v54 = vpop.f32.mrb[129].mxu1  ;;  %v4313_v17 = vld [vmem:[#allocation3 + $0x129] sm:$0xff]  ;;  %v4314_v19 = vld [vmem:[#allocation3 + $0x131] sm:$0xff] }
 0x2fe   : > { %4172 = vst.msk [vmem:[#allocation3 + $0x150] sm:$0xff] %vm850_vm0, %v4084_v30  ;;  %v3296_v60 = vadd.f32 %v22137_v51, %v3295_v54  ;;  %18286 = vmatprep.mubr.msk.f32.mxu0 %vm850_vm0, %v4313_v17  ;;  %v24617_v17 = vld [vmem:[#allocation41_spill] sm:$0xff] }
 0x2ff   : > { %v4087_v8 = vmul.f32 %v24604_v2, %v3301_v48  ;;  %18287 = vmatmul.mubr.msk.f32.gmra.mrb[118].mxu0 %vm850_vm0, %v4314_v19  ;;  %v24616_v48 = vld [vmem:[#allocation42_spill] sm:$0xff] }
 0x300   : > { %v4086_v4 = vmul.f32 %v24605_v47, %v3296_v60  ;;  %v18181_v23 = vpop.f32.mrb[130].mxu1 }
 0x301   : > { %4175 = vst.msk [vmem:[#allocation3 + $0x168] sm:$0xff] %vm850_vm0, %v4087_v8  ;;  %v3311_v45 = vadd.f32 %v18181_v23, %v22137_v51  ;;  %v3305_v21 = vpop.f32.mrb[131].mxu1  ;;  %v4315_v46 = vld [vmem:[#allocation3 + $0x141] sm:$0xff] }
 0x302   : > { %4174 = vst.msk [vmem:[#allocation3 + $0x160] sm:$0xff] %vm850_vm0, %v4086_v4  ;;  %v3306_v57 = vadd.f32 %v22137_v51, %v3305_v21  ;;  %18289 = vmatprep.mubr.msk.f32.mxu0 %vm850_vm0, %v4315_v46  ;;  %v24618_v23 = vld [vmem:[#allocation44_spill] sm:$0xff]  ;;  %v24619_v21 = vld [vmem:[#allocation43_spill] sm:$0xff] }
 0x303   : > { %v4089_v35 = vmul.f32 %v24606_v53, %v3311_v45 }
 0x304   : > { %v4088_v27 = vmul.f32 %v24607_v12, %v3306_v57  ;;  %v18184_v25 = vpop.f32.mrb[132].mxu1 }
 0x305   : > { %4177 = vst.msk [vmem:[#allocation3 + $0x178] sm:$0xff] %vm850_vm0, %v4089_v35  ;;  %v3321_v52 = vadd.f32 %v18184_v25, %v22137_v51  ;;  %v3315_v32 = vpop.f32.mrb[133].mxu1  ;;  %v4316_v59 = vld [vmem:[#allocation3 + $0x149] sm:$0xff]  ;;  %v4317_v55 = vld [vmem:[#allocation3 + $0x151] sm:$0xff] }
 0x306   : > { %4176 = vst.msk [vmem:[#allocation3 + $0x170] sm:$0xff] %vm850_vm0, %v4088_v27  ;;  %v3316_v34 = vadd.f32 %v22137_v51, %v3315_v32  ;;  %18290 = vmatmul.mubr.msk.f32.gmra.mrb[120].mxu0 %vm850_vm0, %v4316_v59  ;;  %v24621_v59 = vld [vmem:[#allocation45_spill] sm:$0xff] }
 0x307   : > { %v4091_v44 = vmul.f32 %v24608_v39, %v3321_v52  ;;  %18292 = vmatprep.mubr.msk.f32.mxu0 %vm850_vm0, %v4317_v55  ;;  %v24620_v52 = vld [vmem:[#allocation46_spill] sm:$0xff] }
 0x308   : > { %v4090_v24 = vmul.f32 %v24609_v31, %v3316_v34  ;;  %v18187_v63 = vpop.f32.mrb[134].mxu1 }
 0x309   : > { %4179 = vst.msk [vmem:[#allocation3 + $0x188] sm:$0xff] %vm850_vm0, %v4091_v44  ;;  %v3331_v61 = vadd.f32 %v18187_v63, %v22137_v51  ;;  %v3325_v26 = vpop.f32.mrb[135].mxu1  ;;  %v4318_v38 = vld [vmem:[#allocation3 + $0x161] sm:$0xff] }
 0x30a   : > { %4178 = vst.msk [vmem:[#allocation3 + $0x180] sm:$0xff] %vm850_vm0, %v4090_v24  ;;  %v3326_v56 = vadd.f32 %v22137_v51, %v3325_v26  ;;  %18293 = vmatmul.mubr.msk.f32.gmra.mrb[122].mxu0 %vm850_vm0, %v4318_v38  ;;  %v24622_v63 = vld [vmem:[#allocation48_spill] sm:$0xff]  ;;  %v24623_v26 = vld [vmem:[#allocation47_spill] sm:$0xff] }
 0x30b   : > { %v4093_v37 = vmul.f32 %v24610_v14, %v3331_v61 }
 0x30c   : > { %v4092_v3 = vmul.f32 %v24611_v1, %v3326_v56  ;;  %v18190_v20 = vpop.f32.mrb[136].mxu1 }
 0x30d   : > { %4181 = vst.msk [vmem:[#allocation3 + $0x198] sm:$0xff] %vm850_vm0, %v4093_v37  ;;  %v3341_v18 = vadd.f32 %v18190_v20, %v22137_v51  ;;  %v3335_v42 = vpop.f32.mrb[137].mxu1  ;;  %v4319_v49 = vld [vmem:[#allocation3 + $0x169] sm:$0xff]  ;;  %v4320_v7 = vld [vmem:[#allocation3 + $0x171] sm:$0xff] }
 0x30e   : > { %4180 = vst.msk [vmem:[#allocation3 + $0x190] sm:$0xff] %vm850_vm0, %v4092_v3  ;;  %v3336_v50 = vadd.f32 %v22137_v51, %v3335_v42  ;;  %18295 = vmatprep.mubr.msk.f32.mxu0 %vm850_vm0, %v4319_v49  ;;  %v24625_v49 = vld [vmem:[#allocation49_spill] sm:$0xff] }
 0x30f   : > { %v4095_v5 = vmul.f32 %v24612_v33, %v3341_v18  ;;  %18296 = vmatmul.mubr.msk.f32.gmra.mrb[124].mxu0 %vm850_vm0, %v4320_v7  ;;  %v24624_v18 = vld [vmem:[#allocation50_spill] sm:$0xff] }
 0x310   : > { %v4094_v36 = vmul.f32 %v24613_v40, %v3336_v50  ;;  %v18193_v16 = vpop.f32.mrb[138].mxu1 }
 0x311   : > { %4183 = vst.msk [vmem:[#allocation3 + $0x1a8] sm:$0xff] %vm850_vm0, %v4095_v5  ;;  %v3351_v10 = vadd.f32 %v18193_v16, %v22137_v51  ;;  %v3345_v6 = vpop.f32.mrb[139].mxu1  ;;  %v4321_v9 = vld [vmem:[#allocation3 + $0x181] sm:$0xff] }
 0x312   : > { %4182 = vst.msk [vmem:[#allocation3 + $0x1a0] sm:$0xff] %vm850_vm0, %v4094_v36  ;;  %v3346_v11 = vadd.f32 %v22137_v51, %v3345_v6  ;;  %18298 = vmatprep.mubr.msk.f32.mxu0 %vm850_vm0, %v4321_v9  ;;  %v24626_v16 = vld [vmem:[#allocation52_spill] sm:$0xff]  ;;  %v24627_v6 = vld [vmem:[#allocation51_spill] sm:$0xff] }
 0x313   : > { %v4097_v0 = vmul.f32 %v24614_v58, %v3351_v10 }
 0x314   : > { %v4096_v29 = vmul.f32 %v24615_v62, %v3346_v11  ;;  %v18196_v41 = vpop.f32.mrb[140].mxu1 }
 0x315   : > { %4185 = vst.msk [vmem:[#allocation3 + $0x1b8] sm:$0xff] %vm850_vm0, %v4097_v0  ;;  %v3361_v15 = vadd.f32 %v18196_v41, %v22137_v51  ;;  %v3355_v13 = vpop.f32.mrb[141].mxu1  ;;  %v4322_v28 = vld [vmem:[#allocation3 + $0x189] sm:$0xff]  ;;  %v4323_v30 = vld [vmem:[#allocation3 + $0x191] sm:$0xff] }
 0x316   : > { %4184 = vst.msk [vmem:[#allocation3 + $0x1b0] sm:$0xff] %vm850_vm0, %v4096_v29  ;;  %v3356_v43 = vadd.f32 %v22137_v51, %v3355_v13  ;;  %18299 = vmatmul.mubr.msk.f32.gmra.mrb[126].mxu0 %vm850_vm0, %v4322_v28  ;;  %v24629_v28 = vld [vmem:[#allocation53_spill] sm:$0xff] }
 0x317   : > { %v4099_v54 = vmul.f32 %v24616_v48, %v3361_v15  ;;  %18301 = vmatprep.mubr.msk.f32.mxu0 %vm850_vm0, %v4323_v30  ;;  %v24628_v15 = vld [vmem:[#allocation54_spill] sm:$0xff] }
 0x318   : > { %v4098_v19 = vmul.f32 %v24617_v17, %v3356_v43  ;;  %v18199_v60 = vpop.f32.mrb[142].mxu1 }
 0x319   : > { %4187 = vst.msk [vmem:[#allocation3 + $0x1c8] sm:$0xff] %vm850_vm0, %v4099_v54  ;;  %v3371_v2 = vadd.f32 %v18199_v60, %v22137_v51  ;;  %v3365_v8 = vpop.f32.mrb[143].mxu1  ;;  %v4324_v47 = vld [vmem:[#allocation3 + $0x1a1] sm:$0xff] }
 0x31a   : > { %4186 = vst.msk [vmem:[#allocation3 + $0x1c0] sm:$0xff] %vm850_vm0, %v4098_v19  ;;  %v3366_v4 = vadd.f32 %v22137_v51, %v3365_v8  ;;  %18302 = vmatmul.mubr.msk.f32.gmra.mrb[128].mxu0 %vm850_vm0, %v4324_v47  ;;  %v24630_v60 = vld [vmem:[#allocation56_spill] sm:$0xff]  ;;  %v24631_v8 = vld [vmem:[#allocation55_spill] sm:$0xff] }
 0x31b   : > { %v4101_v45 = vmul.f32 %v24618_v23, %v3371_v2 }
 0x31c   : > { %v4100_v46 = vmul.f32 %v24619_v21, %v3366_v4  ;;  %v18202_v57 = vpop.f32.mrb[144].mxu1 }
 0x31d   : > { %4189 = vst.msk [vmem:[#allocation3 + $0x1d8] sm:$0xff] %vm850_vm0, %v4101_v45  ;;  %v3381_v53 = vadd.f32 %v18202_v57, %v22137_v51  ;;  %v3375_v35 = vpop.f32.mrb[145].mxu1  ;;  %v4325_v12 = vld [vmem:[#allocation3 + $0x1a9] sm:$0xff]  ;;  %v4326_v27 = vld [vmem:[#allocation3 + $0x1b1] sm:$0xff] }
 0x31e   : > { %4188 = vst.msk [vmem:[#allocation3 + $0x1d0] sm:$0xff] %vm850_vm0, %v4100_v46  ;;  %v3376_v25 = vadd.f32 %v22137_v51, %v3375_v35  ;;  %18304 = vmatprep.mubr.msk.f32.mxu0 %vm850_vm0, %v4325_v12  ;;  %v24633_v12 = vld [vmem:[#allocation57_spill] sm:$0xff] }
 0x31f   : > { %v4103_v32 = vmul.f32 %v24620_v52, %v3381_v53  ;;  %18305 = vmatmul.mubr.msk.f32.gmra.mrb[130].mxu0 %vm850_vm0, %v4326_v27  ;;  %v24632_v53 = vld [vmem:[#allocation58_spill] sm:$0xff] }
 0x320   : > { %v4102_v55 = vmul.f32 %v24621_v59, %v3376_v25  ;;  %v18205_v34 = vpop.f32.mrb[146].mxu1 }
 0x321   : > { %4191 = vst.msk [vmem:[#allocation3 + $0x1e8] sm:$0xff] %vm850_vm0, %v4103_v32  ;;  %v3391_v39 = vadd.f32 %v18205_v34, %v22137_v51  ;;  %v3385_v44 = vpop.f32.mrb[147].mxu1  ;;  %v4327_v31 = vld [vmem:[#allocation3 + $0x1c1] sm:$0xff] }
 0x322   : > { %4190 = vst.msk [vmem:[#allocation3 + $0x1e0] sm:$0xff] %vm850_vm0, %v4102_v55  ;;  %v3386_v24 = vadd.f32 %v22137_v51, %v3385_v44  ;;  %18307 = vmatprep.mubr.msk.f32.mxu0 %vm850_vm0, %v4327_v31  ;;  %v24634_v34 = vld [vmem:[#allocation60_spill] sm:$0xff]  ;;  %v24635_v44 = vld [vmem:[#allocation59_spill] sm:$0xff] }
 0x323   : > { %v4105_v61 = vmul.f32 %v24622_v63, %v3391_v39 }
 0x324   : > { %v4104_v38 = vmul.f32 %v24623_v26, %v3386_v24  ;;  %v18208_v56 = vpop.f32.mrb[148].mxu1 }
 0x325   : > { %4193 = vst.msk [vmem:[#allocation3 + $0x1f8] sm:$0xff] %vm850_vm0, %v4105_v61  ;;  %v3401_v14 = vadd.f32 %v18208_v56, %v22137_v51  ;;  %v3395_v37 = vpop.f32.mrb[149].mxu1  ;;  %v4328_v1 = vld [vmem:[#allocation3 + $0x1c9] sm:$0xff]  ;;  %v4329_v3 = vld [vmem:[#allocation3 + $0x1d1] sm:$0xff] }
 0x326   : > { %4192 = vst.msk [vmem:[#allocation3 + $0x1f0] sm:$0xff] %vm850_vm0, %v4104_v38  ;;  %v3396_v20 = vadd.f32 %v22137_v51, %v3395_v37  ;;  %18308 = vmatmul.mubr.msk.f32.gmra.mrb[132].mxu0 %vm850_vm0, %v4328_v1  ;;  %v24637_v1 = vld [vmem:[#allocation61_spill] sm:$0xff] }
 0x327   : > { %v4107_v42 = vmul.f32 %v24624_v18, %v3401_v14  ;;  %18310 = vmatprep.mubr.msk.f32.mxu0 %vm850_vm0, %v4329_v3  ;;  %v24636_v14 = vld [vmem:[#allocation62_spill] sm:$0xff] }
 0x328   : > { %v4106_v7 = vmul.f32 %v24625_v49, %v3396_v20  ;;  %v18211_v50 = vpop.f32.mrb[150].mxu1 }
 0x329   : > { %4195 = vst.msk [vmem:[#allocation3 + $0x208] sm:$0xff] %vm850_vm0, %v4107_v42  ;;  %v3411_v33 = vadd.f32 %v18211_v50, %v22137_v51  ;;  %v3405_v5 = vpop.f32.mrb[151].mxu1  ;;  %v4330_v40 = vld [vmem:[#allocation3 + $0x1e1] sm:$0xff] }
 0x32a   : > { %4194 = vst.msk [vmem:[#allocation3 + $0x200] sm:$0xff] %vm850_vm0, %v4106_v7  ;;  %v3406_v36 = vadd.f32 %v22137_v51, %v3405_v5  ;;  %18311 = vmatmul.mubr.msk.f32.gmra.mrb[134].mxu0 %vm850_vm0, %v4330_v40  ;;  %v24638_v50 = vld [vmem:[#allocation64_spill] sm:$0xff]  ;;  %v24639_v5 = vld [vmem:[#allocation63_spill] sm:$0xff] }
 0x32b   : > { %v4109_v10 = vmul.f32 %v24626_v16, %v3411_v33 }
 0x32c   : > { %v4108_v9 = vmul.f32 %v24627_v6, %v3406_v36  ;;  %v18214_v11 = vpop.f32.mrb[152].mxu1 }
 0x32d   : > { %4197 = vst.msk [vmem:[#allocation3 + $0x218] sm:$0xff] %vm850_vm0, %v4109_v10  ;;  %v3421_v58 = vadd.f32 %v18214_v11, %v22137_v51  ;;  %v3415_v0 = vpop.f32.mrb[153].mxu1  ;;  %v4331_v62 = vld [vmem:[#allocation3 + $0x1e9] sm:$0xff]  ;;  %v4332_v29 = vld [vmem:[#allocation3 + $0x1f1] sm:$0xff] }
 0x32e   : > { %4196 = vst.msk [vmem:[#allocation3 + $0x210] sm:$0xff] %vm850_vm0, %v4108_v9  ;;  %v3416_v41 = vadd.f32 %v22137_v51, %v3415_v0  ;;  %18313 = vmatprep.mubr.msk.f32.mxu0 %vm850_vm0, %v4331_v62  ;;  %v24641_v62 = vld [vmem:[#allocation65_spill] sm:$0xff] }
 0x32f   : > { %v4111_v13 = vmul.f32 %v24628_v15, %v3421_v58  ;;  %18314 = vmatmul.mubr.msk.f32.gmra.mrb[136].mxu0 %vm850_vm0, %v4332_v29  ;;  %v24640_v58 = vld [vmem:[#allocation66_spill] sm:$0xff] }
 0x330   : > { %v4110_v30 = vmul.f32 %v24629_v28, %v3416_v41  ;;  %v18217_v43 = vpop.f32.mrb[154].mxu1 }
 0x331   : > { %4199 = vst.msk [vmem:[#allocation3 + $0x228] sm:$0xff] %vm850_vm0, %v4111_v13  ;;  %v3431_v48 = vadd.f32 %v18217_v43, %v22137_v51  ;;  %v3425_v54 = vpop.f32.mrb[155].mxu1  ;;  %v4333_v17 = vld [vmem:[#allocation3 + $0x201] sm:$0xff] }
 0x332   : > { %4198 = vst.msk [vmem:[#allocation3 + $0x220] sm:$0xff] %vm850_vm0, %v4110_v30  ;;  %v3426_v19 = vadd.f32 %v22137_v51, %v3425_v54  ;;  %18316 = vmatprep.mubr.msk.f32.mxu0 %vm850_vm0, %v4333_v17  ;;  %v24642_v43 = vld [vmem:[#allocation68_spill] sm:$0xff]  ;;  %v24643_v54 = vld [vmem:[#allocation67_spill] sm:$0xff] }
 0x333   : > { %v4113_v2 = vmul.f32 %v24630_v60, %v3431_v48 }
 0x334   : > { %v4112_v47 = vmul.f32 %v24631_v8, %v3426_v19  ;;  %v18220_v4 = vpop.f32.mrb[156].mxu1 }
 0x335   : > { %4201 = vst.msk [vmem:[#allocation3 + $0x238] sm:$0xff] %vm850_vm0, %v4113_v2  ;;  %v3441_v23 = vadd.f32 %v18220_v4, %v22137_v51  ;;  %v3435_v45 = vpop.f32.mrb[157].mxu1  ;;  %v4334_v21 = vld [vmem:[#allocation3 + $0x209] sm:$0xff]  ;;  %v4335_v46 = vld [vmem:[#allocation3 + $0x211] sm:$0xff] }
 0x336   : > { %4200 = vst.msk [vmem:[#allocation3 + $0x230] sm:$0xff] %vm850_vm0, %v4112_v47  ;;  %v3436_v57 = vadd.f32 %v22137_v51, %v3435_v45  ;;  %18317 = vmatmul.mubr.msk.f32.gmra.mrb[138].mxu0 %vm850_vm0, %v4334_v21  ;;  %v24645_v21 = vld [vmem:[#allocation69_spill] sm:$0xff] }
 0x337   : > { %v4115_v35 = vmul.f32 %v24632_v53, %v3441_v23  ;;  %18319 = vmatprep.mubr.msk.f32.mxu0 %vm850_vm0, %v4335_v46  ;;  %v24644_v23 = vld [vmem:[#allocation70_spill] sm:$0xff] }
 0x338   : > { %v4114_v27 = vmul.f32 %v24633_v12, %v3436_v57  ;;  %v18223_v25 = vpop.f32.mrb[158].mxu1 }
 0x339   : > { %4203 = vst.msk [vmem:[#allocation3 + $0x248] sm:$0xff] %vm850_vm0, %v4115_v35  ;;  %v3451_v52 = vadd.f32 %v18223_v25, %v22137_v51  ;;  %v3445_v32 = vpop.f32.mrb[159].mxu1  ;;  %v4336_v59 = vld [vmem:[#allocation3 + $0x221] sm:$0xff] }
 0x33a   : > { %4202 = vst.msk [vmem:[#allocation3 + $0x240] sm:$0xff] %vm850_vm0, %v4114_v27  ;;  %v3446_v55 = vadd.f32 %v22137_v51, %v3445_v32  ;;  %18320 = vmatmul.mubr.msk.f32.gmra.mrb[140].mxu0 %vm850_vm0, %v4336_v59  ;;  %v24646_v25 = vld [vmem:[#allocation72_spill] sm:$0xff]  ;;  %v24647_v32 = vld [vmem:[#allocation71_spill] sm:$0xff] }
 0x33b   : > { %v4117_v39 = vmul.f32 %v24634_v34, %v3451_v52 }
 0x33c   : > { %v4116_v31 = vmul.f32 %v24635_v44, %v3446_v55  ;;  %v18226_v24 = vpop.f32.mrb[160].mxu1 }
 0x33d   : > { %4205 = vst.msk [vmem:[#allocation3 + $0x258] sm:$0xff] %vm850_vm0, %v4117_v39  ;;  %v3461_v63 = vadd.f32 %v18226_v24, %v22137_v51  ;;  %v3455_v61 = vpop.f32.mrb[161].mxu1  ;;  %v4337_v26 = vld [vmem:[#allocation3 + $0x229] sm:$0xff]  ;;  %v4338_v38 = vld [vmem:[#allocation3 + $0x231] sm:$0xff] }
 0x33e   : > { %4204 = vst.msk [vmem:[#allocation3 + $0x250] sm:$0xff] %vm850_vm0, %v4116_v31  ;;  %v3456_v56 = vadd.f32 %v22137_v51, %v3455_v61  ;;  %18322 = vmatprep.mubr.msk.f32.mxu0 %vm850_vm0, %v4337_v26  ;;  %v4218_v31 = vld [vmem:[#allocation3] sm:$0xff]  ;;  %v4219_v24 = vld [vmem:[#allocation3 + $0x8] sm:$0xff]  ;;  %v22488_v61 = vld [vmem:[%s24473_s7 + $0x18] sm:$0xff] }
 0x33f   : > { %v4119_v37 = vmul.f32 %v24636_v14, %v3461_v63  ;;  %18323 = vmatmul.mubr.msk.f32.gmra.mrb[142].mxu0 %vm850_vm0, %v4338_v38  ;;  %v4220_v63 = vld [vmem:[#allocation3 + $0x10] sm:$0xff]  ;;  %v4221_v26 = vld [vmem:[#allocation3 + $0x20] sm:$0xff]  ;;  %v4222_v38 = vld [vmem:[#allocation3 + $0x28] sm:$0xff] }
 0x340   : > { %v4118_v3 = vmul.f32 %v24637_v1, %v3456_v56  ;;  %v18229_v20 = vpop.f32.mrb[162].mxu1  ;;  %v4223_v56 = vld [vmem:[#allocation3 + $0x30] sm:$0xff]  ;;  %v4224_v14 = vld [vmem:[#allocation3 + $0x40] sm:$0xff] }
 0x341   : > { %4207 = vst.msk [vmem:[#allocation3 + $0x268] sm:$0xff] %vm850_vm0, %v4119_v37  ;;  %v3471_v18 = vadd.f32 %v18229_v20, %v22137_v51  ;;  %v3465_v42 = vpop.f32.mrb[163].mxu1  ;;  %v4339_v49 = vld [vmem:[#allocation3 + $0x241] sm:$0xff]  ;;  %v4226_v37 = vld [vmem:[#allocation3 + $0x50] sm:$0xff] }
 0x342   : > { %4206 = vst.msk [vmem:[#allocation3 + $0x260] sm:$0xff] %vm850_vm0, %v4118_v3  ;;  %v3466_v7 = vadd.f32 %v22137_v51, %v3465_v42  ;;  %18325 = vmatprep.mubr.msk.f32.mxu0 %vm850_vm0, %v4339_v49  ;;  %v4227_v1 = vld [vmem:[#allocation3 + $0x60] sm:$0xff]  ;;  %v4228_v3 = vld [vmem:[#allocation3 + $0x68] sm:$0xff]  ;;  %v4229_v20 = vld [vmem:[#allocation3 + $0x70] sm:$0xff] }
 0x343   : > { %v4121_v33 = vmul.f32 %v24638_v50, %v3471_v18  ;;  %v4230_v18 = vld [vmem:[#allocation3 + $0x80] sm:$0xff]  ;;  %v4231_v42 = vld [vmem:[#allocation3 + $0x88] sm:$0xff]  ;;  %v4232_v49 = vld [vmem:[#allocation3 + $0x90] sm:$0xff] }
 0x344   : > { %v4120_v40 = vmul.f32 %v24639_v5, %v3466_v7  ;;  %v18232_v36 = vpop.f32.mrb[164].mxu1  ;;  %v4233_v7 = vld [vmem:[#allocation3 + $0xa0] sm:$0xff]  ;;  %v4234_v50 = vld [vmem:[#allocation3 + $0xa8] sm:$0xff] }
 0x345   : > { %4209 = vst.msk [vmem:[#allocation3 + $0x278] sm:$0xff] %vm850_vm0, %v4121_v33  ;;  %v3481_v16 = vadd.f32 %v18232_v36, %v22137_v51  ;;  %v3475_v10 = vpop.f32.mrb[165].mxu1  ;;  %v4340_v6 = vld [vmem:[#allocation3 + $0x249] sm:$0xff]  ;;  %v4341_v9 = vld [vmem:[#allocation3 + $0x251] sm:$0xff]  ;;  %v4236_v5 = vld [vmem:[#allocation3 + $0xc0] sm:$0xff] }
 0x346   : > { %4208 = vst.msk [vmem:[#allocation3 + $0x270] sm:$0xff] %vm850_vm0, %v4120_v40  ;;  %v3476_v11 = vadd.f32 %v22137_v51, %v3475_v10  ;;  %18326 = vmatmul.mubr.msk.f32.gmra.mrb[144].mxu0 %vm850_vm0, %v4340_v6  ;;  %v4235_v33 = vld [vmem:[#allocation3 + $0xb0] sm:$0xff]  ;;  %v4237_v40 = vld [vmem:[#allocation3 + $0xc8] sm:$0xff] }
 0x347   : > { %v4123_v0 = vmul.f32 %v24640_v58, %v3481_v16  ;;  %18328 = vmatprep.mubr.msk.f32.mxu0 %vm850_vm0, %v4341_v9  ;;  %v4238_v36 = vld [vmem:[#allocation3 + $0xd0] sm:$0xff]  ;;  %v4239_v16 = vld [vmem:[#allocation3 + $0xe0] sm:$0xff]  ;;  %v4240_v10 = vld [vmem:[#allocation3 + $0xe8] sm:$0xff] }
 0x348   : > { %v4122_v29 = vmul.f32 %v24641_v62, %v3476_v11  ;;  %v18235_v41 = vpop.f32.mrb[166].mxu1  ;;  %v4241_v6 = vld [vmem:[#allocation3 + $0xf0] sm:$0xff]  ;;  %v4242_v9 = vld [vmem:[#allocation3 + $0x100] sm:$0xff]  ;;  %v4243_v11 = vld [vmem:[#allocation3 + $0x108] sm:$0xff] }
 0x349   : > { %4211 = vst.msk [vmem:[#allocation3 + $0x288] sm:$0xff] %vm850_vm0, %v4123_v0  ;;  %v3491_v15 = vadd.f32 %v18235_v41, %v22137_v51  ;;  %v3485_v13 = vpop.f32.mrb[167].mxu1  ;;  %v4342_v28 = vld [vmem:[#allocation3 + $0x261] sm:$0xff]  ;;  %v4244_v58 = vld [vmem:[#allocation3 + $0x110] sm:$0xff] }
 0x34a   : > { %4210 = vst.msk [vmem:[#allocation3 + $0x280] sm:$0xff] %vm850_vm0, %v4122_v29  ;;  %v3486_v30 = vadd.f32 %v22137_v51, %v3485_v13  ;;  %18329 = vmatmul.mubr.msk.f32.gmra.mrb[146].mxu0 %vm850_vm0, %v4342_v28  ;;  %v4245_v0 = vld [vmem:[#allocation3 + $0x120] sm:$0xff]  ;;  %v4246_v62 = vld [vmem:[#allocation3 + $0x128] sm:$0xff]  ;;  %v4247_v29 = vld [vmem:[#allocation3 + $0x130] sm:$0xff] }
 0x34b   : > { %v4125_v48 = vmul.f32 %v24642_v43, %v3491_v15  ;;  %v4248_v41 = vld [vmem:[#allocation3 + $0x140] sm:$0xff]  ;;  %v4249_v15 = vld [vmem:[#allocation3 + $0x148] sm:$0xff]  ;;  %v4250_v13 = vld [vmem:[#allocation3 + $0x150] sm:$0xff] }
 0x34c   : > { %v4124_v17 = vmul.f32 %v24643_v54, %v3486_v30  ;;  %v18238_v19 = vpop.f32.mrb[168].mxu1  ;;  %v4251_v28 = vld [vmem:[#allocation3 + $0x160] sm:$0xff]  ;;  %v4252_v30 = vld [vmem:[#allocation3 + $0x168] sm:$0xff]  ;;  %v4253_v43 = vld [vmem:[#allocation3 + $0x170] sm:$0xff] }
 0x34d   : > { %4213 = vst.msk [vmem:[#allocation3 + $0x298] sm:$0xff] %vm850_vm0, %v4125_v48  ;;  %v3501_v60 = vadd.f32 %v18238_v19, %v22137_v51  ;;  %v3495_v2 = vpop.f32.mrb[169].mxu1  ;;  %v4343_v8 = vld [vmem:[#allocation3 + $0x269] sm:$0xff]  ;;  %v4344_v47 = vld [vmem:[#allocation3 + $0x271] sm:$0xff]  ;;  %v4254_v48 = vld [vmem:[#allocation3 + $0x180] sm:$0xff] }
 0x34e   : > { %4212 = vst.msk [vmem:[#allocation3 + $0x290] sm:$0xff] %vm850_vm0, %v4124_v17  ;;  %v3496_v4 = vadd.f32 %v22137_v51, %v3495_v2  ;;  %18331 = vmatprep.mubr.msk.f32.mxu0 %vm850_vm0, %v4343_v8  ;;  %v4255_v54 = vld [vmem:[#allocation3 + $0x188] sm:$0xff]  ;;  %v4256_v17 = vld [vmem:[#allocation3 + $0x190] sm:$0xff]  ;;  %v4257_v19 = vld [vmem:[#allocation3 + $0x1a0] sm:$0xff] }
 0x34f   : > { %v4127_v45 = vmul.f32 %v24644_v23, %v3501_v60  ;;  %18332 = vmatmul.mubr.msk.f32.gmra.mrb[148].mxu0 %vm850_vm0, %v4344_v47  ;;  %v4258_v60 = vld [vmem:[#allocation3 + $0x1a8] sm:$0xff]  ;;  %v4259_v2 = vld [vmem:[#allocation3 + $0x1b0] sm:$0xff]  ;;  %v4260_v8 = vld [vmem:[#allocation3 + $0x1c0] sm:$0xff] }
 0x350   : > { %v4126_v46 = vmul.f32 %v24645_v21, %v3496_v4  ;;  %v18241_v57 = vpop.f32.mrb[170].mxu1  ;;  %v4261_v47 = vld [vmem:[#allocation3 + $0x1c8] sm:$0xff]  ;;  %v4262_v4 = vld [vmem:[#allocation3 + $0x1d0] sm:$0xff]  ;;  %v4263_v23 = vld [vmem:[#allocation3 + $0x1e0] sm:$0xff] }
 0x351   : > { %4215 = vst.msk [vmem:[#allocation3 + $0x2a8] sm:$0xff] %vm850_vm0, %v4127_v45  ;;  %v3511_v53 = vadd.f32 %v18241_v57, %v22137_v51  ;;  %v3505_v35 = vpop.f32.mrb[171].mxu1  ;;  %v4345_v12 = vld [vmem:[#allocation3 + $0x281] sm:$0xff]  ;;  %v4265_v21 = vld [vmem:[#allocation3 + $0x1f0] sm:$0xff] }
 0x352   : > { %4214 = vst.msk [vmem:[#allocation3 + $0x2a0] sm:$0xff] %vm850_vm0, %v4126_v46  ;;  %v3506_v27 = vadd.f32 %v22137_v51, %v3505_v35  ;;  %18334 = vmatprep.mubr.msk.f32.mxu0 %vm850_vm0, %v4345_v12  ;;  %v4264_v45 = vld [vmem:[#allocation3 + $0x1e8] sm:$0xff]  ;;  %v4266_v46 = vld [vmem:[#allocation3 + $0x200] sm:$0xff] }
 0x353   : > { %v4129_v52 = vmul.f32 %v24646_v25, %v3511_v53  ;;  %v4267_v57 = vld [vmem:[#allocation3 + $0x208] sm:$0xff]  ;;  %v4268_v53 = vld [vmem:[#allocation3 + $0x210] sm:$0xff]  ;;  %v4269_v35 = vld [vmem:[#allocation3 + $0x220] sm:$0xff] }
 0x354   : > { %v4128_v59 = vmul.f32 %v24647_v32, %v3506_v27  ;;  %v4270_v12 = vld [vmem:[#allocation3 + $0x228] sm:$0xff]  ;;  %v4271_v27 = vld [vmem:[#allocation3 + $0x230] sm:$0xff]  ;;  %v4272_v25 = vld [vmem:[#allocation3 + $0x240] sm:$0xff] }
 0x355   : > { %4217 = vst.msk [vmem:[#allocation3 + $0x2b8] sm:$0xff] %vm850_vm0, %v4129_v52  ;;  %v4346_v55 = vld [vmem:[#allocation3 + $0x289] sm:$0xff]  ;;  %v4347_v34 = vld [vmem:[#allocation3 + $0x291] sm:$0xff] }
 0x356   : > { %4216 = vst.msk [vmem:[#allocation3 + $0x2b0] sm:$0xff] %vm850_vm0, %v4128_v59  ;;  %18335 = vmatmul.mubr.msk.f32.gmra.mrb[150].mxu0 %vm850_vm0, %v4346_v55  ;;  %v4273_v52 = vld [vmem:[#allocation3 + $0x248] sm:$0xff]  ;;  %v4274_v32 = vld [vmem:[#allocation3 + $0x250] sm:$0xff]  ;;  %v4275_v59 = vld [vmem:[#allocation3 + $0x260] sm:$0xff] }
 0x357   : > { %18337 = vmatprep.mubr.msk.f32.mxu0 %vm850_vm0, %v4347_v34  ;;  %v4276_v55 = vld [vmem:[#allocation3 + $0x268] sm:$0xff]  ;;  %v4277_v34 = vld [vmem:[#allocation3 + $0x270] sm:$0xff] }
 0x359   : > { %v4348_v39 = vld [vmem:[#allocation3 + $0x2a1] sm:$0xff] }
 0x35a   : > { %18338 = vmatmul.mubr.msk.f32.gmra.mrb[152].mxu0 %vm850_vm0, %v4348_v39  ;;  %v4278_v39 = vld [vmem:[#allocation3 + $0x280] sm:$0xff] }
 0x35d   : > { %v4349_v51 = vld [vmem:[#allocation3 + $0x2a9] sm:$0xff]  ;;  %v4350_v44 = vld [vmem:[#allocation3 + $0x2b1] sm:$0xff] }
 0x35e   : > { %18340 = vmatprep.mubr.msk.f32.mxu0 %vm850_vm0, %v4349_v51  ;;  %v4279_v51 = vld [vmem:[#allocation3 + $0x288] sm:$0xff] }
 0x35f   : > { %18341 = vmatmul.mubr.msk.f32.gmra.mrb[154].mxu0 %vm850_vm0, %v4350_v44  ;;  %v4280_v44 = vld [vmem:[#allocation3 + $0x290] sm:$0xff] }
 0x360   : > { %18345 = vmatprep.mubr.msk.f32.mxu0 %vm850_vm0, %v4218_v31  ;;  %v4281_v31 = vld [vmem:[#allocation3 + $0x2a0] sm:$0xff] }
 0x363   : > { %18346 = vmatmul.mubr.msk.f32.vlgmr.msra.gmra.mrb[90].mxu0 %vm850_vm0, %v4219_v24  ;;  %v4282_v24 = vld [vmem:[#allocation3 + $0x2a8] sm:$0xff] }
 0x364   : > { %18445 = vmatpush3.msra.mxu0 %v22254_v22  ;;  %18348 = vmatprep.mubr.msk.f32.mxu0 %vm850_vm0, %v4220_v63  ;;  %v4225_v22 = vld [vmem:[#allocation3 + $0x48] sm:$0xff]  ;;  %v4283_v63 = vld [vmem:[#allocation3 + $0x2b0] sm:$0xff] }
 0x365   : > { %18545 = vmatprep.subr.mxu0 %v22488_v61 }
 0x367   : > { %18349 = vmatmul.mubr.msk.f32.gmra.mrb[92].mxu0 %vm850_vm0, %v4221_v26  ;;  %v5539_v26 = vld [vmem:[#allocation3 + $0x2] sm:$0xff] }
 0x368   : > { %18351 = vmatprep.mubr.msk.f32.mxu0 %vm850_vm0, %v4222_v38  ;;  %v5540_v38 = vld [vmem:[#allocation3 + $0xa] sm:$0xff] }
 0x36b   : > { %18352 = vmatmul.mubr.msk.f32.gmra.mrb[94].mxu0 %vm850_vm0, %v4223_v56  ;;  %v5541_v56 = vld [vmem:[#allocation3 + $0x12] sm:$0xff] }
 0x36c   : > { %18354 = vmatprep.mubr.msk.f32.mxu0 %vm850_vm0, %v4224_v14  ;;  %v22561_v14 = vld [vmem:[%s24473_s7 + $0x20] sm:$0xff] }
 0x36f   : > { %18355 = vmatmul.mubr.msk.f32.gmra.mrb[96].mxu0 %vm850_vm0, %v4225_v22  ;;  %v5542_v22 = vld [vmem:[#allocation3 + $0x22] sm:$0xff] }
 0x370   : > { %18357 = vmatprep.mubr.msk.f32.mxu0 %vm850_vm0, %v4226_v37  ;;  %v5543_v37 = vld [vmem:[#allocation3 + $0x2a] sm:$0xff] }
 0x373   : > { %18358 = vmatmul.mubr.msk.f32.gmra.mrb[98].mxu0 %vm850_vm0, %v4227_v1  ;;  %v5544_v1 = vld [vmem:[#allocation3 + $0x32] sm:$0xff] }
 0x374   : > { %18360 = vmatprep.mubr.msk.f32.mxu0 %vm850_vm0, %v4228_v3  ;;  %v5545_v3 = vld [vmem:[#allocation3 + $0x42] sm:$0xff] }
 0x377   : > { %18361 = vmatmul.mubr.msk.f32.gmra.mrb[100].mxu0 %vm850_vm0, %v4229_v20  ;;  %v5547_v20 = vld [vmem:[#allocation3 + $0x52] sm:$0xff] }
 0x378   : > { %18363 = vmatprep.mubr.msk.f32.mxu0 %vm850_vm0, %v4230_v18  ;;  %v5548_v18 = vld [vmem:[#allocation3 + $0x62] sm:$0xff] }
 0x37b   : > { %18364 = vmatmul.mubr.msk.f32.gmra.mrb[102].mxu0 %vm850_vm0, %v4231_v42  ;;  %v5549_v42 = vld [vmem:[#allocation3 + $0x6a] sm:$0xff] }
 0x37c   : > { %18366 = vmatprep.mubr.msk.f32.mxu0 %vm850_vm0, %v4232_v49  ;;  %v5550_v49 = vld [vmem:[#allocation3 + $0x72] sm:$0xff] }
 0x37f   : > { %18367 = vmatmul.mubr.msk.f32.gmra.mrb[104].mxu0 %vm850_vm0, %v4233_v7  ;;  %v5551_v7 = vld [vmem:[#allocation3 + $0x82] sm:$0xff] }
 0x380   : > { %18369 = vmatprep.mubr.msk.f32.mxu0 %vm850_vm0, %v4234_v50  ;;  %v5552_v50 = vld [vmem:[#allocation3 + $0x8a] sm:$0xff] }
 0x383   : > { %18370 = vmatmul.mubr.msk.f32.gmra.mrb[106].mxu0 %vm850_vm0, %v4235_v33  ;;  %v5553_v33 = vld [vmem:[#allocation3 + $0x92] sm:$0xff] }
 0x384   : > { %18372 = vmatprep.mubr.msk.f32.mxu0 %vm850_vm0, %v4236_v5  ;;  %v5554_v5 = vld [vmem:[#allocation3 + $0xa2] sm:$0xff] }
 0x387   : > { %18373 = vmatmul.mubr.msk.f32.gmra.mrb[108].mxu0 %vm850_vm0, %v4237_v40  ;;  %v5555_v40 = vld [vmem:[#allocation3 + $0xaa] sm:$0xff] }
 0x388   : > { %18375 = vmatprep.mubr.msk.f32.mxu0 %vm850_vm0, %v4238_v36  ;;  %v5556_v36 = vld [vmem:[#allocation3 + $0xb2] sm:$0xff] }
 0x38b   : > { %18376 = vmatmul.mubr.msk.f32.gmra.mrb[110].mxu0 %vm850_vm0, %v4239_v16  ;;  %v5557_v16 = vld [vmem:[#allocation3 + $0xc2] sm:$0xff] }
 0x38c   : > { %18378 = vmatprep.mubr.msk.f32.mxu0 %vm850_vm0, %v4240_v10  ;;  %v5558_v10 = vld [vmem:[#allocation3 + $0xca] sm:$0xff] }
 0x38f   : > { %18379 = vmatmul.mubr.msk.f32.gmra.mrb[112].mxu0 %vm850_vm0, %v4241_v6  ;;  %v5559_v6 = vld [vmem:[#allocation3 + $0xd2] sm:$0xff] }
 0x390   : > { %18381 = vmatprep.mubr.msk.f32.mxu0 %vm850_vm0, %v4242_v9  ;;  %v5560_v9 = vld [vmem:[#allocation3 + $0xe2] sm:$0xff] }
 0x393   : > { %18382 = vmatmul.mubr.msk.f32.gmra.mrb[114].mxu0 %vm850_vm0, %v4243_v11  ;;  %v5561_v11 = vld [vmem:[#allocation3 + $0xea] sm:$0xff] }
 0x394   : > { %18384 = vmatprep.mubr.msk.f32.mxu0 %vm850_vm0, %v4244_v58  ;;  %v5562_v58 = vld [vmem:[#allocation3 + $0xf2] sm:$0xff] }
 0x397   : > { %18385 = vmatmul.mubr.msk.f32.gmra.mrb[116].mxu0 %vm850_vm0, %v4245_v0  ;;  %v5563_v0 = vld [vmem:[#allocation3 + $0x102] sm:$0xff] }
 0x398   : > { %18387 = vmatprep.mubr.msk.f32.mxu0 %vm850_vm0, %v4246_v62  ;;  %v5564_v62 = vld [vmem:[#allocation3 + $0x10a] sm:$0xff] }
 0x39b   : > { %18388 = vmatmul.mubr.msk.f32.gmra.mrb[118].mxu0 %vm850_vm0, %v4247_v29  ;;  %v5565_v29 = vld [vmem:[#allocation3 + $0x112] sm:$0xff] }
 0x39c   : > { %18390 = vmatprep.mubr.msk.f32.mxu0 %vm850_vm0, %v4248_v41  ;;  %v5566_v41 = vld [vmem:[#allocation3 + $0x122] sm:$0xff] }
 0x39f   : > { %18391 = vmatmul.mubr.msk.f32.gmra.mrb[120].mxu0 %vm850_vm0, %v4249_v15  ;;  %v5567_v15 = vld [vmem:[#allocation3 + $0x12a] sm:$0xff] }
 0x3a0   : > { %18393 = vmatprep.mubr.msk.f32.mxu0 %vm850_vm0, %v4250_v13  ;;  %v5568_v13 = vld [vmem:[#allocation3 + $0x132] sm:$0xff] }
 0x3a3   : > { %18394 = vmatmul.mubr.msk.f32.gmra.mrb[122].mxu0 %vm850_vm0, %v4251_v28  ;;  %v5569_v28 = vld [vmem:[#allocation3 + $0x142] sm:$0xff] }
 0x3a4   : > { %18396 = vmatprep.mubr.msk.f32.mxu0 %vm850_vm0, %v4252_v30  ;;  %v5570_v30 = vld [vmem:[#allocation3 + $0x14a] sm:$0xff] }
 0x3a7   : > { %18397 = vmatmul.mubr.msk.f32.gmra.mrb[124].mxu0 %vm850_vm0, %v4253_v43  ;;  %v5571_v43 = vld [vmem:[#allocation3 + $0x152] sm:$0xff] }
 0x3a8   : > { %18399 = vmatprep.mubr.msk.f32.mxu0 %vm850_vm0, %v4254_v48  ;;  %v5572_v48 = vld [vmem:[#allocation3 + $0x162] sm:$0xff] }
 0x3ab   : > { %18400 = vmatmul.mubr.msk.f32.gmra.mrb[126].mxu0 %vm850_vm0, %v4255_v54  ;;  %v5573_v54 = vld [vmem:[#allocation3 + $0x16a] sm:$0xff] }
 0x3ac   : > { %18402 = vmatprep.mubr.msk.f32.mxu0 %vm850_vm0, %v4256_v17  ;;  %v5574_v17 = vld [vmem:[#allocation3 + $0x172] sm:$0xff] }
 0x3af   : > { %18403 = vmatmul.mubr.msk.f32.gmra.mrb[128].mxu0 %vm850_vm0, %v4257_v19  ;;  %v5575_v19 = vld [vmem:[#allocation3 + $0x182] sm:$0xff] }
 0x3b0   : > { %18405 = vmatprep.mubr.msk.f32.mxu0 %vm850_vm0, %v4258_v60  ;;  %v5576_v60 = vld [vmem:[#allocation3 + $0x18a] sm:$0xff] }
 0x3b3   : > { %18406 = vmatmul.mubr.msk.f32.gmra.mrb[130].mxu0 %vm850_vm0, %v4259_v2  ;;  %v5577_v2 = vld [vmem:[#allocation3 + $0x192] sm:$0xff] }
 0x3b4   : > { %18408 = vmatprep.mubr.msk.f32.mxu0 %vm850_vm0, %v4260_v8  ;;  %v5578_v8 = vld [vmem:[#allocation3 + $0x1a2] sm:$0xff] }
 0x3b7   : > { %18409 = vmatmul.mubr.msk.f32.gmra.mrb[132].mxu0 %vm850_vm0, %v4261_v47  ;;  %v5579_v47 = vld [vmem:[#allocation3 + $0x1aa] sm:$0xff] }
 0x3b8   : > { %18411 = vmatprep.mubr.msk.f32.mxu0 %vm850_vm0, %v4262_v4  ;;  %v5580_v4 = vld [vmem:[#allocation3 + $0x1b2] sm:$0xff] }
 0x3bb   : > { %18412 = vmatmul.mubr.msk.f32.gmra.mrb[134].mxu0 %vm850_vm0, %v4263_v23  ;;  %v5581_v23 = vld [vmem:[#allocation3 + $0x1c2] sm:$0xff] }
 0x3bc   : > { %18414 = vmatprep.mubr.msk.f32.mxu0 %vm850_vm0, %v4264_v45  ;;  %v5582_v45 = vld [vmem:[#allocation3 + $0x1ca] sm:$0xff] }
 0x3bf   : > { %18415 = vmatmul.mubr.msk.f32.gmra.mrb[136].mxu0 %vm850_vm0, %v4265_v21  ;;  %v5583_v21 = vld [vmem:[#allocation3 + $0x1d2] sm:$0xff] }
 0x3c0   : > { %18417 = vmatprep.mubr.msk.f32.mxu0 %vm850_vm0, %v4266_v46  ;;  %v5584_v46 = vld [vmem:[#allocation3 + $0x1e2] sm:$0xff] }
 0x3c3   : > { %18418 = vmatmul.mubr.msk.f32.gmra.mrb[138].mxu0 %vm850_vm0, %v4267_v57  ;;  %v5585_v57 = vld [vmem:[#allocation3 + $0x1ea] sm:$0xff] }
 0x3c4   : > { %18420 = vmatprep.mubr.msk.f32.mxu0 %vm850_vm0, %v4268_v53  ;;  %v5586_v53 = vld [vmem:[#allocation3 + $0x1f2] sm:$0xff] }
 0x3c7   : > { %18421 = vmatmul.mubr.msk.f32.gmra.mrb[140].mxu0 %vm850_vm0, %v4269_v35  ;;  %v5587_v35 = vld [vmem:[#allocation3 + $0x202] sm:$0xff] }
 0x3c8   : > { %18423 = vmatprep.mubr.msk.f32.mxu0 %vm850_vm0, %v4270_v12  ;;  %v5588_v12 = vld [vmem:[#allocation3 + $0x20a] sm:$0xff] }
 0x3cb   : > { %18424 = vmatmul.mubr.msk.f32.gmra.mrb[142].mxu0 %vm850_vm0, %v4271_v27  ;;  %v5589_v27 = vld [vmem:[#allocation3 + $0x212] sm:$0xff] }
 0x3cc   : > { %18426 = vmatprep.mubr.msk.f32.mxu0 %vm850_vm0, %v4272_v25  ;;  %v5590_v25 = vld [vmem:[#allocation3 + $0x222] sm:$0xff] }
 0x3cf   : > { %18427 = vmatmul.mubr.msk.f32.gmra.mrb[144].mxu0 %vm850_vm0, %v4273_v52  ;;  %v5591_v52 = vld [vmem:[#allocation3 + $0x22a] sm:$0xff] }
 0x3d0   : > { %18429 = vmatprep.mubr.msk.f32.mxu0 %vm850_vm0, %v4274_v32  ;;  %v5592_v32 = vld [vmem:[#allocation3 + $0x232] sm:$0xff] }
 0x3d3   : > { %18430 = vmatmul.mubr.msk.f32.gmra.mrb[146].mxu0 %vm850_vm0, %v4275_v59  ;;  %v5593_v59 = vld [vmem:[#allocation3 + $0x242] sm:$0xff] }
 0x3d4   : > { %18432 = vmatprep.mubr.msk.f32.mxu0 %vm850_vm0, %v4276_v55  ;;  %v5594_v55 = vld [vmem:[#allocation3 + $0x24a] sm:$0xff] }
 0x3d7   : > { %18433 = vmatmul.mubr.msk.f32.gmra.mrb[148].mxu0 %vm850_vm0, %v4277_v34  ;;  %v5595_v34 = vld [vmem:[#allocation3 + $0x252] sm:$0xff] }
 0x3d8   : > { %18435 = vmatprep.mubr.msk.f32.mxu0 %vm850_vm0, %v4278_v39  ;;  %v5596_v39 = vld [vmem:[#allocation3 + $0x262] sm:$0xff] }
 0x3db   : > { %18436 = vmatmul.mubr.msk.f32.gmra.mrb[150].mxu0 %vm850_vm0, %v4279_v51  ;;  %v5597_v51 = vld [vmem:[#allocation3 + $0x26a] sm:$0xff] }
 0x3dc   : > { %18438 = vmatprep.mubr.msk.f32.mxu0 %vm850_vm0, %v4280_v44  ;;  %v5598_v44 = vld [vmem:[#allocation3 + $0x272] sm:$0xff] }
 0x3df   : > { %18439 = vmatmul.mubr.msk.f32.gmra.mrb[152].mxu0 %vm850_vm0, %v4281_v31  ;;  %v5599_v31 = vld [vmem:[#allocation3 + $0x282] sm:$0xff] }
 0x3e0   : > { %18441 = vmatprep.mubr.msk.f32.mxu0 %vm850_vm0, %v4282_v24  ;;  %v5600_v24 = vld [vmem:[#allocation3 + $0x28a] sm:$0xff] }
 0x3e3   : > { %18442 = vmatmul.mubr.msk.f32.gmra.mrb[154].mxu0 %vm850_vm0, %v4283_v63  ;;  %v5601_v63 = vld [vmem:[#allocation3 + $0x292] sm:$0xff] }
 0x3e4   : > { %18446 = vmatprep.mubr.msk.f32.mxu0 %vm850_vm0, %v5539_v26  ;;  %v5602_v26 = vld [vmem:[#allocation3 + $0x2a2] sm:$0xff] }
 0x3e7   : > { %18447 = vmatmul.mubr.msk.f32.vlgmr.msra.gmra.mrb[90].mxu0 %vm850_vm0, %v5540_v38  ;;  %v5603_v38 = vld [vmem:[#allocation3 + $0x2aa] sm:$0xff] }
 0x3e8   : > { %18546 = vmatpush3.msra.mxu0 %v22488_v61  ;;  %18449 = vmatprep.mubr.msk.f32.mxu0 %vm850_vm0, %v5541_v56  ;;  %v5546_v61 = vld [vmem:[#allocation3 + $0x4a] sm:$0xff]  ;;  %v5604_v56 = vld [vmem:[#allocation3 + $0x2b2] sm:$0xff] }
 0x3e9   : > { %18646 = vmatprep.subr.mxu0 %v22561_v14 }
 0x3eb   : > { %18450 = vmatmul.mubr.msk.f32.gmra.mrb[92].mxu0 %vm850_vm0, %v5542_v22  ;;  %v6266_v22 = vld [vmem:[#allocation3 + $0x3] sm:$0xff] }
 0x3ec   : > { %18452 = vmatprep.mubr.msk.f32.mxu0 %vm850_vm0, %v5543_v37  ;;  %v6267_v37 = vld [vmem:[#allocation3 + $0xb] sm:$0xff] }
 0x3ef   : > { %18453 = vmatmul.mubr.msk.f32.gmra.mrb[94].mxu0 %vm850_vm0, %v5544_v1  ;;  %v6268_v1 = vld [vmem:[#allocation3 + $0x13] sm:$0xff] }
 0x3f0   : > { %18455 = vmatprep.mubr.msk.f32.mxu0 %vm850_vm0, %v5545_v3  ;;  %v22634_v3 = vld [vmem:[%s24473_s7 + $0x28] sm:$0xff] }
 0x3f3   : > { %18456 = vmatmul.mubr.msk.f32.gmra.mrb[96].mxu0 %vm850_vm0, %v5546_v61  ;;  %v6269_v61 = vld [vmem:[#allocation3 + $0x23] sm:$0xff] }
 0x3f4   : > { %18458 = vmatprep.mubr.msk.f32.mxu0 %vm850_vm0, %v5547_v20  ;;  %v6270_v20 = vld [vmem:[#allocation3 + $0x2b] sm:$0xff] }
 0x3f7   : > { %18459 = vmatmul.mubr.msk.f32.gmra.mrb[98].mxu0 %vm850_vm0, %v5548_v18  ;;  %v6271_v18 = vld [vmem:[#allocation3 + $0x33] sm:$0xff] }
 0x3f8   : > { %18461 = vmatprep.mubr.msk.f32.mxu0 %vm850_vm0, %v5549_v42  ;;  %v6272_v42 = vld [vmem:[#allocation3 + $0x43] sm:$0xff] }
 0x3fb   : > { %18462 = vmatmul.mubr.msk.f32.gmra.mrb[100].mxu0 %vm850_vm0, %v5550_v49  ;;  %v6274_v49 = vld [vmem:[#allocation3 + $0x53] sm:$0xff] }
 0x3fc   : > { %18464 = vmatprep.mubr.msk.f32.mxu0 %vm850_vm0, %v5551_v7  ;;  %v6275_v7 = vld [vmem:[#allocation3 + $0x63] sm:$0xff] }
 0x3ff   : > { %18465 = vmatmul.mubr.msk.f32.gmra.mrb[102].mxu0 %vm850_vm0, %v5552_v50  ;;  %v6276_v50 = vld [vmem:[#allocation3 + $0x6b] sm:$0xff] }
 0x400   : > { %18467 = vmatprep.mubr.msk.f32.mxu0 %vm850_vm0, %v5553_v33  ;;  %v6277_v33 = vld [vmem:[#allocation3 + $0x73] sm:$0xff] }
 0x403   : > { %18468 = vmatmul.mubr.msk.f32.gmra.mrb[104].mxu0 %vm850_vm0, %v5554_v5  ;;  %v6278_v5 = vld [vmem:[#allocation3 + $0x83] sm:$0xff] }
 0x404   : > { %18470 = vmatprep.mubr.msk.f32.mxu0 %vm850_vm0, %v5555_v40  ;;  %v6279_v40 = vld [vmem:[#allocation3 + $0x8b] sm:$0xff] }
 0x407   : > { %18471 = vmatmul.mubr.msk.f32.gmra.mrb[106].mxu0 %vm850_vm0, %v5556_v36  ;;  %v6280_v36 = vld [vmem:[#allocation3 + $0x93] sm:$0xff] }
 0x408   : > { %18473 = vmatprep.mubr.msk.f32.mxu0 %vm850_vm0, %v5557_v16  ;;  %v6281_v16 = vld [vmem:[#allocation3 + $0xa3] sm:$0xff] }
 0x40b   : > { %18474 = vmatmul.mubr.msk.f32.gmra.mrb[108].mxu0 %vm850_vm0, %v5558_v10  ;;  %v6282_v10 = vld [vmem:[#allocation3 + $0xab] sm:$0xff] }
 0x40c   : > { %18476 = vmatprep.mubr.msk.f32.mxu0 %vm850_vm0, %v5559_v6  ;;  %v6283_v6 = vld [vmem:[#allocation3 + $0xb3] sm:$0xff] }
 0x40f   : > { %18477 = vmatmul.mubr.msk.f32.gmra.mrb[110].mxu0 %vm850_vm0, %v5560_v9  ;;  %v6284_v9 = vld [vmem:[#allocation3 + $0xc3] sm:$0xff] }
 0x410   : > { %18479 = vmatprep.mubr.msk.f32.mxu0 %vm850_vm0, %v5561_v11  ;;  %v6285_v11 = vld [vmem:[#allocation3 + $0xcb] sm:$0xff] }
 0x413   : > { %18480 = vmatmul.mubr.msk.f32.gmra.mrb[112].mxu0 %vm850_vm0, %v5562_v58  ;;  %v6286_v58 = vld [vmem:[#allocation3 + $0xd3] sm:$0xff] }
 0x414   : > { %18482 = vmatprep.mubr.msk.f32.mxu0 %vm850_vm0, %v5563_v0  ;;  %v6287_v0 = vld [vmem:[#allocation3 + $0xe3] sm:$0xff] }
 0x417   : > { %18483 = vmatmul.mubr.msk.f32.gmra.mrb[114].mxu0 %vm850_vm0, %v5564_v62  ;;  %v6288_v62 = vld [vmem:[#allocation3 + $0xeb] sm:$0xff] }
 0x418   : > { %18485 = vmatprep.mubr.msk.f32.mxu0 %vm850_vm0, %v5565_v29  ;;  %v6289_v29 = vld [vmem:[#allocation3 + $0xf3] sm:$0xff] }
 0x41b   : > { %18486 = vmatmul.mubr.msk.f32.gmra.mrb[116].mxu0 %vm850_vm0, %v5566_v41  ;;  %v6290_v41 = vld [vmem:[#allocation3 + $0x103] sm:$0xff] }
 0x41c   : > { %18488 = vmatprep.mubr.msk.f32.mxu0 %vm850_vm0, %v5567_v15  ;;  %v6291_v15 = vld [vmem:[#allocation3 + $0x10b] sm:$0xff] }
 0x41f   : > { %18489 = vmatmul.mubr.msk.f32.gmra.mrb[118].mxu0 %vm850_vm0, %v5568_v13  ;;  %v6292_v13 = vld [vmem:[#allocation3 + $0x113] sm:$0xff] }
 0x420   : > { %18491 = vmatprep.mubr.msk.f32.mxu0 %vm850_vm0, %v5569_v28  ;;  %v6293_v28 = vld [vmem:[#allocation3 + $0x123] sm:$0xff] }
 0x423   : > { %18492 = vmatmul.mubr.msk.f32.gmra.mrb[120].mxu0 %vm850_vm0, %v5570_v30  ;;  %v6294_v30 = vld [vmem:[#allocation3 + $0x12b] sm:$0xff] }
 0x424   : > { %18494 = vmatprep.mubr.msk.f32.mxu0 %vm850_vm0, %v5571_v43  ;;  %v6295_v43 = vld [vmem:[#allocation3 + $0x133] sm:$0xff] }
 0x427   : > { %18495 = vmatmul.mubr.msk.f32.gmra.mrb[122].mxu0 %vm850_vm0, %v5572_v48  ;;  %v6296_v48 = vld [vmem:[#allocation3 + $0x143] sm:$0xff] }
 0x428   : > { %18497 = vmatprep.mubr.msk.f32.mxu0 %vm850_vm0, %v5573_v54  ;;  %v6297_v54 = vld [vmem:[#allocation3 + $0x14b] sm:$0xff] }
 0x42b   : > { %18498 = vmatmul.mubr.msk.f32.gmra.mrb[124].mxu0 %vm850_vm0, %v5574_v17  ;;  %v6298_v17 = vld [vmem:[#allocation3 + $0x153] sm:$0xff] }
 0x42c   : > { %18500 = vmatprep.mubr.msk.f32.mxu0 %vm850_vm0, %v5575_v19  ;;  %v6299_v19 = vld [vmem:[#allocation3 + $0x163] sm:$0xff] }
 0x42f   : > { %18501 = vmatmul.mubr.msk.f32.gmra.mrb[126].mxu0 %vm850_vm0, %v5576_v60  ;;  %v6300_v60 = vld [vmem:[#allocation3 + $0x16b] sm:$0xff] }
 0x430   : > { %18503 = vmatprep.mubr.msk.f32.mxu0 %vm850_vm0, %v5577_v2  ;;  %v6301_v2 = vld [vmem:[#allocation3 + $0x173] sm:$0xff] }
 0x433   : > { %18504 = vmatmul.mubr.msk.f32.gmra.mrb[128].mxu0 %vm850_vm0, %v5578_v8  ;;  %v6302_v8 = vld [vmem:[#allocation3 + $0x183] sm:$0xff] }
 0x434   : > { %18506 = vmatprep.mubr.msk.f32.mxu0 %vm850_vm0, %v5579_v47  ;;  %v6303_v47 = vld [vmem:[#allocation3 + $0x18b] sm:$0xff] }
 0x437   : > { %18507 = vmatmul.mubr.msk.f32.gmra.mrb[130].mxu0 %vm850_vm0, %v5580_v4  ;;  %v6304_v4 = vld [vmem:[#allocation3 + $0x193] sm:$0xff] }
 0x438   : > { %18509 = vmatprep.mubr.msk.f32.mxu0 %vm850_vm0, %v5581_v23  ;;  %v6305_v23 = vld [vmem:[#allocation3 + $0x1a3] sm:$0xff] }
 0x43b   : > { %18510 = vmatmul.mubr.msk.f32.gmra.mrb[132].mxu0 %vm850_vm0, %v5582_v45  ;;  %v6306_v45 = vld [vmem:[#allocation3 + $0x1ab] sm:$0xff] }
 0x43c   : > { %18512 = vmatprep.mubr.msk.f32.mxu0 %vm850_vm0, %v5583_v21  ;;  %v6307_v21 = vld [vmem:[#allocation3 + $0x1b3] sm:$0xff] }
 0x43f   : > { %18513 = vmatmul.mubr.msk.f32.gmra.mrb[134].mxu0 %vm850_vm0, %v5584_v46  ;;  %v6308_v46 = vld [vmem:[#allocation3 + $0x1c3] sm:$0xff] }
 0x440   : > { %18515 = vmatprep.mubr.msk.f32.mxu0 %vm850_vm0, %v5585_v57  ;;  %v6309_v57 = vld [vmem:[#allocation3 + $0x1cb] sm:$0xff] }
 0x443   : > { %18516 = vmatmul.mubr.msk.f32.gmra.mrb[136].mxu0 %vm850_vm0, %v5586_v53  ;;  %v6310_v53 = vld [vmem:[#allocation3 + $0x1d3] sm:$0xff] }
 0x444   : > { %18518 = vmatprep.mubr.msk.f32.mxu0 %vm850_vm0, %v5587_v35  ;;  %v6311_v35 = vld [vmem:[#allocation3 + $0x1e3] sm:$0xff] }
 0x447   : > { %18519 = vmatmul.mubr.msk.f32.gmra.mrb[138].mxu0 %vm850_vm0, %v5588_v12  ;;  %v6312_v12 = vld [vmem:[#allocation3 + $0x1eb] sm:$0xff] }
 0x448   : > { %18521 = vmatprep.mubr.msk.f32.mxu0 %vm850_vm0, %v5589_v27  ;;  %v6313_v27 = vld [vmem:[#allocation3 + $0x1f3] sm:$0xff] }
 0x44b   : > { %18522 = vmatmul.mubr.msk.f32.gmra.mrb[140].mxu0 %vm850_vm0, %v5590_v25  ;;  %v6314_v25 = vld [vmem:[#allocation3 + $0x203] sm:$0xff] }
 0x44c   : > { %18524 = vmatprep.mubr.msk.f32.mxu0 %vm850_vm0, %v5591_v52  ;;  %v6315_v52 = vld [vmem:[#allocation3 + $0x20b] sm:$0xff] }
 0x44f   : > { %18525 = vmatmul.mubr.msk.f32.gmra.mrb[142].mxu0 %vm850_vm0, %v5592_v32  ;;  %v6316_v32 = vld [vmem:[#allocation3 + $0x213] sm:$0xff] }
 0x450   : > { %18527 = vmatprep.mubr.msk.f32.mxu0 %vm850_vm0, %v5593_v59  ;;  %v6317_v59 = vld [vmem:[#allocation3 + $0x223] sm:$0xff] }
 0x453   : > { %18528 = vmatmul.mubr.msk.f32.gmra.mrb[144].mxu0 %vm850_vm0, %v5594_v55  ;;  %v6318_v55 = vld [vmem:[#allocation3 + $0x22b] sm:$0xff] }
 0x454   : > { %18530 = vmatprep.mubr.msk.f32.mxu0 %vm850_vm0, %v5595_v34  ;;  %v6319_v34 = vld [vmem:[#allocation3 + $0x233] sm:$0xff] }
 0x457   : > { %18531 = vmatmul.mubr.msk.f32.gmra.mrb[146].mxu0 %vm850_vm0, %v5596_v39  ;;  %v6320_v39 = vld [vmem:[#allocation3 + $0x243] sm:$0xff] }
 0x458   : > { %18533 = vmatprep.mubr.msk.f32.mxu0 %vm850_vm0, %v5597_v51  ;;  %v6321_v51 = vld [vmem:[#allocation3 + $0x24b] sm:$0xff] }
 0x45b   : > { %18534 = vmatmul.mubr.msk.f32.gmra.mrb[148].mxu0 %vm850_vm0, %v5598_v44  ;;  %v6322_v44 = vld [vmem:[#allocation3 + $0x253] sm:$0xff] }
 0x45c   : > { %18536 = vmatprep.mubr.msk.f32.mxu0 %vm850_vm0, %v5599_v31  ;;  %v6323_v31 = vld [vmem:[#allocation3 + $0x263] sm:$0xff] }
 0x45f   : > { %18537 = vmatmul.mubr.msk.f32.gmra.mrb[150].mxu0 %vm850_vm0, %v5600_v24  ;;  %v6324_v24 = vld [vmem:[#allocation3 + $0x26b] sm:$0xff] }
 0x460   : > { %18539 = vmatprep.mubr.msk.f32.mxu0 %vm850_vm0, %v5601_v63  ;;  %v6325_v63 = vld [vmem:[#allocation3 + $0x273] sm:$0xff] }
 0x463   : > { %18540 = vmatmul.mubr.msk.f32.gmra.mrb[152].mxu0 %vm850_vm0, %v5602_v26  ;;  %v6326_v26 = vld [vmem:[#allocation3 + $0x283] sm:$0xff] }
 0x464   : > { %18542 = vmatprep.mubr.msk.f32.mxu0 %vm850_vm0, %v5603_v38  ;;  %v6327_v38 = vld [vmem:[#allocation3 + $0x28b] sm:$0xff] }
 0x467   : > { %18543 = vmatmul.mubr.msk.f32.gmra.mrb[154].mxu0 %vm850_vm0, %v5604_v56  ;;  %v6328_v56 = vld [vmem:[#allocation3 + $0x293] sm:$0xff] }
 0x468   : > { %18547 = vmatprep.mubr.msk.f32.mxu0 %vm850_vm0, %v6266_v22  ;;  %v6329_v22 = vld [vmem:[#allocation3 + $0x2a3] sm:$0xff] }
 0x46b   : > { %18548 = vmatmul.mubr.msk.f32.vlgmr.msra.gmra.mrb[90].mxu0 %vm850_vm0, %v6267_v37  ;;  %v6330_v37 = vld [vmem:[#allocation3 + $0x2ab] sm:$0xff] }
 0x46c   : > { %18647 = vmatpush3.msra.mxu0 %v22561_v14  ;;  %18550 = vmatprep.mubr.msk.f32.mxu0 %vm850_vm0, %v6268_v1  ;;  %v6273_v14 = vld [vmem:[#allocation3 + $0x4b] sm:$0xff]  ;;  %v6331_v1 = vld [vmem:[#allocation3 + $0x2b3] sm:$0xff] }
 0x46d   : > { %18747 = vmatprep.subr.mxu0 %v22634_v3 }
 0x46f   : > { %18551 = vmatmul.mubr.msk.f32.gmra.mrb[92].mxu0 %vm850_vm0, %v6269_v61  ;;  %v6993_v61 = vld [vmem:[#allocation3 + $0x4] sm:$0xff] }
 0x470   : > { %18553 = vmatprep.mubr.msk.f32.mxu0 %vm850_vm0, %v6270_v20  ;;  %v6994_v20 = vld [vmem:[#allocation3 + $0xc] sm:$0xff] }
 0x473   : > { %18554 = vmatmul.mubr.msk.f32.gmra.mrb[94].mxu0 %vm850_vm0, %v6271_v18  ;;  %v6995_v18 = vld [vmem:[#allocation3 + $0x14] sm:$0xff] }
 0x474   : > { %18556 = vmatprep.mubr.msk.f32.mxu0 %vm850_vm0, %v6272_v42  ;;  %v22707_v42 = vld [vmem:[%s24473_s7 + $0x30] sm:$0xff] }
 0x477   : > { %18557 = vmatmul.mubr.msk.f32.gmra.mrb[96].mxu0 %vm850_vm0, %v6273_v14  ;;  %v6996_v14 = vld [vmem:[#allocation3 + $0x24] sm:$0xff] }
 0x478   : > { %18559 = vmatprep.mubr.msk.f32.mxu0 %vm850_vm0, %v6274_v49  ;;  %v6997_v49 = vld [vmem:[#allocation3 + $0x2c] sm:$0xff] }
 0x47b   : > { %18560 = vmatmul.mubr.msk.f32.gmra.mrb[98].mxu0 %vm850_vm0, %v6275_v7  ;;  %v6998_v7 = vld [vmem:[#allocation3 + $0x34] sm:$0xff] }
 0x47c   : > { %18562 = vmatprep.mubr.msk.f32.mxu0 %vm850_vm0, %v6276_v50  ;;  %v6999_v50 = vld [vmem:[#allocation3 + $0x44] sm:$0xff] }
 0x47f   : > { %18563 = vmatmul.mubr.msk.f32.gmra.mrb[100].mxu0 %vm850_vm0, %v6277_v33  ;;  %v7001_v33 = vld [vmem:[#allocation3 + $0x54] sm:$0xff] }
 0x480   : > { %18565 = vmatprep.mubr.msk.f32.mxu0 %vm850_vm0, %v6278_v5  ;;  %v7002_v5 = vld [vmem:[#allocation3 + $0x64] sm:$0xff] }
 0x483   : > { %18566 = vmatmul.mubr.msk.f32.gmra.mrb[102].mxu0 %vm850_vm0, %v6279_v40  ;;  %v7003_v40 = vld [vmem:[#allocation3 + $0x6c] sm:$0xff] }
 0x484   : > { %18568 = vmatprep.mubr.msk.f32.mxu0 %vm850_vm0, %v6280_v36  ;;  %v7004_v36 = vld [vmem:[#allocation3 + $0x74] sm:$0xff] }
 0x487   : > { %18569 = vmatmul.mubr.msk.f32.gmra.mrb[104].mxu0 %vm850_vm0, %v6281_v16  ;;  %v7005_v16 = vld [vmem:[#allocation3 + $0x84] sm:$0xff] }
 0x488   : > { %18571 = vmatprep.mubr.msk.f32.mxu0 %vm850_vm0, %v6282_v10  ;;  %v7006_v10 = vld [vmem:[#allocation3 + $0x8c] sm:$0xff] }
 0x48b   : > { %18572 = vmatmul.mubr.msk.f32.gmra.mrb[106].mxu0 %vm850_vm0, %v6283_v6  ;;  %v7007_v6 = vld [vmem:[#allocation3 + $0x94] sm:$0xff] }
 0x48c   : > { %18574 = vmatprep.mubr.msk.f32.mxu0 %vm850_vm0, %v6284_v9  ;;  %v7008_v9 = vld [vmem:[#allocation3 + $0xa4] sm:$0xff] }
 0x48f   : > { %18575 = vmatmul.mubr.msk.f32.gmra.mrb[108].mxu0 %vm850_vm0, %v6285_v11  ;;  %v7009_v11 = vld [vmem:[#allocation3 + $0xac] sm:$0xff] }
 0x490   : > { %18577 = vmatprep.mubr.msk.f32.mxu0 %vm850_vm0, %v6286_v58  ;;  %v7010_v58 = vld [vmem:[#allocation3 + $0xb4] sm:$0xff] }
 0x493   : > { %18578 = vmatmul.mubr.msk.f32.gmra.mrb[110].mxu0 %vm850_vm0, %v6287_v0  ;;  %v7011_v0 = vld [vmem:[#allocation3 + $0xc4] sm:$0xff] }
 0x494   : > { %18580 = vmatprep.mubr.msk.f32.mxu0 %vm850_vm0, %v6288_v62  ;;  %v7012_v62 = vld [vmem:[#allocation3 + $0xcc] sm:$0xff] }
 0x497   : > { %18581 = vmatmul.mubr.msk.f32.gmra.mrb[112].mxu0 %vm850_vm0, %v6289_v29  ;;  %v7013_v29 = vld [vmem:[#allocation3 + $0xd4] sm:$0xff] }
 0x498   : > { %18583 = vmatprep.mubr.msk.f32.mxu0 %vm850_vm0, %v6290_v41  ;;  %v7014_v41 = vld [vmem:[#allocation3 + $0xe4] sm:$0xff] }
 0x49b   : > { %18584 = vmatmul.mubr.msk.f32.gmra.mrb[114].mxu0 %vm850_vm0, %v6291_v15  ;;  %v7015_v15 = vld [vmem:[#allocation3 + $0xec] sm:$0xff] }
 0x49c   : > { %18586 = vmatprep.mubr.msk.f32.mxu0 %vm850_vm0, %v6292_v13  ;;  %v7016_v13 = vld [vmem:[#allocation3 + $0xf4] sm:$0xff] }
 0x49f   : > { %18587 = vmatmul.mubr.msk.f32.gmra.mrb[116].mxu0 %vm850_vm0, %v6293_v28  ;;  %v7017_v28 = vld [vmem:[#allocation3 + $0x104] sm:$0xff] }
 0x4a0   : > { %18589 = vmatprep.mubr.msk.f32.mxu0 %vm850_vm0, %v6294_v30  ;;  %v7018_v30 = vld [vmem:[#allocation3 + $0x10c] sm:$0xff] }
 0x4a3   : > { %18590 = vmatmul.mubr.msk.f32.gmra.mrb[118].mxu0 %vm850_vm0, %v6295_v43  ;;  %v7019_v43 = vld [vmem:[#allocation3 + $0x114] sm:$0xff] }
 0x4a4   : > { %18592 = vmatprep.mubr.msk.f32.mxu0 %vm850_vm0, %v6296_v48  ;;  %v7020_v48 = vld [vmem:[#allocation3 + $0x124] sm:$0xff] }
 0x4a7   : > { %18593 = vmatmul.mubr.msk.f32.gmra.mrb[120].mxu0 %vm850_vm0, %v6297_v54  ;;  %v7021_v54 = vld [vmem:[#allocation3 + $0x12c] sm:$0xff] }
 0x4a8   : > { %18595 = vmatprep.mubr.msk.f32.mxu0 %vm850_vm0, %v6298_v17  ;;  %v7022_v17 = vld [vmem:[#allocation3 + $0x134] sm:$0xff] }
 0x4ab   : > { %18596 = vmatmul.mubr.msk.f32.gmra.mrb[122].mxu0 %vm850_vm0, %v6299_v19  ;;  %v7023_v19 = vld [vmem:[#allocation3 + $0x144] sm:$0xff] }
 0x4ac   : > { %18598 = vmatprep.mubr.msk.f32.mxu0 %vm850_vm0, %v6300_v60  ;;  %v7024_v60 = vld [vmem:[#allocation3 + $0x14c] sm:$0xff] }
 0x4af   : > { %18599 = vmatmul.mubr.msk.f32.gmra.mrb[124].mxu0 %vm850_vm0, %v6301_v2  ;;  %v7025_v2 = vld [vmem:[#allocation3 + $0x154] sm:$0xff] }
 0x4b0   : > { %18601 = vmatprep.mubr.msk.f32.mxu0 %vm850_vm0, %v6302_v8  ;;  %v7026_v8 = vld [vmem:[#allocation3 + $0x164] sm:$0xff] }
 0x4b3   : > { %18602 = vmatmul.mubr.msk.f32.gmra.mrb[126].mxu0 %vm850_vm0, %v6303_v47  ;;  %v7027_v47 = vld [vmem:[#allocation3 + $0x16c] sm:$0xff] }
 0x4b4   : > { %18604 = vmatprep.mubr.msk.f32.mxu0 %vm850_vm0, %v6304_v4  ;;  %v7028_v4 = vld [vmem:[#allocation3 + $0x174] sm:$0xff] }
 0x4b7   : > { %18605 = vmatmul.mubr.msk.f32.gmra.mrb[128].mxu0 %vm850_vm0, %v6305_v23  ;;  %v7029_v23 = vld [vmem:[#allocation3 + $0x184] sm:$0xff] }
 0x4b8   : > { %18607 = vmatprep.mubr.msk.f32.mxu0 %vm850_vm0, %v6306_v45  ;;  %v7030_v45 = vld [vmem:[#allocation3 + $0x18c] sm:$0xff] }
 0x4bb   : > { %18608 = vmatmul.mubr.msk.f32.gmra.mrb[130].mxu0 %vm850_vm0, %v6307_v21  ;;  %v7031_v21 = vld [vmem:[#allocation3 + $0x194] sm:$0xff] }
 0x4bc   : > { %18610 = vmatprep.mubr.msk.f32.mxu0 %vm850_vm0, %v6308_v46  ;;  %v7032_v46 = vld [vmem:[#allocation3 + $0x1a4] sm:$0xff] }
 0x4bf   : > { %18611 = vmatmul.mubr.msk.f32.gmra.mrb[132].mxu0 %vm850_vm0, %v6309_v57  ;;  %v7033_v57 = vld [vmem:[#allocation3 + $0x1ac] sm:$0xff] }
 0x4c0   : > { %18613 = vmatprep.mubr.msk.f32.mxu0 %vm850_vm0, %v6310_v53  ;;  %v7034_v53 = vld [vmem:[#allocation3 + $0x1b4] sm:$0xff] }
 0x4c3   : > { %18614 = vmatmul.mubr.msk.f32.gmra.mrb[134].mxu0 %vm850_vm0, %v6311_v35  ;;  %v7035_v35 = vld [vmem:[#allocation3 + $0x1c4] sm:$0xff] }
 0x4c4   : > { %18616 = vmatprep.mubr.msk.f32.mxu0 %vm850_vm0, %v6312_v12  ;;  %v7036_v12 = vld [vmem:[#allocation3 + $0x1cc] sm:$0xff] }
 0x4c7   : > { %18617 = vmatmul.mubr.msk.f32.gmra.mrb[136].mxu0 %vm850_vm0, %v6313_v27  ;;  %v7037_v27 = vld [vmem:[#allocation3 + $0x1d4] sm:$0xff] }
 0x4c8   : > { %18619 = vmatprep.mubr.msk.f32.mxu0 %vm850_vm0, %v6314_v25  ;;  %v7038_v25 = vld [vmem:[#allocation3 + $0x1e4] sm:$0xff] }
 0x4cb   : > { %18620 = vmatmul.mubr.msk.f32.gmra.mrb[138].mxu0 %vm850_vm0, %v6315_v52  ;;  %v7039_v52 = vld [vmem:[#allocation3 + $0x1ec] sm:$0xff] }
 0x4cc   : > { %18622 = vmatprep.mubr.msk.f32.mxu0 %vm850_vm0, %v6316_v32  ;;  %v7040_v32 = vld [vmem:[#allocation3 + $0x1f4] sm:$0xff] }
 0x4cf   : > { %18623 = vmatmul.mubr.msk.f32.gmra.mrb[140].mxu0 %vm850_vm0, %v6317_v59  ;;  %v7041_v59 = vld [vmem:[#allocation3 + $0x204] sm:$0xff] }
 0x4d0   : > { %18625 = vmatprep.mubr.msk.f32.mxu0 %vm850_vm0, %v6318_v55  ;;  %v7042_v55 = vld [vmem:[#allocation3 + $0x20c] sm:$0xff] }
 0x4d3   : > { %18626 = vmatmul.mubr.msk.f32.gmra.mrb[142].mxu0 %vm850_vm0, %v6319_v34  ;;  %v7043_v34 = vld [vmem:[#allocation3 + $0x214] sm:$0xff] }
 0x4d4   : > { %18628 = vmatprep.mubr.msk.f32.mxu0 %vm850_vm0, %v6320_v39  ;;  %v7044_v39 = vld [vmem:[#allocation3 + $0x224] sm:$0xff] }
 0x4d7   : > { %18629 = vmatmul.mubr.msk.f32.gmra.mrb[144].mxu0 %vm850_vm0, %v6321_v51  ;;  %v7045_v51 = vld [vmem:[#allocation3 + $0x22c] sm:$0xff] }
 0x4d8   : > { %18631 = vmatprep.mubr.msk.f32.mxu0 %vm850_vm0, %v6322_v44  ;;  %v7046_v44 = vld [vmem:[#allocation3 + $0x234] sm:$0xff] }
 0x4db   : > { %18632 = vmatmul.mubr.msk.f32.gmra.mrb[146].mxu0 %vm850_vm0, %v6323_v31  ;;  %v7047_v31 = vld [vmem:[#allocation3 + $0x244] sm:$0xff] }
 0x4dc   : > { %18634 = vmatprep.mubr.msk.f32.mxu0 %vm850_vm0, %v6324_v24  ;;  %v7048_v24 = vld [vmem:[#allocation3 + $0x24c] sm:$0xff] }
 0x4df   : > { %18635 = vmatmul.mubr.msk.f32.gmra.mrb[148].mxu0 %vm850_vm0, %v6325_v63  ;;  %v7049_v63 = vld [vmem:[#allocation3 + $0x254] sm:$0xff] }
 0x4e0   : > { %18637 = vmatprep.mubr.msk.f32.mxu0 %vm850_vm0, %v6326_v26  ;;  %v7050_v26 = vld [vmem:[#allocation3 + $0x264] sm:$0xff] }
 0x4e3   : > { %18638 = vmatmul.mubr.msk.f32.gmra.mrb[150].mxu0 %vm850_vm0, %v6327_v38  ;;  %v7051_v38 = vld [vmem:[#allocation3 + $0x26c] sm:$0xff] }
 0x4e4   : > { %18640 = vmatprep.mubr.msk.f32.mxu0 %vm850_vm0, %v6328_v56  ;;  %v7052_v56 = vld [vmem:[#allocation3 + $0x274] sm:$0xff] }
 0x4e7   : > { %18641 = vmatmul.mubr.msk.f32.gmra.mrb[152].mxu0 %vm850_vm0, %v6329_v22  ;;  %v7053_v22 = vld [vmem:[#allocation3 + $0x284] sm:$0xff] }
 0x4e8   : > { %18643 = vmatprep.mubr.msk.f32.mxu0 %vm850_vm0, %v6330_v37  ;;  %v7054_v37 = vld [vmem:[#allocation3 + $0x28c] sm:$0xff] }
 0x4eb   : > { %18644 = vmatmul.mubr.msk.f32.gmra.mrb[154].mxu0 %vm850_vm0, %v6331_v1  ;;  %v7055_v1 = vld [vmem:[#allocation3 + $0x294] sm:$0xff] }
 0x4ec   : > { %18648 = vmatprep.mubr.msk.f32.mxu0 %vm850_vm0, %v6993_v61  ;;  %v7056_v61 = vld [vmem:[#allocation3 + $0x2a4] sm:$0xff] }
 0x4ef   : > { %18649 = vmatmul.mubr.msk.f32.vlgmr.msra.gmra.mrb[90].mxu0 %vm850_vm0, %v6994_v20  ;;  %v7057_v20 = vld [vmem:[#allocation3 + $0x2ac] sm:$0xff] }
 0x4f0   : > { %18748 = vmatpush3.msra.mxu0 %v22634_v3  ;;  %18651 = vmatprep.mubr.msk.f32.mxu0 %vm850_vm0, %v6995_v18  ;;  %v7000_v3 = vld [vmem:[#allocation3 + $0x4c] sm:$0xff]  ;;  %v7058_v18 = vld [vmem:[#allocation3 + $0x2b4] sm:$0xff] }
 0x4f1   : > { %18848 = vmatprep.subr.mxu0 %v22707_v42 }
 0x4f3   : > { %18652 = vmatmul.mubr.msk.f32.gmra.mrb[92].mxu0 %vm850_vm0, %v6996_v14  ;;  %v7720_v14 = vld [vmem:[#allocation3 + $0x5] sm:$0xff] }
 0x4f4   : > { %18654 = vmatprep.mubr.msk.f32.mxu0 %vm850_vm0, %v6997_v49  ;;  %v7721_v49 = vld [vmem:[#allocation3 + $0xd] sm:$0xff] }
 0x4f7   : > { %18655 = vmatmul.mubr.msk.f32.gmra.mrb[94].mxu0 %vm850_vm0, %v6998_v7  ;;  %v7722_v7 = vld [vmem:[#allocation3 + $0x15] sm:$0xff] }
 0x4f8   : > { %18657 = vmatprep.mubr.msk.f32.mxu0 %vm850_vm0, %v6999_v50  ;;  %v24648_v50 = vmov 0.0  }
 0x4fb   : > { %18658 = vmatmul.mubr.msk.f32.gmra.mrb[96].mxu0 %vm850_vm0, %v7000_v3  ;;  %v7723_v3 = vld [vmem:[#allocation3 + $0x25] sm:$0xff] }
 0x4fc   : > { %18660 = vmatprep.mubr.msk.f32.mxu0 %vm850_vm0, %v7001_v33  ;;  %v7724_v33 = vld [vmem:[#allocation3 + $0x2d] sm:$0xff] }
 0x4ff   : > { %18661 = vmatmul.mubr.msk.f32.gmra.mrb[98].mxu0 %vm850_vm0, %v7002_v5  ;;  %v7725_v5 = vld [vmem:[#allocation3 + $0x35] sm:$0xff] }
 0x500   : > { %18663 = vmatprep.mubr.msk.f32.mxu0 %vm850_vm0, %v7003_v40  ;;  %v7726_v40 = vld [vmem:[#allocation3 + $0x45] sm:$0xff] }
 0x503   : > { %18664 = vmatmul.mubr.msk.f32.gmra.mrb[100].mxu0 %vm850_vm0, %v7004_v36  ;;  %v7727_v36 = vld [vmem:[#allocation3 + $0x4d] sm:$0xff] }
 0x504   : > { %18666 = vmatprep.mubr.msk.f32.mxu0 %vm850_vm0, %v7005_v16  ;;  %v7729_v16 = vld [vmem:[#allocation3 + $0x65] sm:$0xff] }
 0x507   : > { %18667 = vmatmul.mubr.msk.f32.gmra.mrb[102].mxu0 %vm850_vm0, %v7006_v10  ;;  %v7730_v10 = vld [vmem:[#allocation3 + $0x6d] sm:$0xff] }
 0x508   : > { %18669 = vmatprep.mubr.msk.f32.mxu0 %vm850_vm0, %v7007_v6  ;;  %v7731_v6 = vld [vmem:[#allocation3 + $0x75] sm:$0xff] }
 0x50b   : > { %18670 = vmatmul.mubr.msk.f32.gmra.mrb[104].mxu0 %vm850_vm0, %v7008_v9  ;;  %v7732_v9 = vld [vmem:[#allocation3 + $0x85] sm:$0xff] }
 0x50c   : > { %18672 = vmatprep.mubr.msk.f32.mxu0 %vm850_vm0, %v7009_v11  ;;  %v7733_v11 = vld [vmem:[#allocation3 + $0x8d] sm:$0xff] }
 0x50f   : > { %18673 = vmatmul.mubr.msk.f32.gmra.mrb[106].mxu0 %vm850_vm0, %v7010_v58  ;;  %v7734_v58 = vld [vmem:[#allocation3 + $0x95] sm:$0xff] }
 0x510   : > { %18675 = vmatprep.mubr.msk.f32.mxu0 %vm850_vm0, %v7011_v0  ;;  %v7735_v0 = vld [vmem:[#allocation3 + $0xa5] sm:$0xff] }
 0x513   : > { %18676 = vmatmul.mubr.msk.f32.gmra.mrb[108].mxu0 %vm850_vm0, %v7012_v62  ;;  %v7736_v62 = vld [vmem:[#allocation3 + $0xad] sm:$0xff] }
 0x514   : > { %18678 = vmatprep.mubr.msk.f32.mxu0 %vm850_vm0, %v7013_v29  ;;  %v7737_v29 = vld [vmem:[#allocation3 + $0xb5] sm:$0xff] }
 0x517   : > { %18679 = vmatmul.mubr.msk.f32.gmra.mrb[110].mxu0 %vm850_vm0, %v7014_v41  ;;  %v7738_v41 = vld [vmem:[#allocation3 + $0xc5] sm:$0xff] }
 0x518   : > { %18681 = vmatprep.mubr.msk.f32.mxu0 %vm850_vm0, %v7015_v15  ;;  %v7739_v15 = vld [vmem:[#allocation3 + $0xcd] sm:$0xff] }
 0x51b   : > { %18682 = vmatmul.mubr.msk.f32.gmra.mrb[112].mxu0 %vm850_vm0, %v7016_v13  ;;  %v7740_v13 = vld [vmem:[#allocation3 + $0xd5] sm:$0xff] }
 0x51c   : > { %18684 = vmatprep.mubr.msk.f32.mxu0 %vm850_vm0, %v7017_v28  ;;  %v7741_v28 = vld [vmem:[#allocation3 + $0xe5] sm:$0xff] }
 0x51f   : > { %18685 = vmatmul.mubr.msk.f32.gmra.mrb[114].mxu0 %vm850_vm0, %v7018_v30  ;;  %v7742_v30 = vld [vmem:[#allocation3 + $0xed] sm:$0xff] }
 0x520   : > { %18687 = vmatprep.mubr.msk.f32.mxu0 %vm850_vm0, %v7019_v43  ;;  %v7743_v43 = vld [vmem:[#allocation3 + $0xf5] sm:$0xff] }
 0x523   : > { %18688 = vmatmul.mubr.msk.f32.gmra.mrb[116].mxu0 %vm850_vm0, %v7020_v48  ;;  %v7744_v48 = vld [vmem:[#allocation3 + $0x105] sm:$0xff] }
 0x524   : > { %18690 = vmatprep.mubr.msk.f32.mxu0 %vm850_vm0, %v7021_v54  ;;  %v7745_v54 = vld [vmem:[#allocation3 + $0x10d] sm:$0xff] }
 0x527   : > { %18691 = vmatmul.mubr.msk.f32.gmra.mrb[118].mxu0 %vm850_vm0, %v7022_v17  ;;  %v7746_v17 = vld [vmem:[#allocation3 + $0x115] sm:$0xff] }
 0x528   : > { %18693 = vmatprep.mubr.msk.f32.mxu0 %vm850_vm0, %v7023_v19  ;;  %v7747_v19 = vld [vmem:[#allocation3 + $0x125] sm:$0xff] }
 0x52b   : > { %18694 = vmatmul.mubr.msk.f32.gmra.mrb[120].mxu0 %vm850_vm0, %v7024_v60  ;;  %v7748_v60 = vld [vmem:[#allocation3 + $0x12d] sm:$0xff] }
 0x52c   : > { %18696 = vmatprep.mubr.msk.f32.mxu0 %vm850_vm0, %v7025_v2  ;;  %v7749_v2 = vld [vmem:[#allocation3 + $0x135] sm:$0xff] }
 0x52f   : > { %18697 = vmatmul.mubr.msk.f32.gmra.mrb[122].mxu0 %vm850_vm0, %v7026_v8  ;;  %v7750_v8 = vld [vmem:[#allocation3 + $0x145] sm:$0xff] }
 0x530   : > { %18699 = vmatprep.mubr.msk.f32.mxu0 %vm850_vm0, %v7027_v47  ;;  %v7751_v47 = vld [vmem:[#allocation3 + $0x14d] sm:$0xff] }
 0x533   : > { %18700 = vmatmul.mubr.msk.f32.gmra.mrb[124].mxu0 %vm850_vm0, %v7028_v4  ;;  %v7752_v4 = vld [vmem:[#allocation3 + $0x155] sm:$0xff] }
 0x534   : > { %18702 = vmatprep.mubr.msk.f32.mxu0 %vm850_vm0, %v7029_v23  ;;  %v16316_v23 = vld [vmem:[%s24475_s9 + $0x8] sm:$0xff] }
 0x535   : > { %18949 = vmatprep.subr.mxu1 %v16316_v23 }
 0x536   : > { %18950 = vmatpush3.msra.mxu1 %v16316_v23  ;;  %v8476_v23 = vld [vmem:[#allocation3 + $0x136] sm:$0xff] }
 0x537   : > { %18703 = vmatmul.mubr.msk.f32.gmra.mrb[126].mxu0 %vm850_vm0, %v7030_v45  ;;  %v7753_v45 = vld [vmem:[#allocation3 + $0x165] sm:$0xff] }
 0x538   : > { %18705 = vmatprep.mubr.msk.f32.mxu0 %vm850_vm0, %v7031_v21  ;;  %v7754_v21 = vld [vmem:[#allocation3 + $0x16d] sm:$0xff] }
 0x53b   : > { %18706 = vmatmul.mubr.msk.f32.gmra.mrb[128].mxu0 %vm850_vm0, %v7032_v46  ;;  %v7755_v46 = vld [vmem:[#allocation3 + $0x175] sm:$0xff] }
 0x53c   : > { %18708 = vmatprep.mubr.msk.f32.mxu0 %vm850_vm0, %v7033_v57  ;;  %v7756_v57 = vld [vmem:[#allocation3 + $0x185] sm:$0xff] }
 0x53f   : > { %18709 = vmatmul.mubr.msk.f32.gmra.mrb[130].mxu0 %vm850_vm0, %v7034_v53  ;;  %v7757_v53 = vld [vmem:[#allocation3 + $0x18d] sm:$0xff] }
 0x540   : > { %18711 = vmatprep.mubr.msk.f32.mxu0 %vm850_vm0, %v7035_v35  ;;  %v7758_v35 = vld [vmem:[#allocation3 + $0x195] sm:$0xff] }
 0x543   : > { %18712 = vmatmul.mubr.msk.f32.gmra.mrb[132].mxu0 %vm850_vm0, %v7036_v12  ;;  %v7759_v12 = vld [vmem:[#allocation3 + $0x1a5] sm:$0xff] }
 0x544   : > { %18714 = vmatprep.mubr.msk.f32.mxu0 %vm850_vm0, %v7037_v27  ;;  %v7760_v27 = vld [vmem:[#allocation3 + $0x1ad] sm:$0xff] }
 0x547   : > { %18715 = vmatmul.mubr.msk.f32.gmra.mrb[134].mxu0 %vm850_vm0, %v7038_v25  ;;  %v7761_v25 = vld [vmem:[#allocation3 + $0x1b5] sm:$0xff] }
 0x548   : > { %18717 = vmatprep.mubr.msk.f32.mxu0 %vm850_vm0, %v7039_v52  ;;  %v7762_v52 = vld [vmem:[#allocation3 + $0x1c5] sm:$0xff] }
 0x54b   : > { %18718 = vmatmul.mubr.msk.f32.gmra.mrb[136].mxu0 %vm850_vm0, %v7040_v32  ;;  %v7763_v32 = vld [vmem:[#allocation3 + $0x1cd] sm:$0xff] }
 0x54c   : > { %18720 = vmatprep.mubr.msk.f32.mxu0 %vm850_vm0, %v7041_v59  ;;  %v7764_v59 = vld [vmem:[#allocation3 + $0x1d5] sm:$0xff] }
 0x54f   : > { %18721 = vmatmul.mubr.msk.f32.gmra.mrb[138].mxu0 %vm850_vm0, %v7042_v55  ;;  %v7765_v55 = vld [vmem:[#allocation3 + $0x1e5] sm:$0xff] }
 0x550   : > { %18723 = vmatprep.mubr.msk.f32.mxu0 %vm850_vm0, %v7043_v34  ;;  %v7766_v34 = vld [vmem:[#allocation3 + $0x1ed] sm:$0xff] }
 0x553   : > { %18724 = vmatmul.mubr.msk.f32.gmra.mrb[140].mxu0 %vm850_vm0, %v7044_v39  ;;  %v7767_v39 = vld [vmem:[#allocation3 + $0x1f5] sm:$0xff] }
 0x554   : > { %18726 = vmatprep.mubr.msk.f32.mxu0 %vm850_vm0, %v7045_v51  ;;  %v7768_v51 = vld [vmem:[#allocation3 + $0x205] sm:$0xff] }
 0x557   : > { %18727 = vmatmul.mubr.msk.f32.gmra.mrb[142].mxu0 %vm850_vm0, %v7046_v44  ;;  %v7769_v44 = vld [vmem:[#allocation3 + $0x20d] sm:$0xff] }
 0x558   : > { %18729 = vmatprep.mubr.msk.f32.mxu0 %vm850_vm0, %v7047_v31  ;;  %v7770_v31 = vld [vmem:[#allocation3 + $0x215] sm:$0xff] }
 0x55b   : > { %18730 = vmatmul.mubr.msk.f32.gmra.mrb[144].mxu0 %vm850_vm0, %v7048_v24  ;;  %v7771_v24 = vld [vmem:[#allocation3 + $0x225] sm:$0xff] }
 0x55c   : > { %18732 = vmatprep.mubr.msk.f32.mxu0 %vm850_vm0, %v7049_v63  ;;  %v7772_v63 = vld [vmem:[#allocation3 + $0x22d] sm:$0xff] }
 0x55f   : > { %18733 = vmatmul.mubr.msk.f32.gmra.mrb[146].mxu0 %vm850_vm0, %v7050_v26  ;;  %v7773_v26 = vld [vmem:[#allocation3 + $0x235] sm:$0xff] }
 0x560   : > { %18735 = vmatprep.mubr.msk.f32.mxu0 %vm850_vm0, %v7051_v38  ;;  %v7774_v38 = vld [vmem:[#allocation3 + $0x245] sm:$0xff] }
 0x563   : > { %18736 = vmatmul.mubr.msk.f32.gmra.mrb[148].mxu0 %vm850_vm0, %v7052_v56  ;;  %v7775_v56 = vld [vmem:[#allocation3 + $0x24d] sm:$0xff] }
 0x564   : > { %18738 = vmatprep.mubr.msk.f32.mxu0 %vm850_vm0, %v7053_v22  ;;  %v7776_v22 = vld [vmem:[#allocation3 + $0x255] sm:$0xff] }
 0x567   : > { %18739 = vmatmul.mubr.msk.f32.gmra.mrb[150].mxu0 %vm850_vm0, %v7054_v37  ;;  %v7777_v37 = vld [vmem:[#allocation3 + $0x265] sm:$0xff] }
 0x568   : > { %18741 = vmatprep.mubr.msk.f32.mxu0 %vm850_vm0, %v7055_v1  ;;  %v7778_v1 = vld [vmem:[#allocation3 + $0x26d] sm:$0xff] }
 0x56b   : > { %18742 = vmatmul.mubr.msk.f32.gmra.mrb[152].mxu0 %vm850_vm0, %v7056_v61  ;;  %v7779_v61 = vld [vmem:[#allocation3 + $0x275] sm:$0xff] }
 0x56c   : > { %18744 = vmatprep.mubr.msk.f32.mxu0 %vm850_vm0, %v7057_v20  ;;  %v7780_v20 = vld [vmem:[#allocation3 + $0x285] sm:$0xff] }
 0x56f   : > { %18745 = vmatmul.mubr.msk.f32.gmra.mrb[154].mxu0 %vm850_vm0, %v7058_v18  ;;  %v7781_v18 = vld [vmem:[#allocation3 + $0x28d] sm:$0xff] }
 0x570   : > { %18749 = vmatprep.mubr.msk.f32.mxu0 %vm850_vm0, %v7720_v14  ;;  %v7782_v14 = vld [vmem:[#allocation3 + $0x295] sm:$0xff] }
 0x573   : > { %18750 = vmatmul.mubr.msk.f32.vlgmr.msra.gmra.mrb[90].mxu0 %vm850_vm0, %v7721_v49  ;;  %v7783_v49 = vld [vmem:[#allocation3 + $0x2a5] sm:$0xff] }
 0x574   : > { %18849 = vmatpush3.msra.mxu0 %v22707_v42  ;;  %18752 = vmatprep.mubr.msk.f32.mxu0 %vm850_vm0, %v7722_v7  ;;  %v7728_v42 = vld [vmem:[#allocation3 + $0x55] sm:$0xff]  ;;  %v7784_v7 = vld [vmem:[#allocation3 + $0x2ad] sm:$0xff] }
 0x575   : > { %19559 = vmatprep.subr.mxu0 %v24648_v50 }
 0x577   : > { %18753 = vmatmul.mubr.msk.f32.gmra.mrb[92].mxu0 %vm850_vm0, %v7723_v3  ;;  %v7785_v3 = vld [vmem:[#allocation3 + $0x2b5] sm:$0xff] }
 0x578   : > { %18755 = vmatprep.mubr.msk.f32.mxu0 %vm850_vm0, %v7724_v33  ;;  %v8447_v33 = vld [vmem:[#allocation3 + $0x6] sm:$0xff] }
 0x57b   : > { %18756 = vmatmul.mubr.msk.f32.gmra.mrb[94].mxu0 %vm850_vm0, %v7725_v5  ;;  %v8448_v5 = vld [vmem:[#allocation3 + $0xe] sm:$0xff] }
 0x57c   : > { %18758 = vmatprep.mubr.msk.f32.mxu0 %vm850_vm0, %v7726_v40  ;;  %v8449_v40 = vld [vmem:[#allocation3 + $0x16] sm:$0xff] }
 0x57f   : > { %18759 = vmatmul.mubr.msk.f32.gmra.mrb[96].mxu0 %vm850_vm0, %v7727_v36  ;;  %v8450_v36 = vld [vmem:[#allocation3 + $0x26] sm:$0xff] }
 0x580   : > { %18761 = vmatprep.mubr.msk.f32.mxu0 %vm850_vm0, %v7728_v42  ;;  %v8451_v42 = vld [vmem:[#allocation3 + $0x2e] sm:$0xff] }
 0x583   : > { %18762 = vmatmul.mubr.msk.f32.gmra.mrb[98].mxu0 %vm850_vm0, %v7729_v16  ;;  %v8452_v16 = vld [vmem:[#allocation3 + $0x36] sm:$0xff] }
 0x584   : > { %18764 = vmatprep.mubr.msk.f32.mxu0 %vm850_vm0, %v7730_v10  ;;  %v8453_v10 = vld [vmem:[#allocation3 + $0x46] sm:$0xff] }
 0x587   : > { %18765 = vmatmul.mubr.msk.f32.gmra.mrb[100].mxu0 %vm850_vm0, %v7731_v6  ;;  %v8454_v6 = vld [vmem:[#allocation3 + $0x4e] sm:$0xff] }
 0x588   : > { %18767 = vmatprep.mubr.msk.f32.mxu0 %vm850_vm0, %v7732_v9  ;;  %v8455_v9 = vld [vmem:[#allocation3 + $0x56] sm:$0xff] }
 0x58b   : > { %18768 = vmatmul.mubr.msk.f32.gmra.mrb[102].mxu0 %vm850_vm0, %v7733_v11  ;;  %v8456_v11 = vld [vmem:[#allocation3 + $0x66] sm:$0xff] }
 0x58c   : > { %18770 = vmatprep.mubr.msk.f32.mxu0 %vm850_vm0, %v7734_v58  ;;  %v8457_v58 = vld [vmem:[#allocation3 + $0x6e] sm:$0xff] }
 0x58f   : > { %18771 = vmatmul.mubr.msk.f32.gmra.mrb[104].mxu0 %vm850_vm0, %v7735_v0  ;;  %v8458_v0 = vld [vmem:[#allocation3 + $0x76] sm:$0xff] }
 0x590   : > { %18773 = vmatprep.mubr.msk.f32.mxu0 %vm850_vm0, %v7736_v62  ;;  %v8459_v62 = vld [vmem:[#allocation3 + $0x86] sm:$0xff] }
 0x593   : > { %18774 = vmatmul.mubr.msk.f32.gmra.mrb[106].mxu0 %vm850_vm0, %v7737_v29  ;;  %v8460_v29 = vld [vmem:[#allocation3 + $0x8e] sm:$0xff] }
 0x594   : > { %18776 = vmatprep.mubr.msk.f32.mxu0 %vm850_vm0, %v7738_v41  ;;  %v8461_v41 = vld [vmem:[#allocation3 + $0x96] sm:$0xff] }
 0x597   : > { %18777 = vmatmul.mubr.msk.f32.gmra.mrb[108].mxu0 %vm850_vm0, %v7739_v15  ;;  %v8462_v15 = vld [vmem:[#allocation3 + $0xa6] sm:$0xff] }
 0x598   : > { %18779 = vmatprep.mubr.msk.f32.mxu0 %vm850_vm0, %v7740_v13  ;;  %v8463_v13 = vld [vmem:[#allocation3 + $0xae] sm:$0xff] }
 0x59b   : > { %18780 = vmatmul.mubr.msk.f32.gmra.mrb[110].mxu0 %vm850_vm0, %v7741_v28  ;;  %v8464_v28 = vld [vmem:[#allocation3 + $0xb6] sm:$0xff] }
 0x59c   : > { %18782 = vmatprep.mubr.msk.f32.mxu0 %vm850_vm0, %v7742_v30  ;;  %v8465_v30 = vld [vmem:[#allocation3 + $0xc6] sm:$0xff] }
 0x59f   : > { %18783 = vmatmul.mubr.msk.f32.gmra.mrb[112].mxu0 %vm850_vm0, %v7743_v43  ;;  %v8466_v43 = vld [vmem:[#allocation3 + $0xce] sm:$0xff] }
 0x5a0   : > { %18785 = vmatprep.mubr.msk.f32.mxu0 %vm850_vm0, %v7744_v48  ;;  %v8467_v48 = vld [vmem:[#allocation3 + $0xd6] sm:$0xff] }
 0x5a3   : > { %18786 = vmatmul.mubr.msk.f32.gmra.mrb[114].mxu0 %vm850_vm0, %v7745_v54  ;;  %v8468_v54 = vld [vmem:[#allocation3 + $0xe6] sm:$0xff] }
 0x5a4   : > { %18788 = vmatprep.mubr.msk.f32.mxu0 %vm850_vm0, %v7746_v17  ;;  %v8469_v17 = vld [vmem:[#allocation3 + $0xee] sm:$0xff] }
 0x5a7   : > { %18789 = vmatmul.mubr.msk.f32.gmra.mrb[116].mxu0 %vm850_vm0, %v7747_v19  ;;  %v8470_v19 = vld [vmem:[#allocation3 + $0xf6] sm:$0xff] }
 0x5a8   : > { %18791 = vmatprep.mubr.msk.f32.mxu0 %vm850_vm0, %v7748_v60  ;;  %v8471_v60 = vld [vmem:[#allocation3 + $0x106] sm:$0xff] }
 0x5ab   : > { %18792 = vmatmul.mubr.msk.f32.gmra.mrb[118].mxu0 %vm850_vm0, %v7749_v2  ;;  %v8472_v2 = vld [vmem:[#allocation3 + $0x10e] sm:$0xff] }
 0x5ac   : > { %18794 = vmatprep.mubr.msk.f32.mxu0 %vm850_vm0, %v7750_v8  ;;  %v8473_v8 = vld [vmem:[#allocation3 + $0x116] sm:$0xff] }
 0x5af   : > { %18795 = vmatmul.mubr.msk.f32.gmra.mrb[120].mxu0 %vm850_vm0, %v7751_v47  ;;  %v8474_v47 = vld [vmem:[#allocation3 + $0x126] sm:$0xff] }
 0x5b0   : > { %18797 = vmatprep.mubr.msk.f32.mxu0 %vm850_vm0, %v7752_v4  ;;  %v8475_v4 = vld [vmem:[#allocation3 + $0x12e] sm:$0xff] }
 0x5b3   : > { %18798 = vmatmul.mubr.msk.f32.gmra.mrb[122].mxu0 %vm850_vm0, %v7753_v45  ;;  %v8477_v45 = vld [vmem:[#allocation3 + $0x146] sm:$0xff] }
 0x5b4   : > { %18800 = vmatprep.mubr.msk.f32.mxu0 %vm850_vm0, %v7754_v21  ;;  %v8478_v21 = vld [vmem:[#allocation3 + $0x14e] sm:$0xff] }
 0x5b7   : > { %18801 = vmatmul.mubr.msk.f32.gmra.mrb[124].mxu0 %vm850_vm0, %v7755_v46  ;;  %v8479_v46 = vld [vmem:[#allocation3 + $0x156] sm:$0xff] }
 0x5b8   : > { %18803 = vmatprep.mubr.msk.f32.mxu0 %vm850_vm0, %v7756_v57  ;;  %v8480_v57 = vld [vmem:[#allocation3 + $0x166] sm:$0xff] }
 0x5bb   : > { %18804 = vmatmul.mubr.msk.f32.gmra.mrb[126].mxu0 %vm850_vm0, %v7757_v53  ;;  %v8481_v53 = vld [vmem:[#allocation3 + $0x16e] sm:$0xff] }
 0x5bc   : > { %18806 = vmatprep.mubr.msk.f32.mxu0 %vm850_vm0, %v7758_v35  ;;  %v8482_v35 = vld [vmem:[#allocation3 + $0x176] sm:$0xff] }
 0x5bf   : > { %18807 = vmatmul.mubr.msk.f32.gmra.mrb[128].mxu0 %vm850_vm0, %v7759_v12  ;;  %v8483_v12 = vld [vmem:[#allocation3 + $0x186] sm:$0xff] }
 0x5c0   : > { %18809 = vmatprep.mubr.msk.f32.mxu0 %vm850_vm0, %v7760_v27  ;;  %v8484_v27 = vld [vmem:[#allocation3 + $0x18e] sm:$0xff] }
 0x5c3   : > { %18810 = vmatmul.mubr.msk.f32.gmra.mrb[130].mxu0 %vm850_vm0, %v7761_v25  ;;  %v8485_v25 = vld [vmem:[#allocation3 + $0x196] sm:$0xff] }
 0x5c4   : > { %18812 = vmatprep.mubr.msk.f32.mxu0 %vm850_vm0, %v7762_v52  ;;  %v8486_v52 = vld [vmem:[#allocation3 + $0x1a6] sm:$0xff] }
 0x5c7   : > { %18813 = vmatmul.mubr.msk.f32.gmra.mrb[132].mxu0 %vm850_vm0, %v7763_v32  ;;  %v8487_v32 = vld [vmem:[#allocation3 + $0x1ae] sm:$0xff] }
 0x5c8   : > { %18815 = vmatprep.mubr.msk.f32.mxu0 %vm850_vm0, %v7764_v59  ;;  %v8488_v59 = vld [vmem:[#allocation3 + $0x1b6] sm:$0xff] }
 0x5cb   : > { %18816 = vmatmul.mubr.msk.f32.gmra.mrb[134].mxu0 %vm850_vm0, %v7765_v55  ;;  %v8489_v55 = vld [vmem:[#allocation3 + $0x1c6] sm:$0xff] }
 0x5cc   : > { %18818 = vmatprep.mubr.msk.f32.mxu0 %vm850_vm0, %v7766_v34  ;;  %v8490_v34 = vld [vmem:[#allocation3 + $0x1ce] sm:$0xff] }
 0x5cf   : > { %18819 = vmatmul.mubr.msk.f32.gmra.mrb[136].mxu0 %vm850_vm0, %v7767_v39  ;;  %v8491_v39 = vld [vmem:[#allocation3 + $0x1d6] sm:$0xff] }
 0x5d0   : > { %18821 = vmatprep.mubr.msk.f32.mxu0 %vm850_vm0, %v7768_v51  ;;  %v8492_v51 = vld [vmem:[#allocation3 + $0x1e6] sm:$0xff] }
 0x5d3   : > { %18822 = vmatmul.mubr.msk.f32.gmra.mrb[138].mxu0 %vm850_vm0, %v7769_v44  ;;  %v8493_v44 = vld [vmem:[#allocation3 + $0x1ee] sm:$0xff] }
 0x5d4   : > { %18824 = vmatprep.mubr.msk.f32.mxu0 %vm850_vm0, %v7770_v31  ;;  %v8494_v31 = vld [vmem:[#allocation3 + $0x1f6] sm:$0xff] }
 0x5d7   : > { %18825 = vmatmul.mubr.msk.f32.gmra.mrb[140].mxu0 %vm850_vm0, %v7771_v24  ;;  %v8495_v24 = vld [vmem:[#allocation3 + $0x206] sm:$0xff] }
 0x5d8   : > { %18827 = vmatprep.mubr.msk.f32.mxu0 %vm850_vm0, %v7772_v63  ;;  %v8496_v63 = vld [vmem:[#allocation3 + $0x20e] sm:$0xff] }
 0x5db   : > { %18828 = vmatmul.mubr.msk.f32.gmra.mrb[142].mxu0 %vm850_vm0, %v7773_v26  ;;  %v8497_v26 = vld [vmem:[#allocation3 + $0x216] sm:$0xff] }
 0x5dc   : > { %18830 = vmatprep.mubr.msk.f32.mxu0 %vm850_vm0, %v7774_v38  ;;  %v8498_v38 = vld [vmem:[#allocation3 + $0x226] sm:$0xff] }
 0x5df   : > { %18831 = vmatmul.mubr.msk.f32.gmra.mrb[144].mxu0 %vm850_vm0, %v7775_v56  ;;  %v8499_v56 = vld [vmem:[#allocation3 + $0x22e] sm:$0xff] }
 0x5e0   : > { %18833 = vmatprep.mubr.msk.f32.mxu0 %vm850_vm0, %v7776_v22  ;;  %v8500_v22 = vld [vmem:[#allocation3 + $0x236] sm:$0xff] }
 0x5e3   : > { %18834 = vmatmul.mubr.msk.f32.gmra.mrb[146].mxu0 %vm850_vm0, %v7777_v37  ;;  %v8501_v37 = vld [vmem:[#allocation3 + $0x246] sm:$0xff] }
 0x5e4   : > { %18836 = vmatprep.mubr.msk.f32.mxu0 %vm850_vm0, %v7778_v1  ;;  %v8502_v1 = vld [vmem:[#allocation3 + $0x24e] sm:$0xff] }
 0x5e7   : > { %18837 = vmatmul.mubr.msk.f32.gmra.mrb[148].mxu0 %vm850_vm0, %v7779_v61  ;;  %v8503_v61 = vld [vmem:[#allocation3 + $0x256] sm:$0xff] }
 0x5e8   : > { %18839 = vmatprep.mubr.msk.f32.mxu0 %vm850_vm0, %v7780_v20  ;;  %v22904_v20 = vld [vmem:[%s24475_s9] sm:$0xff] }
 0x5e9   : > { %19023 = vmatprep.subr.mxu1 %v22904_v20 }
 0x5eb   : > { %18840 = vmatmul.mubr.msk.f32.gmra.mrb[150].mxu0 %vm850_vm0, %v7781_v18  ;;  %v8504_v18 = vld [vmem:[#allocation3 + $0x266] sm:$0xff] }
 0x5ec   : > { %18842 = vmatprep.mubr.msk.f32.mxu0 %vm850_vm0, %v7782_v14  ;;  %v8505_v14 = vld [vmem:[#allocation3 + $0x26e] sm:$0xff] }
 0x5ef   : > { %18843 = vmatmul.mubr.msk.f32.gmra.mrb[152].mxu0 %vm850_vm0, %v7783_v49  ;;  %v8506_v49 = vld [vmem:[#allocation3 + $0x276] sm:$0xff] }
 0x5f0   : > { %18845 = vmatprep.mubr.msk.f32.mxu0 %vm850_vm0, %v7784_v7  ;;  %v22909_v7 = vpop.permute.xlu0 %9410 }
 0x5f3   : > { %18846 = vmatmul.mubr.msk.f32.gmra.mrb[154].mxu0 %vm850_vm0, %v7785_v3  ;;  %v8507_v3 = vld [vmem:[#allocation3 + $0x286] sm:$0xff] }
 0x5f4   : > { %18850 = vmatprep.mubr.msk.f32.mxu0 %vm850_vm0, %v8447_v33  ;;  %v22912_v33 = vpop.permute.xlu1 %9415 }
 0x5f7   : > { %18851 = vmatmul.mubr.msk.f32.vlgmr.msra.gmra.mrb[90].mxu0 %vm850_vm0, %v8448_v5  ;;  %v8508_v5 = vld [vmem:[#allocation3 + $0x28e] sm:$0xff] }
 0x5f8   : > { %18853 = vmatprep.mubr.msk.f32.mxu0 %vm850_vm0, %v8449_v40  ;;  %v8509_v40 = vld [vmem:[#allocation3 + $0x296] sm:$0xff] }
 0x5fb   : > { %18854 = vmatmul.mubr.msk.f32.gmra.mrb[92].mxu0 %vm850_vm0, %v8450_v36  ;;  %v22917_v36 = vpop.permute.xlu0 %9420 }
 0x5fc   : > { %18856 = vmatprep.mubr.msk.f32.mxu0 %vm850_vm0, %v8451_v42  ;;  %v22919_v42 = vpop.permute.xlu1 %9425 }
 0x5ff   : > { %18857 = vmatmul.mubr.msk.f32.gmra.mrb[94].mxu0 %vm850_vm0, %v8452_v16  ;;  %v8510_v16 = vld [vmem:[#allocation3 + $0x2a6] sm:$0xff] }
 0x600   : > { %18859 = vmatprep.mubr.msk.f32.mxu0 %vm850_vm0, %v8453_v10  ;;  %v8511_v10 = vld [vmem:[#allocation3 + $0x2ae] sm:$0xff] }
 0x603   : > { %18860 = vmatmul.mubr.msk.f32.gmra.mrb[96].mxu0 %vm850_vm0, %v8454_v6  ;;  %v8512_v6 = vld [vmem:[#allocation3 + $0x2b6] sm:$0xff] }
 0x604   : > { %18862 = vmatprep.mubr.msk.f32.mxu0 %vm850_vm0, %v8455_v9  ;;  %v22923_v9 = vpop.permute.xlu0 %9430 }
 0x607   : > { %18863 = vmatmul.mubr.msk.f32.gmra.mrb[98].mxu0 %vm850_vm0, %v8456_v11  ;;  %v22926_v11 = vpop.permute.xlu1 %9435 }
 0x608   : > { %18865 = vmatprep.mubr.msk.f32.mxu0 %vm850_vm0, %v8457_v58  ;;  %v22930_v58 = vpop.permute.xlu0 %9440 }
 0x60b   : > { %18866 = vmatmul.mubr.msk.f32.gmra.mrb[100].mxu0 %vm850_vm0, %v8458_v0  ;;  %v22932_v0 = vpop.permute.xlu1 %9445 }
 0x60c   : > { %18868 = vmatprep.mubr.msk.f32.mxu0 %vm850_vm0, %v8459_v62  ;;  %v22934_v62 = vpop.permute.xlu0 %9450 }
 0x60f   : > { %18869 = vmatmul.mubr.msk.f32.gmra.mrb[102].mxu0 %vm850_vm0, %v8460_v29  ;;  %v22936_v29 = vpop.permute.xlu1 %9455 }
 0x610   : > { %18871 = vmatprep.mubr.msk.f32.mxu0 %vm850_vm0, %v8461_v41  ;;  %v22938_v41 = vpop.permute.xlu0 %9460 }
 0x613   : > { %18872 = vmatmul.mubr.msk.f32.gmra.mrb[104].mxu0 %vm850_vm0, %v8462_v15  ;;  %v22940_v15 = vpop.permute.xlu1 %9465 }
 0x614   : > { %18874 = vmatprep.mubr.msk.f32.mxu0 %vm850_vm0, %v8463_v13  ;;  %v22942_v13 = vpop.permute.xlu0 %9470 }
 0x617   : > { %18875 = vmatmul.mubr.msk.f32.gmra.mrb[106].mxu0 %vm850_vm0, %v8464_v28  ;;  %v22944_v28 = vpop.permute.xlu1 %9475 }
 0x618   : > { %18877 = vmatprep.mubr.msk.f32.mxu0 %vm850_vm0, %v8465_v30  ;;  %v22946_v30 = vpop.permute.xlu0 %9480 }
 0x61b   : > { %18878 = vmatmul.mubr.msk.f32.gmra.mrb[108].mxu0 %vm850_vm0, %v8466_v43  ;;  %v22948_v43 = vpop.permute.xlu1 %9485 }
 0x61c   : > { %18880 = vmatprep.mubr.msk.f32.mxu0 %vm850_vm0, %v8467_v48  ;;  %v22950_v48 = vpop.permute.xlu0 %9490 }
 0x61f   : > { %18881 = vmatmul.mubr.msk.f32.gmra.mrb[110].mxu0 %vm850_vm0, %v8468_v54  ;;  %v22952_v54 = vpop.permute.xlu1 %9495 }
 0x620   : > { %18883 = vmatprep.mubr.msk.f32.mxu0 %vm850_vm0, %v8469_v17  ;;  %v22954_v17 = vpop.permute.xlu0 %9500 }
 0x623   : > { %18884 = vmatmul.mubr.msk.f32.gmra.mrb[112].mxu0 %vm850_vm0, %v8470_v19  ;;  %v22956_v19 = vpop.permute.xlu1 %9505 }
 0x624   : > { %18886 = vmatprep.mubr.msk.f32.mxu0 %vm850_vm0, %v8471_v60  ;;  %v22958_v60 = vpop.permute.xlu0 %9510 }
 0x627   : > { %18887 = vmatmul.mubr.msk.f32.gmra.mrb[114].mxu0 %vm850_vm0, %v8472_v2  ;;  %v22960_v2 = vpop.permute.xlu1 %9515 }
 0x628   : > { %18889 = vmatprep.mubr.msk.f32.mxu0 %vm850_vm0, %v8473_v8  ;;  %v22962_v8 = vpop.permute.xlu0 %9520 }
 0x62b   : > { %18890 = vmatmul.mubr.msk.f32.gmra.mrb[116].mxu0 %vm850_vm0, %v8474_v47  ;;  %v22964_v47 = vpop.permute.xlu1 %9525 }
 0x62c   : > { %18892 = vmatprep.mubr.msk.f32.mxu0 %vm850_vm0, %v8475_v4  ;;  %v22966_v4 = vpop.permute.xlu0 %9530 }
 0x62f   : > { %18893 = vmatmul.mubr.msk.f32.gmra.mrb[118].mxu0 %vm850_vm0, %v8476_v23  ;;  %v22968_v23 = vpop.permute.xlu1 %9535 }
 0x630   : > { %18895 = vmatprep.mubr.msk.f32.mxu0 %vm850_vm0, %v8477_v45  ;;  %v22970_v45 = vpop.permute.xlu0 %9540 }
 0x633   : > { %18896 = vmatmul.mubr.msk.f32.gmra.mrb[120].mxu0 %vm850_vm0, %v8478_v21  ;;  %v22972_v21 = vpop.permute.xlu1 %9545 }
 0x634   : > { %18898 = vmatprep.mubr.msk.f32.mxu0 %vm850_vm0, %v8479_v46  ;;  %v22974_v46 = vpop.permute.xlu0 %9550 }
 0x637   : > { %18899 = vmatmul.mubr.msk.f32.gmra.mrb[122].mxu0 %vm850_vm0, %v8480_v57  ;;  %v22976_v57 = vpop.permute.xlu1 %9555 }
 0x638   : > { %18901 = vmatprep.mubr.msk.f32.mxu0 %vm850_vm0, %v8481_v53  ;;  %v22978_v53 = vpop.permute.xlu0 %9560 }
 0x63b   : > { %18902 = vmatmul.mubr.msk.f32.gmra.mrb[124].mxu0 %vm850_vm0, %v8482_v35  ;;  %v22980_v35 = vpop.permute.xlu1 %9565 }
 0x63c   : > { %18904 = vmatprep.mubr.msk.f32.mxu0 %vm850_vm0, %v8483_v12  ;;  %v22985_v12 = vld [vmem:[%s24474_s8] ss:$0 sm:$0xff] }
 0x63f   : > { %18905 = vmatmul.mubr.msk.f32.gmra.mrb[126].mxu0 %vm850_vm0, %v8484_v27 }
 0x640   : > { %18907 = vmatprep.mubr.msk.f32.mxu0 %vm850_vm0, %v8485_v25  ;;  %v9316_v25 = vpop.permute.xlu0 %9315 }
 0x643   : > { %18908 = vmatmul.mubr.msk.f32.gmra.mrb[128].mxu0 %vm850_vm0, %v8486_v52 }
 0x644   : > { %18910 = vmatprep.mubr.msk.f32.mxu0 %vm850_vm0, %v8487_v32 }
 0x647   : > { %18911 = vmatmul.mubr.msk.f32.gmra.mrb[130].mxu0 %vm850_vm0, %v8488_v59  ;;  %v9321_v59 = vpop.permute.xlu1 %9320 }
 0x648   : > { %18913 = vmatprep.mubr.msk.f32.mxu0 %vm850_vm0, %v8489_v55 }
 0x64b   : > { %18914 = vmatmul.mubr.msk.f32.gmra.mrb[132].mxu0 %vm850_vm0, %v8490_v34 }
 0x64c   : > { %18916 = vmatprep.mubr.msk.f32.mxu0 %vm850_vm0, %v8491_v39 }
 0x64f   : > { %18917 = vmatmul.mubr.msk.f32.gmra.mrb[134].mxu0 %vm850_vm0, %v8492_v51 }
 0x650   : > { %18919 = vmatprep.mubr.msk.f32.mxu0 %vm850_vm0, %v8493_v44 }
 0x653   : > { %18920 = vmatmul.mubr.msk.f32.gmra.mrb[136].mxu0 %vm850_vm0, %v8494_v31 }
 0x654   : > { %18922 = vmatprep.mubr.msk.f32.mxu0 %vm850_vm0, %v8495_v24 }
 0x657   : > { %18923 = vmatmul.mubr.msk.f32.gmra.mrb[138].mxu0 %vm850_vm0, %v8496_v63  ;;  %v9326_v63 = vpop.permute.xlu0 %9325 }
 0x658   : > { %18925 = vmatprep.mubr.msk.f32.mxu0 %vm850_vm0, %v8497_v26  ;;  %v24649_v26 = vld [vmem:[#allocation73_spill] sm:$0xff] }
 0x65b   : > { %18926 = vmatmul.mubr.msk.f32.gmra.mrb[140].mxu0 %vm850_vm0, %v8498_v38 }
 0x65c   : > { %18928 = vmatprep.mubr.msk.f32.mxu0 %vm850_vm0, %v8499_v56 }
 0x65f   : > { %18929 = vmatmul.mubr.msk.f32.gmra.mrb[142].mxu0 %vm850_vm0, %v8500_v22 }
 0x660   : > { %18931 = vmatprep.mubr.msk.f32.mxu0 %vm850_vm0, %v8501_v37 }
 0x663   : > { %18932 = vmatmul.mubr.msk.f32.gmra.mrb[144].mxu0 %vm850_vm0, %v8502_v1 }
 0x664   : > { %18934 = vmatprep.mubr.msk.f32.mxu0 %vm850_vm0, %v8503_v61 }
 0x667   : > { %18935 = vmatmul.mubr.msk.f32.gmra.mrb[146].mxu0 %vm850_vm0, %v8504_v18  ;;  %v24650_v18 = vld [vmem:[#allocation75_spill] sm:$0xff] }
 0x668   : > { %18937 = vmatprep.mubr.msk.f32.mxu0 %vm850_vm0, %v8505_v14 }
 0x66b   : > { %18938 = vmatmul.mubr.msk.f32.gmra.mrb[148].mxu0 %vm850_vm0, %v8506_v49  ;;  %v24651_v49 = vld [vmem:[#allocation74_spill] sm:$0xff] }
 0x66c   : > { %18940 = vmatprep.mubr.msk.f32.mxu0 %vm850_vm0, %v8507_v3 }
 0x66f   : > { %18941 = vmatmul.mubr.msk.f32.gmra.mrb[150].mxu0 %vm850_vm0, %v8508_v5 }
 0x670   : > { %18943 = vmatprep.mubr.msk.f32.mxu0 %vm850_vm0, %v8509_v40 }
 0x673   : > { %18944 = vmatmul.mubr.msk.f32.gmra.mrb[152].mxu0 %vm850_vm0, %v8510_v16 }
 0x674   : > { %18946 = vmatprep.mubr.msk.f32.mxu0 %vm850_vm0, %v8511_v10 }
 0x677   : > { %18947 = vmatmul.mubr.msk.f32.gmra.mrb[154].mxu0 %vm850_vm0, %v8512_v6  ;;  %v24652_v6 = vld [vmem:[#allocation77_spill] sm:$0xff] }
 0x678   : > { %19561 = vmatprep.mubr.msk.f32.mxu0 %vm20383_vm1, %v24648_v50 }
 0x6ca   : > { %v18852_v27 = vpop.f32.mrb[90].mxu0 }
 0x6cb   : > { %v9182_v52 = vadd.f32 %v18852_v27, %v22985_v12  ;;  %v8779_v32 = vpop.f32.mrb[91].mxu0 }
 0x6cc   : > { %v9181_v55 = vadd.f32 %v22985_v12, %v8779_v32 }
 0x6cd   : > { %v9644_v34 = vmul.f32 %v9321_v59, %v9182_v52 }
 0x6ce   : > { %v9643_v39 = vmul.f32 %v9316_v25, %v9181_v55  ;;  %v18855_v51 = vpop.f32.mrb[92].mxu0  ;;  %v24653_v25 = vld [vmem:[#allocation76_spill] sm:$0xff] }
 0x6cf   : > { %9710 = vst.msk [vmem:[#allocation4 + $0x8] sm:$0xff] %vm850_vm0, %v9644_v34  ;;  %v9184_v44 = vadd.f32 %v18855_v51, %v22985_v12  ;;  %v8789_v31 = vpop.f32.mrb[93].mxu0  ;;  %v24654_v51 = vld [vmem:[#allocation79_spill] sm:$0xff] }
 0x6d0   : > { %9709 = vst.msk [vmem:[#allocation4] sm:$0xff] %vm850_vm0, %v9643_v39  ;;  %v9183_v24 = vadd.f32 %v22985_v12, %v8789_v31  ;;  %v24655_v31 = vld [vmem:[#allocation78_spill] sm:$0xff] }
 0x6d1   : > { %v9646_v38 = vmul.f32 %v24649_v26, %v9184_v44 }
 0x6d2   : > { %v9645_v56 = vmul.f32 %v9326_v63, %v9183_v24  ;;  %v18858_v22 = vpop.f32.mrb[94].mxu0 }
 0x6d3   : > { %9712 = vst.msk [vmem:[#allocation4 + $0x18] sm:$0xff] %vm850_vm0, %v9646_v38  ;;  %v9186_v37 = vadd.f32 %v18858_v22, %v22985_v12  ;;  %v8799_v1 = vpop.f32.mrb[95].mxu0  ;;  %v23023_v22 = vld [vmem:[%s24475_s9 + $0x10] sm:$0xff] }
 0x6d4   : > { %9711 = vst.msk [vmem:[#allocation4 + $0x10] sm:$0xff] %vm850_vm0, %v9645_v56  ;;  %v9185_v61 = vadd.f32 %v22985_v12, %v8799_v1 }
 0x6d5   : > { %v9648_v14 = vmul.f32 %v24650_v18, %v9186_v37 }
 0x6d6   : > { %v9647_v3 = vmul.f32 %v24651_v49, %v9185_v61  ;;  %v18861_v5 = vpop.f32.mrb[96].mxu0  ;;  %v24656_v61 = vld [vmem:[#allocation81_spill] sm:$0xff] }
 0x6d7   : > { %9714 = vst.msk [vmem:[#allocation4 + $0x28] sm:$0xff] %vm850_vm0, %v9648_v14  ;;  %v9188_v40 = vadd.f32 %v18861_v5, %v22985_v12  ;;  %v8809_v16 = vpop.f32.mrb[97].mxu0  ;;  %v24657_v14 = vld [vmem:[#allocation80_spill] sm:$0xff] }
 0x6d8   : > { %9713 = vst.msk [vmem:[#allocation4 + $0x20] sm:$0xff] %vm850_vm0, %v9647_v3  ;;  %v9187_v10 = vadd.f32 %v22985_v12, %v8809_v16 }
 0x6d9   : > { %v9650_v27 = vmul.f32 %v24652_v6, %v9188_v40  ;;  %v24658_v6 = vld [vmem:[#allocation83_spill] sm:$0xff] }
 0x6da   : > { %v9649_v52 = vmul.f32 %v24653_v25, %v9187_v10  ;;  %v18864_v32 = vpop.f32.mrb[98].mxu0  ;;  %v23006_v59 = vld [vmem:[#allocation4 + $0x18] sm:$0xff]  ;;  %v24659_v25 = vld [vmem:[#allocation82_spill] sm:$0xff] }
 0x6db   : > { %9716 = vst.msk [vmem:[#allocation4 + $0x38] sm:$0xff] %vm850_vm0, %v9650_v27  ;;  %v9190_v55 = vadd.f32 %v18864_v32, %v22985_v12  ;;  %v8819_v34 = vpop.f32.mrb[99].mxu0  ;;  %18951 = vmatprep.mubr.msk.f32.mxu1 %vm850_vm0, %v23006_v59 }
 0x6dc   : > { %9715 = vst.msk [vmem:[#allocation4 + $0x30] sm:$0xff] %vm850_vm0, %v9649_v52  ;;  %v9189_v39 = vadd.f32 %v22985_v12, %v8819_v34 }
 0x6dd   : > { %v9652_v44 = vmul.f32 %v24654_v51, %v9190_v55 }
 0x6de   : > { %v9651_v24 = vmul.f32 %v24655_v31, %v9189_v39  ;;  %v18867_v63 = vpop.f32.mrb[100].mxu0  ;;  %v23029_v1 = vld [vmem:[#allocation4 + $0x28] sm:$0xff] }
 0x6df   : > { %9718 = vst.msk [vmem:[#allocation4 + $0x48] sm:$0xff] %vm850_vm0, %v9652_v44  ;;  %v9192_v26 = vadd.f32 %v18867_v63, %v22985_v12  ;;  %v8829_v38 = vpop.f32.mrb[101].mxu0  ;;  %v23018_v56 = vld [vmem:[#allocation4 + $0x20] sm:$0xff]  ;;  %v24660_v31 = vld [vmem:[#allocation85_spill] sm:$0xff] }
 0x6e0   : > { %9717 = vst.msk [vmem:[#allocation4 + $0x40] sm:$0xff] %vm850_vm0, %v9651_v24  ;;  %v9191_v37 = vadd.f32 %v22985_v12, %v8829_v38  ;;  %18952 = vmatmul.mubr.msk.f32.vlgmr.msra.gmra.mrb[172].mxu1 %vm850_vm0, %v23018_v56  ;;  %v24661_v63 = vld [vmem:[#allocation84_spill] sm:$0xff] }
 0x6e1   : > { %v9654_v18 = vmul.f32 %v24656_v61, %v9192_v26  ;;  %19024 = vmatpush3.msra.mxu1 %v22904_v20  ;;  %18954 = vmatprep.mubr.msk.f32.mxu1 %vm850_vm0, %v23029_v1 }
 0x6e2   : > { %v9653_v49 = vmul.f32 %v24657_v14, %v9191_v37  ;;  %v18870_v3 = vpop.f32.mrb[102].mxu0  ;;  %19097 = vmatprep.subr.mxu1 %v23023_v22  ;;  %v23045_v20 = vld [vmem:[#allocation4 + $0x38] sm:$0xff] }
 0x6e3   : > { %9720 = vst.msk [vmem:[#allocation4 + $0x58] sm:$0xff] %vm850_vm0, %v9654_v18  ;;  %v9194_v5 = vadd.f32 %v18870_v3, %v22985_v12  ;;  %v8839_v40 = vpop.f32.mrb[103].mxu0  ;;  %v23039_v16 = vld [vmem:[#allocation4 + $0x30] sm:$0xff]  ;;  %v24662_v3 = vld [vmem:[#allocation87_spill] sm:$0xff] }
 0x6e4   : > { %9719 = vst.msk [vmem:[#allocation4 + $0x50] sm:$0xff] %vm850_vm0, %v9653_v49  ;;  %v9193_v10 = vadd.f32 %v22985_v12, %v8839_v40  ;;  %18955 = vmatmul.mubr.msk.f32.gmra.mrb[174].mxu1 %vm850_vm0, %v23039_v16  ;;  %v24663_v40 = vld [vmem:[#allocation86_spill] sm:$0xff] }
 0x6e5   : > { %v9656_v27 = vmul.f32 %v24658_v6, %v9194_v5  ;;  %18957 = vmatprep.mubr.msk.f32.mxu1 %vm850_vm0, %v23045_v20 }
 0x6e6   : > { %v9655_v52 = vmul.f32 %v24659_v25, %v9193_v10  ;;  %v18873_v32 = vpop.f32.mrb[104].mxu0  ;;  %v23059_v44 = vld [vmem:[#allocation4 + $0x48] sm:$0xff] }
 0x6e7   : > { %9722 = vst.msk [vmem:[#allocation4 + $0x68] sm:$0xff] %vm850_vm0, %v9656_v27  ;;  %v9196_v55 = vadd.f32 %v18873_v32, %v22985_v12  ;;  %v8849_v34 = vpop.f32.mrb[105].mxu0  ;;  %v23053_v39 = vld [vmem:[#allocation4 + $0x40] sm:$0xff] }
 0x6e8   : > { %9721 = vst.msk [vmem:[#allocation4 + $0x60] sm:$0xff] %vm850_vm0, %v9655_v52  ;;  %v9195_v51 = vadd.f32 %v22985_v12, %v8849_v34  ;;  %18958 = vmatmul.mubr.msk.f32.gmra.mrb[176].mxu1 %vm850_vm0, %v23053_v39 }
 0x6e9   : > { %v9658_v24 = vmul.f32 %v24660_v31, %v9196_v55  ;;  %18960 = vmatprep.mubr.msk.f32.mxu1 %vm850_vm0, %v23059_v44 }
 0x6ea   : > { %v9657_v26 = vmul.f32 %v24661_v63, %v9195_v51  ;;  %v18876_v38 = vpop.f32.mrb[106].mxu0  ;;  %v23073_v49 = vld [vmem:[#allocation4 + $0x58] sm:$0xff]  ;;  %v24664_v51 = vld [vmem:[#allocation88_spill] sm:$0xff] }
 0x6eb   : > { %9724 = vst.msk [vmem:[#allocation4 + $0x78] sm:$0xff] %vm850_vm0, %v9658_v24  ;;  %v9198_v37 = vadd.f32 %v18876_v38, %v22985_v12  ;;  %v8859_v61 = vpop.f32.mrb[107].mxu0  ;;  %v23067_v18 = vld [vmem:[#allocation4 + $0x50] sm:$0xff] }
 0x6ec   : > { %9723 = vst.msk [vmem:[#allocation4 + $0x70] sm:$0xff] %vm850_vm0, %v9657_v26  ;;  %v9197_v14 = vadd.f32 %v22985_v12, %v8859_v61  ;;  %18961 = vmatmul.mubr.msk.f32.gmra.mrb[178].mxu1 %vm850_vm0, %v23067_v18 }
 0x6ed   : > { %v9660_v5 = vmul.f32 %v24662_v3, %v9198_v37  ;;  %18963 = vmatprep.mubr.msk.f32.mxu1 %vm850_vm0, %v23073_v49 }
 0x6ee   : > { %v9659_v10 = vmul.f32 %v24663_v40, %v9197_v14  ;;  %v18879_v6 = vpop.f32.mrb[108].mxu0  ;;  %v23087_v55 = vld [vmem:[#allocation4 + $0x68] sm:$0xff] }
 0x6ef   : > { %9726 = vst.msk [vmem:[#allocation4 + $0x88] sm:$0xff] %vm850_vm0, %v9660_v5  ;;  %v9200_v27 = vadd.f32 %v18879_v6, %v22985_v12  ;;  %v8869_v25 = vpop.f32.mrb[109].mxu0  ;;  %v23081_v52 = vld [vmem:[#allocation4 + $0x60] sm:$0xff] }
 0x6f0   : > { %9725 = vst.msk [vmem:[#allocation4 + $0x80] sm:$0xff] %vm850_vm0, %v9659_v10  ;;  %v9199_v32 = vadd.f32 %v22985_v12, %v8869_v25  ;;  %18964 = vmatmul.mubr.msk.f32.gmra.mrb[180].mxu1 %vm850_vm0, %v23081_v52 }
 0x6f1   : > { %v9662_v34 = vmul.f32 %v22909_v7, %v9200_v27  ;;  %18966 = vmatprep.mubr.msk.f32.mxu1 %vm850_vm0, %v23087_v55 }
 0x6f2   : > { %v9661_v31 = vmul.f32 %v24664_v51, %v9199_v32  ;;  %v18882_v24 = vpop.f32.mrb[110].mxu0  ;;  %v23101_v7 = vld [vmem:[#allocation4 + $0x78] sm:$0xff] }
 0x6f3   : > { %9728 = vst.msk [vmem:[#allocation4 + $0x98] sm:$0xff] %vm850_vm0, %v9662_v34  ;;  %v9202_v63 = vadd.f32 %v18882_v24, %v22985_v12  ;;  %v8879_v26 = vpop.f32.mrb[111].mxu0  ;;  %v23095_v38 = vld [vmem:[#allocation4 + $0x70] sm:$0xff] }
 0x6f4   : > { %9727 = vst.msk [vmem:[#allocation4 + $0x90] sm:$0xff] %vm850_vm0, %v9661_v31  ;;  %v9201_v37 = vadd.f32 %v22985_v12, %v8879_v26  ;;  %18967 = vmatmul.mubr.msk.f32.gmra.mrb[182].mxu1 %vm850_vm0, %v23095_v38 }
 0x6f5   : > { %v9664_v61 = vmul.f32 %v22917_v36, %v9202_v63  ;;  %18969 = vmatprep.mubr.msk.f32.mxu1 %vm850_vm0, %v23101_v7 }
 0x6f6   : > { %v9663_v14 = vmul.f32 %v22912_v33, %v9201_v37  ;;  %v18885_v3 = vpop.f32.mrb[112].mxu0  ;;  %v23115_v36 = vld [vmem:[#allocation4 + $0x88] sm:$0xff] }
 0x6f7   : > { %9730 = vst.msk [vmem:[#allocation4 + $0xa8] sm:$0xff] %vm850_vm0, %v9664_v61  ;;  %v9204_v5 = vadd.f32 %v18885_v3, %v22985_v12  ;;  %v8889_v40 = vpop.f32.mrb[113].mxu0  ;;  %v23109_v10 = vld [vmem:[#allocation4 + $0x80] sm:$0xff] }
 0x6f8   : > { %9729 = vst.msk [vmem:[#allocation4 + $0xa0] sm:$0xff] %vm850_vm0, %v9663_v14  ;;  %v9203_v6 = vadd.f32 %v22985_v12, %v8889_v40  ;;  %18970 = vmatmul.mubr.msk.f32.gmra.mrb[184].mxu1 %vm850_vm0, %v23109_v10 }
 0x6f9   : > { %v9666_v27 = vmul.f32 %v22923_v9, %v9204_v5  ;;  %18972 = vmatprep.mubr.msk.f32.mxu1 %vm850_vm0, %v23115_v36 }
 0x6fa   : > { %v9665_v33 = vmul.f32 %v22919_v42, %v9203_v6  ;;  %v18888_v25 = vpop.f32.mrb[114].mxu0  ;;  %v23129_v9 = vld [vmem:[#allocation4 + $0x98] sm:$0xff] }
 0x6fb   : > { %9732 = vst.msk [vmem:[#allocation4 + $0xb8] sm:$0xff] %vm850_vm0, %v9666_v27  ;;  %v9206_v32 = vadd.f32 %v18888_v25, %v22985_v12  ;;  %v8899_v34 = vpop.f32.mrb[115].mxu0  ;;  %v23123_v51 = vld [vmem:[#allocation4 + $0x90] sm:$0xff] }
 0x6fc   : > { %9731 = vst.msk [vmem:[#allocation4 + $0xb0] sm:$0xff] %vm850_vm0, %v9665_v33  ;;  %v9205_v31 = vadd.f32 %v22985_v12, %v8899_v34  ;;  %18973 = vmatmul.mubr.msk.f32.gmra.mrb[186].mxu1 %vm850_vm0, %v23123_v51 }
 0x6fd   : > { %v9668_v24 = vmul.f32 %v22930_v58, %v9206_v32  ;;  %18975 = vmatprep.mubr.msk.f32.mxu1 %vm850_vm0, %v23129_v9 }
 0x6fe   : > { %v9667_v42 = vmul.f32 %v22926_v11, %v9205_v31  ;;  %v18891_v63 = vpop.f32.mrb[116].mxu0  ;;  %v23143_v58 = vld [vmem:[#allocation4 + $0xa8] sm:$0xff] }
 0x6ff   : > { %9734 = vst.msk [vmem:[#allocation4 + $0xc8] sm:$0xff] %vm850_vm0, %v9668_v24  ;;  %v9208_v26 = vadd.f32 %v18891_v63, %v22985_v12  ;;  %v8909_v37 = vpop.f32.mrb[117].mxu0  ;;  %v23137_v61 = vld [vmem:[#allocation4 + $0xa0] sm:$0xff] }
 0x700   : > { %9733 = vst.msk [vmem:[#allocation4 + $0xc0] sm:$0xff] %vm850_vm0, %v9667_v42  ;;  %v9207_v14 = vadd.f32 %v22985_v12, %v8909_v37  ;;  %18976 = vmatmul.mubr.msk.f32.gmra.mrb[188].mxu1 %vm850_vm0, %v23137_v61 }
 0x701   : > { %v9670_v3 = vmul.f32 %v22934_v62, %v9208_v26  ;;  %18978 = vmatprep.mubr.msk.f32.mxu1 %vm850_vm0, %v23143_v58 }
 0x702   : > { %v9669_v11 = vmul.f32 %v22932_v0, %v9207_v14  ;;  %v18894_v5 = vpop.f32.mrb[118].mxu0  ;;  %v23157_v62 = vld [vmem:[#allocation4 + $0xb8] sm:$0xff] }
 0x703   : > { %9736 = vst.msk [vmem:[#allocation4 + $0xd8] sm:$0xff] %vm850_vm0, %v9670_v3  ;;  %v9210_v40 = vadd.f32 %v18894_v5, %v22985_v12  ;;  %v8919_v6 = vpop.f32.mrb[119].mxu0  ;;  %v23151_v27 = vld [vmem:[#allocation4 + $0xb0] sm:$0xff] }
 0x704   : > { %9735 = vst.msk [vmem:[#allocation4 + $0xd0] sm:$0xff] %vm850_vm0, %v9669_v11  ;;  %v9209_v33 = vadd.f32 %v22985_v12, %v8919_v6  ;;  %18979 = vmatmul.mubr.msk.f32.gmra.mrb[190].mxu1 %vm850_vm0, %v23151_v27 }
 0x705   : > { %v9672_v25 = vmul.f32 %v22938_v41, %v9210_v40  ;;  %18981 = vmatprep.mubr.msk.f32.mxu1 %vm850_vm0, %v23157_v62 }
 0x706   : > { %v9671_v0 = vmul.f32 %v22936_v29, %v9209_v33  ;;  %v18897_v32 = vpop.f32.mrb[120].mxu0  ;;  %v23171_v41 = vld [vmem:[#allocation4 + $0xc8] sm:$0xff] }
 0x707   : > { %9738 = vst.msk [vmem:[#allocation4 + $0xe8] sm:$0xff] %vm850_vm0, %v9672_v25  ;;  %v9212_v34 = vadd.f32 %v18897_v32, %v22985_v12  ;;  %v8929_v31 = vpop.f32.mrb[121].mxu0  ;;  %v23165_v24 = vld [vmem:[#allocation4 + $0xc0] sm:$0xff] }
 0x708   : > { %9737 = vst.msk [vmem:[#allocation4 + $0xe0] sm:$0xff] %vm850_vm0, %v9671_v0  ;;  %v9211_v42 = vadd.f32 %v22985_v12, %v8929_v31  ;;  %18982 = vmatmul.mubr.msk.f32.gmra.mrb[192].mxu1 %vm850_vm0, %v23165_v24 }
 0x709   : > { %v9674_v63 = vmul.f32 %v22942_v13, %v9212_v34  ;;  %18984 = vmatprep.mubr.msk.f32.mxu1 %vm850_vm0, %v23171_v41 }
 0x70a   : > { %v9673_v29 = vmul.f32 %v22940_v15, %v9211_v42  ;;  %v18900_v26 = vpop.f32.mrb[122].mxu0  ;;  %v23185_v13 = vld [vmem:[#allocation4 + $0xd8] sm:$0xff] }
 0x70b   : > { %9740 = vst.msk [vmem:[#allocation4 + $0xf8] sm:$0xff] %vm850_vm0, %v9674_v63  ;;  %v9214_v37 = vadd.f32 %v18900_v26, %v22985_v12  ;;  %v8939_v14 = vpop.f32.mrb[123].mxu0  ;;  %v23179_v3 = vld [vmem:[#allocation4 + $0xd0] sm:$0xff] }
 0x70c   : > { %9739 = vst.msk [vmem:[#allocation4 + $0xf0] sm:$0xff] %vm850_vm0, %v9673_v29  ;;  %v9213_v11 = vadd.f32 %v22985_v12, %v8939_v14  ;;  %18985 = vmatmul.mubr.msk.f32.gmra.mrb[194].mxu1 %vm850_vm0, %v23179_v3 }
 0x70d   : > { %v9676_v5 = vmul.f32 %v22946_v30, %v9214_v37  ;;  %18987 = vmatprep.mubr.msk.f32.mxu1 %vm850_vm0, %v23185_v13 }
 0x70e   : > { %v9675_v15 = vmul.f32 %v22944_v28, %v9213_v11  ;;  %v18903_v40 = vpop.f32.mrb[124].mxu0  ;;  %v23199_v30 = vld [vmem:[#allocation4 + $0xe8] sm:$0xff] }
 0x70f   : > { %9742 = vst.msk [vmem:[#allocation4 + $0x108] sm:$0xff] %vm850_vm0, %v9676_v5  ;;  %v9216_v6 = vadd.f32 %v18903_v40, %v22985_v12  ;;  %v8949_v33 = vpop.f32.mrb[125].mxu0  ;;  %v23193_v25 = vld [vmem:[#allocation4 + $0xe0] sm:$0xff] }
 0x710   : > { %9741 = vst.msk [vmem:[#allocation4 + $0x100] sm:$0xff] %vm850_vm0, %v9675_v15  ;;  %v9215_v0 = vadd.f32 %v22985_v12, %v8949_v33  ;;  %18988 = vmatmul.mubr.msk.f32.gmra.mrb[196].mxu1 %vm850_vm0, %v23193_v25 }
 0x711   : > { %v9678_v32 = vmul.f32 %v22950_v48, %v9216_v6  ;;  %18990 = vmatprep.mubr.msk.f32.mxu1 %vm850_vm0, %v23199_v30 }
 0x712   : > { %v9677_v28 = vmul.f32 %v22948_v43, %v9215_v0  ;;  %v18906_v34 = vpop.f32.mrb[126].mxu0  ;;  %v23213_v48 = vld [vmem:[#allocation4 + $0xf8] sm:$0xff] }
 0x713   : > { %9744 = vst.msk [vmem:[#allocation4 + $0x118] sm:$0xff] %vm850_vm0, %v9678_v32  ;;  %v9218_v31 = vadd.f32 %v18906_v34, %v22985_v12  ;;  %v8959_v42 = vpop.f32.mrb[127].mxu0  ;;  %v23207_v63 = vld [vmem:[#allocation4 + $0xf0] sm:$0xff] }
 0x714   : > { %9743 = vst.msk [vmem:[#allocation4 + $0x110] sm:$0xff] %vm850_vm0, %v9677_v28  ;;  %v9217_v29 = vadd.f32 %v22985_v12, %v8959_v42  ;;  %18991 = vmatmul.mubr.msk.f32.gmra.mrb[198].mxu1 %vm850_vm0, %v23207_v63 }
 0x715   : > { %v9680_v26 = vmul.f32 %v22954_v17, %v9218_v31  ;;  %18993 = vmatprep.mubr.msk.f32.mxu1 %vm850_vm0, %v23213_v48 }
 0x716   : > { %v9679_v43 = vmul.f32 %v22952_v54, %v9217_v29  ;;  %v18909_v37 = vpop.f32.mrb[128].mxu0  ;;  %v23227_v17 = vld [vmem:[#allocation4 + $0x108] sm:$0xff] }
 0x717   : > { %9746 = vst.msk [vmem:[#allocation4 + $0x128] sm:$0xff] %vm850_vm0, %v9680_v26  ;;  %v9220_v14 = vadd.f32 %v18909_v37, %v22985_v12  ;;  %v8969_v11 = vpop.f32.mrb[129].mxu0  ;;  %v23221_v5 = vld [vmem:[#allocation4 + $0x100] sm:$0xff] }
 0x718   : > { %9745 = vst.msk [vmem:[#allocation4 + $0x120] sm:$0xff] %vm850_vm0, %v9679_v43  ;;  %v9219_v15 = vadd.f32 %v22985_v12, %v8969_v11  ;;  %18994 = vmatmul.mubr.msk.f32.gmra.mrb[200].mxu1 %vm850_vm0, %v23221_v5 }
 0x719   : > { %v9682_v40 = vmul.f32 %v22958_v60, %v9220_v14  ;;  %18996 = vmatprep.mubr.msk.f32.mxu1 %vm850_vm0, %v23227_v17 }
 0x71a   : > { %v9681_v54 = vmul.f32 %v22956_v19, %v9219_v15  ;;  %v18912_v6 = vpop.f32.mrb[130].mxu0  ;;  %v23241_v60 = vld [vmem:[#allocation4 + $0x118] sm:$0xff] }
 0x71b   : > { %9748 = vst.msk [vmem:[#allocation4 + $0x138] sm:$0xff] %vm850_vm0, %v9682_v40  ;;  %v9222_v33 = vadd.f32 %v18912_v6, %v22985_v12  ;;  %v8979_v0 = vpop.f32.mrb[131].mxu0  ;;  %v23235_v32 = vld [vmem:[#allocation4 + $0x110] sm:$0xff] }
 0x71c   : > { %9747 = vst.msk [vmem:[#allocation4 + $0x130] sm:$0xff] %vm850_vm0, %v9681_v54  ;;  %v9221_v28 = vadd.f32 %v22985_v12, %v8979_v0  ;;  %18997 = vmatmul.mubr.msk.f32.gmra.mrb[202].mxu1 %vm850_vm0, %v23235_v32 }
 0x71d   : > { %v9684_v34 = vmul.f32 %v22962_v8, %v9222_v33  ;;  %18999 = vmatprep.mubr.msk.f32.mxu1 %vm850_vm0, %v23241_v60 }
 0x71e   : > { %v9683_v19 = vmul.f32 %v22960_v2, %v9221_v28  ;;  %v18915_v31 = vpop.f32.mrb[132].mxu0  ;;  %v23255_v8 = vld [vmem:[#allocation4 + $0x128] sm:$0xff]  ;;  %v9571_v2 = vpop.permute.xlu1 %9570 }
 0x71f   : > { %9750 = vst.msk [vmem:[#allocation4 + $0x148] sm:$0xff] %vm850_vm0, %v9684_v34  ;;  %v9224_v42 = vadd.f32 %v18915_v31, %v22985_v12  ;;  %v8989_v29 = vpop.f32.mrb[133].mxu0  ;;  %v23249_v26 = vld [vmem:[#allocation4 + $0x120] sm:$0xff] }
 0x720   : > { %9749 = vst.msk [vmem:[#allocation4 + $0x140] sm:$0xff] %vm850_vm0, %v9683_v19  ;;  %v9223_v43 = vadd.f32 %v22985_v12, %v8989_v29  ;;  %19000 = vmatmul.mubr.msk.f32.gmra.mrb[204].mxu1 %vm850_vm0, %v23249_v26  ;;  %v9576_v29 = vpop.permute.xlu0 %9575 }
 0x721   : > { %v9686_v37 = vmul.f32 %v22966_v4, %v9224_v42  ;;  %19002 = vmatprep.mubr.msk.f32.mxu1 %vm850_vm0, %v23255_v8 }
 0x722   : > { %v9685_v14 = vmul.f32 %v22964_v47, %v9223_v43  ;;  %v18918_v11 = vpop.f32.mrb[134].mxu0  ;;  %v23269_v4 = vld [vmem:[#allocation4 + $0x138] sm:$0xff]  ;;  %v9581_v31 = vpop.permute.xlu1 %9580 }
 0x723   : > { %9752 = vst.msk [vmem:[#allocation4 + $0x158] sm:$0xff] %vm850_vm0, %v9686_v37  ;;  %v9226_v15 = vadd.f32 %v18918_v11, %v22985_v12  ;;  %v8999_v40 = vpop.f32.mrb[135].mxu0  ;;  %v23263_v54 = vld [vmem:[#allocation4 + $0x130] sm:$0xff] }
 0x724   : > { %9751 = vst.msk [vmem:[#allocation4 + $0x150] sm:$0xff] %vm850_vm0, %v9685_v14  ;;  %v9225_v6 = vadd.f32 %v22985_v12, %v8999_v40  ;;  %19003 = vmatmul.mubr.msk.f32.gmra.mrb[206].mxu1 %vm850_vm0, %v23263_v54 }
 0x725   : > { %v9688_v33 = vmul.f32 %v22970_v45, %v9226_v15  ;;  %19005 = vmatprep.mubr.msk.f32.mxu1 %vm850_vm0, %v23269_v4 }
 0x726   : > { %v9687_v47 = vmul.f32 %v22968_v23, %v9225_v6  ;;  %v18921_v0 = vpop.f32.mrb[136].mxu0  ;;  %v23283_v45 = vld [vmem:[#allocation4 + $0x148] sm:$0xff] }
 0x727   : > { %9754 = vst.msk [vmem:[#allocation4 + $0x168] sm:$0xff] %vm850_vm0, %v9688_v33  ;;  %v9228_v28 = vadd.f32 %v18921_v0, %v22985_v12  ;;  %v9009_v34 = vpop.f32.mrb[137].mxu0  ;;  %v23277_v19 = vld [vmem:[#allocation4 + $0x140] sm:$0xff]  ;;  %v9586_v0 = vpop.permute.xlu0 %9585 }
 0x728   : > { %9753 = vst.msk [vmem:[#allocation4 + $0x160] sm:$0xff] %vm850_vm0, %v9687_v47  ;;  %v9227_v42 = vadd.f32 %v22985_v12, %v9009_v34  ;;  %19006 = vmatmul.mubr.msk.f32.gmra.mrb[208].mxu1 %vm850_vm0, %v23277_v19 }
 0x729   : > { %v9690_v23 = vmul.f32 %v22974_v46, %v9228_v28  ;;  %19008 = vmatprep.mubr.msk.f32.mxu1 %vm850_vm0, %v23283_v45 }
 0x72a   : > { %v9689_v43 = vmul.f32 %v22972_v21, %v9227_v42  ;;  %v18924_v37 = vpop.f32.mrb[138].mxu0  ;;  %v23297_v46 = vld [vmem:[#allocation4 + $0x158] sm:$0xff]  ;;  %v9591_v21 = vpop.permute.xlu1 %9590 }
 0x72b   : > { %9756 = vst.msk [vmem:[#allocation4 + $0x178] sm:$0xff] %vm850_vm0, %v9690_v23  ;;  %v9230_v14 = vadd.f32 %v18924_v37, %v22985_v12  ;;  %v9019_v11 = vpop.f32.mrb[139].mxu0  ;;  %v23291_v15 = vld [vmem:[#allocation4 + $0x150] sm:$0xff] }
 0x72c   : > { %9755 = vst.msk [vmem:[#allocation4 + $0x170] sm:$0xff] %vm850_vm0, %v9689_v43  ;;  %v9229_v40 = vadd.f32 %v22985_v12, %v9019_v11  ;;  %19009 = vmatmul.mubr.msk.f32.gmra.mrb[210].mxu1 %vm850_vm0, %v23291_v15 }
 0x72d   : > { %v9692_v6 = vmul.f32 %v22978_v53, %v9230_v14  ;;  %19011 = vmatprep.mubr.msk.f32.mxu1 %vm850_vm0, %v23297_v46 }
 0x72e   : > { %v9691_v33 = vmul.f32 %v22976_v57, %v9229_v40  ;;  %v18927_v47 = vpop.f32.mrb[140].mxu0  ;;  %v23311_v53 = vld [vmem:[#allocation4 + $0x168] sm:$0xff] }
 0x72f   : > { %9758 = vst.msk [vmem:[#allocation4 + $0x188] sm:$0xff] %vm850_vm0, %v9692_v6  ;;  %v9232_v28 = vadd.f32 %v18927_v47, %v22985_v12  ;;  %v9029_v34 = vpop.f32.mrb[141].mxu0  ;;  %v23305_v42 = vld [vmem:[#allocation4 + $0x160] sm:$0xff]  ;;  %v9601_v6 = vpop.permute.xlu1 %9600 }
 0x730   : > { %9757 = vst.msk [vmem:[#allocation4 + $0x180] sm:$0xff] %vm850_vm0, %v9691_v33  ;;  %v9231_v23 = vadd.f32 %v22985_v12, %v9029_v34  ;;  %19012 = vmatmul.mubr.msk.f32.gmra.mrb[212].mxu1 %vm850_vm0, %v23305_v42  ;;  %v9596_v47 = vpop.permute.xlu0 %9595 }
 0x731   : > { %v9694_v43 = vmul.f32 %v9571_v2, %v9232_v28  ;;  %19014 = vmatprep.mubr.msk.f32.mxu1 %vm850_vm0, %v23311_v53 }
 0x732   : > { %v9693_v57 = vmul.f32 %v22980_v35, %v9231_v23  ;;  %v18930_v37 = vpop.f32.mrb[142].mxu0  ;;  %v23324_v2 = vld [vmem:[#allocation4 + $0x178] sm:$0xff] }
 0x733   : > { %9760 = vst.msk [vmem:[#allocation4 + $0x198] sm:$0xff] %vm850_vm0, %v9694_v43  ;;  %v9234_v14 = vadd.f32 %v18930_v37, %v22985_v12  ;;  %v9039_v11 = vpop.f32.mrb[143].mxu0  ;;  %v23318_v40 = vld [vmem:[#allocation4 + $0x170] sm:$0xff] }
 0x734   : > { %9759 = vst.msk [vmem:[#allocation4 + $0x190] sm:$0xff] %vm850_vm0, %v9693_v57  ;;  %v9233_v33 = vadd.f32 %v22985_v12, %v9039_v11  ;;  %19015 = vmatmul.mubr.msk.f32.gmra.mrb[214].mxu1 %vm850_vm0, %v23318_v40 }
 0x735   : > { %v9696_v35 = vmul.f32 %v9581_v31, %v9234_v14  ;;  %19017 = vmatprep.mubr.msk.f32.mxu1 %vm850_vm0, %v23324_v2 }
 0x736   : > { %v9695_v28 = vmul.f32 %v9576_v29, %v9233_v33  ;;  %v18933_v34 = vpop.f32.mrb[144].mxu0  ;;  %v23336_v31 = vld [vmem:[#allocation4 + $0x188] sm:$0xff]  ;;  %v9611_v29 = vpop.permute.xlu1 %9610 }
 0x737   : > { %9762 = vst.msk [vmem:[#allocation4 + $0x1a8] sm:$0xff] %vm850_vm0, %v9696_v35  ;;  %v9236_v23 = vadd.f32 %v18933_v34, %v22985_v12  ;;  %v9049_v43 = vpop.f32.mrb[145].mxu0  ;;  %v23330_v57 = vld [vmem:[#allocation4 + $0x180] sm:$0xff]  ;;  %24665 = vst [vmem:[#allocation6_spill] sm:$0xff] %v23336_v31  ;;  %v9606_v35 = vpop.permute.xlu0 %9605 }
 0x738   : > { %9761 = vst.msk [vmem:[#allocation4 + $0x1a0] sm:$0xff] %vm850_vm0, %v9695_v28  ;;  %v9235_v37 = vadd.f32 %v22985_v12, %v9049_v43  ;;  %19018 = vmatmul.mubr.msk.f32.gmra.mrb[216].mxu1 %vm850_vm0, %v23330_v57 }
 0x739   : > { %v9698_v14 = vmul.f32 %v9591_v21, %v9236_v23  ;;  %19020 = vmatprep.mubr.msk.f32.mxu1 %vm850_vm0, %v23336_v31  ;;  %v9775_v21 = vld [vmem:[#allocation4] sm:$0xff]  ;;  %v9776_v31 = vld [vmem:[#allocation4 + $0x8] sm:$0xff] }
 0x73a   : > { %v9697_v11 = vmul.f32 %v9586_v0, %v9235_v37  ;;  %v18936_v33 = vpop.f32.mrb[146].mxu0 }
 0x73b   : > { %9764 = vst.msk [vmem:[#allocation4 + $0x1b8] sm:$0xff] %vm850_vm0, %v9698_v14  ;;  %v9238_v34 = vadd.f32 %v18936_v33, %v22985_v12  ;;  %v9059_v28 = vpop.f32.mrb[147].mxu0  ;;  %v23342_v50 = vld [vmem:[#allocation4 + $0x190] sm:$0xff] }
 0x73c   : > { %9763 = vst.msk [vmem:[#allocation4 + $0x1b0] sm:$0xff] %vm850_vm0, %v9697_v11  ;;  %v9237_v43 = vadd.f32 %v22985_v12, %v9059_v28  ;;  %19021 = vmatmul.mubr.msk.f32.gmra.mrb[218].mxu1 %vm850_vm0, %v23342_v50  ;;  %v23354_v11 = vld [vmem:[%s24475_s9 + $0x18] sm:$0xff]  ;;  %v9621_v28 = vpop.permute.xlu1 %9620 }
 0x73d   : > { %v9700_v23 = vmul.f32 %v9601_v6, %v9238_v34  ;;  %19025 = vmatprep.mubr.msk.f32.mxu1 %vm850_vm0, %v9775_v21  ;;  %v9616_v34 = vpop.permute.xlu0 %9615 }
 0x73e   : > { %v9699_v0 = vmul.f32 %v9596_v47, %v9237_v43  ;;  %v18939_v37 = vpop.f32.mrb[148].mxu0  ;;  %v9777_v47 = vld [vmem:[#allocation4 + $0x10] sm:$0xff] }
 0x73f   : > { %9766 = vst.msk [vmem:[#allocation4 + $0x1c8] sm:$0xff] %vm850_vm0, %v9700_v23  ;;  %v9240_v14 = vadd.f32 %v18939_v37, %v22985_v12  ;;  %v9069_v33 = vpop.f32.mrb[149].mxu0 }
 0x740   : > { %9765 = vst.msk [vmem:[#allocation4 + $0x1c0] sm:$0xff] %vm850_vm0, %v9699_v0  ;;  %v9239_v6 = vadd.f32 %v22985_v12, %v9069_v33  ;;  %19026 = vmatmul.mubr.msk.f32.vlgmr.msra.gmra.mrb[172].mxu1 %vm850_vm0, %v9776_v31 }
 0x741   : > { %v9702_v43 = vmul.f32 %v9611_v29, %v9240_v14  ;;  %19098 = vmatpush3.msra.mxu1 %v23023_v22  ;;  %19028 = vmatprep.mubr.msk.f32.mxu1 %vm850_vm0, %v9777_v47  ;;  %v9631_v22 = vpop.permute.xlu1 %9630  ;;  %v9626_v33 = vpop.permute.xlu0 %9625 }
 0x742   : > { %v9701_v21 = vmul.f32 %v9606_v35, %v9239_v6  ;;  %v18942_v23 = vpop.f32.mrb[150].mxu0  ;;  %19171 = vmatprep.subr.mxu1 %v23354_v11 }
 0x743   : > { %9768 = vst.msk [vmem:[#allocation4 + $0x1d8] sm:$0xff] %vm850_vm0, %v9702_v43  ;;  %v9242_v37 = vadd.f32 %v18942_v23, %v22985_v12  ;;  %v9079_v0 = vpop.f32.mrb[151].mxu0 }
 0x744   : > { %9767 = vst.msk [vmem:[#allocation4 + $0x1d0] sm:$0xff] %vm850_vm0, %v9701_v21  ;;  %v9241_v31 = vadd.f32 %v22985_v12, %v9079_v0  ;;  %19029 = vmatmul.mubr.msk.f32.gmra.mrb[174].mxu1 %vm850_vm0, %v23006_v59 }
 0x745   : > { %v9704_v29 = vmul.f32 %v9621_v28, %v9242_v37  ;;  %19031 = vmatprep.mubr.msk.f32.mxu1 %vm850_vm0, %v23018_v56  ;;  %v9641_v23 = vpop.permute.xlu1 %9640 }
 0x746   : > { %v9703_v35 = vmul.f32 %v9616_v34, %v9241_v31  ;;  %v18945_v14 = vpop.f32.mrb[152].mxu0 }
 0x747   : > { %9770 = vst.msk [vmem:[#allocation4 + $0x1e8] sm:$0xff] %vm850_vm0, %v9704_v29  ;;  %v9244_v6 = vadd.f32 %v18945_v14, %v22985_v12  ;;  %v9089_v47 = vpop.f32.mrb[153].mxu0  ;;  %v16560_v29 = vld [vmem:[%s24475_s9 + $0x28] sm:$0xff] }
 0x748   : > { %9769 = vst.msk [vmem:[#allocation4 + $0x1e0] sm:$0xff] %vm850_vm0, %v9703_v35  ;;  %v9243_v43 = vadd.f32 %v22985_v12, %v9089_v47  ;;  %19032 = vmatmul.mubr.msk.f32.gmra.mrb[176].mxu1 %vm850_vm0, %v23029_v1  ;;  %v9636_v1 = vpop.permute.xlu0 %9635  ;;  %v12447_v35 = vld [vmem:[#allocation4 + $0x160] sm:$0xff]  ;;  %v12448_v14 = vld [vmem:[#allocation4 + $0x168] sm:$0xff] }
 0x749   : > { %v9706_v59 = vmul.f32 %v9631_v22, %v9244_v6  ;;  %19034 = vmatprep.mubr.msk.f32.mxu1 %vm850_vm0, %v23039_v16  ;;  %v23717_v22 = vld [vmem:[#allocation4 + $0xc8] sm:$0xff]  ;;  %v12450_v6 = vld [vmem:[#allocation4 + $0x178] sm:$0xff] }
 0x74a   : > { %v9705_v56 = vmul.f32 %v9626_v33, %v9243_v43  ;;  %v18948_v28 = vpop.f32.mrb[154].mxu0  ;;  %v12449_v33 = vld [vmem:[#allocation4 + $0x170] sm:$0xff]  ;;  %v16659_v43 = vld [vmem:[%s24477_s11 + $0x8] sm:$0xff] }
 0x74b   : > { %9772 = vst.msk [vmem:[#allocation4 + $0x1f8] sm:$0xff] %vm850_vm0, %v9706_v59  ;;  %v9246_v34 = vadd.f32 %v18948_v28, %v22985_v12  ;;  %v9099_v21 = vpop.f32.mrb[155].mxu0  ;;  %v12996_v59 = vld [vmem:[#allocation4 + $0x180] sm:$0xff]  ;;  %v12998_v28 = vld [vmem:[#allocation4 + $0x190] sm:$0xff] }
 0x74c   : > { %9771 = vst.msk [vmem:[#allocation4 + $0x1f0] sm:$0xff] %vm850_vm0, %v9705_v56  ;;  %v9245_v37 = vadd.f32 %v22985_v12, %v9099_v21  ;;  %19035 = vmatmul.mubr.msk.f32.gmra.mrb[178].mxu1 %vm850_vm0, %v23045_v20  ;;  %v16511_v12 = vld [vmem:[%s24475_s9 + $0x20] sm:$0xff]  ;;  %v12997_v56 = vld [vmem:[#allocation4 + $0x188] sm:$0xff] }
 0x74d   : > { %v9708_v0 = vmul.f32 %v9641_v23, %v9246_v34  ;;  %19037 = vmatprep.mubr.msk.f32.mxu1 %vm850_vm0, %v23053_v39 }
 0x74e   : > { %v9707_v31 = vmul.f32 %v9636_v1, %v9245_v37  ;;  %v16690_v37 = vld [vmem:[%s24477_s11 + $0x20] sm:$0xff]  ;;  %v13624_v1 = vpop.permute.xlu1 %13623 }
 0x74f   : > { %9774 = vst.msk [vmem:[#allocation4 + $0x208] sm:$0xff] %vm850_vm0, %v9708_v0  ;;  %19560 = vmatpush3.msra.mxu0 %v16690_v37  ;;  %v13619_v0 = vpop.permute.xlu0 %13618 }
 0x750   : > { %9773 = vst.msk [vmem:[#allocation4 + $0x200] sm:$0xff] %vm850_vm0, %v9707_v31  ;;  %19038 = vmatmul.mubr.msk.f32.gmra.mrb[180].mxu1 %vm850_vm0, %v23059_v44 }
 0x751   : > { %19040 = vmatprep.mubr.msk.f32.mxu1 %vm850_vm0, %v23067_v18 }
 0x752   : > { %v13011_v34 = vld [vmem:[#allocation4 + $0x1f8] sm:$0xff]  ;;  %v23984_v31 = vpop.permute.xlu1 %13653 }
 0x753   : > { %v12465_v47 = vld [vmem:[#allocation4 + $0x1f0] sm:$0xff] }
 0x754   : > { %19041 = vmatmul.mubr.msk.f32.gmra.mrb[182].mxu1 %vm850_vm0, %v23073_v49 }
 0x755   : > { %19043 = vmatprep.mubr.msk.f32.mxu1 %vm850_vm0, %v23081_v52 }
 0x756   : > { %v13013_v23 = vld [vmem:[#allocation4 + $0x208] sm:$0xff] }
 0x757   : > { %v13012_v21 = vld [vmem:[#allocation4 + $0x200] sm:$0xff] }
 0x758   : > { %19044 = vmatmul.mubr.msk.f32.gmra.mrb[184].mxu1 %vm850_vm0, %v23087_v55 }
 0x759   : > { %19046 = vmatprep.mubr.msk.f32.mxu1 %vm850_vm0, %v23095_v38 }
 0x75c   : > { %19047 = vmatmul.mubr.msk.f32.gmra.mrb[186].mxu1 %vm850_vm0, %v23101_v7 }
 0x75d   : > { %19049 = vmatprep.mubr.msk.f32.mxu1 %vm850_vm0, %v23109_v10 }
 0x760   : > { %19050 = vmatmul.mubr.msk.f32.gmra.mrb[188].mxu1 %vm850_vm0, %v23115_v36 }
 0x761   : > { %19052 = vmatprep.mubr.msk.f32.mxu1 %vm850_vm0, %v23123_v51 }
 0x764   : > { %19053 = vmatmul.mubr.msk.f32.gmra.mrb[190].mxu1 %vm850_vm0, %v23129_v9 }
 0x765   : > { %19055 = vmatprep.mubr.msk.f32.mxu1 %vm850_vm0, %v23137_v61 }
 0x768   : > { %19056 = vmatmul.mubr.msk.f32.gmra.mrb[192].mxu1 %vm850_vm0, %v23143_v58 }
 0x769   : > { %19058 = vmatprep.mubr.msk.f32.mxu1 %vm850_vm0, %v23151_v27 }
 0x76c   : > { %19059 = vmatmul.mubr.msk.f32.gmra.mrb[194].mxu1 %vm850_vm0, %v23157_v62 }
 0x76d   : > { %19061 = vmatprep.mubr.msk.f32.mxu1 %vm850_vm0, %v23165_v24 }
 0x770   : > { %19062 = vmatmul.mubr.msk.f32.gmra.mrb[196].mxu1 %vm850_vm0, %v23171_v41 }
 0x771   : > { %19064 = vmatprep.mubr.msk.f32.mxu1 %vm850_vm0, %v23179_v3 }
 0x774   : > { %19065 = vmatmul.mubr.msk.f32.gmra.mrb[198].mxu1 %vm850_vm0, %v23185_v13 }
 0x775   : > { %19067 = vmatprep.mubr.msk.f32.mxu1 %vm850_vm0, %v23193_v25 }
 0x778   : > { %19068 = vmatmul.mubr.msk.f32.gmra.mrb[200].mxu1 %vm850_vm0, %v23199_v30 }
 0x779   : > { %19070 = vmatprep.mubr.msk.f32.mxu1 %vm850_vm0, %v23207_v63 }
 0x77c   : > { %19071 = vmatmul.mubr.msk.f32.gmra.mrb[202].mxu1 %vm850_vm0, %v23213_v48 }
 0x77d   : > { %19073 = vmatprep.mubr.msk.f32.mxu1 %vm850_vm0, %v23221_v5 }
 0x780   : > { %19074 = vmatmul.mubr.msk.f32.gmra.mrb[204].mxu1 %vm850_vm0, %v23227_v17 }
 0x781   : > { %19076 = vmatprep.mubr.msk.f32.mxu1 %vm850_vm0, %v23235_v32 }
 0x784   : > { %19077 = vmatmul.mubr.msk.f32.gmra.mrb[206].mxu1 %vm850_vm0, %v23241_v60 }
 0x785   : > { %19079 = vmatprep.mubr.msk.f32.mxu1 %vm850_vm0, %v23249_v26 }
 0x788   : > { %19080 = vmatmul.mubr.msk.f32.gmra.mrb[208].mxu1 %vm850_vm0, %v23255_v8 }
 0x789   : > { %19082 = vmatprep.mubr.msk.f32.mxu1 %vm850_vm0, %v23263_v54 }
 0x78c   : > { %19083 = vmatmul.mubr.msk.f32.gmra.mrb[210].mxu1 %vm850_vm0, %v23269_v4 }
 0x78d   : > { %19085 = vmatprep.mubr.msk.f32.mxu1 %vm850_vm0, %v23277_v19 }
 0x790   : > { %19086 = vmatmul.mubr.msk.f32.gmra.mrb[212].mxu1 %vm850_vm0, %v23283_v45 }
 0x791   : > { %19088 = vmatprep.mubr.msk.f32.mxu1 %vm850_vm0, %v23291_v15 }
 0x794   : > { %19089 = vmatmul.mubr.msk.f32.gmra.mrb[214].mxu1 %vm850_vm0, %v23297_v46 }
 0x795   : > { %19091 = vmatprep.mubr.msk.f32.mxu1 %vm850_vm0, %v23305_v42 }
 0x798   : > { %19092 = vmatmul.mubr.msk.f32.gmra.mrb[216].mxu1 %vm850_vm0, %v23311_v53 }
 0x799   : > { %19094 = vmatprep.mubr.msk.f32.mxu1 %vm850_vm0, %v23318_v40 }
 0x79c   : > { %19095 = vmatmul.mubr.msk.f32.gmra.mrb[218].mxu1 %vm850_vm0, %v23324_v2 }
 0x79d   : > { %19099 = vmatprep.mubr.msk.f32.mxu1 %vm850_vm0, %v23039_v16  ;;  %v24666_v16 = vld [vmem:[#allocation6_spill] sm:$0xff] }
 0x7a0   : > { %19100 = vmatmul.mubr.msk.f32.vlgmr.msra.gmra.mrb[172].mxu1 %vm850_vm0, %v23045_v20  ;;  %v23560_v20 = vld [vmem:[#allocation4 + $0x198] sm:$0xff] }
 0x7a1   : > { %19172 = vmatpush3.msra.mxu1 %v23354_v11  ;;  %19102 = vmatprep.mubr.msk.f32.mxu1 %vm850_vm0, %v23053_v39  ;;  %v23564_v39 = vld [vmem:[#allocation4 + $0x1a0] sm:$0xff]  ;;  %v23568_v11 = vld [vmem:[#allocation4 + $0x1a8] sm:$0xff] }
 0x7a2   : > { %19245 = vmatprep.subr.mxu1 %v16511_v12 }
 0x7a4   : > { %19103 = vmatmul.mubr.msk.f32.gmra.mrb[174].mxu1 %vm850_vm0, %v23059_v44 }
 0x7a5   : > { %19105 = vmatprep.mubr.msk.f32.mxu1 %vm850_vm0, %v23067_v18 }
 0x7a8   : > { %19106 = vmatmul.mubr.msk.f32.gmra.mrb[176].mxu1 %vm850_vm0, %v23073_v49 }
 0x7a9   : > { %19108 = vmatprep.mubr.msk.f32.mxu1 %vm850_vm0, %v23081_v52 }
 0x7ac   : > { %19109 = vmatmul.mubr.msk.f32.gmra.mrb[178].mxu1 %vm850_vm0, %v23087_v55 }
 0x7ad   : > { %19111 = vmatprep.mubr.msk.f32.mxu1 %vm850_vm0, %v23095_v38 }
 0x7b0   : > { %19112 = vmatmul.mubr.msk.f32.gmra.mrb[180].mxu1 %vm850_vm0, %v23101_v7 }
 0x7b1   : > { %19114 = vmatprep.mubr.msk.f32.mxu1 %vm850_vm0, %v23109_v10 }
 0x7b4   : > { %19115 = vmatmul.mubr.msk.f32.gmra.mrb[182].mxu1 %vm850_vm0, %v23115_v36 }
 0x7b5   : > { %19117 = vmatprep.mubr.msk.f32.mxu1 %vm850_vm0, %v23123_v51 }
 0x7b8   : > { %19118 = vmatmul.mubr.msk.f32.gmra.mrb[184].mxu1 %vm850_vm0, %v23129_v9 }
 0x7b9   : > { %19120 = vmatprep.mubr.msk.f32.mxu1 %vm850_vm0, %v23137_v61 }
 0x7bc   : > { %19121 = vmatmul.mubr.msk.f32.gmra.mrb[186].mxu1 %vm850_vm0, %v23143_v58 }
 0x7bd   : > { %19123 = vmatprep.mubr.msk.f32.mxu1 %vm850_vm0, %v23151_v27 }
 0x7c0   : > { %19124 = vmatmul.mubr.msk.f32.gmra.mrb[188].mxu1 %vm850_vm0, %v23157_v62 }
 0x7c1   : > { %19126 = vmatprep.mubr.msk.f32.mxu1 %vm850_vm0, %v23165_v24 }
 0x7c4   : > { %19127 = vmatmul.mubr.msk.f32.gmra.mrb[190].mxu1 %vm850_vm0, %v23171_v41 }
 0x7c5   : > { %19129 = vmatprep.mubr.msk.f32.mxu1 %vm850_vm0, %v23179_v3 }
 0x7c8   : > { %19130 = vmatmul.mubr.msk.f32.gmra.mrb[192].mxu1 %vm850_vm0, %v23185_v13 }
 0x7c9   : > { %19132 = vmatprep.mubr.msk.f32.mxu1 %vm850_vm0, %v23193_v25 }
 0x7cc   : > { %19133 = vmatmul.mubr.msk.f32.gmra.mrb[194].mxu1 %vm850_vm0, %v23199_v30 }
 0x7cd   : > { %19135 = vmatprep.mubr.msk.f32.mxu1 %vm850_vm0, %v23207_v63 }
 0x7d0   : > { %19136 = vmatmul.mubr.msk.f32.gmra.mrb[196].mxu1 %vm850_vm0, %v23213_v48 }
 0x7d1   : > { %19138 = vmatprep.mubr.msk.f32.mxu1 %vm850_vm0, %v23221_v5 }
 0x7d4   : > { %19139 = vmatmul.mubr.msk.f32.gmra.mrb[198].mxu1 %vm850_vm0, %v23227_v17 }
 0x7d5   : > { %19141 = vmatprep.mubr.msk.f32.mxu1 %vm850_vm0, %v23235_v32 }
 0x7d8   : > { %19142 = vmatmul.mubr.msk.f32.gmra.mrb[200].mxu1 %vm850_vm0, %v23241_v60 }
 0x7d9   : > { %19144 = vmatprep.mubr.msk.f32.mxu1 %vm850_vm0, %v23249_v26 }
 0x7dc   : > { %19145 = vmatmul.mubr.msk.f32.gmra.mrb[202].mxu1 %vm850_vm0, %v23255_v8 }
 0x7dd   : > { %19147 = vmatprep.mubr.msk.f32.mxu1 %vm850_vm0, %v23263_v54 }
 0x7e0   : > { %19148 = vmatmul.mubr.msk.f32.gmra.mrb[204].mxu1 %vm850_vm0, %v23269_v4 }
 0x7e1   : > { %19150 = vmatprep.mubr.msk.f32.mxu1 %vm850_vm0, %v23277_v19 }
 0x7e4   : > { %19151 = vmatmul.mubr.msk.f32.gmra.mrb[206].mxu1 %vm850_vm0, %v23283_v45 }
 0x7e5   : > { %19153 = vmatprep.mubr.msk.f32.mxu1 %vm850_vm0, %v23291_v15 }
 0x7e8   : > { %19154 = vmatmul.mubr.msk.f32.gmra.mrb[208].mxu1 %vm850_vm0, %v23297_v46 }
 0x7e9   : > { %19156 = vmatprep.mubr.msk.f32.mxu1 %vm850_vm0, %v23305_v42 }
 0x7ec   : > { %19157 = vmatmul.mubr.msk.f32.gmra.mrb[210].mxu1 %vm850_vm0, %v23311_v53 }
 0x7ed   : > { %19159 = vmatprep.mubr.msk.f32.mxu1 %vm850_vm0, %v23318_v40 }
 0x7f0   : > { %19160 = vmatmul.mubr.msk.f32.gmra.mrb[212].mxu1 %vm850_vm0, %v23324_v2 }
 0x7f1   : > { %19162 = vmatprep.mubr.msk.f32.mxu1 %vm850_vm0, %v23330_v57 }
 0x7f4   : > { %19163 = vmatmul.mubr.msk.f32.gmra.mrb[214].mxu1 %vm850_vm0, %v24666_v16 }
 0x7f5   : > { %19165 = vmatprep.mubr.msk.f32.mxu1 %vm850_vm0, %v23342_v50 }
 0x7f8   : > { %19166 = vmatmul.mubr.msk.f32.gmra.mrb[216].mxu1 %vm850_vm0, %v23560_v20 }
 0x7f9   : > { %19168 = vmatprep.mubr.msk.f32.mxu1 %vm850_vm0, %v23564_v39 }
 0x7fc   : > { %19169 = vmatmul.mubr.msk.f32.gmra.mrb[218].mxu1 %vm850_vm0, %v23568_v11 }
 0x7fd   : > { %19173 = vmatprep.mubr.msk.f32.mxu1 %vm850_vm0, %v23059_v44  ;;  %v23665_v44 = vld [vmem:[#allocation4 + $0x1b0] sm:$0xff] }
 0x800   : > { %19174 = vmatmul.mubr.msk.f32.vlgmr.msra.gmra.mrb[172].mxu1 %vm850_vm0, %v23067_v18  ;;  %v23669_v18 = vld [vmem:[#allocation4 + $0x1b8] sm:$0xff] }
 0x801   : > { %19246 = vmatpush3.msra.mxu1 %v16511_v12  ;;  %19176 = vmatprep.mubr.msk.f32.mxu1 %vm850_vm0, %v23073_v49  ;;  %v23673_v49 = vld [vmem:[#allocation4 + $0x1c0] sm:$0xff]  ;;  %v23986_v12 = vpop.permute.xlu0 %13648 }
 0x802   : > { %19319 = vmatprep.subr.mxu1 %v16560_v29 }
 0x804   : > { %19177 = vmatmul.mubr.msk.f32.gmra.mrb[174].mxu1 %vm850_vm0, %v23081_v52  ;;  %v11870_v52 = vld [vmem:[#allocation4 + $0x60] sm:$0xff] }
 0x805   : > { %19179 = vmatprep.mubr.msk.f32.mxu1 %vm850_vm0, %v23087_v55  ;;  %v11871_v55 = vld [vmem:[#allocation4 + $0x68] sm:$0xff] }
 0x808   : > { %19180 = vmatmul.mubr.msk.f32.gmra.mrb[176].mxu1 %vm850_vm0, %v23095_v38  ;;  %v23681_v38 = vld [vmem:[%s24475_s9 + $0x30] sm:$0xff] }
 0x809   : > { %19182 = vmatprep.mubr.msk.f32.mxu1 %vm850_vm0, %v23101_v7  ;;  %v11872_v7 = vld [vmem:[#allocation4 + $0x70] sm:$0xff] }
 0x80c   : > { %19183 = vmatmul.mubr.msk.f32.gmra.mrb[178].mxu1 %vm850_vm0, %v23109_v10  ;;  %v11873_v10 = vld [vmem:[#allocation4 + $0x78] sm:$0xff] }
 0x80d   : > { %19185 = vmatprep.mubr.msk.f32.mxu1 %vm850_vm0, %v23115_v36  ;;  %v11874_v36 = vld [vmem:[#allocation4 + $0x80] sm:$0xff] }
 0x810   : > { %19186 = vmatmul.mubr.msk.f32.gmra.mrb[180].mxu1 %vm850_vm0, %v23123_v51  ;;  %v11875_v51 = vld [vmem:[#allocation4 + $0x88] sm:$0xff] }
 0x811   : > { %19188 = vmatprep.mubr.msk.f32.mxu1 %vm850_vm0, %v23129_v9  ;;  %v23689_v9 = vld [vmem:[#allocation4 + $0x90] sm:$0xff] }
 0x814   : > { %19189 = vmatmul.mubr.msk.f32.gmra.mrb[182].mxu1 %vm850_vm0, %v23137_v61  ;;  %v23693_v61 = vld [vmem:[#allocation4 + $0x98] sm:$0xff] }
 0x815   : > { %19191 = vmatprep.mubr.msk.f32.mxu1 %vm850_vm0, %v23143_v58  ;;  %v23697_v58 = vld [vmem:[#allocation4 + $0xa0] sm:$0xff] }
 0x818   : > { %19192 = vmatmul.mubr.msk.f32.gmra.mrb[184].mxu1 %vm850_vm0, %v23151_v27  ;;  %v23701_v27 = vld [vmem:[#allocation4 + $0xa8] sm:$0xff] }
 0x819   : > { %19194 = vmatprep.mubr.msk.f32.mxu1 %vm850_vm0, %v23157_v62  ;;  %v23705_v62 = vld [vmem:[#allocation4 + $0xb0] sm:$0xff] }
 0x81c   : > { %19195 = vmatmul.mubr.msk.f32.gmra.mrb[186].mxu1 %vm850_vm0, %v23165_v24  ;;  %v23709_v24 = vld [vmem:[#allocation4 + $0xb8] sm:$0xff] }
 0x81d   : > { %19197 = vmatprep.mubr.msk.f32.mxu1 %vm850_vm0, %v23171_v41  ;;  %v23713_v41 = vld [vmem:[#allocation4 + $0xc0] sm:$0xff] }
 0x820   : > { %19198 = vmatmul.mubr.msk.f32.gmra.mrb[188].mxu1 %vm850_vm0, %v23179_v3 }
 0x821   : > { %19200 = vmatprep.mubr.msk.f32.mxu1 %vm850_vm0, %v23185_v13 }
 0x824   : > { %19201 = vmatmul.mubr.msk.f32.gmra.mrb[190].mxu1 %vm850_vm0, %v23193_v25 }
 0x825   : > { %19203 = vmatprep.mubr.msk.f32.mxu1 %vm850_vm0, %v23199_v30 }
 0x828   : > { %19204 = vmatmul.mubr.msk.f32.gmra.mrb[192].mxu1 %vm850_vm0, %v23207_v63 }
 0x829   : > { %19206 = vmatprep.mubr.msk.f32.mxu1 %vm850_vm0, %v23213_v48 }
 0x82c   : > { %19207 = vmatmul.mubr.msk.f32.gmra.mrb[194].mxu1 %vm850_vm0, %v23221_v5 }
 0x82d   : > { %19209 = vmatprep.mubr.msk.f32.mxu1 %vm850_vm0, %v23227_v17 }
 0x830   : > { %19210 = vmatmul.mubr.msk.f32.gmra.mrb[196].mxu1 %vm850_vm0, %v23235_v32 }
 0x831   : > { %19212 = vmatprep.mubr.msk.f32.mxu1 %vm850_vm0, %v23241_v60 }
 0x834   : > { %19213 = vmatmul.mubr.msk.f32.gmra.mrb[198].mxu1 %vm850_vm0, %v23249_v26 }
 0x835   : > { %19215 = vmatprep.mubr.msk.f32.mxu1 %vm850_vm0, %v23255_v8 }
 0x838   : > { %19216 = vmatmul.mubr.msk.f32.gmra.mrb[200].mxu1 %vm850_vm0, %v23263_v54 }
 0x839   : > { %19218 = vmatprep.mubr.msk.f32.mxu1 %vm850_vm0, %v23269_v4 }
 0x83c   : > { %19219 = vmatmul.mubr.msk.f32.gmra.mrb[202].mxu1 %vm850_vm0, %v23277_v19 }
 0x83d   : > { %19221 = vmatprep.mubr.msk.f32.mxu1 %vm850_vm0, %v23283_v45 }
 0x840   : > { %19222 = vmatmul.mubr.msk.f32.gmra.mrb[204].mxu1 %vm850_vm0, %v23291_v15 }
 0x841   : > { %19224 = vmatprep.mubr.msk.f32.mxu1 %vm850_vm0, %v23297_v46 }
 0x844   : > { %19225 = vmatmul.mubr.msk.f32.gmra.mrb[206].mxu1 %vm850_vm0, %v23305_v42 }
 0x845   : > { %19227 = vmatprep.mubr.msk.f32.mxu1 %vm850_vm0, %v23311_v53 }
 0x848   : > { %19228 = vmatmul.mubr.msk.f32.gmra.mrb[208].mxu1 %vm850_vm0, %v23318_v40 }
 0x849   : > { %19230 = vmatprep.mubr.msk.f32.mxu1 %vm850_vm0, %v23324_v2 }
 0x84c   : > { %19231 = vmatmul.mubr.msk.f32.gmra.mrb[210].mxu1 %vm850_vm0, %v23330_v57 }
 0x84d   : > { %19233 = vmatprep.mubr.msk.f32.mxu1 %vm850_vm0, %v24666_v16 }
 0x850   : > { %19234 = vmatmul.mubr.msk.f32.gmra.mrb[212].mxu1 %vm850_vm0, %v23342_v50 }
 0x851   : > { %19236 = vmatprep.mubr.msk.f32.mxu1 %vm850_vm0, %v23560_v20 }
 0x854   : > { %19237 = vmatmul.mubr.msk.f32.gmra.mrb[214].mxu1 %vm850_vm0, %v23564_v39 }
 0x855   : > { %19239 = vmatprep.mubr.msk.f32.mxu1 %vm850_vm0, %v23568_v11 }
 0x858   : > { %19240 = vmatmul.mubr.msk.f32.gmra.mrb[216].mxu1 %vm850_vm0, %v23665_v44 }
 0x859   : > { %19242 = vmatprep.mubr.msk.f32.mxu1 %vm850_vm0, %v23669_v18 }
 0x85c   : > { %19243 = vmatmul.mubr.msk.f32.gmra.mrb[218].mxu1 %vm850_vm0, %v23673_v49 }
 0x85d   : > { %19247 = vmatprep.mubr.msk.f32.mxu1 %vm850_vm0, %v11870_v52 }
 0x860   : > { %19248 = vmatmul.mubr.msk.f32.vlgmr.msra.gmra.mrb[172].mxu1 %vm850_vm0, %v11871_v55 }
 0x861   : > { %19320 = vmatpush3.msra.mxu1 %v16560_v29  ;;  %19250 = vmatprep.mubr.msk.f32.mxu1 %vm850_vm0, %v11872_v7 }
 0x862   : > { %19393 = vmatprep.subr.mxu1 %v23681_v38 }
 0x864   : > { %19251 = vmatmul.mubr.msk.f32.gmra.mrb[174].mxu1 %vm850_vm0, %v11873_v10 }
 0x865   : > { %19253 = vmatprep.mubr.msk.f32.mxu1 %vm850_vm0, %v11874_v36 }
 0x868   : > { %19254 = vmatmul.mubr.msk.f32.gmra.mrb[176].mxu1 %vm850_vm0, %v11875_v51 }
 0x869   : > { %19256 = vmatprep.mubr.msk.f32.mxu1 %vm850_vm0, %v23689_v9 }
 0x86c   : > { %19257 = vmatmul.mubr.msk.f32.gmra.mrb[178].mxu1 %vm850_vm0, %v23693_v61 }
 0x86d   : > { %19259 = vmatprep.mubr.msk.f32.mxu1 %vm850_vm0, %v23697_v58 }
 0x870   : > { %19260 = vmatmul.mubr.msk.f32.gmra.mrb[180].mxu1 %vm850_vm0, %v23701_v27 }
 0x871   : > { %19262 = vmatprep.mubr.msk.f32.mxu1 %vm850_vm0, %v23705_v62 }
 0x874   : > { %19263 = vmatmul.mubr.msk.f32.gmra.mrb[182].mxu1 %vm850_vm0, %v23709_v24 }
 0x875   : > { %19265 = vmatprep.mubr.msk.f32.mxu1 %vm850_vm0, %v23713_v41 }
 0x878   : > { %19266 = vmatmul.mubr.msk.f32.gmra.mrb[184].mxu1 %vm850_vm0, %v23717_v22 }
 0x879   : > { %19268 = vmatprep.mubr.msk.f32.mxu1 %vm850_vm0, %v23179_v3  ;;  %v23783_v3 = vld [vmem:[#allocation4 + $0x1c8] sm:$0xff] }
 0x87c   : > { %19269 = vmatmul.mubr.msk.f32.gmra.mrb[186].mxu1 %vm850_vm0, %v23185_v13  ;;  %v23787_v13 = vld [vmem:[#allocation4 + $0x1d0] sm:$0xff] }
 0x87d   : > { %19271 = vmatprep.mubr.msk.f32.mxu1 %vm850_vm0, %v23193_v25  ;;  %v23791_v25 = vld [vmem:[#allocation4 + $0x1d8] sm:$0xff] }
 0x880   : > { %19272 = vmatmul.mubr.msk.f32.gmra.mrb[188].mxu1 %vm850_vm0, %v23199_v30  ;;  %v24667_v30 = vmov 0.0  }
 0x881   : > { %19274 = vmatprep.mubr.msk.f32.mxu1 %vm850_vm0, %v23207_v63  ;;  %v23816_v63 = vld [vmem:[#allocation4 + $0xd0] sm:$0xff]  ;;  %19605 = vmatprep.subr.mxu0 %v24667_v30 }
 0x884   : > { %19275 = vmatmul.mubr.msk.f32.gmra.mrb[190].mxu1 %vm850_vm0, %v23213_v48  ;;  %v23820_v48 = vld [vmem:[#allocation4 + $0xd8] sm:$0xff] }
 0x885   : > { %19277 = vmatprep.mubr.msk.f32.mxu1 %vm850_vm0, %v23221_v5  ;;  %v23824_v5 = vld [vmem:[#allocation4 + $0xe0] sm:$0xff] }
 0x888   : > { %19278 = vmatmul.mubr.msk.f32.gmra.mrb[192].mxu1 %vm850_vm0, %v23227_v17  ;;  %v23828_v17 = vld [vmem:[#allocation4 + $0xe8] sm:$0xff] }
 0x889   : > { %19280 = vmatprep.mubr.msk.f32.mxu1 %vm850_vm0, %v23235_v32  ;;  %v23832_v32 = vld [vmem:[#allocation4 + $0xf0] sm:$0xff] }
 0x88c   : > { %19281 = vmatmul.mubr.msk.f32.gmra.mrb[194].mxu1 %vm850_vm0, %v23241_v60  ;;  %v23836_v60 = vld [vmem:[#allocation4 + $0xf8] sm:$0xff] }
 0x88d   : > { %19283 = vmatprep.mubr.msk.f32.mxu1 %vm850_vm0, %v23249_v26  ;;  %v23840_v26 = vld [vmem:[#allocation4 + $0x100] sm:$0xff] }
 0x890   : > { %19284 = vmatmul.mubr.msk.f32.gmra.mrb[196].mxu1 %vm850_vm0, %v23255_v8  ;;  %v23844_v8 = vld [vmem:[#allocation4 + $0x108] sm:$0xff] }
 0x891   : > { %19286 = vmatprep.mubr.msk.f32.mxu1 %vm850_vm0, %v23263_v54  ;;  %v23848_v54 = vld [vmem:[#allocation4 + $0x110] sm:$0xff] }
 0x894   : > { %19287 = vmatmul.mubr.msk.f32.gmra.mrb[198].mxu1 %vm850_vm0, %v23269_v4  ;;  %v23852_v4 = vld [vmem:[#allocation4 + $0x118] sm:$0xff] }
 0x895   : > { %19289 = vmatprep.mubr.msk.f32.mxu1 %vm850_vm0, %v23277_v19  ;;  %v23856_v19 = vld [vmem:[#allocation4 + $0x120] sm:$0xff] }
 0x898   : > { %19290 = vmatmul.mubr.msk.f32.gmra.mrb[200].mxu1 %vm850_vm0, %v23283_v45  ;;  %v12440_v45 = vld [vmem:[#allocation4 + $0x128] sm:$0xff] }
 0x899   : > { %19292 = vmatprep.mubr.msk.f32.mxu1 %vm850_vm0, %v23291_v15  ;;  %v12441_v15 = vld [vmem:[#allocation4 + $0x130] sm:$0xff] }
 0x89c   : > { %19293 = vmatmul.mubr.msk.f32.gmra.mrb[202].mxu1 %vm850_vm0, %v23297_v46  ;;  %v12442_v46 = vld [vmem:[#allocation4 + $0x138] sm:$0xff] }
 0x89d   : > { %19295 = vmatprep.mubr.msk.f32.mxu1 %vm850_vm0, %v23305_v42  ;;  %v12443_v42 = vld [vmem:[#allocation4 + $0x140] sm:$0xff] }
 0x8a0   : > { %19296 = vmatmul.mubr.msk.f32.gmra.mrb[204].mxu1 %vm850_vm0, %v23311_v53  ;;  %v12444_v53 = vld [vmem:[#allocation4 + $0x148] sm:$0xff] }
 0x8a1   : > { %19298 = vmatprep.mubr.msk.f32.mxu1 %vm850_vm0, %v23318_v40  ;;  %v12445_v40 = vld [vmem:[#allocation4 + $0x150] sm:$0xff] }
 0x8a4   : > { %19299 = vmatmul.mubr.msk.f32.gmra.mrb[206].mxu1 %vm850_vm0, %v23324_v2  ;;  %v12446_v2 = vld [vmem:[#allocation4 + $0x158] sm:$0xff] }
 0x8a5   : > { %19301 = vmatprep.mubr.msk.f32.mxu1 %vm850_vm0, %v23330_v57 }
 0x8a8   : > { %19302 = vmatmul.mubr.msk.f32.gmra.mrb[208].mxu1 %vm850_vm0, %v24666_v16 }
 0x8a9   : > { %19304 = vmatprep.mubr.msk.f32.mxu1 %vm850_vm0, %v23342_v50 }
 0x8ac   : > { %19305 = vmatmul.mubr.msk.f32.gmra.mrb[210].mxu1 %vm850_vm0, %v23560_v20 }
 0x8ad   : > { %19307 = vmatprep.mubr.msk.f32.mxu1 %vm850_vm0, %v23564_v39 }
 0x8b0   : > { %19308 = vmatmul.mubr.msk.f32.gmra.mrb[212].mxu1 %vm850_vm0, %v23568_v11 }
 0x8b1   : > { %19310 = vmatprep.mubr.msk.f32.mxu1 %vm850_vm0, %v23665_v44 }
 0x8b4   : > { %19311 = vmatmul.mubr.msk.f32.gmra.mrb[214].mxu1 %vm850_vm0, %v23669_v18 }
 0x8b5   : > { %19313 = vmatprep.mubr.msk.f32.mxu1 %vm850_vm0, %v23673_v49 }
 0x8b8   : > { %19314 = vmatmul.mubr.msk.f32.gmra.mrb[216].mxu1 %vm850_vm0, %v23783_v3 }
 0x8b9   : > { %19316 = vmatprep.mubr.msk.f32.mxu1 %vm850_vm0, %v23787_v13 }
 0x8bc   : > { %19317 = vmatmul.mubr.msk.f32.gmra.mrb[218].mxu1 %vm850_vm0, %v23791_v25 }
 0x8bd   : > { %19321 = vmatprep.mubr.msk.f32.mxu1 %vm850_vm0, %v11873_v10 }
 0x8c0   : > { %19322 = vmatmul.mubr.msk.f32.vlgmr.msra.gmra.mrb[172].mxu1 %vm850_vm0, %v11874_v36 }
 0x8c1   : > { %19394 = vmatpush3.msra.mxu1 %v23681_v38  ;;  %19324 = vmatprep.mubr.msk.f32.mxu1 %vm850_vm0, %v11875_v51 }
 0x8c2   : > { %19467 = vmatprep.subr.mxu1 %v24667_v30 }
 0x8c4   : > { %19325 = vmatmul.mubr.msk.f32.gmra.mrb[174].mxu1 %vm850_vm0, %v23689_v9 }
 0x8c5   : > { %19327 = vmatprep.mubr.msk.f32.mxu1 %vm850_vm0, %v23693_v61 }
 0x8c8   : > { %19328 = vmatmul.mubr.msk.f32.gmra.mrb[176].mxu1 %vm850_vm0, %v23697_v58 }
 0x8c9   : > { %19330 = vmatprep.mubr.msk.f32.mxu1 %vm850_vm0, %v23701_v27 }
 0x8cc   : > { %19331 = vmatmul.mubr.msk.f32.gmra.mrb[178].mxu1 %vm850_vm0, %v23705_v62 }
 0x8cd   : > { %19333 = vmatprep.mubr.msk.f32.mxu1 %vm850_vm0, %v23709_v24 }
 0x8d0   : > { %19334 = vmatmul.mubr.msk.f32.gmra.mrb[180].mxu1 %vm850_vm0, %v23713_v41 }
 0x8d1   : > { %19336 = vmatprep.mubr.msk.f32.mxu1 %vm850_vm0, %v23717_v22 }
 0x8d4   : > { %19337 = vmatmul.mubr.msk.f32.gmra.mrb[182].mxu1 %vm850_vm0, %v23816_v63 }
 0x8d5   : > { %19339 = vmatprep.mubr.msk.f32.mxu1 %vm850_vm0, %v23820_v48 }
 0x8d8   : > { %19340 = vmatmul.mubr.msk.f32.gmra.mrb[184].mxu1 %vm850_vm0, %v23824_v5 }
 0x8d9   : > { %19342 = vmatprep.mubr.msk.f32.mxu1 %vm850_vm0, %v23828_v17 }
 0x8dc   : > { %19343 = vmatmul.mubr.msk.f32.gmra.mrb[186].mxu1 %vm850_vm0, %v23832_v32 }
 0x8dd   : > { %19345 = vmatprep.mubr.msk.f32.mxu1 %vm850_vm0, %v23836_v60 }
 0x8e0   : > { %19346 = vmatmul.mubr.msk.f32.gmra.mrb[188].mxu1 %vm850_vm0, %v23840_v26 }
 0x8e1   : > { %19348 = vmatprep.mubr.msk.f32.mxu1 %vm850_vm0, %v23844_v8 }
 0x8e4   : > { %19349 = vmatmul.mubr.msk.f32.gmra.mrb[190].mxu1 %vm850_vm0, %v23848_v54 }
 0x8e5   : > { %19351 = vmatprep.mubr.msk.f32.mxu1 %vm850_vm0, %v23852_v4 }
 0x8e8   : > { %19352 = vmatmul.mubr.msk.f32.gmra.mrb[192].mxu1 %vm850_vm0, %v23856_v19 }
 0x8e9   : > { %19354 = vmatprep.mubr.msk.f32.mxu1 %vm850_vm0, %v12440_v45 }
 0x8ec   : > { %19355 = vmatmul.mubr.msk.f32.gmra.mrb[194].mxu1 %vm850_vm0, %v12441_v15 }
 0x8ed   : > { %19357 = vmatprep.mubr.msk.f32.mxu1 %vm850_vm0, %v12442_v46 }
 0x8f0   : > { %19358 = vmatmul.mubr.msk.f32.gmra.mrb[196].mxu1 %vm850_vm0, %v12443_v42 }
 0x8f1   : > { %19360 = vmatprep.mubr.msk.f32.mxu1 %vm850_vm0, %v12444_v53 }
 0x8f4   : > { %19361 = vmatmul.mubr.msk.f32.gmra.mrb[198].mxu1 %vm850_vm0, %v12445_v40 }
 0x8f5   : > { %19363 = vmatprep.mubr.msk.f32.mxu1 %vm850_vm0, %v12446_v2 }
 0x8f8   : > { %19364 = vmatmul.mubr.msk.f32.gmra.mrb[200].mxu1 %vm850_vm0, %v12447_v35 }
 0x8f9   : > { %19366 = vmatprep.mubr.msk.f32.mxu1 %vm850_vm0, %v12448_v14 }
 0x8fc   : > { %19367 = vmatmul.mubr.msk.f32.gmra.mrb[202].mxu1 %vm850_vm0, %v12449_v33 }
 0x8fd   : > { %19369 = vmatprep.mubr.msk.f32.mxu1 %vm850_vm0, %v12450_v6 }
 0x900   : > { %19370 = vmatmul.mubr.msk.f32.gmra.mrb[204].mxu1 %vm850_vm0, %v23330_v57  ;;  %v12464_v57 = vld [vmem:[#allocation4 + $0x1e8] sm:$0xff] }
 0x901   : > { %19372 = vmatprep.mubr.msk.f32.mxu1 %vm850_vm0, %v24666_v16  ;;  %v23988_v16 = vpop.permute.xlu1 %13683 }
 0x904   : > { %19373 = vmatmul.mubr.msk.f32.gmra.mrb[206].mxu1 %vm850_vm0, %v23342_v50  ;;  %v12463_v50 = vld [vmem:[#allocation4 + $0x1e0] sm:$0xff] }
 0x905   : > { %19375 = vmatprep.mubr.msk.f32.mxu1 %vm850_vm0, %v23560_v20 }
 0x908   : > { %19376 = vmatmul.mubr.msk.f32.gmra.mrb[208].mxu1 %vm850_vm0, %v23564_v39 }
 0x909   : > { %19378 = vmatprep.mubr.msk.f32.mxu1 %vm850_vm0, %v23568_v11 }
 0x90c   : > { %19379 = vmatmul.mubr.msk.f32.gmra.mrb[210].mxu1 %vm850_vm0, %v23665_v44 }
 0x90d   : > { %19381 = vmatprep.mubr.msk.f32.mxu1 %vm850_vm0, %v23669_v18 }
 0x910   : > { %19382 = vmatmul.mubr.msk.f32.gmra.mrb[212].mxu1 %vm850_vm0, %v23673_v49 }
 0x911   : > { %19384 = vmatprep.mubr.msk.f32.mxu1 %vm850_vm0, %v23783_v3 }
 0x914   : > { %19385 = vmatmul.mubr.msk.f32.gmra.mrb[214].mxu1 %vm850_vm0, %v23787_v13 }
 0x915   : > { %19387 = vmatprep.mubr.msk.f32.mxu1 %vm850_vm0, %v23791_v25 }
 0x918   : > { %19388 = vmatmul.mubr.msk.f32.gmra.mrb[216].mxu1 %vm850_vm0, %v12463_v50 }
 0x919   : > { %19390 = vmatprep.mubr.msk.f32.mxu1 %vm850_vm0, %v12464_v57 }
 0x91c   : > { %19391 = vmatmul.mubr.msk.f32.gmra.mrb[218].mxu1 %vm850_vm0, %v12465_v47 }
 0x91d   : > { %19395 = vmatprep.mubr.msk.f32.mxu1 %vm850_vm0, %v23689_v9 }
 0x920   : > { %19396 = vmatmul.mubr.msk.f32.vlgmr.msra.gmra.mrb[172].mxu1 %vm850_vm0, %v23693_v61 }
 0x921   : > { %19398 = vmatprep.mubr.msk.f32.mxu1 %vm850_vm0, %v23697_v58  ;;  %19468 = vmatpush3.msra.mxu1 %v16659_v43  ;;  %v13965_v43 = vld [vmem:[%s24477_s11] sm:$0xff] }
 0x922   : > { %19490 = vmatprep.subr.mxu1 %v24667_v30 }
 0x924   : > { %19399 = vmatmul.mubr.msk.f32.gmra.mrb[174].mxu1 %vm850_vm0, %v23701_v27 }
 0x925   : > { %19401 = vmatprep.mubr.msk.f32.mxu1 %vm850_vm0, %v23705_v62 }
 0x928   : > { %19402 = vmatmul.mubr.msk.f32.gmra.mrb[176].mxu1 %vm850_vm0, %v23709_v24 }
 0x929   : > { %19404 = vmatprep.mubr.msk.f32.mxu1 %vm850_vm0, %v23713_v41 }
 0x92c   : > { %19405 = vmatmul.mubr.msk.f32.gmra.mrb[178].mxu1 %vm850_vm0, %v23717_v22 }
 0x92d   : > { %19407 = vmatprep.mubr.msk.f32.mxu1 %vm850_vm0, %v23816_v63 }
 0x930   : > { %19408 = vmatmul.mubr.msk.f32.gmra.mrb[180].mxu1 %vm850_vm0, %v23820_v48  ;;  %v24037_v48 = vld [vmem:[%s24476_s10] ss:$0 sm:$0xff] }
 0x931   : > { %19410 = vmatprep.mubr.msk.f32.mxu1 %vm850_vm0, %v23824_v5 }
 0x934   : > { %19411 = vmatmul.mubr.msk.f32.gmra.mrb[182].mxu1 %vm850_vm0, %v23828_v17 }
 0x935   : > { %19413 = vmatprep.mubr.msk.f32.mxu1 %vm850_vm0, %v23832_v32 }
 0x938   : > { %19414 = vmatmul.mubr.msk.f32.gmra.mrb[184].mxu1 %vm850_vm0, %v23836_v60 }
 0x939   : > { %19416 = vmatprep.mubr.msk.f32.mxu1 %vm850_vm0, %v23840_v26 }
 0x93c   : > { %19417 = vmatmul.mubr.msk.f32.gmra.mrb[186].mxu1 %vm850_vm0, %v23844_v8 }
 0x93d   : > { %19419 = vmatprep.mubr.msk.f32.mxu1 %vm850_vm0, %v23848_v54 }
 0x940   : > { %19420 = vmatmul.mubr.msk.f32.gmra.mrb[188].mxu1 %vm850_vm0, %v23852_v4 }
 0x941   : > { %19422 = vmatprep.mubr.msk.f32.mxu1 %vm850_vm0, %v23856_v19 }
 0x944   : > { %19423 = vmatmul.mubr.msk.f32.gmra.mrb[190].mxu1 %vm850_vm0, %v12440_v45 }
 0x945   : > { %19425 = vmatprep.mubr.msk.f32.mxu1 %vm850_vm0, %v12441_v15 }
 0x948   : > { %19426 = vmatmul.mubr.msk.f32.gmra.mrb[192].mxu1 %vm850_vm0, %v12442_v46 }
 0x949   : > { %19428 = vmatprep.mubr.msk.f32.mxu1 %vm850_vm0, %v12443_v42 }
 0x94c   : > { %19429 = vmatmul.mubr.msk.f32.gmra.mrb[194].mxu1 %vm850_vm0, %v12444_v53 }
 0x94d   : > { %19431 = vmatprep.mubr.msk.f32.mxu1 %vm850_vm0, %v12445_v40 }
 0x950   : > { %19432 = vmatmul.mubr.msk.f32.gmra.mrb[196].mxu1 %vm850_vm0, %v12446_v2 }
 0x951   : > { %19434 = vmatprep.mubr.msk.f32.mxu1 %vm850_vm0, %v12447_v35 }
 0x954   : > { %19435 = vmatmul.mubr.msk.f32.gmra.mrb[198].mxu1 %vm850_vm0, %v12448_v14 }
 0x955   : > { %19437 = vmatprep.mubr.msk.f32.mxu1 %vm850_vm0, %v12449_v33 }
 0x958   : > { %19438 = vmatmul.mubr.msk.f32.gmra.mrb[200].mxu1 %vm850_vm0, %v12450_v6 }
 0x959   : > { %19440 = vmatprep.mubr.msk.f32.mxu1 %vm850_vm0, %v12996_v59 }
 0x95c   : > { %19441 = vmatmul.mubr.msk.f32.gmra.mrb[202].mxu1 %vm850_vm0, %v12997_v56 }
 0x95d   : > { %19443 = vmatprep.mubr.msk.f32.mxu1 %vm850_vm0, %v12998_v28 }
 0x960   : > { %19444 = vmatmul.mubr.msk.f32.gmra.mrb[204].mxu1 %vm850_vm0, %v23560_v20  ;;  %v23990_v20 = vpop.permute.xlu0 %13678 }
 0x961   : > { %19446 = vmatprep.mubr.msk.f32.mxu1 %vm850_vm0, %v23564_v39  ;;  %v23992_v39 = vpop.permute.xlu1 %13713 }
 0x964   : > { %19447 = vmatmul.mubr.msk.f32.gmra.mrb[206].mxu1 %vm850_vm0, %v23568_v11  ;;  %v23994_v11 = vpop.permute.xlu0 %13708 }
 0x965   : > { %19449 = vmatprep.mubr.msk.f32.mxu1 %vm850_vm0, %v23665_v44  ;;  %v23996_v29 = vpop.permute.xlu1 %13743 }
 0x968   : > { %19450 = vmatmul.mubr.msk.f32.gmra.mrb[208].mxu1 %vm850_vm0, %v23669_v18  ;;  %v23998_v44 = vpop.permute.xlu0 %13738 }
 0x969   : > { %19452 = vmatprep.mubr.msk.f32.mxu1 %vm850_vm0, %v23673_v49  ;;  %v24000_v18 = vpop.permute.xlu1 %13773 }
 0x96c   : > { %19453 = vmatmul.mubr.msk.f32.gmra.mrb[210].mxu1 %vm850_vm0, %v23783_v3  ;;  %v24002_v49 = vpop.permute.xlu0 %13768 }
 0x96d   : > { %19455 = vmatprep.mubr.msk.f32.mxu1 %vm850_vm0, %v23787_v13  ;;  %v24004_v52 = vpop.permute.xlu1 %13803 }
 0x970   : > { %19456 = vmatmul.mubr.msk.f32.gmra.mrb[212].mxu1 %vm850_vm0, %v23791_v25  ;;  %v24006_v55 = vpop.permute.xlu0 %13798 }
 0x971   : > { %19458 = vmatprep.mubr.msk.f32.mxu1 %vm850_vm0, %v12463_v50  ;;  %v24008_v38 = vpop.permute.xlu1 %13658 }
 0x974   : > { %19459 = vmatmul.mubr.msk.f32.gmra.mrb[214].mxu1 %vm850_vm0, %v12464_v57  ;;  %v13629_v7 = vpop.permute.xlu0 %13628 }
 0x975   : > { %19461 = vmatprep.mubr.msk.f32.mxu1 %vm850_vm0, %v12465_v47  ;;  %v24010_v10 = vpop.permute.xlu1 %13718 }
 0x978   : > { %19462 = vmatmul.mubr.msk.f32.gmra.mrb[216].mxu1 %vm850_vm0, %v13011_v34  ;;  %v24012_v36 = vpop.permute.xlu0 %13688 }
 0x979   : > { %19464 = vmatprep.mubr.msk.f32.mxu1 %vm850_vm0, %v13012_v21  ;;  %v24014_v51 = vpop.permute.xlu1 %13778 }
 0x97c   : > { %19465 = vmatmul.mubr.msk.f32.gmra.mrb[218].mxu1 %vm850_vm0, %v13013_v23  ;;  %v24016_v9 = vpop.permute.xlu0 %13748 }
 0x97d   : > { %19469 = vmatprep.mubr.msk.f32.mxu1 %vm20383_vm1, %v24667_v30  ;;  %v13634_v61 = vpop.permute.xlu1 %13633 }
 0x980   : > { %v24018_v58 = vpop.permute.xlu0 %13808 }
 0x981   : > { %v13664_v27 = vpop.permute.xlu1 %13663 }
 0x984   : > { %v13639_v62 = vpop.permute.xlu0 %13638 }
 0x985   : > { %v24020_v24 = vpop.permute.xlu1 %13693 }
 0x988   : > { %v24022_v41 = vpop.permute.xlu0 %13668 }
 0x989   : > { %v24024_v22 = vpop.permute.xlu1 %13723 }
 0x98c   : > { %v24026_v3 = vpop.permute.xlu0 %13698 }
 0x98d   : > { %v24028_v13 = vpop.permute.xlu1 %13753 }
 0x990   : > { %v24030_v25 = vpop.permute.xlu0 %13728 }
 0x991   : > { %v24032_v63 = vpop.permute.xlu1 %13783 }
 0x994   : > { %v24041_v26 = vpop.permute.xlu0 %13758 }
 0x995   : > { %v24043_v54 = vpop.permute.xlu1 %13813 }
 0x998   : > { %v24051_v14 = vpop.permute.xlu0 %13788 }
 0x999   : > { %v13644_v33 = vpop.permute.xlu1 %13643 }
 0x99c   : > { %v24066_v23 = vpop.permute.xlu0 %13818 }
 0x9f3   : > { %v19397_v5 = vpop.f32.mrb[172].mxu1 }
 0x9f4   : > { %v13521_v17 = vadd.f32 %v19397_v5, %v24037_v48  ;;  %v13226_v32 = vpop.f32.mrb[173].mxu1 }
 0x9f5   : > { %v13520_v60 = vadd.f32 %v24037_v48, %v13226_v32 }
 0x9f6   : > { %v13857_v8 = vmul.f32 %v13624_v1, %v13521_v17 }
 0x9f7   : > { %v13856_v4 = vmul.f32 %v13619_v0, %v13520_v60  ;;  %v19400_v19 = vpop.f32.mrb[174].mxu1 }
 0x9f8   : > { %13905 = vst.msk [vmem:[#allocation5 + $0x8] sm:$0xff] %vm850_vm0, %v13857_v8  ;;  %v13523_v45 = vadd.f32 %v19400_v19, %v24037_v48  ;;  %v13236_v15 = vpop.f32.mrb[175].mxu1  ;;  %v13674_v8 = vpop.permute.xlu0 %13673 }
 0x9f9   : > { %13904 = vst.msk [vmem:[#allocation5] sm:$0xff] %vm850_vm0, %v13856_v4  ;;  %v13522_v46 = vadd.f32 %v24037_v48, %v13236_v15 }
 0x9fa   : > { %v13859_v42 = vmul.f32 %v13634_v61, %v13523_v45 }
 0x9fb   : > { %v13858_v53 = vmul.f32 %v13629_v7, %v13522_v46  ;;  %v19403_v40 = vpop.f32.mrb[176].mxu1 }
 0x9fc   : > { %13907 = vst.msk [vmem:[#allocation5 + $0x18] sm:$0xff] %vm850_vm0, %v13859_v42  ;;  %v13525_v2 = vadd.f32 %v19403_v40, %v24037_v48  ;;  %v13246_v35 = vpop.f32.mrb[177].mxu1 }
 0x9fd   : > { %13906 = vst.msk [vmem:[#allocation5 + $0x10] sm:$0xff] %vm850_vm0, %v13858_v53  ;;  %v13524_v6 = vadd.f32 %v24037_v48, %v13246_v35 }
 0x9fe   : > { %v13861_v50 = vmul.f32 %v13644_v33, %v13525_v2 }
 0x9ff   : > { %v13860_v57 = vmul.f32 %v13639_v62, %v13524_v6  ;;  %v19406_v47 = vpop.f32.mrb[178].mxu1 }
 0xa00   : > { %13909 = vst.msk [vmem:[#allocation5 + $0x28] sm:$0xff] %vm850_vm0, %v13861_v50  ;;  %v13527_v59 = vadd.f32 %v19406_v47, %v24037_v48  ;;  %v13256_v56 = vpop.f32.mrb[179].mxu1  ;;  %v13967_v28 = vld [vmem:[#allocation5 + $0x1] ss:$2 sm:$0xff] }
 0xa01   : > { %13908 = vst.msk [vmem:[#allocation5 + $0x20] sm:$0xff] %vm850_vm0, %v13860_v57  ;;  %v13526_v34 = vadd.f32 %v24037_v48, %v13256_v56  ;;  %19470 = vmatmul.mubr.msk.f32.vlgmr.msra.gmra.mrb[220].mxu1 %vm850_vm0, %v13967_v28 }
 0xa02   : > { %v13863_v21 = vmul.f32 %v23984_v31, %v13527_v59  ;;  %19472 = vmatprep.mubr.msk.f32.mxu1 %vm20383_vm1, %v24667_v30  ;;  %19491 = vmatpush3.msra.mxu1 %v13965_v43  ;;  %v13704_v43 = vpop.permute.xlu1 %13703 }
 0xa03   : > { %v13862_v37 = vmul.f32 %v23986_v12, %v13526_v34  ;;  %v19409_v1 = vpop.f32.mrb[180].mxu1  ;;  %19513 = vmatprep.subr.mxu1 %v24667_v30  ;;  %v16706_v12 = vld [vmem:[%s24477_s11 + $0x30] sm:$0xff] }
 0xa04   : > { %13911 = vst.msk [vmem:[#allocation5 + $0x38] sm:$0xff] %vm850_vm0, %v13863_v21  ;;  %v13529_v0 = vadd.f32 %v19409_v1, %v24037_v48  ;;  %v13266_v7 = vpop.f32.mrb[181].mxu1 }
 0xa05   : > { %13910 = vst.msk [vmem:[#allocation5 + $0x30] sm:$0xff] %vm850_vm0, %v13862_v37  ;;  %v13528_v31 = vadd.f32 %v24037_v48, %v13266_v7 }
 0xa06   : > { %v13865_v61 = vmul.f32 %v13664_v27, %v13529_v0 }
 0xa07   : > { %v13864_v62 = vmul.f32 %v24008_v38, %v13528_v31  ;;  %v19412_v5 = vpop.f32.mrb[182].mxu1 }
 0xa08   : > { %13913 = vst.msk [vmem:[#allocation5 + $0x48] sm:$0xff] %vm850_vm0, %v13865_v61  ;;  %v13531_v17 = vadd.f32 %v19412_v5, %v24037_v48  ;;  %v13276_v32 = vpop.f32.mrb[183].mxu1  ;;  %v14513_v60 = vld [vmem:[#allocation5 + $0x19] ss:$2 sm:$0xff] }
 0xa09   : > { %13912 = vst.msk [vmem:[#allocation5 + $0x40] sm:$0xff] %vm850_vm0, %v13864_v62  ;;  %v13530_v4 = vadd.f32 %v24037_v48, %v13276_v32  ;;  %19562 = vmatmul.mubr.msk.f32.vlgmr.msra.gmra.mrb[156].mxu0 %vm850_vm0, %v14513_v60  ;;  %v13734_v32 = vpop.permute.xlu0 %13733 }
 0xa0a   : > { %v13867_v27 = vmul.f32 %v13674_v8, %v13531_v17  ;;  %19564 = vmatprep.mubr.msk.f32.mxu0 %vm20383_vm1, %v24667_v30  ;;  %19606 = vmatpush3.msra.mxu0 %v16706_v12 }
 0xa0b   : > { %v13866_v38 = vmul.f32 %v24022_v41, %v13530_v4  ;;  %v19415_v19 = vpop.f32.mrb[184].mxu1  ;;  %19651 = vmatprep.subr.mxu0 %v24667_v30 }
 0xa0c   : > { %13915 = vst.msk [vmem:[#allocation5 + $0x58] sm:$0xff] %vm850_vm0, %v13867_v27  ;;  %v13533_v45 = vadd.f32 %v19415_v19, %v24037_v48  ;;  %v13286_v15 = vpop.f32.mrb[185].mxu1  ;;  %v13969_v46 = vld [vmem:[#allocation5 + $0x31] ss:$2 sm:$0xff] }
 0xa0d   : > { %13914 = vst.msk [vmem:[#allocation5 + $0x50] sm:$0xff] %vm850_vm0, %v13866_v38  ;;  %v13532_v42 = vadd.f32 %v24037_v48, %v13286_v15  ;;  %19473 = vmatmul.mubr.msk.f32.gmra.mrb[222].mxu1 %vm850_vm0, %v13969_v46 }
 0xa0e   : > { %v13869_v53 = vmul.f32 %v23988_v16, %v13533_v45  ;;  %19475 = vmatprep.mubr.msk.f32.mxu1 %vm20383_vm1, %v24667_v30 }
 0xa0f   : > { %v13868_v41 = vmul.f32 %v23990_v20, %v13532_v42  ;;  %v19418_v40 = vpop.f32.mrb[186].mxu1 }
 0xa10   : > { %13917 = vst.msk [vmem:[#allocation5 + $0x68] sm:$0xff] %vm850_vm0, %v13869_v53  ;;  %v13535_v2 = vadd.f32 %v19418_v40, %v24037_v48  ;;  %v13296_v35 = vpop.f32.mrb[187].mxu1 }
 0xa11   : > { %13916 = vst.msk [vmem:[#allocation5 + $0x60] sm:$0xff] %vm850_vm0, %v13868_v41  ;;  %v13534_v33 = vadd.f32 %v24037_v48, %v13296_v35 }
 0xa12   : > { %v13871_v6 = vmul.f32 %v24020_v24, %v13535_v2 }
 0xa13   : > { %v13870_v50 = vmul.f32 %v24012_v36, %v13534_v33  ;;  %v19421_v16 = vpop.f32.mrb[188].mxu1  ;;  %v13764_v33 = vpop.permute.xlu1 %13763 }
 0xa14   : > { %13919 = vst.msk [vmem:[#allocation5 + $0x78] sm:$0xff] %vm850_vm0, %v13871_v6  ;;  %v13537_v57 = vadd.f32 %v19421_v16, %v24037_v48  ;;  %v13306_v20 = vpop.f32.mrb[189].mxu1  ;;  %v14515_v47 = vld [vmem:[#allocation5 + $0x49] ss:$2 sm:$0xff] }
 0xa15   : > { %13918 = vst.msk [vmem:[#allocation5 + $0x70] sm:$0xff] %vm850_vm0, %v13870_v50  ;;  %v13536_v59 = vadd.f32 %v24037_v48, %v13306_v20  ;;  %19565 = vmatmul.mubr.msk.f32.gmra.mrb[158].mxu0 %vm850_vm0, %v14515_v47 }
 0xa16   : > { %v13873_v56 = vmul.f32 %v13704_v43, %v13537_v57  ;;  %19567 = vmatprep.mubr.msk.f32.mxu0 %vm20383_vm1, %v24667_v30 }
 0xa17   : > { %v13872_v36 = vmul.f32 %v24026_v3, %v13536_v59  ;;  %v19424_v24 = vpop.f32.mrb[190].mxu1 }
 0xa18   : > { %13921 = vst.msk [vmem:[#allocation5 + $0x88] sm:$0xff] %vm850_vm0, %v13873_v56  ;;  %v13539_v28 = vadd.f32 %v19424_v24, %v24037_v48  ;;  %v13316_v34 = vpop.f32.mrb[191].mxu1  ;;  %v13971_v21 = vld [vmem:[#allocation5 + $0x61] ss:$2 sm:$0xff] }
 0xa19   : > { %13920 = vst.msk [vmem:[#allocation5 + $0x80] sm:$0xff] %vm850_vm0, %v13872_v36  ;;  %v13538_v37 = vadd.f32 %v24037_v48, %v13316_v34  ;;  %19476 = vmatmul.mubr.msk.f32.gmra.mrb[224].mxu1 %vm850_vm0, %v13971_v21 }
 0xa1a   : > { %v13875_v1 = vmul.f32 %v23992_v39, %v13539_v28  ;;  %19478 = vmatprep.mubr.msk.f32.mxu1 %vm20383_vm1, %v24667_v30 }
 0xa1b   : > { %v13874_v3 = vmul.f32 %v23994_v11, %v13538_v37  ;;  %v19427_v0 = vpop.f32.mrb[192].mxu1 }
 0xa1c   : > { %13923 = vst.msk [vmem:[#allocation5 + $0x98] sm:$0xff] %vm850_vm0, %v13875_v1  ;;  %v13541_v7 = vadd.f32 %v19427_v0, %v24037_v48  ;;  %v13326_v31 = vpop.f32.mrb[193].mxu1  ;;  %v13794_v1 = vpop.permute.xlu0 %13793 }
 0xa1d   : > { %13922 = vst.msk [vmem:[#allocation5 + $0x90] sm:$0xff] %vm850_vm0, %v13874_v3  ;;  %v13540_v61 = vadd.f32 %v24037_v48, %v13326_v31 }
 0xa1e   : > { %v13877_v62 = vmul.f32 %v24024_v22, %v13541_v7 }
 0xa1f   : > { %v13876_v5 = vmul.f32 %v24010_v10, %v13540_v61  ;;  %v19430_v39 = vpop.f32.mrb[194].mxu1 }
 0xa20   : > { %13925 = vst.msk [vmem:[#allocation5 + $0xa8] sm:$0xff] %vm850_vm0, %v13877_v62  ;;  %v13543_v12 = vadd.f32 %v19430_v39, %v24037_v48  ;;  %v13336_v11 = vpop.f32.mrb[195].mxu1  ;;  %v14517_v17 = vld [vmem:[#allocation5 + $0x79] ss:$2 sm:$0xff]  ;;  %v13824_v39 = vpop.permute.xlu1 %13823 }
 0xa21   : > { %13924 = vst.msk [vmem:[#allocation5 + $0xa0] sm:$0xff] %vm850_vm0, %v13876_v5  ;;  %v13542_v60 = vadd.f32 %v24037_v48, %v13336_v11  ;;  %19568 = vmatmul.mubr.msk.f32.gmra.mrb[160].mxu0 %vm850_vm0, %v14517_v17 }
 0xa22   : > { %v13879_v8 = vmul.f32 %v13734_v32, %v13543_v12  ;;  %19570 = vmatprep.mubr.msk.f32.mxu0 %vm20383_vm1, %v24667_v30 }
 0xa23   : > { %v13878_v10 = vmul.f32 %v24030_v25, %v13542_v60  ;;  %v19433_v22 = vpop.f32.mrb[196].mxu1 }
 0xa24   : > { %13927 = vst.msk [vmem:[#allocation5 + $0xb8] sm:$0xff] %vm850_vm0, %v13879_v8  ;;  %v13545_v4 = vadd.f32 %v19433_v22, %v24037_v48  ;;  %v13346_v27 = vpop.f32.mrb[197].mxu1  ;;  %v13973_v38 = vld [vmem:[#allocation5 + $0x91] ss:$2 sm:$0xff] }
 0xa25   : > { %13926 = vst.msk [vmem:[#allocation5 + $0xb0] sm:$0xff] %vm850_vm0, %v13878_v10  ;;  %v13544_v19 = vadd.f32 %v24037_v48, %v13346_v27  ;;  %19479 = vmatmul.mubr.msk.f32.gmra.mrb[226].mxu1 %vm850_vm0, %v13973_v38  ;;  %v13829_v38 = vpop.permute.xlu0 %13828 }
 0xa26   : > { %v13881_v45 = vmul.f32 %v23996_v29, %v13545_v4  ;;  %19481 = vmatprep.mubr.msk.f32.mxu1 %vm20383_vm1, %v24667_v30  ;;  %v13834_v4 = vpop.permute.xlu1 %13833 }
 0xa27   : > { %v13880_v25 = vmul.f32 %v23998_v44, %v13544_v19  ;;  %v19436_v15 = vpop.f32.mrb[198].mxu1 }
 0xa28   : > { %13929 = vst.msk [vmem:[#allocation5 + $0xc8] sm:$0xff] %vm850_vm0, %v13881_v45  ;;  %v13547_v46 = vadd.f32 %v19436_v15, %v24037_v48  ;;  %v13356_v42 = vpop.f32.mrb[199].mxu1 }
 0xa29   : > { %13928 = vst.msk [vmem:[#allocation5 + $0xc0] sm:$0xff] %vm850_vm0, %v13880_v25  ;;  %v13546_v53 = vadd.f32 %v24037_v48, %v13356_v42 }
 0xa2a   : > { %v13883_v41 = vmul.f32 %v24028_v13, %v13547_v46 }
 0xa2b   : > { %v13882_v40 = vmul.f32 %v24016_v9, %v13546_v53  ;;  %v19439_v29 = vpop.f32.mrb[200].mxu1  ;;  %v13844_v53 = vpop.permute.xlu1 %13843 }
 0xa2c   : > { %13931 = vst.msk [vmem:[#allocation5 + $0xd8] sm:$0xff] %vm850_vm0, %v13883_v41  ;;  %v13549_v2 = vadd.f32 %v19439_v29, %v24037_v48  ;;  %v13366_v44 = vpop.f32.mrb[201].mxu1  ;;  %v14519_v35 = vld [vmem:[#allocation5 + $0xa9] ss:$2 sm:$0xff]  ;;  %v13839_v29 = vpop.permute.xlu0 %13838 }
 0xa2d   : > { %13930 = vst.msk [vmem:[#allocation5 + $0xd0] sm:$0xff] %vm850_vm0, %v13882_v40  ;;  %v13548_v6 = vadd.f32 %v24037_v48, %v13366_v44  ;;  %19571 = vmatmul.mubr.msk.f32.gmra.mrb[162].mxu0 %vm850_vm0, %v14519_v35  ;;  %v16674_v40 = vld [vmem:[%s24477_s11 + $0x10] sm:$0xff] }
 0xa2e   : > { %v13885_v50 = vmul.f32 %v13764_v33, %v13549_v2  ;;  %19573 = vmatprep.mubr.msk.f32.mxu0 %vm20383_vm1, %v24667_v30  ;;  %v13952_v44 = vld [vmem:[#allocation5] ss:$2 sm:$0xff] }
 0xa2f   : > { %v13884_v9 = vmul.f32 %v24041_v26, %v13548_v6  ;;  %v19442_v13 = vpop.f32.mrb[202].mxu1 }
 0xa30   : > { %13933 = vst.msk [vmem:[#allocation5 + $0xe8] sm:$0xff] %vm850_vm0, %v13885_v50  ;;  %v13551_v16 = vadd.f32 %v19442_v13, %v24037_v48  ;;  %v13376_v57 = vpop.f32.mrb[203].mxu1  ;;  %v13975_v20 = vld [vmem:[#allocation5 + $0xc1] ss:$2 sm:$0xff] }
 0xa31   : > { %13932 = vst.msk [vmem:[#allocation5 + $0xe0] sm:$0xff] %vm850_vm0, %v13884_v9  ;;  %v13550_v47 = vadd.f32 %v24037_v48, %v13376_v57  ;;  %19482 = vmatmul.mubr.msk.f32.gmra.mrb[228].mxu1 %vm850_vm0, %v13975_v20  ;;  %v13954_v9 = vld [vmem:[#allocation5 + $0x30] ss:$2 sm:$0xff]  ;;  %v13956_v57 = vld [vmem:[#allocation5 + $0x60] ss:$2 sm:$0xff] }
 0xa32   : > { %v13887_v43 = vmul.f32 %v24000_v18, %v13551_v16  ;;  %19484 = vmatprep.mubr.msk.f32.mxu1 %vm20383_vm1, %v24667_v30  ;;  %v13854_v16 = vpop.permute.xlu1 %13853  ;;  %v14801_v20 = vld [vmem:[#allocation5 + $0x30] ss:$2 sm:$0xff] }
 0xa33   : > { %v13886_v26 = vmul.f32 %v24002_v49, %v13550_v47  ;;  %v19445_v59 = vpop.f32.mrb[204].mxu1  ;;  %v16722_v47 = vld [vmem:[%s24477_s11 + $0x40] sm:$0xff] }
 0xa34   : > { %13935 = vst.msk [vmem:[#allocation5 + $0xf8] sm:$0xff] %vm850_vm0, %v13887_v43  ;;  %v13553_v56 = vadd.f32 %v19445_v59, %v24037_v48  ;;  %v13386_v36 = vpop.f32.mrb[205].mxu1  ;;  %v13958_v43 = vld [vmem:[#allocation5 + $0x90] ss:$2 sm:$0xff]  ;;  %v13960_v59 = vld [vmem:[#allocation5 + $0xc0] ss:$2 sm:$0xff] }
 0xa35   : > { %13934 = vst.msk [vmem:[#allocation5 + $0xf0] sm:$0xff] %vm850_vm0, %v13886_v26  ;;  %v13552_v24 = vadd.f32 %v24037_v48, %v13386_v36  ;;  %v14803_v26 = vld [vmem:[#allocation5 + $0x60] ss:$2 sm:$0xff] }
 0xa36   : > { %v13889_v28 = vmul.f32 %v24032_v63, %v13553_v56  ;;  %v14805_v56 = vld [vmem:[#allocation5 + $0x90] ss:$2 sm:$0xff] }
 0xa37   : > { %v13888_v34 = vmul.f32 %v24014_v51, %v13552_v24  ;;  %v19448_v18 = vpop.f32.mrb[206].mxu1  ;;  %v14807_v24 = vld [vmem:[#allocation5 + $0xc0] ss:$2 sm:$0xff] }
 0xa38   : > { %13937 = vst.msk [vmem:[#allocation5 + $0x108] sm:$0xff] %vm850_vm0, %v13889_v28  ;;  %v13555_v21 = vadd.f32 %v19448_v18, %v24037_v48  ;;  %v13396_v49 = vpop.f32.mrb[207].mxu1  ;;  %v14521_v37 = vld [vmem:[#allocation5 + $0xd9] ss:$2 sm:$0xff]  ;;  %v16682_v18 = vld [vmem:[%s24477_s11 + $0x18] sm:$0xff] }
 0xa39   : > { %13936 = vst.msk [vmem:[#allocation5 + $0x100] sm:$0xff] %vm850_vm0, %v13888_v34  ;;  %v13554_v3 = vadd.f32 %v24037_v48, %v13396_v49  ;;  %19574 = vmatmul.mubr.msk.f32.gmra.mrb[164].mxu0 %vm850_vm0, %v14521_v37  ;;  %v14227_v37 = vld [vmem:[#allocation5 + $0x32] ss:$2 sm:$0xff] }
 0xa3a   : > { %v13891_v0 = vmul.f32 %v13794_v1, %v13555_v21  ;;  %19576 = vmatprep.mubr.msk.f32.mxu0 %vm20383_vm1, %v24667_v30  ;;  %v14225_v21 = vld [vmem:[#allocation5 + $0x2] ss:$2 sm:$0xff] }
 0xa3b   : > { %v13890_v51 = vmul.f32 %v24051_v14, %v13554_v3  ;;  %v19451_v63 = vpop.f32.mrb[208].mxu1  ;;  %v14229_v3 = vld [vmem:[#allocation5 + $0x62] ss:$2 sm:$0xff] }
 0xa3c   : > { %13939 = vst.msk [vmem:[#allocation5 + $0x118] sm:$0xff] %vm850_vm0, %v13891_v0  ;;  %v13557_v7 = vadd.f32 %v19451_v63, %v24037_v48  ;;  %v13406_v31 = vpop.f32.mrb[209].mxu1  ;;  %v13977_v61 = vld [vmem:[#allocation5 + $0xf1] ss:$2 sm:$0xff]  ;;  %v13962_v36 = vld [vmem:[#allocation5 + $0xf0] ss:$2 sm:$0xff] }
 0xa3d   : > { %13938 = vst.msk [vmem:[#allocation5 + $0x110] sm:$0xff] %vm850_vm0, %v13890_v51  ;;  %v13556_v62 = vadd.f32 %v24037_v48, %v13406_v31  ;;  %19485 = vmatmul.mubr.msk.f32.gmra.mrb[230].mxu1 %vm850_vm0, %v13977_v61  ;;  %v14809_v34 = vld [vmem:[#allocation5 + $0xf0] ss:$2 sm:$0xff]  ;;  %v14953_v53 = vld [vmem:[#allocation5 + $0xf1] ss:$2 sm:$0xff] }
 0xa3e   : > { %v13893_v5 = vmul.f32 %v24004_v52, %v13557_v7  ;;  %19487 = vmatprep.mubr.msk.f32.mxu1 %vm20383_vm1, %v24667_v30  ;;  %v15089_v0 = vld [vmem:[#allocation5 + $0x32] ss:$2 sm:$0xff]  ;;  %v15091_v63 = vld [vmem:[#allocation5 + $0x62] ss:$2 sm:$0xff] }
 0xa3f   : > { %v13892_v14 = vmul.f32 %v24006_v55, %v13556_v62  ;;  %v19454_v12 = vpop.f32.mrb[210].mxu1  ;;  %v14231_v51 = vld [vmem:[#allocation5 + $0x92] ss:$2 sm:$0xff]  ;;  %v14233_v7 = vld [vmem:[#allocation5 + $0xc2] ss:$2 sm:$0xff] }
 0xa40   : > { %13941 = vst.msk [vmem:[#allocation5 + $0x128] sm:$0xff] %vm850_vm0, %v13893_v5  ;;  %v13559_v11 = vadd.f32 %v19454_v12, %v24037_v48  ;;  %v13416_v17 = vpop.f32.mrb[211].mxu1  ;;  %v15093_v31 = vld [vmem:[#allocation5 + $0x92] ss:$2 sm:$0xff]  ;;  %v15095_v62 = vld [vmem:[#allocation5 + $0xc2] ss:$2 sm:$0xff] }
 0xa41   : > { %13940 = vst.msk [vmem:[#allocation5 + $0x120] sm:$0xff] %vm850_vm0, %v13892_v14  ;;  %v13558_v32 = vadd.f32 %v24037_v48, %v13416_v17  ;;  %v14235_v61 = vld [vmem:[#allocation5 + $0xf2] ss:$2 sm:$0xff] }
 0xa42   : > { %v13895_v60 = vmul.f32 %v24043_v54, %v13559_v11  ;;  %v16698_v14 = vld [vmem:[%s24477_s11 + $0x28] sm:$0xff]  ;;  %v14371_v17 = vld [vmem:[#allocation5 + $0x48] ss:$2 sm:$0xff] }
 0xa43   : > { %v13894_v52 = vmul.f32 %v24018_v58, %v13558_v32  ;;  %v19457_v8 = vpop.f32.mrb[212].mxu1  ;;  %v14369_v12 = vld [vmem:[#allocation5 + $0x18] ss:$2 sm:$0xff] }
 0xa44   : > { %13943 = vst.msk [vmem:[#allocation5 + $0x138] sm:$0xff] %vm850_vm0, %v13895_v60  ;;  %v13561_v10 = vadd.f32 %v19457_v8, %v24037_v48  ;;  %v13426_v55 = vpop.f32.mrb[213].mxu1  ;;  %v14523_v22 = vld [vmem:[#allocation5 + $0x109] ss:$2 sm:$0xff]  ;;  %v14373_v60 = vld [vmem:[#allocation5 + $0x78] ss:$2 sm:$0xff] }
 0xa45   : > { %13942 = vst.msk [vmem:[#allocation5 + $0x130] sm:$0xff] %vm850_vm0, %v13894_v52  ;;  %v13560_v27 = vadd.f32 %v24037_v48, %v13426_v55  ;;  %19577 = vmatmul.mubr.msk.f32.gmra.mrb[166].mxu0 %vm850_vm0, %v14523_v22  ;;  %v14375_v52 = vld [vmem:[#allocation5 + $0xa8] ss:$2 sm:$0xff]  ;;  %v14377_v8 = vld [vmem:[#allocation5 + $0xd8] ss:$2 sm:$0xff] }
 0xa46   : > { %v13897_v19 = vmul.f32 %v13824_v39, %v13561_v10  ;;  %19579 = vmatprep.mubr.msk.f32.mxu0 %vm20383_vm1, %v24667_v30  ;;  %v15097_v39 = vld [vmem:[#allocation5 + $0xf2] ss:$2 sm:$0xff]  ;;  %v16714_v22 = vld [vmem:[%s24477_s11 + $0x38] sm:$0xff] }
 0xa47   : > { %v13896_v58 = vmul.f32 %v24066_v23, %v13560_v27  ;;  %v19460_v54 = vpop.f32.mrb[214].mxu1  ;;  %v14379_v10 = vld [vmem:[#allocation5 + $0x108] ss:$2 sm:$0xff] }
 0xa48   : > { %13945 = vst.msk [vmem:[#allocation5 + $0x148] sm:$0xff] %vm850_vm0, %v13897_v19  ;;  %v13563_v45 = vadd.f32 %v19460_v54, %v24037_v48  ;;  %v13436_v25 = vpop.f32.mrb[215].mxu1  ;;  %v13979_v15 = vld [vmem:[#allocation5 + $0x121] ss:$2 sm:$0xff]  ;;  %v13964_v28 = vld [vmem:[#allocation5 + $0x120] ss:$2 sm:$0xff] }
 0xa49   : > { %13944 = vst.msk [vmem:[#allocation5 + $0x140] sm:$0xff] %vm850_vm0, %v13896_v58  ;;  %v13562_v46 = vadd.f32 %v24037_v48, %v13436_v25  ;;  %19488 = vmatmul.mubr.msk.f32.gmra.mrb[232].mxu1 %vm850_vm0, %v13979_v15  ;;  %v14811_v49 = vld [vmem:[#allocation5 + $0x120] ss:$2 sm:$0xff]  ;;  %v14945_v25 = vld [vmem:[#allocation5 + $0x31] ss:$2 sm:$0xff] }
 0xa4a   : > { %v13899_v42 = vmul.f32 %v13834_v4, %v13563_v45  ;;  %19492 = vmatprep.mubr.msk.f32.mxu1 %vm20383_vm1, %v24667_v30  ;;  %v14657_v4 = vld [vmem:[#allocation5 + $0x1a] ss:$2 sm:$0xff]  ;;  %v14659_v27 = vld [vmem:[#allocation5 + $0x4a] ss:$2 sm:$0xff]  ;;  %v14947_v15 = vld [vmem:[#allocation5 + $0x61] ss:$2 sm:$0xff] }
 0xa4b   : > { %v13898_v41 = vmul.f32 %v13829_v38, %v13562_v46  ;;  %v19463_v23 = vpop.f32.mrb[216].mxu1  ;;  %v14661_v38 = vld [vmem:[#allocation5 + $0x7a] ss:$2 sm:$0xff]  ;;  %v14663_v19 = vld [vmem:[#allocation5 + $0xaa] ss:$2 sm:$0xff] }
 0xa4c   : > { %13947 = vst.msk [vmem:[#allocation5 + $0x158] sm:$0xff] %vm850_vm0, %v13899_v42  ;;  %v13446_v2 = vpop.f32.mrb[217].mxu1  ;;  %v14237_v5 = vld [vmem:[#allocation5 + $0x122] ss:$2 sm:$0xff]  ;;  %v14949_v46 = vld [vmem:[#allocation5 + $0x91] ss:$2 sm:$0xff] }
 0xa4d   : > { %13946 = vst.msk [vmem:[#allocation5 + $0x150] sm:$0xff] %vm850_vm0, %v13898_v41  ;;  %v13564_v35 = vadd.f32 %v24037_v48, %v13446_v2  ;;  %19493 = vmatmul.mubr.msk.f32.vlgmr.msra.gmra.mrb[234].mxu1 %vm850_vm0, %v13952_v44  ;;  %v13849_v48 = vpop.permute.xlu0 %13848  ;;  %v15099_v11 = vld [vmem:[#allocation5 + $0x122] ss:$2 sm:$0xff]  ;;  %v14951_v42 = vld [vmem:[#allocation5 + $0xc1] ss:$2 sm:$0xff] }
 0xa4e   : > { %19514 = vmatpush3.msra.mxu1 %v16674_v40  ;;  %19495 = vmatprep.mubr.msk.f32.mxu1 %vm20383_vm1, %v24667_v30  ;;  %v14665_v58 = vld [vmem:[#allocation5 + $0xda] ss:$2 sm:$0xff]  ;;  %v14667_v54 = vld [vmem:[#allocation5 + $0x10a] ss:$2 sm:$0xff]  ;;  %v14955_v41 = vld [vmem:[#allocation5 + $0x121] ss:$2 sm:$0xff] }
 0xa4f   : > { %v13900_v33 = vmul.f32 %v13839_v29, %v13564_v35  ;;  %v19466_v6 = vpop.f32.mrb[218].mxu1  ;;  %19536 = vmatprep.subr.mxu1 %v24667_v30 }
 0xa50   : > { %v13456_v50 = vpop.f32.mrb[219].mxu1  ;;  %v14525_v13 = vld [vmem:[#allocation5 + $0x139] ss:$2 sm:$0xff]  ;;  %v14381_v55 = vld [vmem:[#allocation5 + $0x138] ss:$2 sm:$0xff] }
 0xa51   : > { %13948 = vst.msk [vmem:[#allocation5 + $0x160] sm:$0xff] %vm850_vm0, %v13900_v33  ;;  %19496 = vmatmul.mubr.msk.f32.gmra.mrb[236].mxu1 %vm850_vm0, %v13954_v9  ;;  %19580 = vmatmul.mubr.msk.f32.gmra.mrb[168].mxu0 %vm850_vm0, %v14525_v13  ;;  %v14669_v45 = vld [vmem:[#allocation5 + $0x13a] ss:$2 sm:$0xff] }
 0xa52   : > { %19498 = vmatprep.mubr.msk.f32.mxu1 %vm20383_vm1, %v24667_v30  ;;  %19607 = vmatprep.mubr.msk.f32.mxu0 %vm20383_vm1, %v24667_v30 }
 0xa54   : > { %v14813_v1 = vld [vmem:[#allocation5 + $0x150] ss:$2 sm:$0xff]  ;;  %v14957_v40 = vld [vmem:[#allocation5 + $0x151] ss:$2 sm:$0xff] }
 0xa55   : > { %19499 = vmatmul.mubr.msk.f32.gmra.mrb[238].mxu1 %vm850_vm0, %v13956_v57  ;;  %19608 = vmatmul.mubr.msk.f32.vlgmr.msra.gmra.mrb[170].mxu0 %vm850_vm0, %v14801_v20 }
 0xa56   : > { %19501 = vmatprep.mubr.msk.f32.mxu1 %vm20383_vm1, %v24667_v30  ;;  %19610 = vmatprep.mubr.msk.f32.mxu0 %vm20383_vm1, %v24667_v30 }
 0xa57   : > { %19652 = vmatpush3.msra.mxu0 %v16722_v47 }
 0xa58   : > { %v15101_v32 = vld [vmem:[#allocation5 + $0x152] ss:$2 sm:$0xff] }
 0xa59   : > { %19502 = vmatmul.mubr.msk.f32.gmra.mrb[240].mxu1 %vm850_vm0, %v13958_v43  ;;  %19611 = vmatmul.mubr.msk.f32.gmra.mrb[172].mxu0 %vm850_vm0, %v14803_v26 }
 0xa5a   : > { %19504 = vmatprep.mubr.msk.f32.mxu1 %vm20383_vm1, %v24667_v30  ;;  %19613 = vmatprep.mubr.msk.f32.mxu0 %vm20383_vm1, %v24667_v30 }
 0xa5d   : > { %19505 = vmatmul.mubr.msk.f32.gmra.mrb[242].mxu1 %vm850_vm0, %v13960_v59  ;;  %19614 = vmatmul.mubr.msk.f32.gmra.mrb[174].mxu0 %vm850_vm0, %v14805_v56 }
 0xa5e   : > { %19507 = vmatprep.mubr.msk.f32.mxu1 %vm20383_vm1, %v24667_v30  ;;  %19616 = vmatprep.mubr.msk.f32.mxu0 %vm20383_vm1, %v24667_v30 }
 0xa61   : > { %19508 = vmatmul.mubr.msk.f32.gmra.mrb[244].mxu1 %vm850_vm0, %v13962_v36  ;;  %19617 = vmatmul.mubr.msk.f32.gmra.mrb[176].mxu0 %vm850_vm0, %v14807_v24 }
 0xa62   : > { %19510 = vmatprep.mubr.msk.f32.mxu1 %vm20383_vm1, %v24667_v30  ;;  %19619 = vmatprep.mubr.msk.f32.mxu0 %vm20383_vm1, %v24667_v30 }
 0xa65   : > { %19511 = vmatmul.mubr.msk.f32.gmra.mrb[246].mxu1 %vm850_vm0, %v13964_v28  ;;  %19620 = vmatmul.mubr.msk.f32.gmra.mrb[178].mxu0 %vm850_vm0, %v14809_v34 }
 0xa66   : > { %19515 = vmatprep.mubr.msk.f32.mxu1 %vm20383_vm1, %v24667_v30  ;;  %19622 = vmatprep.mubr.msk.f32.mxu0 %vm20383_vm1, %v24667_v30 }
 0xa69   : > { %19516 = vmatmul.mubr.msk.f32.vlgmr.msra.gmra.mrb[248].mxu1 %vm850_vm0, %v14225_v21  ;;  %19623 = vmatmul.mubr.msk.f32.gmra.mrb[180].mxu0 %vm850_vm0, %v14811_v49 }
 0xa6a   : > { %19537 = vmatpush3.msra.mxu1 %v16682_v18  ;;  %19518 = vmatprep.mubr.msk.f32.mxu1 %vm20383_vm1, %v24667_v30 }
 0xa6b   : > { %19625 = vmatprep.mubr.msk.f32.mxu0 %vm20383_vm1, %v24667_v30  ;;  %19582 = vmatprep.subr.mxu1 %v24667_v30 }
 0xa6d   : > { %19519 = vmatmul.mubr.msk.f32.gmra.mrb[250].mxu1 %vm850_vm0, %v14227_v37  ;;  %19626 = vmatmul.mubr.msk.f32.gmra.mrb[182].mxu0 %vm850_vm0, %v14813_v1 }
 0xa6e   : > { %19521 = vmatprep.mubr.msk.f32.mxu1 %vm20383_vm1, %v24667_v30  ;;  %19653 = vmatprep.mubr.msk.f32.mxu0 %vm20383_vm1, %v24667_v30 }
 0xa71   : > { %19522 = vmatmul.mubr.msk.f32.gmra.mrb[252].mxu1 %vm850_vm0, %v14229_v3  ;;  %19654 = vmatmul.mubr.msk.f32.vlgmr.msra.gmra.mrb[184].mxu0 %vm850_vm0, %v15089_v0 }
 0xa72   : > { %19524 = vmatprep.mubr.msk.f32.mxu1 %vm20383_vm1, %v24667_v30  ;;  %19656 = vmatprep.mubr.msk.f32.mxu0 %vm20383_vm1, %v24667_v30 }
 0xa75   : > { %19525 = vmatmul.mubr.msk.f32.gmra.mrb[254].mxu1 %vm850_vm0, %v14231_v51  ;;  %19657 = vmatmul.mubr.msk.f32.gmra.mrb[186].mxu0 %vm850_vm0, %v15091_v63 }
 0xa76   : > { %19527 = vmatprep.mubr.msk.f32.mxu1 %vm20383_vm1, %v24667_v30  ;;  %19659 = vmatprep.mubr.msk.f32.mxu0 %vm20383_vm1, %v24667_v30 }
 0xa79   : > { %19528 = vmatmul.mubr.msk.f32.gmra.mrb[0].mxu1 %vm850_vm0, %v14233_v7  ;;  %19660 = vmatmul.mubr.msk.f32.gmra.mrb[188].mxu0 %vm850_vm0, %v15093_v31 }
 0xa7a   : > { %19530 = vmatprep.mubr.msk.f32.mxu1 %vm20383_vm1, %v24667_v30  ;;  %19662 = vmatprep.mubr.msk.f32.mxu0 %vm20383_vm1, %v24667_v30 }
 0xa7d   : > { %19531 = vmatmul.mubr.msk.f32.gmra.mrb[2].mxu1 %vm850_vm0, %v14235_v61  ;;  %19663 = vmatmul.mubr.msk.f32.gmra.mrb[190].mxu0 %vm850_vm0, %v15095_v62 }
 0xa7e   : > { %19533 = vmatprep.mubr.msk.f32.mxu1 %vm20383_vm1, %v24667_v30  ;;  %19665 = vmatprep.mubr.msk.f32.mxu0 %vm20383_vm1, %v24667_v30 }
 0xa81   : > { %19534 = vmatmul.mubr.msk.f32.gmra.mrb[4].mxu1 %vm850_vm0, %v14237_v5  ;;  %19666 = vmatmul.mubr.msk.f32.gmra.mrb[192].mxu0 %vm850_vm0, %v15097_v39 }
 0xa82   : > { %19538 = vmatprep.mubr.msk.f32.mxu1 %vm20383_vm1, %v24667_v30  ;;  %19668 = vmatprep.mubr.msk.f32.mxu0 %vm20383_vm1, %v24667_v30 }
 0xa85   : > { %19539 = vmatmul.mubr.msk.f32.vlgmr.msra.gmra.mrb[6].mxu1 %vm850_vm0, %v14369_v12  ;;  %19669 = vmatmul.mubr.msk.f32.gmra.mrb[194].mxu0 %vm850_vm0, %v15099_v11 }
 0xa86   : > { %19583 = vmatpush3.msra.mxu1 %v16698_v14  ;;  %19541 = vmatprep.mubr.msk.f32.mxu1 %vm20383_vm1, %v24667_v30 }
 0xa87   : > { %19671 = vmatprep.mubr.msk.f32.mxu0 %vm20383_vm1, %v24667_v30  ;;  %19628 = vmatprep.subr.mxu1 %v24667_v30 }
 0xa89   : > { %19542 = vmatmul.mubr.msk.f32.gmra.mrb[8].mxu1 %vm850_vm0, %v14371_v17  ;;  %19672 = vmatmul.mubr.msk.f32.gmra.mrb[196].mxu0 %vm850_vm0, %v15101_v32 }
 0xa8a   : > { %19544 = vmatprep.mubr.msk.f32.mxu1 %vm20383_vm1, %v24667_v30 }
 0xa8d   : > { %19545 = vmatmul.mubr.msk.f32.gmra.mrb[10].mxu1 %vm850_vm0, %v14373_v60 }
 0xa8e   : > { %19547 = vmatprep.mubr.msk.f32.mxu1 %vm20383_vm1, %v24667_v30 }
 0xa91   : > { %19548 = vmatmul.mubr.msk.f32.gmra.mrb[12].mxu1 %vm850_vm0, %v14375_v52 }
 0xa92   : > { %19550 = vmatprep.mubr.msk.f32.mxu1 %vm20383_vm1, %v24667_v30 }
 0xa95   : > { %19551 = vmatmul.mubr.msk.f32.gmra.mrb[14].mxu1 %vm850_vm0, %v14377_v8 }
 0xa96   : > { %19553 = vmatprep.mubr.msk.f32.mxu1 %vm20383_vm1, %v24667_v30 }
 0xa99   : > { %19554 = vmatmul.mubr.msk.f32.gmra.mrb[16].mxu1 %vm850_vm0, %v14379_v10 }
 0xa9a   : > { %19556 = vmatprep.mubr.msk.f32.mxu1 %vm20383_vm1, %v24667_v30 }
 0xa9d   : > { %19557 = vmatmul.mubr.msk.f32.gmra.mrb[18].mxu1 %vm850_vm0, %v14381_v55 }
 0xa9e   : > { %19584 = vmatprep.mubr.msk.f32.mxu1 %vm20383_vm1, %v24667_v30 }
 0xaa1   : > { %19585 = vmatmul.mubr.msk.f32.vlgmr.msra.gmra.mrb[20].mxu1 %vm850_vm0, %v14657_v4 }
 0xaa2   : > { %19629 = vmatpush3.msra.mxu1 %v16714_v22  ;;  %19587 = vmatprep.mubr.msk.f32.mxu1 %vm20383_vm1, %v24667_v30 }
 0xaa5   : > { %19588 = vmatmul.mubr.msk.f32.gmra.mrb[22].mxu1 %vm850_vm0, %v14659_v27 }
 0xaa6   : > { %19590 = vmatprep.mubr.msk.f32.mxu1 %vm20383_vm1, %v24667_v30 }
 0xaa9   : > { %19591 = vmatmul.mubr.msk.f32.gmra.mrb[24].mxu1 %vm850_vm0, %v14661_v38 }
 0xaaa   : > { %19593 = vmatprep.mubr.msk.f32.mxu1 %vm20383_vm1, %v24667_v30 }
 0xaad   : > { %19594 = vmatmul.mubr.msk.f32.gmra.mrb[26].mxu1 %vm850_vm0, %v14663_v19 }
 0xaae   : > { %19596 = vmatprep.mubr.msk.f32.mxu1 %vm20383_vm1, %v24667_v30 }
 0xab1   : > { %19597 = vmatmul.mubr.msk.f32.gmra.mrb[28].mxu1 %vm850_vm0, %v14665_v58 }
 0xab2   : > { %19599 = vmatprep.mubr.msk.f32.mxu1 %vm20383_vm1, %v24667_v30 }
 0xab5   : > { %19600 = vmatmul.mubr.msk.f32.gmra.mrb[30].mxu1 %vm850_vm0, %v14667_v54 }
 0xab6   : > { %19602 = vmatprep.mubr.msk.f32.mxu1 %vm20383_vm1, %v24667_v30 }
 0xab9   : > { %19603 = vmatmul.mubr.msk.f32.gmra.mrb[32].mxu1 %vm850_vm0, %v14669_v45 }
 0xaba   : > { %19630 = vmatprep.mubr.msk.f32.mxu1 %vm20383_vm1, %v24667_v30 }
 0xabd   : > { %19631 = vmatmul.mubr.msk.f32.vlgmr.msra.gmra.mrb[34].mxu1 %vm850_vm0, %v14945_v25 }
 0xabe   : > { %19633 = vmatprep.mubr.msk.f32.mxu1 %vm20383_vm1, %v24667_v30 }
 0xac1   : > { %19634 = vmatmul.mubr.msk.f32.gmra.mrb[36].mxu1 %vm850_vm0, %v14947_v15 }
 0xac2   : > { %19636 = vmatprep.mubr.msk.f32.mxu1 %vm20383_vm1, %v24667_v30 }
 0xac5   : > { %19637 = vmatmul.mubr.msk.f32.gmra.mrb[38].mxu1 %vm850_vm0, %v14949_v46 }
 0xac6   : > { %19639 = vmatprep.mubr.msk.f32.mxu1 %vm20383_vm1, %v24667_v30 }
 0xac9   : > { %19640 = vmatmul.mubr.msk.f32.gmra.mrb[40].mxu1 %vm850_vm0, %v14951_v42 }
 0xaca   : > { %19642 = vmatprep.mubr.msk.f32.mxu1 %vm20383_vm1, %v24667_v30 }
 0xacd   : > { %19643 = vmatmul.mubr.msk.f32.gmra.mrb[42].mxu1 %vm850_vm0, %v14953_v53 }
 0xace   : > { %19645 = vmatprep.mubr.msk.f32.mxu1 %vm20383_vm1, %v24667_v30 }
 0xad1   : > { %19646 = vmatmul.mubr.msk.f32.gmra.mrb[44].mxu1 %vm850_vm0, %v14955_v41 }
 0xad2   : > { %19648 = vmatprep.mubr.msk.f32.mxu1 %vm20383_vm1, %v24667_v30 }
 0xad4   : > { %v14069_v23 = vpop.f32.mrb[220].mxu1 }
 0xad5   : > { %v19471_v29 = vpop.f32.mrb[221].mxu1  ;;  %19649 = vmatmul.mubr.msk.f32.gmra.mrb[46].mxu1 %vm850_vm0, %v14957_v40 }
 0xadc   : > { %v24377_v2 = vpop.f32.mrb[156].mxu0 }
 0xadd   : > { %v19563_v44 = vpop.f32.mrb[157].mxu0 }
 0xae0   : > { %v14074_v35 = vpop.f32.mrb[222].mxu1 }
 0xae1   : > { %v19474_v33 = vpop.f32.mrb[223].mxu1 }
 0xae8   : > { %v24379_v6 = vpop.f32.mrb[158].mxu0 }
 0xae9   : > { %v19566_v50 = vpop.f32.mrb[159].mxu0 }
 0xaec   : > { %v14079_v9 = vpop.f32.mrb[224].mxu1 }
 0xaed   : > { %v19477_v13 = vpop.f32.mrb[225].mxu1 }
 0xaf4   : > { %v24381_v16 = vpop.f32.mrb[160].mxu0 }
 0xaf5   : > { %v19569_v48 = vpop.f32.mrb[161].mxu0 }
 0xaf8   : > { %v14084_v57 = vpop.f32.mrb[226].mxu1 }
 0xaf9   : > { %v19480_v30 = vpop.f32.mrb[227].mxu1 }
 0xb00   : > { %v24383_v20 = vpop.f32.mrb[162].mxu0 }
 0xb01   : > { %v19572_v47 = vpop.f32.mrb[163].mxu0 }
 0xb04   : > { %v14089_v43 = vpop.f32.mrb[228].mxu1 }
 0xb05   : > { %v19483_v26 = vpop.f32.mrb[229].mxu1 }
 0xb0c   : > { %v24385_v59 = vpop.f32.mrb[164].mxu0 }
 0xb0d   : > { %v19575_v56 = vpop.f32.mrb[165].mxu0 }
 0xb10   : > { %v14094_v36 = vpop.f32.mrb[230].mxu1 }
 0xb11   : > { %v19486_v24 = vpop.f32.mrb[231].mxu1 }
 0xb18   : > { %v24387_v28 = vpop.f32.mrb[166].mxu0 }
 0xb19   : > { %v19578_v34 = vpop.f32.mrb[167].mxu0 }
 0xb1c   : > { %v14099_v18 = vpop.f32.mrb[232].mxu1 }
 0xb1d   : > { %v19489_v21 = vpop.f32.mrb[233].mxu1 }
 0xb20   : > { %v14190_v49 = vpop.f32.mrb[234].mxu1 }
 0xb21   : > { %v14191_v37 = vadd.f32 %v14190_v49, %v14069_v23  ;;  %v19494_v1 = vpop.f32.mrb[235].mxu1 }
 0xb24   : > { %v14195_v3 = vpop.f32.mrb[236].mxu1  ;;  %v24389_v0 = vpop.f32.mrb[168].mxu0 }
 0xb25   : > { %v14196_v51 = vadd.f32 %v14195_v3, %v14074_v35  ;;  %v19497_v63 = vpop.f32.mrb[237].mxu1  ;;  %v19581_v7 = vpop.f32.mrb[169].mxu0 }
 0xb28   : > { %v14200_v31 = vpop.f32.mrb[238].mxu1  ;;  %v24391_v61 = vpop.f32.mrb[170].mxu0 }
 0xb29   : > { %v14201_v62 = vadd.f32 %v14200_v31, %v14079_v9  ;;  %v19500_v5 = vpop.f32.mrb[239].mxu1  ;;  %v19609_v39 = vpop.f32.mrb[171].mxu0 }
 0xb2c   : > { %v14205_v14 = vpop.f32.mrb[240].mxu1  ;;  %v24393_v12 = vpop.f32.mrb[172].mxu0 }
 0xb2d   : > { %v14206_v11 = vadd.f32 %v14205_v14, %v14084_v57  ;;  %v19503_v17 = vpop.f32.mrb[241].mxu1  ;;  %v19612_v32 = vpop.f32.mrb[173].mxu0 }
 0xb30   : > { %v14210_v60 = vpop.f32.mrb[242].mxu1  ;;  %v24395_v52 = vpop.f32.mrb[174].mxu0 }
 0xb31   : > { %v14211_v8 = vadd.f32 %v14210_v60, %v14089_v43  ;;  %v19506_v10 = vpop.f32.mrb[243].mxu1  ;;  %v19615_v55 = vpop.f32.mrb[175].mxu0 }
 0xb34   : > { %v14215_v22 = vpop.f32.mrb[244].mxu1  ;;  %v24397_v4 = vpop.f32.mrb[176].mxu0 }
 0xb35   : > { %v14216_v27 = vadd.f32 %v14215_v22, %v14094_v36  ;;  %v19509_v38 = vpop.f32.mrb[245].mxu1  ;;  %v19618_v19 = vpop.f32.mrb[177].mxu0 }
 0xb38   : > { %v14220_v58 = vpop.f32.mrb[246].mxu1  ;;  %v24399_v54 = vpop.f32.mrb[178].mxu0 }
 0xb39   : > { %v14221_v45 = vadd.f32 %v14220_v58, %v14099_v18  ;;  %v19512_v25 = vpop.f32.mrb[247].mxu1  ;;  %v19621_v15 = vpop.f32.mrb[179].mxu0 }
 0xb3c   : > { %v14327_v46 = vpop.f32.mrb[248].mxu1  ;;  %v24401_v42 = vpop.f32.mrb[180].mxu0 }
 0xb3d   : > { %v14361_v53 = vadd.f32 %v14327_v46, %v14191_v37  ;;  %v19517_v41 = vpop.f32.mrb[249].mxu1  ;;  %v19624_v23 = vpop.f32.mrb[181].mxu0 }
 0xb40   : > { %v14332_v40 = vpop.f32.mrb[250].mxu1  ;;  %v24403_v29 = vpop.f32.mrb[182].mxu0 }
 0xb41   : > { %v14362_v44 = vadd.f32 %v14332_v40, %v14196_v51  ;;  %v19520_v35 = vpop.f32.mrb[251].mxu1  ;;  %v19627_v33 = vpop.f32.mrb[183].mxu0 }
 0xb44   : > { %v14337_v50 = vpop.f32.mrb[252].mxu1  ;;  %v24405_v9 = vpop.f32.mrb[184].mxu0 }
 0xb45   : > { %v14363_v13 = vadd.f32 %v14337_v50, %v14201_v62  ;;  %v19523_v48 = vpop.f32.mrb[253].mxu1  ;;  %v19655_v57 = vpop.f32.mrb[185].mxu0 }
 0xb48   : > { %v14342_v30 = vpop.f32.mrb[254].mxu1  ;;  %v24407_v47 = vpop.f32.mrb[186].mxu0 }
 0xb49   : > { %v14364_v43 = vadd.f32 %v14342_v30, %v14206_v11  ;;  %v19526_v26 = vpop.f32.mrb[255].mxu1  ;;  %v19658_v56 = vpop.f32.mrb[187].mxu0 }
 0xb4c   : > { %v14347_v36 = vpop.f32.mrb[0].mxu1  ;;  %v24409_v24 = vpop.f32.mrb[188].mxu0 }
 0xb4d   : > { %v14365_v34 = vadd.f32 %v14347_v36, %v14211_v8  ;;  %v19529_v18 = vpop.f32.mrb[1].mxu1  ;;  %v19661_v21 = vpop.f32.mrb[189].mxu0 }
 0xb50   : > { %v14352_v49 = vpop.f32.mrb[2].mxu1  ;;  %v24411_v37 = vpop.f32.mrb[190].mxu0 }
 0xb51   : > { %v14366_v1 = vadd.f32 %v14352_v49, %v14216_v27  ;;  %v19532_v3 = vpop.f32.mrb[3].mxu1  ;;  %v19664_v51 = vpop.f32.mrb[191].mxu0 }
 0xb54   : > { %v14357_v63 = vpop.f32.mrb[4].mxu1  ;;  %v24413_v7 = vpop.f32.mrb[192].mxu0 }
 0xb55   : > { %v14367_v31 = vadd.f32 %v14357_v63, %v14221_v45  ;;  %v19535_v62 = vpop.f32.mrb[5].mxu1  ;;  %v19667_v5 = vpop.f32.mrb[193].mxu0 }
 0xb58   : > { %v14471_v39 = vpop.f32.mrb[6].mxu1  ;;  %v24415_v14 = vpop.f32.mrb[194].mxu0 }
 0xb59   : > { %v14505_v11 = vadd.f32 %v14471_v39, %v14361_v53  ;;  %v19540_v17 = vpop.f32.mrb[7].mxu1  ;;  %v19670_v32 = vpop.f32.mrb[195].mxu0 }
 0xb5b   : > { %v14649_v60 = vadd.f32 %v24377_v2, %v14505_v11 }
 0xb5c   : > { %v14476_v8 = vpop.f32.mrb[8].mxu1  ;;  %v24418_v10 = vpop.f32.mrb[196].mxu0 }
 0xb5d   : > { %v14506_v55 = vadd.f32 %v14476_v8, %v14362_v44  ;;  %v19543_v22 = vpop.f32.mrb[9].mxu1  ;;  %v19673_v27 = vpop.f32.mrb[197].mxu0 }
 0xb5f   : > { %v14650_v38 = vadd.f32 %v24379_v6, %v14506_v55 }
 0xb60   : > { %v14481_v19 = vpop.f32.mrb[10].mxu1 }
 0xb61   : > { %v14507_v58 = vadd.f32 %v14481_v19, %v14363_v13  ;;  %v19546_v45 = vpop.f32.mrb[11].mxu1 }
 0xb63   : > { %v14651_v25 = vadd.f32 %v24381_v16, %v14507_v58 }
 0xb64   : > { %v14486_v15 = vpop.f32.mrb[12].mxu1 }
 0xb65   : > { %v14508_v46 = vadd.f32 %v14486_v15, %v14364_v43  ;;  %v19549_v53 = vpop.f32.mrb[13].mxu1 }
 0xb67   : > { %v14652_v41 = vadd.f32 %v24383_v20, %v14508_v46 }
 0xb68   : > { %v14491_v23 = vpop.f32.mrb[14].mxu1 }
 0xb69   : > { %v14509_v2 = vadd.f32 %v14491_v23, %v14365_v34  ;;  %v19552_v40 = vpop.f32.mrb[15].mxu1 }
 0xb6b   : > { %v14653_v35 = vadd.f32 %v24385_v59, %v14509_v2 }
 0xb6c   : > { %v14496_v44 = vpop.f32.mrb[16].mxu1 }
 0xb6d   : > { %v14510_v33 = vadd.f32 %v14496_v44, %v14366_v1  ;;  %v19555_v50 = vpop.f32.mrb[17].mxu1 }
 0xb6f   : > { %v14654_v6 = vadd.f32 %v24387_v28, %v14510_v33 }
 0xb70   : > { %v14501_v48 = vpop.f32.mrb[18].mxu1 }
 0xb71   : > { %v14511_v13 = vadd.f32 %v14501_v48, %v14367_v31  ;;  %v19558_v57 = vpop.f32.mrb[19].mxu1 }
 0xb73   : > { %v14655_v16 = vadd.f32 %v24389_v0, %v14511_v13 }
 0xb74   : > { %v14759_v30 = vpop.f32.mrb[20].mxu1 }
 0xb75   : > { %v14793_v43 = vadd.f32 %v14759_v30, %v14649_v60  ;;  %v19586_v26 = vpop.f32.mrb[21].mxu1 }
 0xb77   : > { %v14937_v20 = vadd.f32 %v24391_v61, %v14793_v43 }
 0xb78   : > { %v14764_v56 = vpop.f32.mrb[22].mxu1 }
 0xb79   : > { %v14794_v36 = vadd.f32 %v14764_v56, %v14650_v38  ;;  %v19589_v34 = vpop.f32.mrb[23].mxu1 }
 0xb7b   : > { %v14938_v59 = vadd.f32 %v24393_v12, %v14794_v36 }
 0xb7c   : > { %v14769_v18 = vpop.f32.mrb[24].mxu1 }
 0xb7d   : > { %v14795_v21 = vadd.f32 %v14769_v18, %v14651_v25  ;;  %v19592_v49 = vpop.f32.mrb[25].mxu1 }
 0xb7f   : > { %v14939_v28 = vadd.f32 %v24395_v52, %v14795_v21 }
 0xb80   : > { %v14774_v1 = vpop.f32.mrb[26].mxu1 }
 0xb81   : > { %v14796_v3 = vadd.f32 %v14774_v1, %v14652_v41  ;;  %v19595_v51 = vpop.f32.mrb[27].mxu1 }
 0xb83   : > { %v14940_v0 = vadd.f32 %v24397_v4, %v14796_v3  ;;  %v16730_v4 = vld [vmem:[%s24478_s12] ss:$0 sm:$0xff] }
 0xb84   : > { %v14779_v63 = vpop.f32.mrb[28].mxu1 }
 0xb85   : > { %v14797_v31 = vadd.f32 %v14779_v63, %v14653_v35  ;;  %v19598_v62 = vpop.f32.mrb[29].mxu1 }
 0xb87   : > { %v14941_v61 = vadd.f32 %v24399_v54, %v14797_v31 }
 0xb88   : > { %v14784_v5 = vpop.f32.mrb[30].mxu1 }
 0xb89   : > { %v14798_v39 = vadd.f32 %v14784_v5, %v14654_v6  ;;  %v19601_v11 = vpop.f32.mrb[31].mxu1 }
 0xb8b   : > { %v14942_v12 = vadd.f32 %v24401_v42, %v14798_v39 }
 0xb8c   : > { %v14789_v17 = vpop.f32.mrb[32].mxu1 }
 0xb8d   : > { %v14799_v32 = vadd.f32 %v14789_v17, %v14655_v16  ;;  %v19604_v60 = vpop.f32.mrb[33].mxu1 }
 0xb8f   : > { %v14943_v52 = vadd.f32 %v24403_v29, %v14799_v32 }
 0xb90   : > { %v15047_v8 = vpop.f32.mrb[34].mxu1 }
 0xb91   : > { %v15081_v55 = vadd.f32 %v15047_v8, %v14937_v20  ;;  %v19632_v22 = vpop.f32.mrb[35].mxu1 }
 0xb93   : > { %v15225_v27 = vadd.f32 %v24405_v9, %v15081_v55 }
 0xb94   : > { %v15052_v54 = vpop.f32.mrb[36].mxu1 }
 0xb95   : > { %v15239_v42 = vadd.f32 %v16730_v4, %v15225_v27  ;;  %v15082_v29 = vadd.f32 %v15052_v54, %v14938_v59  ;;  %v19635_v38 = vpop.f32.mrb[37].mxu1 }
 0xb97   : > { %15246 = vst.msk [vmem:[%s24441_s29] sm:$0xff] %vm850_vm0, %v15239_v42  ;;  %v15226_v19 = vadd.f32 %v24407_v47, %v15082_v29 }
 0xb98   : > { %v15057_v58 = vpop.f32.mrb[38].mxu1 }
 0xb99   : > { %v15240_v45 = vadd.f32 %v16730_v4, %v15226_v19  ;;  %v15083_v9 = vadd.f32 %v15057_v58, %v14939_v28  ;;  %v19638_v25 = vpop.f32.mrb[39].mxu1 }
 0xb9b   : > { %15247 = vst.msk [vmem:[%s24441_s29 + $0x8] sm:$0xff] %vm850_vm0, %v15240_v45  ;;  %v15227_v15 = vadd.f32 %v24409_v24, %v15083_v9 }
 0xb9c   : > { %v15062_v46 = vpop.f32.mrb[40].mxu1 }
 0xb9d   : > { %v15241_v53 = vadd.f32 %v16730_v4, %v15227_v15  ;;  %v15084_v41 = vadd.f32 %v15062_v46, %v14940_v0  ;;  %v19641_v23 = vpop.f32.mrb[41].mxu1 }
 0xb9f   : > { %15248 = vst.msk [vmem:[%s24441_s29 + $0x10] sm:$0xff] %vm850_vm0, %v15241_v53  ;;  %v15228_v2 = vadd.f32 %v24411_v37, %v15084_v41 }
 0xba0   : > { %v15067_v40 = vpop.f32.mrb[42].mxu1 }
 0xba1   : > { %v15242_v47 = vadd.f32 %v16730_v4, %v15228_v2  ;;  %v15085_v35 = vadd.f32 %v15067_v40, %v14941_v61  ;;  %v19644_v44 = vpop.f32.mrb[43].mxu1 }
 0xba3   : > { %15249 = vst.msk [vmem:[%s24441_s29 + $0x18] sm:$0xff] %vm850_vm0, %v15242_v47  ;;  %v15229_v33 = vadd.f32 %v24413_v7, %v15085_v35 }
 0xba4   : > { %v15072_v24 = vpop.f32.mrb[44].mxu1 }
 0xba5   : > { %v15243_v50 = vadd.f32 %v16730_v4, %v15229_v33  ;;  %v15086_v6 = vadd.f32 %v15072_v24, %v14942_v12  ;;  %v19647_v48 = vpop.f32.mrb[45].mxu1 }
 0xba7   : > { %15250 = vst.msk [vmem:[%s24441_s29 + $0x20] sm:$0xff] %vm850_vm0, %v15243_v50  ;;  %v15230_v13 = vadd.f32 %v24415_v14, %v15086_v6 }
 0xba8   : > { %v15077_v57 = vpop.f32.mrb[46].mxu1 }
 0xba9   : > { %v15244_v37 = vadd.f32 %v16730_v4, %v15230_v13  ;;  %v15087_v16 = vadd.f32 %v15077_v57, %v14943_v52  ;;  %v19650_v30 = vpop.f32.mrb[47].mxu1 }
 0xbab   : > { %15251 = vst.msk [vmem:[%s24441_s29 + $0x28] sm:$0xff] %vm850_vm0, %v15244_v37  ;;  %v15231_v43 = vadd.f32 %v24418_v10, %v15087_v16 }
 0xbad   : > { %v15245_v26 = vadd.f32 %v16730_v4, %v15231_v43 }
 0xbaf   : > { %15252 = vst.msk [vmem:[%s24441_s29 + $0x30] sm:$0xff] %vm850_vm0, %v15245_v26 }
 0xbb0 PF: > { %s29_s27 = sadd.s32 1, %s20379_s27  }
 0xbb1   : > { %p26_p4 = scmp.ge.s32.totalorder %s29_s27, 4  }
 0xbb3   :  { %28 = sbr.rel (!%p26_p4) target bundleno = 4 (0x4), region = 362 }

</bundles_post_ra>
